<compile_context>
chip_gen: v7x
topology: tpu7x:2x2x1
jax: 0.10.0
libtpu: 0.0.40
codegen_flags: <defaults>
</compile_context>

<pallas_src>
import math
import functools

import jax
import jax.numpy as jnp
from jax import lax
from jax.experimental import pallas as pl
from jax.experimental.pallas import tpu as pltpu


# ------------------------- fused Bottleneck kernel ---------------------------

def _make_bottleneck_kernel(*, H, W, cin, out3, dw):
    """One batch image: ghost1 -> relu -> ghost2 -> relu -> ghost3 + x -> relu."""
    halo = dw // 2
    f32 = jnp.float32
    bf16 = jnp.bfloat16
    HW = H * W

    def pad_hw(a3):
        # Static zero rows/cols: this IS the conv zero padding (no HBM pad).
        r, c, ch = a3.shape
        zr = jnp.zeros((halo, c, ch), a3.dtype)
        a3 = jnp.concatenate([zr, a3, zr], axis=0)
        zc = jnp.zeros((r + 2 * halo, halo, ch), a3.dtype)
        return jnp.concatenate([zc, a3, zc], axis=1)

    def conv1x1(h2d_bf, w, b):
        # (HW, Cin)bf16 @ (Cin, Cout)bf16 -> (HW, Cout)f32, + bias.
        return jnp.dot(h2d_bf, w, preferred_element_type=f32) + b

    def conv3x3(h3d_bf, wtaps, b):
        # 3x3 'same' conv as dw*dw shifted MXU matmuls accumulated in f32
        # (per-tap accumulation: no im2col lane concat).
        hp = pad_hw(h3d_bf)
        cout = wtaps.shape[-1]
        acc = jnp.zeros((HW, cout), f32)
        for t in range(dw * dw):
            ty, tx = divmod(t, dw)
            win = hp[ty:ty + H, tx:tx + W, :].reshape(HW, -1)
            acc = acc + jnp.dot(win, wtaps[t], preferred_element_type=f32)
        return acc + b

    def ghost(xp2d_f32, w2blk, b2):
        # Ghost (grouped depthwise 3x3) branch as a dense block-diagonal MXU
        # matmul: removes all per-channel lane gathers from the epilogue.
        cpr = xp2d_f32.shape[-1]
        xp3d = xp2d_f32.reshape(H, W, cpr).astype(bf16)
        return conv3x3(xp3d, w2blk, b2)

    def to_lane_dense(o2d, cout):
        # (HW, C) -> (H, W*C): lane-dense slab for an unmasked, full-width
        # store, assembled with slices + lane concat (reliably lowerable).
        o3d = o2d.reshape(H, W, cout)
        cols = [o3d[:, j:j + 1, :].reshape(H, cout) for j in range(W)]
        return jnp.concatenate(cols, axis=-1)

    def kernel(x_ref,
               w11_ref, b11_ref, w21_ref, b21_ref,
               w12_ref, b12_ref, w22_ref, b22_ref,
               w13_ref, b13_ref, w23_ref, b23_ref,
               o_ref):
        x3 = x_ref[0]                       # (H, W, cin) bf16, resident residual
        x2 = x3.reshape(HW, cin)

        # ---- GhostModule 1 (1x1 primary) + ReLU ----
        xp1 = conv1x1(x2, w11_ref[...], b11_ref[...])
        g1 = ghost(xp1, w21_ref[...], b21_ref[...])
        h1 = jnp.maximum(jnp.concatenate([xp1, g1], axis=-1), 0.0).astype(bf16)

        # ---- GhostModule 2 (3x3 primary, pad 1) + ReLU ----
        xp2 = conv3x3(h1.reshape(H, W, -1), w12_ref[...], b12_ref[...])
        g2 = ghost(xp2, w22_ref[...], b22_ref[...])
        h2 = jnp.maximum(jnp.concatenate([xp2, g2], axis=-1), 0.0).astype(bf16)

        # ---- GhostModule 3 (1x1 primary) + residual + ReLU ----
        xp3 = conv1x1(h2, w13_ref[...], b13_ref[...])
        g3 = ghost(xp3, w23_ref[...], b23_ref[...])
        out = jnp.concatenate([xp3, g3], axis=-1) + x2.astype(f32)
        out = jnp.maximum(out, 0.0)

        o_ref[0] = to_lane_dense(out, out3).astype(o_ref.dtype)

    return kernel


# ------------------------------ wrapper ---------------------------------------

def _ghost_channels(out_c, ratio):
    init_c = int(math.ceil(out_c / ratio))
    new_c = init_c * (ratio - 1)
    keep = out_c - init_c if new_c > 0 else 0
    return init_c, keep, ratio - 1


def _pack_ghost(p, in_c, out_c, K, ratio, dw):
    """Pack one GhostModule's weights for the fused kernel."""
    init_c, keep, mult = _ghost_channels(out_c, ratio)
    assert keep > 0, "fused kernel assumes a non-empty ghost branch (out_c >= 2)"
    w1 = p['w1'].astype(jnp.bfloat16)                       # (init_c, in_c, K, K)
    if K == 1:
        w1m = jnp.transpose(w1[:, :, 0, 0], (1, 0))         # (in_c, init_c)
    else:
        w1m = jnp.transpose(w1, (2, 3, 1, 0)).reshape(K * K, in_c, init_c)
    b1 = p['b1'].reshape(1, init_c).astype(jnp.float32)
    # depthwise weights -> dense block-diagonal expansion (init_c, keep) per tap
    w2m = jnp.transpose(p['w2'][:, 0], (1, 2, 0)).reshape(dw * dw, -1)[:, :keep]
    expand = (jnp.arange(init_c)[:, None] ==
              (jnp.arange(keep) // mult)[None, :]).astype(jnp.float32)
    w2blk = (expand[None, :, :] * w2m[:, None, :]).astype(jnp.bfloat16)
    b2 = p['b2'][:keep].reshape(1, keep).astype(jnp.float32)
    return (init_c, keep, mult), [w1m, b1, w2blk, b2]


def bottleneck_forward_nhwc(x_nhwc, params, *, planes, stride=1, ratio=4, dw=3):
    # downsample is None in the reference module -> identity residual, stride 1
    assert stride == 1, "identity residual requires stride == 1"
    n, h, w, cin = x_nhwc.shape
    out3 = planes * 4
    assert cin == out3, "identity residual requires inplanes == planes * 4"

    c1, p1 = _pack_ghost(params['conv1'], cin, planes, 1, ratio, dw)
    c2, p2 = _pack_ghost(params['conv2'], planes, planes, 3, ratio, dw)
    c3, p3 = _pack_ghost(params['conv3'], planes, out3, 1, ratio, dw)
    weights = p1 + p2 + p3

    x_bf = x_nhwc.astype(jnp.bfloat16)

    kernel = _make_bottleneck_kernel(H=h, W=w, cin=cin, out3=out3, dw=dw)

    in_specs = [pl.BlockSpec((1, h, w, cin), lambda b: (b, 0, 0, 0))]
    for a in weights:
        in_specs.append(pl.BlockSpec(a.shape, lambda b, _nd=a.ndim: (0,) * _nd))

    # cost estimate (advisory): primary convs + block-diagonal ghost matmuls
    flops = 2 * n * h * w * (
        cin * c1[0] + dw * dw * c1[0] * c1[1]
        + dw * dw * planes * c2[0] + dw * dw * c2[0] * c2[1]
        + planes * c3[0] + dw * dw * c3[0] * c3[1])
    bytes_accessed = (x_bf.size * 2 + n * h * w * out3 * 4
                      + sum(int(a.size) * int(a.dtype.itemsize) for a in weights))

    # VMEM budget from actual block sizes (double-buffered blocks + a generous
    # allowance for in-kernel temporaries); capped at 64 MiB so it is a valid
    # limit on v7x as well as v5e/v6e.
    blk_bytes = h * w * cin * 2 + h * w * out3 * 4
    weight_bytes = sum(int(a.size) * int(a.dtype.itemsize) for a in weights)
    work_bytes = 8 * h * w * max(cin, out3) * 4
    vmem_limit = int(min(max(2 * blk_bytes + weight_bytes + work_bytes,
                             32 * 1024 * 1024), 64 * 1024 * 1024))

    out_flat = pl.pallas_call(
        kernel,
        out_shape=jax.ShapeDtypeStruct((n, h, w * out3), jnp.float32),
        grid=(n,),
        in_specs=in_specs,
        out_specs=pl.BlockSpec((1, h, w * out3), lambda b: (b, 0, 0)),
        compiler_params=pltpu.CompilerParams(
            dimension_semantics=("parallel",),
            vmem_limit_bytes=vmem_limit),
        cost_estimate=pl.CostEstimate(flops=int(flops), transcendentals=0,
                                      bytes_accessed=int(bytes_accessed)),
    )(x_bf, *weights)

    # free reshape: (n, h, w*out3) is layout-identical to NHWC (n, h, w, out3)
    return out_flat.reshape(n, h, w, out3)


def bottleneck_forward(x_nchw, params, *, planes, stride=1, ratio=4, dw=3):
    # NCHW boundary wrapper (PyTorch parity); a backbone should stay NHWC and
    # call bottleneck_forward_nhwc directly.
    x = jnp.transpose(x_nchw, (0, 2, 3, 1))
    out = bottleneck_forward_nhwc(x, params, planes=planes, stride=stride,
                                  ratio=ratio, dw=dw)
    return jnp.transpose(out, (0, 3, 1, 2))


# ------------------------- parameter plumbing (glue) --------------------------

def init_ghost_params(key, in_c, out_c, kernel_size, *, ratio=4, dw=3):
    init_c, _, _ = _ghost_channels(out_c, ratio)
    new_c = init_c * (ratio - 1)
    K = kernel_size
    k1, k2, k3, k4 = jax.random.split(key, 4)
    p = {'w1': 0.1 * jax.random.normal(k1, (init_c, in_c, K, K), jnp.float32),
         'b1': 0.1 * jax.random.normal(k2, (init_c,), jnp.float32)}
    if new_c > 0:
        p['w2'] = 0.1 * jax.random.normal(k3, (new_c, 1, dw, dw), jnp.float32)
        p['b2'] = 0.1 * jax.random.normal(k4, (new_c,), jnp.float32)
    return p


# --------------------------- pure-JAX reference -------------------------------

def _ref_conv(x, w_oihw, b, stride, padding, groups=1):
    rhs = jnp.transpose(w_oihw, (2, 3, 1, 0))  # OIHW -> HWIO
    y = lax.conv_general_dilated(
        x, rhs, (stride, stride), ((padding, padding), (padding, padding)),
        dimension_numbers=('NHWC', 'HWIO', 'NHWC'), feature_group_count=groups,
        precision=lax.Precision.HIGHEST, preferred_element_type=jnp.float32)
    return y + b


def _ref_ghost(inp, p, *, out_c, padding, ratio=4, dw=3):
    # mirrors the kernel's precision choices: bf16 MXU inputs, f32 accumulation
    init_c, keep, _ = _ghost_channels(out_c, ratio)
    x1 = _ref_conv(inp.astype(jnp.bfloat16), p['w1'].astype(jnp.bfloat16),
                   p['b1'], 1, padding)
    if keep <= 0:
        return x1
    x2 = _ref_conv(x1.astype(jnp.bfloat16), p['w2'].astype(jnp.bfloat16),
                   p['b2'], 1, dw // 2, groups=init_c)
    return jnp.concatenate([x1, x2[..., :keep]], axis=-1)


def _ref_bottleneck(x_nchw, params, *, planes, ratio=4, dw=3):
    x = jnp.transpose(x_nchw, (0, 2, 3, 1)).astype(jnp.bfloat16)
    h1 = jnp.maximum(_ref_ghost(x, params['conv1'], out_c=planes, padding=0,
                                ratio=ratio, dw=dw), 0.0).astype(jnp.bfloat16)
    h2 = jnp.maximum(_ref_ghost(h1, params['conv2'], out_c=planes, padding=1,
                                ratio=ratio, dw=dw), 0.0).astype(jnp.bfloat16)
    h3 = _ref_ghost(h2, params['conv3'], out_c=planes * 4, padding=0,
                    ratio=ratio, dw=dw)
    out = jnp.maximum(h3 + x.astype(jnp.float32), 0.0)
    return jnp.transpose(out, (0, 3, 1, 2))


# ---------------------------------- main --------------------------------------

if __name__ == "__main__":
    key = jax.random.PRNGKey(0)
    planes = 8
    inplanes = planes * 4            # Bottleneck.expansion = 4, downsample=None
    N, H, W = 2, 16, 16

    kx, k1, k2, k3 = jax.random.split(key, 4)
    x = jax.random.normal(kx, (N, inplanes, H, W), jnp.float32)   # NCHW

    params = {
        'conv1': init_ghost_params(k1, inplanes, planes, 1),
        'conv2': init_ghost_params(k2, planes, planes, 3),
        'conv3': init_ghost_params(k3, planes, planes * 4, 1),
    }

    fwd = jax.jit(functools.partial(bottleneck_forward, planes=planes, stride=1))
    out = jax.block_until_ready(fwd(x, params))
    assert out.shape == (N, planes * 4, H, W)

    ref = jax.block_until_ready(_ref_bottleneck(x, params, planes=planes))
    err = float(jnp.max(jnp.abs(out - ref)))
    if not jnp.allclose(out, ref, rtol=1e-2, atol=1e-2):
        raise AssertionError(f"mismatch vs reference, max abs diff = {err}")

    print("KERNEL_OK")
</pallas_src>

<mosaic_0001>
module attributes {stable_mosaic.version = 11 : i64} {
  func.func @kernel(%arg0: i32, %arg1: memref<1x16x16x32xbf16, #tpu.memory_space<vmem>>, %arg2: memref<32x2xbf16, #tpu.memory_space<vmem>>, %arg3: memref<1x2xf32, #tpu.memory_space<vmem>>, %arg4: memref<9x2x6xbf16, #tpu.memory_space<vmem>>, %arg5: memref<1x6xf32, #tpu.memory_space<vmem>>, %arg6: memref<9x8x2xbf16, #tpu.memory_space<vmem>>, %arg7: memref<1x2xf32, #tpu.memory_space<vmem>>, %arg8: memref<9x2x6xbf16, #tpu.memory_space<vmem>>, %arg9: memref<1x6xf32, #tpu.memory_space<vmem>>, %arg10: memref<8x8xbf16, #tpu.memory_space<vmem>>, %arg11: memref<1x8xf32, #tpu.memory_space<vmem>>, %arg12: memref<9x8x24xbf16, #tpu.memory_space<vmem>>, %arg13: memref<1x24xf32, #tpu.memory_space<vmem>>, %arg14: memref<1x16x512xf32, #tpu.memory_space<vmem>>) attributes {dimension_semantics = [#tpu.dimension_semantics<parallel>], iteration_bounds = array<i64: 2>, scalar_prefetch = 0 : i64, scratch_operands = 0 : i64, tpu.core_type = #tpu.core_type<tc>, window_params = [{transform_indices = @transform_0, window_bounds = array<i64: 1, 16, 16, 32>}, {pipeline_mode = #tpu.pipeline_mode<synchronous>, transform_indices = @transform_1, window_bounds = array<i64: 32, 2>}, {pipeline_mode = #tpu.pipeline_mode<synchronous>, transform_indices = @transform_2, window_bounds = array<i64: 1, 2>}, {pipeline_mode = #tpu.pipeline_mode<synchronous>, transform_indices = @transform_3, window_bounds = array<i64: 9, 2, 6>}, {pipeline_mode = #tpu.pipeline_mode<synchronous>, transform_indices = @transform_4, window_bounds = array<i64: 1, 6>}, {pipeline_mode = #tpu.pipeline_mode<synchronous>, transform_indices = @transform_5, window_bounds = array<i64: 9, 8, 2>}, {pipeline_mode = #tpu.pipeline_mode<synchronous>, transform_indices = @transform_6, window_bounds = array<i64: 1, 2>}, {pipeline_mode = #tpu.pipeline_mode<synchronous>, transform_indices = @transform_7, window_bounds = array<i64: 9, 2, 6>}, {pipeline_mode = #tpu.pipeline_mode<synchronous>, transform_indices = @transform_8, window_bounds = array<i64: 1, 6>}, {pipeline_mode = #tpu.pipeline_mode<synchronous>, transform_indices = @transform_9, window_bounds = array<i64: 8, 8>}, {pipeline_mode = #tpu.pipeline_mode<synchronous>, transform_indices = @transform_10, window_bounds = array<i64: 1, 8>}, {pipeline_mode = #tpu.pipeline_mode<synchronous>, transform_indices = @transform_11, window_bounds = array<i64: 9, 8, 24>}, {pipeline_mode = #tpu.pipeline_mode<synchronous>, transform_indices = @transform_12, window_bounds = array<i64: 1, 24>}, {transform_indices = @transform_13, window_bounds = array<i64: 1, 16, 512>}]} {
    %c0 = arith.constant 0 : index
    %c0_0 = arith.constant 0 : index
    %c0_1 = arith.constant 0 : index
    %c0_2 = arith.constant 0 : index
    %0 = vector.load %arg1[%c0, %c0_0, %c0_1, %c0_2] : memref<1x16x16x32xbf16, #tpu.memory_space<vmem>>, vector<1x16x16x32xbf16>
    %1 = vector.shape_cast %0 : vector<1x16x16x32xbf16> to vector<16x16x32xbf16>
    %2 = vector.shape_cast %1 : vector<16x16x32xbf16> to vector<256x32xbf16>
    %c0_3 = arith.constant 0 : index
    %c0_4 = arith.constant 0 : index
    %3 = vector.load %arg2[%c0_3, %c0_4] : memref<32x2xbf16, #tpu.memory_space<vmem>>, vector<32x2xbf16>
    %c0_5 = arith.constant 0 : index
    %c0_6 = arith.constant 0 : index
    %4 = vector.load %arg3[%c0_5, %c0_6] : memref<1x2xf32, #tpu.memory_space<vmem>>, vector<1x2xf32>
    %cst = arith.constant dense<0.000000e+00> : vector<256x2xf32>
    %5 = tpu.matmul %2, %3, %cst {dimension_numbers = #tpu.dot_dimension_numbers<[1], [0], [0], [1], [0, 0, 1, 1], [], []>} : vector<256x32xbf16>, vector<32x2xbf16>, vector<256x2xf32> -> vector<256x2xf32>
    %6 = vector.broadcast %4 : vector<1x2xf32> to vector<256x2xf32>
    %7 = arith.addf %5, %6 : vector<256x2xf32>
    %c0_7 = arith.constant 0 : index
    %c0_8 = arith.constant 0 : index
    %c0_9 = arith.constant 0 : index
    %8 = vector.load %arg4[%c0_7, %c0_8, %c0_9] : memref<9x2x6xbf16, #tpu.memory_space<vmem>>, vector<9x2x6xbf16>
    %c0_10 = arith.constant 0 : index
    %c0_11 = arith.constant 0 : index
    %9 = vector.load %arg5[%c0_10, %c0_11] : memref<1x6xf32, #tpu.memory_space<vmem>>, vector<1x6xf32>
    %10 = vector.shape_cast %7 : vector<256x2xf32> to vector<16x16x2xf32>
    %11 = arith.truncf %10 : vector<16x16x2xf32> to vector<16x16x2xbf16>
    %cst_12 = arith.constant 0.000000e+00 : bf16
    %12 = vector.broadcast %cst_12 : bf16 to vector<1x16x2xbf16>
    %13 = tpu.concatenate %12, %11, %12 in 0 : vector<1x16x2xbf16>, vector<16x16x2xbf16>, vector<1x16x2xbf16> -> vector<18x16x2xbf16>
    %cst_13 = arith.constant 0.000000e+00 : bf16
    %14 = vector.broadcast %cst_13 : bf16 to vector<18x1x2xbf16>
    %15 = tpu.concatenate %14, %13, %14 in 1 : vector<18x1x2xbf16>, vector<18x16x2xbf16>, vector<18x1x2xbf16> -> vector<18x18x2xbf16>
    %cst_14 = arith.constant 0.000000e+00 : f32
    %16 = vector.broadcast %cst_14 : f32 to vector<256x6xf32>
    %17 = vector.extract_strided_slice %15 {offsets = [0, 0, 0], sizes = [16, 16, 2], strides = [1, 1, 1]} : vector<18x18x2xbf16> to vector<16x16x2xbf16>
    %18 = vector.shape_cast %17 : vector<16x16x2xbf16> to vector<256x2xbf16>
    %19 = vector.extract_strided_slice %8 {offsets = [0, 0, 0], sizes = [1, 2, 6], strides = [1, 1, 1]} : vector<9x2x6xbf16> to vector<1x2x6xbf16>
    %20 = vector.shape_cast %19 : vector<1x2x6xbf16> to vector<2x6xbf16>
    %cst_15 = arith.constant dense<0.000000e+00> : vector<256x6xf32>
    %21 = tpu.matmul %18, %20, %cst_15 {dimension_numbers = #tpu.dot_dimension_numbers<[1], [0], [0], [1], [0, 0, 1, 1], [], []>} : vector<256x2xbf16>, vector<2x6xbf16>, vector<256x6xf32> -> vector<256x6xf32>
    %22 = arith.addf %16, %21 : vector<256x6xf32>
    %23 = vector.extract_strided_slice %15 {offsets = [0, 1, 0], sizes = [16, 16, 2], strides = [1, 1, 1]} : vector<18x18x2xbf16> to vector<16x16x2xbf16>
    %24 = vector.shape_cast %23 : vector<16x16x2xbf16> to vector<256x2xbf16>
    %25 = vector.extract_strided_slice %8 {offsets = [1, 0, 0], sizes = [1, 2, 6], strides = [1, 1, 1]} : vector<9x2x6xbf16> to vector<1x2x6xbf16>
    %26 = vector.shape_cast %25 : vector<1x2x6xbf16> to vector<2x6xbf16>
    %cst_16 = arith.constant dense<0.000000e+00> : vector<256x6xf32>
    %27 = tpu.matmul %24, %26, %cst_16 {dimension_numbers = #tpu.dot_dimension_numbers<[1], [0], [0], [1], [0, 0, 1, 1], [], []>} : vector<256x2xbf16>, vector<2x6xbf16>, vector<256x6xf32> -> vector<256x6xf32>
    %28 = arith.addf %22, %27 : vector<256x6xf32>
    %29 = vector.extract_strided_slice %15 {offsets = [0, 2, 0], sizes = [16, 16, 2], strides = [1, 1, 1]} : vector<18x18x2xbf16> to vector<16x16x2xbf16>
    %30 = vector.shape_cast %29 : vector<16x16x2xbf16> to vector<256x2xbf16>
    %31 = vector.extract_strided_slice %8 {offsets = [2, 0, 0], sizes = [1, 2, 6], strides = [1, 1, 1]} : vector<9x2x6xbf16> to vector<1x2x6xbf16>
    %32 = vector.shape_cast %31 : vector<1x2x6xbf16> to vector<2x6xbf16>
    %cst_17 = arith.constant dense<0.000000e+00> : vector<256x6xf32>
    %33 = tpu.matmul %30, %32, %cst_17 {dimension_numbers = #tpu.dot_dimension_numbers<[1], [0], [0], [1], [0, 0, 1, 1], [], []>} : vector<256x2xbf16>, vector<2x6xbf16>, vector<256x6xf32> -> vector<256x6xf32>
    %34 = arith.addf %28, %33 : vector<256x6xf32>
    %35 = vector.extract_strided_slice %15 {offsets = [1, 0, 0], sizes = [16, 16, 2], strides = [1, 1, 1]} : vector<18x18x2xbf16> to vector<16x16x2xbf16>
    %36 = vector.shape_cast %35 : vector<16x16x2xbf16> to vector<256x2xbf16>
    %37 = vector.extract_strided_slice %8 {offsets = [3, 0, 0], sizes = [1, 2, 6], strides = [1, 1, 1]} : vector<9x2x6xbf16> to vector<1x2x6xbf16>
    %38 = vector.shape_cast %37 : vector<1x2x6xbf16> to vector<2x6xbf16>
    %cst_18 = arith.constant dense<0.000000e+00> : vector<256x6xf32>
    %39 = tpu.matmul %36, %38, %cst_18 {dimension_numbers = #tpu.dot_dimension_numbers<[1], [0], [0], [1], [0, 0, 1, 1], [], []>} : vector<256x2xbf16>, vector<2x6xbf16>, vector<256x6xf32> -> vector<256x6xf32>
    %40 = arith.addf %34, %39 : vector<256x6xf32>
    %41 = vector.extract_strided_slice %15 {offsets = [1, 1, 0], sizes = [16, 16, 2], strides = [1, 1, 1]} : vector<18x18x2xbf16> to vector<16x16x2xbf16>
    %42 = vector.shape_cast %41 : vector<16x16x2xbf16> to vector<256x2xbf16>
    %43 = vector.extract_strided_slice %8 {offsets = [4, 0, 0], sizes = [1, 2, 6], strides = [1, 1, 1]} : vector<9x2x6xbf16> to vector<1x2x6xbf16>
    %44 = vector.shape_cast %43 : vector<1x2x6xbf16> to vector<2x6xbf16>
    %cst_19 = arith.constant dense<0.000000e+00> : vector<256x6xf32>
    %45 = tpu.matmul %42, %44, %cst_19 {dimension_numbers = #tpu.dot_dimension_numbers<[1], [0], [0], [1], [0, 0, 1, 1], [], []>} : vector<256x2xbf16>, vector<2x6xbf16>, vector<256x6xf32> -> vector<256x6xf32>
    %46 = arith.addf %40, %45 : vector<256x6xf32>
    %47 = vector.extract_strided_slice %15 {offsets = [1, 2, 0], sizes = [16, 16, 2], strides = [1, 1, 1]} : vector<18x18x2xbf16> to vector<16x16x2xbf16>
    %48 = vector.shape_cast %47 : vector<16x16x2xbf16> to vector<256x2xbf16>
    %49 = vector.extract_strided_slice %8 {offsets = [5, 0, 0], sizes = [1, 2, 6], strides = [1, 1, 1]} : vector<9x2x6xbf16> to vector<1x2x6xbf16>
    %50 = vector.shape_cast %49 : vector<1x2x6xbf16> to vector<2x6xbf16>
    %cst_20 = arith.constant dense<0.000000e+00> : vector<256x6xf32>
    %51 = tpu.matmul %48, %50, %cst_20 {dimension_numbers = #tpu.dot_dimension_numbers<[1], [0], [0], [1], [0, 0, 1, 1], [], []>} : vector<256x2xbf16>, vector<2x6xbf16>, vector<256x6xf32> -> vector<256x6xf32>
    %52 = arith.addf %46, %51 : vector<256x6xf32>
    %53 = vector.extract_strided_slice %15 {offsets = [2, 0, 0], sizes = [16, 16, 2], strides = [1, 1, 1]} : vector<18x18x2xbf16> to vector<16x16x2xbf16>
    %54 = vector.shape_cast %53 : vector<16x16x2xbf16> to vector<256x2xbf16>
    %55 = vector.extract_strided_slice %8 {offsets = [6, 0, 0], sizes = [1, 2, 6], strides = [1, 1, 1]} : vector<9x2x6xbf16> to vector<1x2x6xbf16>
    %56 = vector.shape_cast %55 : vector<1x2x6xbf16> to vector<2x6xbf16>
    %cst_21 = arith.constant dense<0.000000e+00> : vector<256x6xf32>
    %57 = tpu.matmul %54, %56, %cst_21 {dimension_numbers = #tpu.dot_dimension_numbers<[1], [0], [0], [1], [0, 0, 1, 1], [], []>} : vector<256x2xbf16>, vector<2x6xbf16>, vector<256x6xf32> -> vector<256x6xf32>
    %58 = arith.addf %52, %57 : vector<256x6xf32>
    %59 = vector.extract_strided_slice %15 {offsets = [2, 1, 0], sizes = [16, 16, 2], strides = [1, 1, 1]} : vector<18x18x2xbf16> to vector<16x16x2xbf16>
    %60 = vector.shape_cast %59 : vector<16x16x2xbf16> to vector<256x2xbf16>
    %61 = vector.extract_strided_slice %8 {offsets = [7, 0, 0], sizes = [1, 2, 6], strides = [1, 1, 1]} : vector<9x2x6xbf16> to vector<1x2x6xbf16>
    %62 = vector.shape_cast %61 : vector<1x2x6xbf16> to vector<2x6xbf16>
    %cst_22 = arith.constant dense<0.000000e+00> : vector<256x6xf32>
    %63 = tpu.matmul %60, %62, %cst_22 {dimension_numbers = #tpu.dot_dimension_numbers<[1], [0], [0], [1], [0, 0, 1, 1], [], []>} : vector<256x2xbf16>, vector<2x6xbf16>, vector<256x6xf32> -> vector<256x6xf32>
    %64 = arith.addf %58, %63 : vector<256x6xf32>
    %65 = vector.extract_strided_slice %15 {offsets = [2, 2, 0], sizes = [16, 16, 2], strides = [1, 1, 1]} : vector<18x18x2xbf16> to vector<16x16x2xbf16>
    %66 = vector.shape_cast %65 : vector<16x16x2xbf16> to vector<256x2xbf16>
    %67 = vector.extract_strided_slice %8 {offsets = [8, 0, 0], sizes = [1, 2, 6], strides = [1, 1, 1]} : vector<9x2x6xbf16> to vector<1x2x6xbf16>
    %68 = vector.shape_cast %67 : vector<1x2x6xbf16> to vector<2x6xbf16>
    %cst_23 = arith.constant dense<0.000000e+00> : vector<256x6xf32>
    %69 = tpu.matmul %66, %68, %cst_23 {dimension_numbers = #tpu.dot_dimension_numbers<[1], [0], [0], [1], [0, 0, 1, 1], [], []>} : vector<256x2xbf16>, vector<2x6xbf16>, vector<256x6xf32> -> vector<256x6xf32>
    %70 = arith.addf %64, %69 : vector<256x6xf32>
    %71 = vector.broadcast %9 : vector<1x6xf32> to vector<256x6xf32>
    %72 = arith.addf %70, %71 : vector<256x6xf32>
    %73 = tpu.concatenate %7, %72 in 1 : vector<256x2xf32>, vector<256x6xf32> -> vector<256x8xf32>
    %cst_24 = arith.constant 0.000000e+00 : f32
    %74 = vector.broadcast %cst_24 : f32 to vector<256x8xf32>
    %75 = arith.maximumf %73, %74 : vector<256x8xf32>
    %76 = arith.truncf %75 : vector<256x8xf32> to vector<256x8xbf16>
    %77 = vector.shape_cast %76 : vector<256x8xbf16> to vector<16x16x8xbf16>
    %c0_25 = arith.constant 0 : index
    %c0_26 = arith.constant 0 : index
    %c0_27 = arith.constant 0 : index
    %78 = vector.load %arg6[%c0_25, %c0_26, %c0_27] : memref<9x8x2xbf16, #tpu.memory_space<vmem>>, vector<9x8x2xbf16>
    %c0_28 = arith.constant 0 : index
    %c0_29 = arith.constant 0 : index
    %79 = vector.load %arg7[%c0_28, %c0_29] : memref<1x2xf32, #tpu.memory_space<vmem>>, vector<1x2xf32>
    %cst_30 = arith.constant 0.000000e+00 : bf16
    %80 = vector.broadcast %cst_30 : bf16 to vector<1x16x8xbf16>
    %81 = tpu.concatenate %80, %77, %80 in 0 : vector<1x16x8xbf16>, vector<16x16x8xbf16>, vector<1x16x8xbf16> -> vector<18x16x8xbf16>
    %cst_31 = arith.constant 0.000000e+00 : bf16
    %82 = vector.broadcast %cst_31 : bf16 to vector<18x1x8xbf16>
    %83 = tpu.concatenate %82, %81, %82 in 1 : vector<18x1x8xbf16>, vector<18x16x8xbf16>, vector<18x1x8xbf16> -> vector<18x18x8xbf16>
    %cst_32 = arith.constant 0.000000e+00 : f32
    %84 = vector.broadcast %cst_32 : f32 to vector<256x2xf32>
    %85 = vector.extract_strided_slice %83 {offsets = [0, 0, 0], sizes = [16, 16, 8], strides = [1, 1, 1]} : vector<18x18x8xbf16> to vector<16x16x8xbf16>
    %86 = vector.shape_cast %85 : vector<16x16x8xbf16> to vector<256x8xbf16>
    %87 = vector.extract_strided_slice %78 {offsets = [0, 0, 0], sizes = [1, 8, 2], strides = [1, 1, 1]} : vector<9x8x2xbf16> to vector<1x8x2xbf16>
    %88 = vector.shape_cast %87 : vector<1x8x2xbf16> to vector<8x2xbf16>
    %cst_33 = arith.constant dense<0.000000e+00> : vector<256x2xf32>
    %89 = tpu.matmul %86, %88, %cst_33 {dimension_numbers = #tpu.dot_dimension_numbers<[1], [0], [0], [1], [0, 0, 1, 1], [], []>} : vector<256x8xbf16>, vector<8x2xbf16>, vector<256x2xf32> -> vector<256x2xf32>
    %90 = arith.addf %84, %89 : vector<256x2xf32>
    %91 = vector.extract_strided_slice %83 {offsets = [0, 1, 0], sizes = [16, 16, 8], strides = [1, 1, 1]} : vector<18x18x8xbf16> to vector<16x16x8xbf16>
    %92 = vector.shape_cast %91 : vector<16x16x8xbf16> to vector<256x8xbf16>
    %93 = vector.extract_strided_slice %78 {offsets = [1, 0, 0], sizes = [1, 8, 2], strides = [1, 1, 1]} : vector<9x8x2xbf16> to vector<1x8x2xbf16>
    %94 = vector.shape_cast %93 : vector<1x8x2xbf16> to vector<8x2xbf16>
    %cst_34 = arith.constant dense<0.000000e+00> : vector<256x2xf32>
    %95 = tpu.matmul %92, %94, %cst_34 {dimension_numbers = #tpu.dot_dimension_numbers<[1], [0], [0], [1], [0, 0, 1, 1], [], []>} : vector<256x8xbf16>, vector<8x2xbf16>, vector<256x2xf32> -> vector<256x2xf32>
    %96 = arith.addf %90, %95 : vector<256x2xf32>
    %97 = vector.extract_strided_slice %83 {offsets = [0, 2, 0], sizes = [16, 16, 8], strides = [1, 1, 1]} : vector<18x18x8xbf16> to vector<16x16x8xbf16>
    %98 = vector.shape_cast %97 : vector<16x16x8xbf16> to vector<256x8xbf16>
    %99 = vector.extract_strided_slice %78 {offsets = [2, 0, 0], sizes = [1, 8, 2], strides = [1, 1, 1]} : vector<9x8x2xbf16> to vector<1x8x2xbf16>
    %100 = vector.shape_cast %99 : vector<1x8x2xbf16> to vector<8x2xbf16>
    %cst_35 = arith.constant dense<0.000000e+00> : vector<256x2xf32>
    %101 = tpu.matmul %98, %100, %cst_35 {dimension_numbers = #tpu.dot_dimension_numbers<[1], [0], [0], [1], [0, 0, 1, 1], [], []>} : vector<256x8xbf16>, vector<8x2xbf16>, vector<256x2xf32> -> vector<256x2xf32>
    %102 = arith.addf %96, %101 : vector<256x2xf32>
    %103 = vector.extract_strided_slice %83 {offsets = [1, 0, 0], sizes = [16, 16, 8], strides = [1, 1, 1]} : vector<18x18x8xbf16> to vector<16x16x8xbf16>
    %104 = vector.shape_cast %103 : vector<16x16x8xbf16> to vector<256x8xbf16>
    %105 = vector.extract_strided_slice %78 {offsets = [3, 0, 0], sizes = [1, 8, 2], strides = [1, 1, 1]} : vector<9x8x2xbf16> to vector<1x8x2xbf16>
    %106 = vector.shape_cast %105 : vector<1x8x2xbf16> to vector<8x2xbf16>
    %cst_36 = arith.constant dense<0.000000e+00> : vector<256x2xf32>
    %107 = tpu.matmul %104, %106, %cst_36 {dimension_numbers = #tpu.dot_dimension_numbers<[1], [0], [0], [1], [0, 0, 1, 1], [], []>} : vector<256x8xbf16>, vector<8x2xbf16>, vector<256x2xf32> -> vector<256x2xf32>
    %108 = arith.addf %102, %107 : vector<256x2xf32>
    %109 = vector.extract_strided_slice %83 {offsets = [1, 1, 0], sizes = [16, 16, 8], strides = [1, 1, 1]} : vector<18x18x8xbf16> to vector<16x16x8xbf16>
    %110 = vector.shape_cast %109 : vector<16x16x8xbf16> to vector<256x8xbf16>
    %111 = vector.extract_strided_slice %78 {offsets = [4, 0, 0], sizes = [1, 8, 2], strides = [1, 1, 1]} : vector<9x8x2xbf16> to vector<1x8x2xbf16>
    %112 = vector.shape_cast %111 : vector<1x8x2xbf16> to vector<8x2xbf16>
    %cst_37 = arith.constant dense<0.000000e+00> : vector<256x2xf32>
    %113 = tpu.matmul %110, %112, %cst_37 {dimension_numbers = #tpu.dot_dimension_numbers<[1], [0], [0], [1], [0, 0, 1, 1], [], []>} : vector<256x8xbf16>, vector<8x2xbf16>, vector<256x2xf32> -> vector<256x2xf32>
    %114 = arith.addf %108, %113 : vector<256x2xf32>
    %115 = vector.extract_strided_slice %83 {offsets = [1, 2, 0], sizes = [16, 16, 8], strides = [1, 1, 1]} : vector<18x18x8xbf16> to vector<16x16x8xbf16>
    %116 = vector.shape_cast %115 : vector<16x16x8xbf16> to vector<256x8xbf16>
    %117 = vector.extract_strided_slice %78 {offsets = [5, 0, 0], sizes = [1, 8, 2], strides = [1, 1, 1]} : vector<9x8x2xbf16> to vector<1x8x2xbf16>
    %118 = vector.shape_cast %117 : vector<1x8x2xbf16> to vector<8x2xbf16>
    %cst_38 = arith.constant dense<0.000000e+00> : vector<256x2xf32>
    %119 = tpu.matmul %116, %118, %cst_38 {dimension_numbers = #tpu.dot_dimension_numbers<[1], [0], [0], [1], [0, 0, 1, 1], [], []>} : vector<256x8xbf16>, vector<8x2xbf16>, vector<256x2xf32> -> vector<256x2xf32>
    %120 = arith.addf %114, %119 : vector<256x2xf32>
    %121 = vector.extract_strided_slice %83 {offsets = [2, 0, 0], sizes = [16, 16, 8], strides = [1, 1, 1]} : vector<18x18x8xbf16> to vector<16x16x8xbf16>
    %122 = vector.shape_cast %121 : vector<16x16x8xbf16> to vector<256x8xbf16>
    %123 = vector.extract_strided_slice %78 {offsets = [6, 0, 0], sizes = [1, 8, 2], strides = [1, 1, 1]} : vector<9x8x2xbf16> to vector<1x8x2xbf16>
    %124 = vector.shape_cast %123 : vector<1x8x2xbf16> to vector<8x2xbf16>
    %cst_39 = arith.constant dense<0.000000e+00> : vector<256x2xf32>
    %125 = tpu.matmul %122, %124, %cst_39 {dimension_numbers = #tpu.dot_dimension_numbers<[1], [0], [0], [1], [0, 0, 1, 1], [], []>} : vector<256x8xbf16>, vector<8x2xbf16>, vector<256x2xf32> -> vector<256x2xf32>
    %126 = arith.addf %120, %125 : vector<256x2xf32>
    %127 = vector.extract_strided_slice %83 {offsets = [2, 1, 0], sizes = [16, 16, 8], strides = [1, 1, 1]} : vector<18x18x8xbf16> to vector<16x16x8xbf16>
    %128 = vector.shape_cast %127 : vector<16x16x8xbf16> to vector<256x8xbf16>
    %129 = vector.extract_strided_slice %78 {offsets = [7, 0, 0], sizes = [1, 8, 2], strides = [1, 1, 1]} : vector<9x8x2xbf16> to vector<1x8x2xbf16>
    %130 = vector.shape_cast %129 : vector<1x8x2xbf16> to vector<8x2xbf16>
    %cst_40 = arith.constant dense<0.000000e+00> : vector<256x2xf32>
    %131 = tpu.matmul %128, %130, %cst_40 {dimension_numbers = #tpu.dot_dimension_numbers<[1], [0], [0], [1], [0, 0, 1, 1], [], []>} : vector<256x8xbf16>, vector<8x2xbf16>, vector<256x2xf32> -> vector<256x2xf32>
    %132 = arith.addf %126, %131 : vector<256x2xf32>
    %133 = vector.extract_strided_slice %83 {offsets = [2, 2, 0], sizes = [16, 16, 8], strides = [1, 1, 1]} : vector<18x18x8xbf16> to vector<16x16x8xbf16>
    %134 = vector.shape_cast %133 : vector<16x16x8xbf16> to vector<256x8xbf16>
    %135 = vector.extract_strided_slice %78 {offsets = [8, 0, 0], sizes = [1, 8, 2], strides = [1, 1, 1]} : vector<9x8x2xbf16> to vector<1x8x2xbf16>
    %136 = vector.shape_cast %135 : vector<1x8x2xbf16> to vector<8x2xbf16>
    %cst_41 = arith.constant dense<0.000000e+00> : vector<256x2xf32>
    %137 = tpu.matmul %134, %136, %cst_41 {dimension_numbers = #tpu.dot_dimension_numbers<[1], [0], [0], [1], [0, 0, 1, 1], [], []>} : vector<256x8xbf16>, vector<8x2xbf16>, vector<256x2xf32> -> vector<256x2xf32>
    %138 = arith.addf %132, %137 : vector<256x2xf32>
    %139 = vector.broadcast %79 : vector<1x2xf32> to vector<256x2xf32>
    %140 = arith.addf %138, %139 : vector<256x2xf32>
    %c0_42 = arith.constant 0 : index
    %c0_43 = arith.constant 0 : index
    %c0_44 = arith.constant 0 : index
    %141 = vector.load %arg8[%c0_42, %c0_43, %c0_44] : memref<9x2x6xbf16, #tpu.memory_space<vmem>>, vector<9x2x6xbf16>
    %c0_45 = arith.constant 0 : index
    %c0_46 = arith.constant 0 : index
    %142 = vector.load %arg9[%c0_45, %c0_46] : memref<1x6xf32, #tpu.memory_space<vmem>>, vector<1x6xf32>
    %143 = vector.shape_cast %140 : vector<256x2xf32> to vector<16x16x2xf32>
    %144 = arith.truncf %143 : vector<16x16x2xf32> to vector<16x16x2xbf16>
    %cst_47 = arith.constant 0.000000e+00 : bf16
    %145 = vector.broadcast %cst_47 : bf16 to vector<1x16x2xbf16>
    %146 = tpu.concatenate %145, %144, %145 in 0 : vector<1x16x2xbf16>, vector<16x16x2xbf16>, vector<1x16x2xbf16> -> vector<18x16x2xbf16>
    %cst_48 = arith.constant 0.000000e+00 : bf16
    %147 = vector.broadcast %cst_48 : bf16 to vector<18x1x2xbf16>
    %148 = tpu.concatenate %147, %146, %147 in 1 : vector<18x1x2xbf16>, vector<18x16x2xbf16>, vector<18x1x2xbf16> -> vector<18x18x2xbf16>
    %cst_49 = arith.constant 0.000000e+00 : f32
    %149 = vector.broadcast %cst_49 : f32 to vector<256x6xf32>
    %150 = vector.extract_strided_slice %148 {offsets = [0, 0, 0], sizes = [16, 16, 2], strides = [1, 1, 1]} : vector<18x18x2xbf16> to vector<16x16x2xbf16>
    %151 = vector.shape_cast %150 : vector<16x16x2xbf16> to vector<256x2xbf16>
    %152 = vector.extract_strided_slice %141 {offsets = [0, 0, 0], sizes = [1, 2, 6], strides = [1, 1, 1]} : vector<9x2x6xbf16> to vector<1x2x6xbf16>
    %153 = vector.shape_cast %152 : vector<1x2x6xbf16> to vector<2x6xbf16>
    %cst_50 = arith.constant dense<0.000000e+00> : vector<256x6xf32>
    %154 = tpu.matmul %151, %153, %cst_50 {dimension_numbers = #tpu.dot_dimension_numbers<[1], [0], [0], [1], [0, 0, 1, 1], [], []>} : vector<256x2xbf16>, vector<2x6xbf16>, vector<256x6xf32> -> vector<256x6xf32>
    %155 = arith.addf %149, %154 : vector<256x6xf32>
    %156 = vector.extract_strided_slice %148 {offsets = [0, 1, 0], sizes = [16, 16, 2], strides = [1, 1, 1]} : vector<18x18x2xbf16> to vector<16x16x2xbf16>
    %157 = vector.shape_cast %156 : vector<16x16x2xbf16> to vector<256x2xbf16>
    %158 = vector.extract_strided_slice %141 {offsets = [1, 0, 0], sizes = [1, 2, 6], strides = [1, 1, 1]} : vector<9x2x6xbf16> to vector<1x2x6xbf16>
    %159 = vector.shape_cast %158 : vector<1x2x6xbf16> to vector<2x6xbf16>
    %cst_51 = arith.constant dense<0.000000e+00> : vector<256x6xf32>
    %160 = tpu.matmul %157, %159, %cst_51 {dimension_numbers = #tpu.dot_dimension_numbers<[1], [0], [0], [1], [0, 0, 1, 1], [], []>} : vector<256x2xbf16>, vector<2x6xbf16>, vector<256x6xf32> -> vector<256x6xf32>
    %161 = arith.addf %155, %160 : vector<256x6xf32>
    %162 = vector.extract_strided_slice %148 {offsets = [0, 2, 0], sizes = [16, 16, 2], strides = [1, 1, 1]} : vector<18x18x2xbf16> to vector<16x16x2xbf16>
    %163 = vector.shape_cast %162 : vector<16x16x2xbf16> to vector<256x2xbf16>
    %164 = vector.extract_strided_slice %141 {offsets = [2, 0, 0], sizes = [1, 2, 6], strides = [1, 1, 1]} : vector<9x2x6xbf16> to vector<1x2x6xbf16>
    %165 = vector.shape_cast %164 : vector<1x2x6xbf16> to vector<2x6xbf16>
    %cst_52 = arith.constant dense<0.000000e+00> : vector<256x6xf32>
    %166 = tpu.matmul %163, %165, %cst_52 {dimension_numbers = #tpu.dot_dimension_numbers<[1], [0], [0], [1], [0, 0, 1, 1], [], []>} : vector<256x2xbf16>, vector<2x6xbf16>, vector<256x6xf32> -> vector<256x6xf32>
    %167 = arith.addf %161, %166 : vector<256x6xf32>
    %168 = vector.extract_strided_slice %148 {offsets = [1, 0, 0], sizes = [16, 16, 2], strides = [1, 1, 1]} : vector<18x18x2xbf16> to vector<16x16x2xbf16>
    %169 = vector.shape_cast %168 : vector<16x16x2xbf16> to vector<256x2xbf16>
    %170 = vector.extract_strided_slice %141 {offsets = [3, 0, 0], sizes = [1, 2, 6], strides = [1, 1, 1]} : vector<9x2x6xbf16> to vector<1x2x6xbf16>
    %171 = vector.shape_cast %170 : vector<1x2x6xbf16> to vector<2x6xbf16>
    %cst_53 = arith.constant dense<0.000000e+00> : vector<256x6xf32>
    %172 = tpu.matmul %169, %171, %cst_53 {dimension_numbers = #tpu.dot_dimension_numbers<[1], [0], [0], [1], [0, 0, 1, 1], [], []>} : vector<256x2xbf16>, vector<2x6xbf16>, vector<256x6xf32> -> vector<256x6xf32>
    %173 = arith.addf %167, %172 : vector<256x6xf32>
    %174 = vector.extract_strided_slice %148 {offsets = [1, 1, 0], sizes = [16, 16, 2], strides = [1, 1, 1]} : vector<18x18x2xbf16> to vector<16x16x2xbf16>
    %175 = vector.shape_cast %174 : vector<16x16x2xbf16> to vector<256x2xbf16>
    %176 = vector.extract_strided_slice %141 {offsets = [4, 0, 0], sizes = [1, 2, 6], strides = [1, 1, 1]} : vector<9x2x6xbf16> to vector<1x2x6xbf16>
    %177 = vector.shape_cast %176 : vector<1x2x6xbf16> to vector<2x6xbf16>
    %cst_54 = arith.constant dense<0.000000e+00> : vector<256x6xf32>
    %178 = tpu.matmul %175, %177, %cst_54 {dimension_numbers = #tpu.dot_dimension_numbers<[1], [0], [0], [1], [0, 0, 1, 1], [], []>} : vector<256x2xbf16>, vector<2x6xbf16>, vector<256x6xf32> -> vector<256x6xf32>
    %179 = arith.addf %173, %178 : vector<256x6xf32>
    %180 = vector.extract_strided_slice %148 {offsets = [1, 2, 0], sizes = [16, 16, 2], strides = [1, 1, 1]} : vector<18x18x2xbf16> to vector<16x16x2xbf16>
    %181 = vector.shape_cast %180 : vector<16x16x2xbf16> to vector<256x2xbf16>
    %182 = vector.extract_strided_slice %141 {offsets = [5, 0, 0], sizes = [1, 2, 6], strides = [1, 1, 1]} : vector<9x2x6xbf16> to vector<1x2x6xbf16>
    %183 = vector.shape_cast %182 : vector<1x2x6xbf16> to vector<2x6xbf16>
    %cst_55 = arith.constant dense<0.000000e+00> : vector<256x6xf32>
    %184 = tpu.matmul %181, %183, %cst_55 {dimension_numbers = #tpu.dot_dimension_numbers<[1], [0], [0], [1], [0, 0, 1, 1], [], []>} : vector<256x2xbf16>, vector<2x6xbf16>, vector<256x6xf32> -> vector<256x6xf32>
    %185 = arith.addf %179, %184 : vector<256x6xf32>
    %186 = vector.extract_strided_slice %148 {offsets = [2, 0, 0], sizes = [16, 16, 2], strides = [1, 1, 1]} : vector<18x18x2xbf16> to vector<16x16x2xbf16>
    %187 = vector.shape_cast %186 : vector<16x16x2xbf16> to vector<256x2xbf16>
    %188 = vector.extract_strided_slice %141 {offsets = [6, 0, 0], sizes = [1, 2, 6], strides = [1, 1, 1]} : vector<9x2x6xbf16> to vector<1x2x6xbf16>
    %189 = vector.shape_cast %188 : vector<1x2x6xbf16> to vector<2x6xbf16>
    %cst_56 = arith.constant dense<0.000000e+00> : vector<256x6xf32>
    %190 = tpu.matmul %187, %189, %cst_56 {dimension_numbers = #tpu.dot_dimension_numbers<[1], [0], [0], [1], [0, 0, 1, 1], [], []>} : vector<256x2xbf16>, vector<2x6xbf16>, vector<256x6xf32> -> vector<256x6xf32>
    %191 = arith.addf %185, %190 : vector<256x6xf32>
    %192 = vector.extract_strided_slice %148 {offsets = [2, 1, 0], sizes = [16, 16, 2], strides = [1, 1, 1]} : vector<18x18x2xbf16> to vector<16x16x2xbf16>
    %193 = vector.shape_cast %192 : vector<16x16x2xbf16> to vector<256x2xbf16>
    %194 = vector.extract_strided_slice %141 {offsets = [7, 0, 0], sizes = [1, 2, 6], strides = [1, 1, 1]} : vector<9x2x6xbf16> to vector<1x2x6xbf16>
    %195 = vector.shape_cast %194 : vector<1x2x6xbf16> to vector<2x6xbf16>
    %cst_57 = arith.constant dense<0.000000e+00> : vector<256x6xf32>
    %196 = tpu.matmul %193, %195, %cst_57 {dimension_numbers = #tpu.dot_dimension_numbers<[1], [0], [0], [1], [0, 0, 1, 1], [], []>} : vector<256x2xbf16>, vector<2x6xbf16>, vector<256x6xf32> -> vector<256x6xf32>
    %197 = arith.addf %191, %196 : vector<256x6xf32>
    %198 = vector.extract_strided_slice %148 {offsets = [2, 2, 0], sizes = [16, 16, 2], strides = [1, 1, 1]} : vector<18x18x2xbf16> to vector<16x16x2xbf16>
    %199 = vector.shape_cast %198 : vector<16x16x2xbf16> to vector<256x2xbf16>
    %200 = vector.extract_strided_slice %141 {offsets = [8, 0, 0], sizes = [1, 2, 6], strides = [1, 1, 1]} : vector<9x2x6xbf16> to vector<1x2x6xbf16>
    %201 = vector.shape_cast %200 : vector<1x2x6xbf16> to vector<2x6xbf16>
    %cst_58 = arith.constant dense<0.000000e+00> : vector<256x6xf32>
    %202 = tpu.matmul %199, %201, %cst_58 {dimension_numbers = #tpu.dot_dimension_numbers<[1], [0], [0], [1], [0, 0, 1, 1], [], []>} : vector<256x2xbf16>, vector<2x6xbf16>, vector<256x6xf32> -> vector<256x6xf32>
    %203 = arith.addf %197, %202 : vector<256x6xf32>
    %204 = vector.broadcast %142 : vector<1x6xf32> to vector<256x6xf32>
    %205 = arith.addf %203, %204 : vector<256x6xf32>
    %206 = tpu.concatenate %140, %205 in 1 : vector<256x2xf32>, vector<256x6xf32> -> vector<256x8xf32>
    %cst_59 = arith.constant 0.000000e+00 : f32
    %207 = vector.broadcast %cst_59 : f32 to vector<256x8xf32>
    %208 = arith.maximumf %206, %207 : vector<256x8xf32>
    %209 = arith.truncf %208 : vector<256x8xf32> to vector<256x8xbf16>
    %c0_60 = arith.constant 0 : index
    %c0_61 = arith.constant 0 : index
    %210 = vector.load %arg10[%c0_60, %c0_61] : memref<8x8xbf16, #tpu.memory_space<vmem>>, vector<8x8xbf16>
    %c0_62 = arith.constant 0 : index
    %c0_63 = arith.constant 0 : index
    %211 = vector.load %arg11[%c0_62, %c0_63] : memref<1x8xf32, #tpu.memory_space<vmem>>, vector<1x8xf32>
    %cst_64 = arith.constant dense<0.000000e+00> : vector<256x8xf32>
    %212 = tpu.matmul %209, %210, %cst_64 {dimension_numbers = #tpu.dot_dimension_numbers<[1], [0], [0], [1], [0, 0, 1, 1], [], []>} : vector<256x8xbf16>, vector<8x8xbf16>, vector<256x8xf32> -> vector<256x8xf32>
    %213 = vector.broadcast %211 : vector<1x8xf32> to vector<256x8xf32>
    %214 = arith.addf %212, %213 : vector<256x8xf32>
    %c0_65 = arith.constant 0 : index
    %c0_66 = arith.constant 0 : index
    %c0_67 = arith.constant 0 : index
    %215 = vector.load %arg12[%c0_65, %c0_66, %c0_67] : memref<9x8x24xbf16, #tpu.memory_space<vmem>>, vector<9x8x24xbf16>
    %c0_68 = arith.constant 0 : index
    %c0_69 = arith.constant 0 : index
    %216 = vector.load %arg13[%c0_68, %c0_69] : memref<1x24xf32, #tpu.memory_space<vmem>>, vector<1x24xf32>
    %217 = vector.shape_cast %214 : vector<256x8xf32> to vector<16x16x8xf32>
    %218 = arith.truncf %217 : vector<16x16x8xf32> to vector<16x16x8xbf16>
    %cst_70 = arith.constant 0.000000e+00 : bf16
    %219 = vector.broadcast %cst_70 : bf16 to vector<1x16x8xbf16>
    %220 = tpu.concatenate %219, %218, %219 in 0 : vector<1x16x8xbf16>, vector<16x16x8xbf16>, vector<1x16x8xbf16> -> vector<18x16x8xbf16>
    %cst_71 = arith.constant 0.000000e+00 : bf16
    %221 = vector.broadcast %cst_71 : bf16 to vector<18x1x8xbf16>
    %222 = tpu.concatenate %221, %220, %221 in 1 : vector<18x1x8xbf16>, vector<18x16x8xbf16>, vector<18x1x8xbf16> -> vector<18x18x8xbf16>
    %cst_72 = arith.constant 0.000000e+00 : f32
    %223 = vector.broadcast %cst_72 : f32 to vector<256x24xf32>
    %224 = vector.extract_strided_slice %222 {offsets = [0, 0, 0], sizes = [16, 16, 8], strides = [1, 1, 1]} : vector<18x18x8xbf16> to vector<16x16x8xbf16>
    %225 = vector.shape_cast %224 : vector<16x16x8xbf16> to vector<256x8xbf16>
    %226 = vector.extract_strided_slice %215 {offsets = [0, 0, 0], sizes = [1, 8, 24], strides = [1, 1, 1]} : vector<9x8x24xbf16> to vector<1x8x24xbf16>
    %227 = vector.shape_cast %226 : vector<1x8x24xbf16> to vector<8x24xbf16>
    %cst_73 = arith.constant dense<0.000000e+00> : vector<256x24xf32>
    %228 = tpu.matmul %225, %227, %cst_73 {dimension_numbers = #tpu.dot_dimension_numbers<[1], [0], [0], [1], [0, 0, 1, 1], [], []>} : vector<256x8xbf16>, vector<8x24xbf16>, vector<256x24xf32> -> vector<256x24xf32>
    %229 = arith.addf %223, %228 : vector<256x24xf32>
    %230 = vector.extract_strided_slice %222 {offsets = [0, 1, 0], sizes = [16, 16, 8], strides = [1, 1, 1]} : vector<18x18x8xbf16> to vector<16x16x8xbf16>
    %231 = vector.shape_cast %230 : vector<16x16x8xbf16> to vector<256x8xbf16>
    %232 = vector.extract_strided_slice %215 {offsets = [1, 0, 0], sizes = [1, 8, 24], strides = [1, 1, 1]} : vector<9x8x24xbf16> to vector<1x8x24xbf16>
    %233 = vector.shape_cast %232 : vector<1x8x24xbf16> to vector<8x24xbf16>
    %cst_74 = arith.constant dense<0.000000e+00> : vector<256x24xf32>
    %234 = tpu.matmul %231, %233, %cst_74 {dimension_numbers = #tpu.dot_dimension_numbers<[1], [0], [0], [1], [0, 0, 1, 1], [], []>} : vector<256x8xbf16>, vector<8x24xbf16>, vector<256x24xf32> -> vector<256x24xf32>
    %235 = arith.addf %229, %234 : vector<256x24xf32>
    %236 = vector.extract_strided_slice %222 {offsets = [0, 2, 0], sizes = [16, 16, 8], strides = [1, 1, 1]} : vector<18x18x8xbf16> to vector<16x16x8xbf16>
    %237 = vector.shape_cast %236 : vector<16x16x8xbf16> to vector<256x8xbf16>
    %238 = vector.extract_strided_slice %215 {offsets = [2, 0, 0], sizes = [1, 8, 24], strides = [1, 1, 1]} : vector<9x8x24xbf16> to vector<1x8x24xbf16>
    %239 = vector.shape_cast %238 : vector<1x8x24xbf16> to vector<8x24xbf16>
    %cst_75 = arith.constant dense<0.000000e+00> : vector<256x24xf32>
    %240 = tpu.matmul %237, %239, %cst_75 {dimension_numbers = #tpu.dot_dimension_numbers<[1], [0], [0], [1], [0, 0, 1, 1], [], []>} : vector<256x8xbf16>, vector<8x24xbf16>, vector<256x24xf32> -> vector<256x24xf32>
    %241 = arith.addf %235, %240 : vector<256x24xf32>
    %242 = vector.extract_strided_slice %222 {offsets = [1, 0, 0], sizes = [16, 16, 8], strides = [1, 1, 1]} : vector<18x18x8xbf16> to vector<16x16x8xbf16>
    %243 = vector.shape_cast %242 : vector<16x16x8xbf16> to vector<256x8xbf16>
    %244 = vector.extract_strided_slice %215 {offsets = [3, 0, 0], sizes = [1, 8, 24], strides = [1, 1, 1]} : vector<9x8x24xbf16> to vector<1x8x24xbf16>
    %245 = vector.shape_cast %244 : vector<1x8x24xbf16> to vector<8x24xbf16>
    %cst_76 = arith.constant dense<0.000000e+00> : vector<256x24xf32>
    %246 = tpu.matmul %243, %245, %cst_76 {dimension_numbers = #tpu.dot_dimension_numbers<[1], [0], [0], [1], [0, 0, 1, 1], [], []>} : vector<256x8xbf16>, vector<8x24xbf16>, vector<256x24xf32> -> vector<256x24xf32>
    %247 = arith.addf %241, %246 : vector<256x24xf32>
    %248 = vector.extract_strided_slice %222 {offsets = [1, 1, 0], sizes = [16, 16, 8], strides = [1, 1, 1]} : vector<18x18x8xbf16> to vector<16x16x8xbf16>
    %249 = vector.shape_cast %248 : vector<16x16x8xbf16> to vector<256x8xbf16>
    %250 = vector.extract_strided_slice %215 {offsets = [4, 0, 0], sizes = [1, 8, 24], strides = [1, 1, 1]} : vector<9x8x24xbf16> to vector<1x8x24xbf16>
    %251 = vector.shape_cast %250 : vector<1x8x24xbf16> to vector<8x24xbf16>
    %cst_77 = arith.constant dense<0.000000e+00> : vector<256x24xf32>
    %252 = tpu.matmul %249, %251, %cst_77 {dimension_numbers = #tpu.dot_dimension_numbers<[1], [0], [0], [1], [0, 0, 1, 1], [], []>} : vector<256x8xbf16>, vector<8x24xbf16>, vector<256x24xf32> -> vector<256x24xf32>
    %253 = arith.addf %247, %252 : vector<256x24xf32>
    %254 = vector.extract_strided_slice %222 {offsets = [1, 2, 0], sizes = [16, 16, 8], strides = [1, 1, 1]} : vector<18x18x8xbf16> to vector<16x16x8xbf16>
    %255 = vector.shape_cast %254 : vector<16x16x8xbf16> to vector<256x8xbf16>
    %256 = vector.extract_strided_slice %215 {offsets = [5, 0, 0], sizes = [1, 8, 24], strides = [1, 1, 1]} : vector<9x8x24xbf16> to vector<1x8x24xbf16>
    %257 = vector.shape_cast %256 : vector<1x8x24xbf16> to vector<8x24xbf16>
    %cst_78 = arith.constant dense<0.000000e+00> : vector<256x24xf32>
    %258 = tpu.matmul %255, %257, %cst_78 {dimension_numbers = #tpu.dot_dimension_numbers<[1], [0], [0], [1], [0, 0, 1, 1], [], []>} : vector<256x8xbf16>, vector<8x24xbf16>, vector<256x24xf32> -> vector<256x24xf32>
    %259 = arith.addf %253, %258 : vector<256x24xf32>
    %260 = vector.extract_strided_slice %222 {offsets = [2, 0, 0], sizes = [16, 16, 8], strides = [1, 1, 1]} : vector<18x18x8xbf16> to vector<16x16x8xbf16>
    %261 = vector.shape_cast %260 : vector<16x16x8xbf16> to vector<256x8xbf16>
    %262 = vector.extract_strided_slice %215 {offsets = [6, 0, 0], sizes = [1, 8, 24], strides = [1, 1, 1]} : vector<9x8x24xbf16> to vector<1x8x24xbf16>
    %263 = vector.shape_cast %262 : vector<1x8x24xbf16> to vector<8x24xbf16>
    %cst_79 = arith.constant dense<0.000000e+00> : vector<256x24xf32>
    %264 = tpu.matmul %261, %263, %cst_79 {dimension_numbers = #tpu.dot_dimension_numbers<[1], [0], [0], [1], [0, 0, 1, 1], [], []>} : vector<256x8xbf16>, vector<8x24xbf16>, vector<256x24xf32> -> vector<256x24xf32>
    %265 = arith.addf %259, %264 : vector<256x24xf32>
    %266 = vector.extract_strided_slice %222 {offsets = [2, 1, 0], sizes = [16, 16, 8], strides = [1, 1, 1]} : vector<18x18x8xbf16> to vector<16x16x8xbf16>
    %267 = vector.shape_cast %266 : vector<16x16x8xbf16> to vector<256x8xbf16>
    %268 = vector.extract_strided_slice %215 {offsets = [7, 0, 0], sizes = [1, 8, 24], strides = [1, 1, 1]} : vector<9x8x24xbf16> to vector<1x8x24xbf16>
    %269 = vector.shape_cast %268 : vector<1x8x24xbf16> to vector<8x24xbf16>
    %cst_80 = arith.constant dense<0.000000e+00> : vector<256x24xf32>
    %270 = tpu.matmul %267, %269, %cst_80 {dimension_numbers = #tpu.dot_dimension_numbers<[1], [0], [0], [1], [0, 0, 1, 1], [], []>} : vector<256x8xbf16>, vector<8x24xbf16>, vector<256x24xf32> -> vector<256x24xf32>
    %271 = arith.addf %265, %270 : vector<256x24xf32>
    %272 = vector.extract_strided_slice %222 {offsets = [2, 2, 0], sizes = [16, 16, 8], strides = [1, 1, 1]} : vector<18x18x8xbf16> to vector<16x16x8xbf16>
    %273 = vector.shape_cast %272 : vector<16x16x8xbf16> to vector<256x8xbf16>
    %274 = vector.extract_strided_slice %215 {offsets = [8, 0, 0], sizes = [1, 8, 24], strides = [1, 1, 1]} : vector<9x8x24xbf16> to vector<1x8x24xbf16>
    %275 = vector.shape_cast %274 : vector<1x8x24xbf16> to vector<8x24xbf16>
    %cst_81 = arith.constant dense<0.000000e+00> : vector<256x24xf32>
    %276 = tpu.matmul %273, %275, %cst_81 {dimension_numbers = #tpu.dot_dimension_numbers<[1], [0], [0], [1], [0, 0, 1, 1], [], []>} : vector<256x8xbf16>, vector<8x24xbf16>, vector<256x24xf32> -> vector<256x24xf32>
    %277 = arith.addf %271, %276 : vector<256x24xf32>
    %278 = vector.broadcast %216 : vector<1x24xf32> to vector<256x24xf32>
    %279 = arith.addf %277, %278 : vector<256x24xf32>
    %280 = tpu.concatenate %214, %279 in 1 : vector<256x8xf32>, vector<256x24xf32> -> vector<256x32xf32>
    %281 = arith.extf %2 : vector<256x32xbf16> to vector<256x32xf32>
    %282 = arith.addf %280, %281 : vector<256x32xf32>
    %cst_82 = arith.constant 0.000000e+00 : f32
    %283 = vector.broadcast %cst_82 : f32 to vector<256x32xf32>
    %284 = arith.maximumf %282, %283 : vector<256x32xf32>
    %285 = vector.shape_cast %284 : vector<256x32xf32> to vector<16x16x32xf32>
    %286 = vector.extract_strided_slice %285 {offsets = [0, 0, 0], sizes = [16, 1, 32], strides = [1, 1, 1]} : vector<16x16x32xf32> to vector<16x1x32xf32>
    %287 = vector.shape_cast %286 : vector<16x1x32xf32> to vector<16x32xf32>
    %288 = vector.extract_strided_slice %285 {offsets = [0, 1, 0], sizes = [16, 1, 32], strides = [1, 1, 1]} : vector<16x16x32xf32> to vector<16x1x32xf32>
    %289 = vector.shape_cast %288 : vector<16x1x32xf32> to vector<16x32xf32>
    %290 = vector.extract_strided_slice %285 {offsets = [0, 2, 0], sizes = [16, 1, 32], strides = [1, 1, 1]} : vector<16x16x32xf32> to vector<16x1x32xf32>
    %291 = vector.shape_cast %290 : vector<16x1x32xf32> to vector<16x32xf32>
    %292 = vector.extract_strided_slice %285 {offsets = [0, 3, 0], sizes = [16, 1, 32], strides = [1, 1, 1]} : vector<16x16x32xf32> to vector<16x1x32xf32>
    %293 = vector.shape_cast %292 : vector<16x1x32xf32> to vector<16x32xf32>
    %294 = vector.extract_strided_slice %285 {offsets = [0, 4, 0], sizes = [16, 1, 32], strides = [1, 1, 1]} : vector<16x16x32xf32> to vector<16x1x32xf32>
    %295 = vector.shape_cast %294 : vector<16x1x32xf32> to vector<16x32xf32>
    %296 = vector.extract_strided_slice %285 {offsets = [0, 5, 0], sizes = [16, 1, 32], strides = [1, 1, 1]} : vector<16x16x32xf32> to vector<16x1x32xf32>
    %297 = vector.shape_cast %296 : vector<16x1x32xf32> to vector<16x32xf32>
    %298 = vector.extract_strided_slice %285 {offsets = [0, 6, 0], sizes = [16, 1, 32], strides = [1, 1, 1]} : vector<16x16x32xf32> to vector<16x1x32xf32>
    %299 = vector.shape_cast %298 : vector<16x1x32xf32> to vector<16x32xf32>
    %300 = vector.extract_strided_slice %285 {offsets = [0, 7, 0], sizes = [16, 1, 32], strides = [1, 1, 1]} : vector<16x16x32xf32> to vector<16x1x32xf32>
    %301 = vector.shape_cast %300 : vector<16x1x32xf32> to vector<16x32xf32>
    %302 = vector.extract_strided_slice %285 {offsets = [0, 8, 0], sizes = [16, 1, 32], strides = [1, 1, 1]} : vector<16x16x32xf32> to vector<16x1x32xf32>
    %303 = vector.shape_cast %302 : vector<16x1x32xf32> to vector<16x32xf32>
    %304 = vector.extract_strided_slice %285 {offsets = [0, 9, 0], sizes = [16, 1, 32], strides = [1, 1, 1]} : vector<16x16x32xf32> to vector<16x1x32xf32>
    %305 = vector.shape_cast %304 : vector<16x1x32xf32> to vector<16x32xf32>
    %306 = vector.extract_strided_slice %285 {offsets = [0, 10, 0], sizes = [16, 1, 32], strides = [1, 1, 1]} : vector<16x16x32xf32> to vector<16x1x32xf32>
    %307 = vector.shape_cast %306 : vector<16x1x32xf32> to vector<16x32xf32>
    %308 = vector.extract_strided_slice %285 {offsets = [0, 11, 0], sizes = [16, 1, 32], strides = [1, 1, 1]} : vector<16x16x32xf32> to vector<16x1x32xf32>
    %309 = vector.shape_cast %308 : vector<16x1x32xf32> to vector<16x32xf32>
    %310 = vector.extract_strided_slice %285 {offsets = [0, 12, 0], sizes = [16, 1, 32], strides = [1, 1, 1]} : vector<16x16x32xf32> to vector<16x1x32xf32>
    %311 = vector.shape_cast %310 : vector<16x1x32xf32> to vector<16x32xf32>
    %312 = vector.extract_strided_slice %285 {offsets = [0, 13, 0], sizes = [16, 1, 32], strides = [1, 1, 1]} : vector<16x16x32xf32> to vector<16x1x32xf32>
    %313 = vector.shape_cast %312 : vector<16x1x32xf32> to vector<16x32xf32>
    %314 = vector.extract_strided_slice %285 {offsets = [0, 14, 0], sizes = [16, 1, 32], strides = [1, 1, 1]} : vector<16x16x32xf32> to vector<16x1x32xf32>
    %315 = vector.shape_cast %314 : vector<16x1x32xf32> to vector<16x32xf32>
    %316 = vector.extract_strided_slice %285 {offsets = [0, 15, 0], sizes = [16, 1, 32], strides = [1, 1, 1]} : vector<16x16x32xf32> to vector<16x1x32xf32>
    %317 = vector.shape_cast %316 : vector<16x1x32xf32> to vector<16x32xf32>
    %318 = tpu.concatenate %287, %289, %291, %293, %295, %297, %299, %301, %303, %305, %307, %309, %311, %313, %315, %317 in 1 : vector<16x32xf32>, vector<16x32xf32>, vector<16x32xf32>, vector<16x32xf32>, vector<16x32xf32>, vector<16x32xf32>, vector<16x32xf32>, vector<16x32xf32>, vector<16x32xf32>, vector<16x32xf32>, vector<16x32xf32>, vector<16x32xf32>, vector<16x32xf32>, vector<16x32xf32>, vector<16x32xf32>, vector<16x32xf32> -> vector<16x512xf32>
    %c0_83 = arith.constant 0 : index
    %c0_84 = arith.constant 0 : index
    %c0_85 = arith.constant 0 : index
    %319 = vector.load %arg14[%c0_83, %c0_84, %c0_85] : memref<1x16x512xf32, #tpu.memory_space<vmem>>, vector<1x16x512xf32>
    %320 = vector.shape_cast %319 : vector<1x16x512xf32> to vector<16x512xf32>
    %321 = vector.shape_cast %318 : vector<16x512xf32> to vector<1x16x512xf32>
    tpu.vector_store %arg14[%c0_83, %c0_84, %c0_85], %321 {strides = array<i32>} : memref<1x16x512xf32, #tpu.memory_space<vmem>>, vector<1x16x512xf32>,
    return
  }
  func.func @transform_0(%arg0: i32) -> (i32, i32, i32, i32) {
    %c0_i32 = arith.constant 0 : i32
    %c0_i32_0 = arith.constant 0 : i32
    %c0_i32_1 = arith.constant 0 : i32
    %c0_i32_2 = arith.constant 0 : i32
    return %arg0, %c0_i32, %c0_i32_0, %c0_i32_1 : i32, i32, i32, i32
  }
  func.func @transform_1(%arg0: i32) -> (i32, i32) {
    %c0_i32 = arith.constant 0 : i32
    %c0_i32_0 = arith.constant 0 : i32
    %c0_i32_1 = arith.constant 0 : i32
    return %c0_i32, %c0_i32_0 : i32, i32
  }
  func.func @transform_2(%arg0: i32) -> (i32, i32) {
    %c0_i32 = arith.constant 0 : i32
    %c0_i32_0 = arith.constant 0 : i32
    %c0_i32_1 = arith.constant 0 : i32
    return %c0_i32, %c0_i32_0 : i32, i32
  }
  func.func @transform_3(%arg0: i32) -> (i32, i32, i32) {
    %c0_i32 = arith.constant 0 : i32
    %c0_i32_0 = arith.constant 0 : i32
    %c0_i32_1 = arith.constant 0 : i32
    %c0_i32_2 = arith.constant 0 : i32
    return %c0_i32, %c0_i32_0, %c0_i32_1 : i32, i32, i32
  }
  func.func @transform_4(%arg0: i32) -> (i32, i32) {
    %c0_i32 = arith.constant 0 : i32
    %c0_i32_0 = arith.constant 0 : i32
    %c0_i32_1 = arith.constant 0 : i32
    return %c0_i32, %c0_i32_0 : i32, i32
  }
  func.func @transform_5(%arg0: i32) -> (i32, i32, i32) {
    %c0_i32 = arith.constant 0 : i32
    %c0_i32_0 = arith.constant 0 : i32
    %c0_i32_1 = arith.constant 0 : i32
    %c0_i32_2 = arith.constant 0 : i32
    return %c0_i32, %c0_i32_0, %c0_i32_1 : i32, i32, i32
  }
  func.func @transform_6(%arg0: i32) -> (i32, i32) {
    %c0_i32 = arith.constant 0 : i32
    %c0_i32_0 = arith.constant 0 : i32
    %c0_i32_1 = arith.constant 0 : i32
    return %c0_i32, %c0_i32_0 : i32, i32
  }
  func.func @transform_7(%arg0: i32) -> (i32, i32, i32) {
    %c0_i32 = arith.constant 0 : i32
    %c0_i32_0 = arith.constant 0 : i32
    %c0_i32_1 = arith.constant 0 : i32
    %c0_i32_2 = arith.constant 0 : i32
    return %c0_i32, %c0_i32_0, %c0_i32_1 : i32, i32, i32
  }
  func.func @transform_8(%arg0: i32) -> (i32, i32) {
    %c0_i32 = arith.constant 0 : i32
    %c0_i32_0 = arith.constant 0 : i32
    %c0_i32_1 = arith.constant 0 : i32
    return %c0_i32, %c0_i32_0 : i32, i32
  }
  func.func @transform_9(%arg0: i32) -> (i32, i32) {
    %c0_i32 = arith.constant 0 : i32
    %c0_i32_0 = arith.constant 0 : i32
    %c0_i32_1 = arith.constant 0 : i32
    return %c0_i32, %c0_i32_0 : i32, i32
  }
  func.func @transform_10(%arg0: i32) -> (i32, i32) {
    %c0_i32 = arith.constant 0 : i32
    %c0_i32_0 = arith.constant 0 : i32
    %c0_i32_1 = arith.constant 0 : i32
    return %c0_i32, %c0_i32_0 : i32, i32
  }
  func.func @transform_11(%arg0: i32) -> (i32, i32, i32) {
    %c0_i32 = arith.constant 0 : i32
    %c0_i32_0 = arith.constant 0 : i32
    %c0_i32_1 = arith.constant 0 : i32
    %c0_i32_2 = arith.constant 0 : i32
    return %c0_i32, %c0_i32_0, %c0_i32_1 : i32, i32, i32
  }
  func.func @transform_12(%arg0: i32) -> (i32, i32) {
    %c0_i32 = arith.constant 0 : i32
    %c0_i32_0 = arith.constant 0 : i32
    %c0_i32_1 = arith.constant 0 : i32
    return %c0_i32, %c0_i32_0 : i32, i32
  }
  func.func @transform_13(%arg0: i32) -> (i32, i32, i32) {
    %c0_i32 = arith.constant 0 : i32
    %c0_i32_0 = arith.constant 0 : i32
    %c0_i32_1 = arith.constant 0 : i32
    return %arg0, %c0_i32, %c0_i32_0 : i32, i32, i32
  }
}

</mosaic_0001>

<bundles_post_ra>
// kernel: mul.25
= control target key start
LH: loop header
LB: loop body
LE: loop exit
PB: predicated region body
PF: predicated region fallthrough
CT: control target
= control target key end

     0   :  { %vm16_vm0 = vcmask 48128   ;;  %s61_s0 = inlined_call_operand.vmem [shape: f32[3,3,6], index: 0, kind: input, shape index: {}]   ;;  %s62_s1 = inlined_call_operand.vmem [shape: f32[9,6], index: 1, kind: output, shape index: {}]  }
   0x1   :  { %v29_v0 = vld [vmem:[%s61_s0 + $0x8] sm:$0xf]  ;;  %v30_v1 = vld [vmem:[%s61_s0 + $0x4] sm:$0xf]  ;;  %v13_v2 = vld [vmem:[%s61_s0] sm:$0xf] }
   0x2   :  { %8 = vst [vmem:[#allocation0 + $0x10] sm:$0xf] %v29_v0  ;;  %12 = vst [vmem:[#allocation0 + $0x8] sm:$0xf] %v30_v1 }
   0x3   :  { %14 = vst [vmem:[#allocation0] sm:$0xf] %v13_v2 }
   0x9   :  { %v19_v4 = vld [vmem:[#allocation0 + $0x8] sm:$0x7]   ;;  %v24_v5 = vld [vmem:[#allocation0 + $0x10] sm:$0x7]  }
   0xa   :  { %v15_v3 = vld [vmem:[#allocation0] sm:$0x7]   ;;  %31 = vst.msk [vmem:[%s62_s1 + $0x3] sm:$0x7] %vm16_vm0, %v19_v4   ;;  %32 = vst.msk [vmem:[%s62_s1 + $0x6] sm:$0x7] %vm16_vm0, %v24_v5  }
   0xb   :  { %17 = vst.msk [vmem:[%s62_s1] sm:$0x7] %vm16_vm0, %v15_v3  }

// kernel: mul.39
= control target key start
LH: loop header
LB: loop body
LE: loop exit
PB: predicated region body
PF: predicated region fallthrough
CT: control target
= control target key end

     0   :  { %vm16_vm0 = vcmask 195584   ;;  %s61_s0 = inlined_call_operand.vmem [shape: f32[3,3,24], index: 0, kind: input, shape index: {}]   ;;  %s62_s1 = inlined_call_operand.vmem [shape: f32[9,24], index: 1, kind: output, shape index: {}]  }
   0x1   :  { %v29_v0 = vld [vmem:[%s61_s0 + $0x8] sm:$0xf]  ;;  %v30_v1 = vld [vmem:[%s61_s0 + $0x4] sm:$0xf]  ;;  %v13_v2 = vld [vmem:[%s61_s0] sm:$0xf] }
   0x2   :  { %8 = vst [vmem:[#allocation0 + $0x10] sm:$0xf] %v29_v0  ;;  %12 = vst [vmem:[#allocation0 + $0x8] sm:$0xf] %v30_v1 }
   0x3   :  { %14 = vst [vmem:[#allocation0] sm:$0xf] %v13_v2 }
   0x9   :  { %v19_v4 = vld [vmem:[#allocation0 + $0x8] sm:$0x7]   ;;  %v24_v5 = vld [vmem:[#allocation0 + $0x10] sm:$0x7]  }
   0xa   :  { %v15_v3 = vld [vmem:[#allocation0] sm:$0x7]   ;;  %31 = vst.msk [vmem:[%s62_s1 + $0x3] sm:$0x7] %vm16_vm0, %v19_v4   ;;  %32 = vst.msk [vmem:[%s62_s1 + $0x6] sm:$0x7] %vm16_vm0, %v24_v5  }
   0xb   :  { %17 = vst.msk [vmem:[%s62_s1] sm:$0x7] %vm16_vm0, %v15_v3  }

// kernel: bottleneck_forward.1
= control target key start
LH: loop header
LB: loop body
LE: loop exit
PB: predicated region body
PF: predicated region fallthrough
CT: control target
= control target key end

     0   :  { %s15685_s25 = smov 0   ;;  %s19879_s0 = inlined_call_operand.vmem [shape: bf16[2,16,16,32], index: 0, kind: input, shape index: {}]   ;;  %s19880_s1 = inlined_call_operand.vmem [shape: bf16[32,2], index: 1, kind: input, shape index: {}]   ;;  %s19881_s2 = inlined_call_operand.vmem [shape: f32[1,2], index: 2, kind: input, shape index: {}]   ;;  %s19882_s3 = inlined_call_operand.vmem [shape: bf16[9,2,6], index: 3, kind: input, shape index: {}]   ;;  %s19883_s4 = inlined_call_operand.vmem [shape: f32[1,6], index: 4, kind: input, shape index: {}]   ;;  %s19884_s5 = inlined_call_operand.vmem [shape: bf16[9,8,2], index: 5, kind: input, shape index: {}]   ;;  %s19885_s6 = inlined_call_operand.vmem [shape: f32[1,2], index: 6, kind: input, shape index: {}]   ;;  %s19886_s7 = inlined_call_operand.vmem [shape: bf16[9,2,6], index: 7, kind: input, shape index: {}]   ;;  %s19887_s8 = inlined_call_operand.vmem [shape: f32[1,6], index: 8, kind: input, shape index: {}]   ;;  %s19888_s9 = inlined_call_operand.vmem [shape: bf16[8,8], index: 9, kind: input, shape index: {}]   ;;  %s19889_s10 = inlined_call_operand.vmem [shape: f32[1,8], index: 10, kind: input, shape index: {}]   ;;  %s19890_s11 = inlined_call_operand.vmem [shape: bf16[9,8,24], index: 11, kind: input, shape index: {}]   ;;  %s19891_s12 = inlined_call_operand.vmem [shape: f32[1,24], index: 12, kind: input, shape index: {}]   ;;  %s19892_s13 = inlined_call_operand.vmem [shape: f32[2,16,512], index: 13, kind: output, shape index: {}]  }
   0x1 LB: > { %s11730_s26 = sadd.s32 4294967295, %s15607_s25   ;;  %p11734_p0 = scmp.ge.s32.totalorder %s15607_s25, 1  ;;  %s15607_s25 = sphi %s15685_s25, %s23_s25  }
   0x2   : > { %p387_p1 = scmp.lt.s32.totalorder %s15607_s25, 3 }
   0x4   : > { %p388_p2 = pnand %p11734_p0, %p387_p1 }
   0x6   : > { %391 = sbr.rel (%p388_p2) target bundleno = 4049 (0xfd1), region = 72 }
   0xd   : > { %v15551_v0 = vld [vmem:[%s19880_s1] sm:$0xff]   ;;  %p431_p3 = scmp.lt.s32.totalorder %s11730_s26, 1  ;;  %v15552_v1 = vld [vmem:[%s19880_s1 + $0x8] sm:$0xff]   ;;  %vm577_vm0 = vcmask 261120   ;;  %vm966_vm1 = vcmask 1040384   ;;  %v15609_v20 = vmov 0  }
   0xe   : > { %13022 = vmatprep.subr.bf16.mxu1 %v15551_v0  ;;  %v788_v2 = vld [vmem:[%s19882_s3 + $0x1] sm:$0x1]  ;;  %vm967_vm2 = vsmask.f32 256  ;;  %v816_v21 = vrot.slane %v15609_v20, 7  ;;  %vm1196_vm5 = vcmask 15360  }
   0xf   : > { %s20191_s26 = smov (!%p431_p3, %s11730_s26), 1  ;;  %13023 = vmatpush3.bf16.msra.mxu1 %v15551_v0  ;;  %v1247_v6 = vsel %vm966_vm1, %v788_v2, 0  ;;  %vm15745_vm3 = vmand %vm966_vm1, %vm967_vm2  ;;  %vm1003_vm4 = vsmask.f32 7424  ;;  %v787_v32 = vld [vmem:[%s19882_s3] sm:$0x1] }
  0x10   : > { %13024 = vmatprep.subr.bf16.mxu1 %v15552_v1  ;;  %s12373_s14 = sshll.u32 %s20191_s26, 7  ;;  %v15751_v23 = vsel %vm15745_vm3, 0, %v816_v21  ;;  %v15756_v25 = vsel %vm15745_vm3, %v816_v21, 0  ;;  %v15772_v34 = vld [vmem:[%s19881_s2] ss:$0 sm:$0xff]  ;;  %vm1638_vm6 = vcmask 1046528  }
  0x11   : > { %s15705_s17 = scalar_lea.vmem %s19879_s0, %s12373_s14  ;;  %v1007_v24 = vshll.u32 %v15751_v23, 16  ;;  %v1005_v26 = vshrl.u32 %v15751_v23, 16  ;;  %v1012_v28 = vshll.u32 %v15756_v25, 16  ;;  %s15610_s28 = smov 2   ;;  %vm3792_vm7 = vcmask 1043456  }
  0x12   : > { %v442_v3 = vld [vmem:[%s15705_s17] sm:$0xff]   ;;  %v444_v4 = vld [vmem:[%s15705_s17 + $0x8] sm:$0xff]   ;;  %v446_v5 = vld [vmem:[%s15705_s17 + $0x10] sm:$0xff]   ;;  %vm3744_vm8 = vcmask 64512   ;;  %s15611_s23 = smov 8   ;;  %vm11091_vm9 = vcmask 1041409  }
  0x13   : > { %13025 = vmatpush3.bf16.msra.mxu1 %v15552_v1  ;;  %13026 = vmatprep.mubr.msk.bf16.mxu1 %vm577_vm0, %v442_v3  ;;  %v448_v7 = vld [vmem:[%s15705_s17 + $0x18] sm:$0xff]   ;;  %v450_v8 = vld [vmem:[%s15705_s17 + $0x20] sm:$0xff]   ;;  %v452_v9 = vld [vmem:[%s15705_s17 + $0x28] sm:$0xff]   ;;  %v1009_v27 = vrot.slane %v1007_v24, 1  ;;  %v1014_v30 = vrot.slane %v1012_v28, 1  ;;  %vm11094_vm10 = vcmask 1042434  }
  0x14   : > { %15340 = vmatprep.subr.msk.bf16.mxu1 %vm966_vm1, %v788_v2  ;;  %v454_v10 = vld [vmem:[%s15705_s17 + $0x30] sm:$0xff]   ;;  %v456_v11 = vld [vmem:[%s15705_s17 + $0x38] sm:$0xff]   ;;  %v458_v12 = vld [vmem:[%s15705_s17 + $0x40] sm:$0xff]   ;;  %vm11097_vm11 = vcmask 1043459   ;;  %vm11100_vm12 = vcmask 1044484   ;;  %vm11103_vm13 = vcmask 1045509  }
  0x15   : > { %v460_v13 = vld [vmem:[%s15705_s17 + $0x48] sm:$0xff]   ;;  %v462_v14 = vld [vmem:[%s15705_s17 + $0x50] sm:$0xff]   ;;  %v464_v15 = vld [vmem:[%s15705_s17 + $0x58] sm:$0xff]   ;;  %v1010_v29 = vor.u32 %v1009_v27, %v1005_v26  ;;  %vm11106_vm14 = vcmask 1046534   ;;  %vm11109_vm15 = vcmask 1047559   ;;  %s15613_s24 = smov 32  }
  0x16   : > { %13027 = vmatmul.mubr.msk.bf16.vlgmr.msra.gmra.mrb[0].mxu1 %vm577_vm0, %v444_v4  ;;  %v466_v16 = vld [vmem:[%s15705_s17 + $0x60] sm:$0xff]   ;;  %v468_v17 = vld [vmem:[%s15705_s17 + $0x68] sm:$0xff]   ;;  %v470_v18 = vld [vmem:[%s15705_s17 + $0x70] sm:$0xff]   ;;  %s15614_s27 = smov 96   ;;  %s12374_s29 = sshll.u32 %s20191_s26, 6  ;;  %vm11643_vm2 = vcmask 523264  }
  0x17   : > { %13030 = vmatprep.mubr.msk.bf16.mxu1 %vm577_vm0, %v446_v5  ;;  %13059 = vmatpush3.bf16.msra.mxu1 %v1247_v6  ;;  %v472_v19 = vld [vmem:[%s15705_s17 + $0x78] sm:$0xff]   ;;  %v15761_v31 = vsel %vm1003_vm4, %v1010_v29, %v1014_v30  ;;  %s19776_s15 = scalar_lea.vmem %s19892_s13, %s12374_s29 }
  0x18   : > { %19989 = vst [vmem:[#allocation2_spill] sm:$0xff] %v15761_v31  ;;  %15341 = vmatprep.subr.msk.bf16.mxu1 %vm966_vm1, %v787_v32 }
  0x1e   : > { %13031 = vmatmul.mubr.msk.bf16.gmra.mrb[4].mxu1 %vm577_vm0, %v448_v7  ;;  %v1443_v7 = vsel %vm966_vm1, %v787_v32, 0 }
  0x1f   : > { %13034 = vmatprep.mubr.msk.bf16.mxu1 %vm577_vm0, %v450_v8 }
  0x26   : > { %13035 = vmatmul.mubr.msk.bf16.gmra.mrb[8].mxu1 %vm577_vm0, %v452_v9 }
  0x27   : > { %13038 = vmatprep.mubr.msk.bf16.mxu1 %vm577_vm0, %v454_v10 }
  0x2e   : > { %13039 = vmatmul.mubr.msk.bf16.gmra.mrb[12].mxu1 %vm577_vm0, %v456_v11 }
  0x2f   : > { %13042 = vmatprep.mubr.msk.bf16.mxu1 %vm577_vm0, %v458_v12 }
  0x36   : > { %13043 = vmatmul.mubr.msk.bf16.gmra.mrb[16].mxu1 %vm577_vm0, %v460_v13 }
  0x37   : > { %13046 = vmatprep.mubr.msk.bf16.mxu1 %vm577_vm0, %v462_v14 }
  0x3e   : > { %13047 = vmatmul.mubr.msk.bf16.gmra.mrb[20].mxu1 %vm577_vm0, %v464_v15 }
  0x3f   : > { %13050 = vmatprep.mubr.msk.bf16.mxu1 %vm577_vm0, %v466_v16 }
  0x46   : > { %13051 = vmatmul.mubr.msk.bf16.gmra.mrb[24].mxu1 %vm577_vm0, %v468_v17 }
  0x47   : > { %13054 = vmatprep.mubr.msk.bf16.mxu1 %vm577_vm0, %v470_v18 }
  0x4e   : > { %13055 = vmatmul.mubr.msk.bf16.gmra.mrb[28].mxu1 %vm577_vm0, %v472_v19 }
  0x4f   : > { %13060 = vmatprep.mubr.msk.bf16.mxu1 %vm1196_vm5, %v15761_v31 }
  0xe9   : > { %v13028_v33 = vpop.f32.mrb[0].mxu1 }
  0xea   : > { %v660_v35 = vpop.f32.mrb[1].mxu1  ;;  %v15775_v37 = vadd.f32 %v13028_v33, %v15772_v34 }
  0xeb   : > { %v13029_v36 = vpop.f32.mrb[2].mxu1  ;;  %v15781_v40 = vadd.f32 %v15772_v34, %v660_v35 }
  0xec   : > { %19990 = vst [vmem:[#allocation3_spill] sm:$0xff] %v15775_v37  ;;  %v15778_v38 = vadd.f32 %v13029_v36, %v15772_v34  ;;  %v663_v39 = vpop.f32.mrb[3].mxu1 }
  0xed   : > { %19992 = vst [vmem:[#allocation5_spill] sm:$0xff] %v15781_v40  ;;  %v15784_v41 = vadd.f32 %v15772_v34, %v663_v39 }
  0xee   : > { %19991 = vst [vmem:[#allocation4_spill] sm:$0xff] %v15778_v38  ;;  %v798_v42 = vpack.c.bf16 %v15778_v38, %v15775_v37 }
  0xef   : > { %19993 = vst [vmem:[#allocation6_spill] sm:$0xff] %v15784_v41  ;;  %v797_v43 = vpack.c.bf16 %v15784_v41, %v15781_v40 }
  0xf0   : > { %v828_v44 = vshrl.u32 %v798_v42, 16  ;;  %v831_v48 = vshll.u32 %v798_v42, 16 }
  0xf1   : > { %v821_v45 = vshrl.u32 %v797_v43, 16  ;;  %v13032_v46 = vpop.f32.mrb[4].mxu1  ;;  %v824_v51 = vshll.u32 %v797_v43, 16 }
  0xf2   : > { %v830_v47 = vrot.slane %v828_v44, 7  ;;  %v676_v49 = vpop.f32.mrb[5].mxu1  ;;  %v15791_v54 = vadd.f32 %v13032_v46, %v15772_v34 }
  0xf3   : > { %v823_v50 = vrot.slane %v821_v45, 7  ;;  %v13033_v52 = vpop.f32.mrb[6].mxu1  ;;  %v15794_v55 = vadd.f32 %v15772_v34, %v676_v49  ;;  %v15861_v45 = vld [vmem:[%s19882_s3 + $0x2] sm:$0x1] }
  0xf4   : > { %v833_v53 = vor.u32 %v831_v48, %v830_v47  ;;  %19994 = vst [vmem:[#allocation7_spill] sm:$0xff] %v15791_v54  ;;  %v15797_v56 = vadd.f32 %v13033_v52, %v15772_v34  ;;  %v679_v57 = vpop.f32.mrb[7].mxu1  ;;  %v15801_v58 = vsel %vm15745_vm3, %v830_v47, 0 }
  0xf5   : > { %19995 = vst [vmem:[#allocation8_spill] sm:$0xff] %v15794_v55  ;;  %v826_v59 = vor.u32 %v824_v51, %v823_v50  ;;  %v15805_v60 = vsel %vm15745_vm3, %v823_v50, 0  ;;  %v15808_v61 = vadd.f32 %v15772_v34, %v679_v57  ;;  %v1036_v4 = vshll.u32 %v15801_v58, 16 }
  0xf6   : > { %19996 = vst [vmem:[#allocation9_spill] sm:$0xff] %v15797_v56  ;;  %v15812_v62 = vsel %vm15745_vm3, 0, %v833_v53  ;;  %v1024_v63 = vshll.u32 %v15805_v60, 16  ;;  %v800_v0 = vpack.c.bf16 %v15797_v56, %v15791_v54 }
  0xf7   : > { %19997 = vst [vmem:[#allocation10_spill] sm:$0xff] %v15808_v61  ;;  %v15819_v1 = vsel %vm15745_vm3, 0, %v826_v59  ;;  %v799_v2 = vpack.c.bf16 %v15808_v61, %v15794_v55  ;;  %v1031_v3 = vshll.u32 %v15812_v62, 16  ;;  %v1029_v11 = vshrl.u32 %v15812_v62, 16 }
  0xf8   : > { %v1019_v5 = vshll.u32 %v15819_v1, 16  ;;  %v842_v6 = vshrl.u32 %v800_v0, 16  ;;  %v1017_v8 = vshrl.u32 %v15819_v1, 16  ;;  %v1026_v13 = vrot.slane %v1024_v63, 1 }
  0xf9   : > { %v835_v9 = vshrl.u32 %v799_v2, 16  ;;  %v13036_v10 = vpop.f32.mrb[8].mxu1  ;;  %v1033_v12 = vrot.slane %v1031_v3, 1  ;;  %v845_v15 = vshll.u32 %v800_v0, 16  ;;  %v838_v19 = vshll.u32 %v799_v2, 16 }
  0xfa   : > { %v844_v14 = vrot.slane %v842_v6, 7  ;;  %v692_v16 = vpop.f32.mrb[9].mxu1  ;;  %v1021_v17 = vrot.slane %v1019_v5, 1  ;;  %v15830_v20 = vadd.f32 %v13036_v10, %v15772_v34  ;;  %v1038_v30 = vrot.slane %v1036_v4, 1 }
  0xfb   : > { %v837_v18 = vrot.slane %v835_v9, 7  ;;  %v13037_v21 = vpop.f32.mrb[10].mxu1  ;;  %v1034_v24 = vor.u32 %v1033_v12, %v1029_v11  ;;  %v15840_v35 = vadd.f32 %v15772_v34, %v692_v16 }
  0xfc   : > { %19998 = vst [vmem:[#allocation11_spill] sm:$0xff] %v15830_v20  ;;  %v847_v26 = vor.u32 %v845_v15, %v844_v14  ;;  %v15833_v27 = vadd.f32 %v13037_v21, %v15772_v34  ;;  %v695_v28 = vpop.f32.mrb[11].mxu1  ;;  %v1022_v29 = vor.u32 %v1021_v17, %v1017_v8  ;;  %v15851_v42 = vsel %vm15745_vm3, %v844_v14, 0 }
  0xfd   : > { %v840_v32 = vor.u32 %v838_v19, %v837_v18  ;;  %v15837_v33 = vsel %vm15745_vm3, %v837_v18, 0  ;;  %20000 = vst [vmem:[#allocation13_spill] sm:$0xff] %v15840_v35  ;;  %v15843_v36 = vadd.f32 %v15772_v34, %v695_v28  ;;  %v15873_v49 = vsel %vm1003_vm4, %v1034_v24, %v1038_v30 }
  0xfe   : > { %19999 = vst [vmem:[#allocation12_spill] sm:$0xff] %v15833_v27  ;;  %v15847_v39 = vsel %vm15745_vm3, 0, %v847_v26  ;;  %v802_v43 = vpack.c.bf16 %v15833_v27, %v15830_v20  ;;  %v15856_v44 = vsel %vm1003_vm4, %v1022_v29, %v1026_v13  ;;  %v1048_v47 = vshll.u32 %v15837_v33, 16 }
  0xff   : > { %20001 = vst [vmem:[#allocation14_spill] sm:$0xff] %v15843_v36  ;;  %v15865_v46 = vsel %vm15745_vm3, 0, %v840_v32  ;;  %v801_v48 = vpack.c.bf16 %v15843_v36, %v15840_v35  ;;  %13061 = vmatmul.mubr.msk.bf16.vlgmr.msra.gmra.mrb[32].mxu1 %vm1196_vm5, %v15856_v44  ;;  %v1060_v52 = vshll.u32 %v15851_v42, 16  ;;  %v1053_v59 = vshrl.u32 %v15847_v39, 16 }
 0x100   : > { %v856_v50 = vshrl.u32 %v802_v43, 16  ;;  %13093 = vmatpush3.bf16.msra.mxu1 %v1443_v7  ;;  %13064 = vmatprep.mubr.msk.bf16.mxu1 %vm1196_vm5, %v15873_v49  ;;  %v1043_v51 = vshll.u32 %v15865_v46, 16  ;;  %v1055_v63 = vshll.u32 %v15847_v39, 16  ;;  %v859_v2 = vshll.u32 %v802_v43, 16 }
 0x101   : > { %v849_v53 = vshrl.u32 %v801_v48, 16  ;;  %v13040_v57 = vpop.f32.mrb[12].mxu1  ;;  %15342 = vmatprep.subr.msk.bf16.mxu1 %vm966_vm1, %v15861_v45  ;;  %v1041_v4 = vshrl.u32 %v15865_v46, 16  ;;  %v852_v7 = vshll.u32 %v801_v48, 16  ;;  %v1050_v9 = vrot.slane %v1048_v47, 1 }
 0x102   : > { %v858_v0 = vrot.slane %v856_v50, 7  ;;  %v708_v3 = vpop.f32.mrb[13].mxu1  ;;  %v1045_v5 = vrot.slane %v1043_v51, 1  ;;  %v1057_v10 = vrot.slane %v1055_v63, 1  ;;  %v15885_v12 = vadd.f32 %v13040_v57, %v15772_v34 }
 0x103   : > { %v851_v6 = vrot.slane %v849_v53, 7  ;;  %v13041_v8 = vpop.f32.mrb[14].mxu1  ;;  %v15895_v18 = vadd.f32 %v15772_v34, %v708_v3  ;;  %v1062_v28 = vrot.slane %v1060_v52, 1 }
 0x104   : > { %v861_v11 = vor.u32 %v859_v2, %v858_v0  ;;  %20002 = vst [vmem:[#allocation15_spill] sm:$0xff] %v15885_v12  ;;  %v15888_v13 = vadd.f32 %v13041_v8, %v15772_v34  ;;  %v711_v14 = vpop.f32.mrb[15].mxu1  ;;  %v1046_v15 = vor.u32 %v1045_v5, %v1041_v4  ;;  %v15902_v21 = vsel %vm15745_vm3, %v858_v0, 0 }
 0x105   : > { %v854_v16 = vor.u32 %v852_v7, %v851_v6  ;;  %v15892_v17 = vsel %vm15745_vm3, %v851_v6, 0  ;;  %20004 = vst [vmem:[#allocation17_spill] sm:$0xff] %v15895_v18  ;;  %v15898_v19 = vadd.f32 %v15772_v34, %v711_v14  ;;  %v1058_v43 = vor.u32 %v1057_v10, %v1053_v59 }
 0x106   : > { %20003 = vst [vmem:[#allocation16_spill] sm:$0xff] %v15888_v13  ;;  %v804_v24 = vpack.c.bf16 %v15888_v13, %v15885_v12  ;;  %v15907_v26 = vsel %vm1003_vm4, %v1046_v15, %v1050_v9  ;;  %v1072_v30 = vshll.u32 %v15892_v17, 16  ;;  %v15920_v47 = vsel %vm15745_vm3, 0, %v861_v11 }
 0x107   : > { %20005 = vst [vmem:[#allocation18_spill] sm:$0xff] %v15898_v19  ;;  %v15911_v29 = vsel %vm15745_vm3, 0, %v854_v16  ;;  %v803_v32 = vpack.c.bf16 %v15898_v19, %v15895_v18  ;;  %13065 = vmatmul.mubr.msk.bf16.gmra.mrb[36].mxu1 %vm1196_vm5, %v15907_v26  ;;  %v1084_v51 = vshll.u32 %v15902_v21, 16  ;;  %v15925_v53 = vsel %vm1003_vm4, %v1058_v43, %v1062_v28 }
 0x108   : > { %v870_v48 = vshrl.u32 %v804_v24, 16  ;;  %v1067_v50 = vshll.u32 %v15911_v29, 16  ;;  %v873_v0 = vshll.u32 %v804_v24, 16  ;;  %13068 = vmatprep.mubr.msk.bf16.mxu1 %vm1196_vm5, %v15925_v53  ;;  %v1065_v2 = vshrl.u32 %v15911_v29, 16 }
 0x109   : > { %v863_v52 = vshrl.u32 %v803_v32, 16  ;;  %v13044_v57 = vpop.f32.mrb[16].mxu1  ;;  %v866_v5 = vshll.u32 %v803_v32, 16  ;;  %v1074_v7 = vrot.slane %v1072_v30, 1  ;;  %v1079_v8 = vshll.u32 %v15920_v47, 16 }
 0x10a   : > { %v872_v63 = vrot.slane %v870_v48, 7  ;;  %v724_v59 = vpop.f32.mrb[17].mxu1  ;;  %v1069_v3 = vrot.slane %v1067_v50, 1  ;;  %v15932_v10 = vadd.f32 %v13044_v57, %v15772_v34  ;;  %v1077_v50 = vshrl.u32 %v15920_v47, 16 }
 0x10b   : > { %v865_v4 = vrot.slane %v863_v52, 7  ;;  %v13045_v6 = vpop.f32.mrb[18].mxu1  ;;  %v15942_v28 = vadd.f32 %v15772_v34, %v724_v59 }
 0x10c   : > { %v875_v9 = vor.u32 %v873_v0, %v872_v63  ;;  %20006 = vst [vmem:[#allocation19_spill] sm:$0xff] %v15932_v10  ;;  %v15935_v11 = vadd.f32 %v13045_v6, %v15772_v34  ;;  %v727_v14 = vpop.f32.mrb[19].mxu1  ;;  %v1070_v15 = vor.u32 %v1069_v3, %v1065_v2  ;;  %v15949_v32 = vsel %vm15745_vm3, %v872_v63, 0 }
 0x10d   : > { %v868_v16 = vor.u32 %v866_v5, %v865_v4  ;;  %v15939_v24 = vsel %vm15745_vm3, %v865_v4, 0  ;;  %20008 = vst [vmem:[#allocation21_spill] sm:$0xff] %v15942_v28  ;;  %v15945_v30 = vadd.f32 %v15772_v34, %v727_v14  ;;  %v1081_v63 = vrot.slane %v1079_v8, 1 }
 0x10e   : > { %20007 = vst [vmem:[#allocation20_spill] sm:$0xff] %v15935_v11  ;;  %v806_v43 = vpack.c.bf16 %v15935_v11, %v15932_v10  ;;  %v15954_v48 = vsel %vm1003_vm4, %v1070_v15, %v1074_v7  ;;  %v1096_v57 = vshll.u32 %v15939_v24, 16  ;;  %v15968_v59 = vsel %vm15745_vm3, 0, %v875_v9 }
 0x10f   : > { %20009 = vst [vmem:[#allocation22_spill] sm:$0xff] %v15945_v30  ;;  %v15959_v52 = vsel %vm15745_vm3, 0, %v868_v16  ;;  %v805_v0 = vpack.c.bf16 %v15945_v30, %v15942_v28  ;;  %13069 = vmatmul.mubr.msk.bf16.gmra.mrb[40].mxu1 %vm1196_vm5, %v15954_v48  ;;  %v1086_v3 = vrot.slane %v1084_v51, 1  ;;  %v1108_v5 = vshll.u32 %v15949_v32, 16 }
 0x110   : > { %v884_v2 = vshrl.u32 %v806_v43, 16  ;;  %v1091_v4 = vshll.u32 %v15959_v52, 16  ;;  %v887_v6 = vshll.u32 %v806_v43, 16  ;;  %v1082_v14 = vor.u32 %v1081_v63, %v1077_v50 }
 0x111   : > { %v877_v7 = vshrl.u32 %v805_v0, 16  ;;  %v13048_v15 = vpop.f32.mrb[20].mxu1  ;;  %v880_v28 = vshll.u32 %v805_v0, 16  ;;  %v1089_v10 = vshrl.u32 %v15959_v52, 16  ;;  %v1098_v51 = vrot.slane %v1096_v57, 1 }
 0x112   : > { %v886_v16 = vrot.slane %v884_v2, 7  ;;  %v740_v30 = vpop.f32.mrb[21].mxu1  ;;  %v1093_v8 = vrot.slane %v1091_v4, 1  ;;  %v15974_v9 = vsel %vm1003_vm4, %v1082_v14, %v1086_v3  ;;  %v1103_v19 = vshll.u32 %v15968_v59, 16 }
 0x113   : > { %v879_v11 = vrot.slane %v877_v7, 7  ;;  %v13049_v18 = vpop.f32.mrb[22].mxu1  ;;  %13072 = vmatprep.mubr.msk.bf16.mxu1 %vm1196_vm5, %v15974_v9  ;;  %v15980_v43 = vadd.f32 %v13048_v15, %v15772_v34  ;;  %v15990_v57 = vadd.f32 %v15772_v34, %v740_v30 }
 0x114   : > { %v889_v12 = vor.u32 %v887_v6, %v886_v16  ;;  %v15983_v50 = vadd.f32 %v13049_v18, %v15772_v34  ;;  %v743_v0 = vpop.f32.mrb[23].mxu1  ;;  %v1094_v63 = vor.u32 %v1093_v8, %v1089_v10  ;;  %v15997_v6 = vsel %vm15745_vm3, %v886_v16, 0 }
 0x115   : > { %20010 = vst [vmem:[#allocation23_spill] sm:$0xff] %v15980_v43  ;;  %v882_v2 = vor.u32 %v880_v28, %v879_v11  ;;  %v15987_v3 = vsel %vm15745_vm3, %v879_v11, 0  ;;  %20012 = vst [vmem:[#allocation25_spill] sm:$0xff] %v15990_v57  ;;  %v15993_v4 = vadd.f32 %v15772_v34, %v743_v0  ;;  %v1101_v28 = vshrl.u32 %v15968_v59, 16 }
 0x116   : > { %20011 = vst [vmem:[#allocation24_spill] sm:$0xff] %v15983_v50  ;;  %v808_v18 = vpack.c.bf16 %v15983_v50, %v15980_v43  ;;  %v16002_v10 = vsel %vm1003_vm4, %v1094_v63, %v1098_v51  ;;  %v1120_v30 = vshll.u32 %v15987_v3, 16  ;;  %v1105_v14 = vrot.slane %v1103_v19, 1 }
 0x117   : > { %20013 = vst [vmem:[#allocation26_spill] sm:$0xff] %v15993_v4  ;;  %v16007_v11 = vsel %vm15745_vm3, 0, %v882_v2  ;;  %v807_v7 = vpack.c.bf16 %v15993_v4, %v15990_v57  ;;  %13073 = vmatmul.mubr.msk.bf16.gmra.mrb[44].mxu1 %vm1196_vm5, %v16002_v10  ;;  %v16016_v15 = vsel %vm15745_vm3, 0, %v889_v12  ;;  %v1110_v8 = vrot.slane %v1108_v5, 1 }
 0x118   : > { %v898_v16 = vshrl.u32 %v808_v18, 16  ;;  %v1115_v51 = vshll.u32 %v16007_v11, 16  ;;  %v1132_v0 = vshll.u32 %v15997_v6, 16  ;;  %v901_v63 = vshll.u32 %v808_v18, 16 }
 0x119   : > { %v891_v2 = vshrl.u32 %v807_v7, 16  ;;  %v1106_v43 = vor.u32 %v1105_v14, %v1101_v28  ;;  %v13052_v50 = vpop.f32.mrb[24].mxu1  ;;  %v894_v57 = vshll.u32 %v807_v7, 16  ;;  %v1113_v35 = vshrl.u32 %v16007_v11, 16 }
 0x11a   : > { %v900_v13 = vrot.slane %v898_v16, 7  ;;  %v756_v4 = vpop.f32.mrb[25].mxu1  ;;  %v1117_v19 = vrot.slane %v1115_v51, 1  ;;  %v1122_v5 = vrot.slane %v1120_v30, 1  ;;  %v1127_v27 = vshll.u32 %v16016_v15, 16 }
 0x11b   : > { %v893_v36 = vrot.slane %v891_v2, 7  ;;  %v16022_v12 = vsel %vm1003_vm4, %v1106_v43, %v1110_v8  ;;  %v13053_v20 = vpop.f32.mrb[26].mxu1  ;;  %v16028_v18 = vadd.f32 %v13052_v50, %v15772_v34  ;;  %v16038_v30 = vadd.f32 %v15772_v34, %v756_v4 }
 0x11c   : > { %v903_v54 = vor.u32 %v901_v63, %v900_v13  ;;  %13076 = vmatprep.mubr.msk.bf16.mxu1 %vm1196_vm5, %v16022_v12  ;;  %v16031_v28 = vadd.f32 %v13053_v20, %v15772_v34  ;;  %v759_v7 = vpop.f32.mrb[27].mxu1  ;;  %v1118_v14 = vor.u32 %v1117_v19, %v1113_v35  ;;  %v16045_v50 = vsel %vm15745_vm3, %v900_v13, 0 }
 0x11d   : > { %20014 = vst [vmem:[#allocation27_spill] sm:$0xff] %v16028_v18  ;;  %v896_v16 = vor.u32 %v894_v57, %v893_v36  ;;  %v16035_v43 = vsel %vm15745_vm3, %v893_v36, 0  ;;  %20016 = vst [vmem:[#allocation29_spill] sm:$0xff] %v16038_v30  ;;  %v16041_v8 = vadd.f32 %v15772_v34, %v759_v7  ;;  %v1125_v57 = vshrl.u32 %v16016_v15, 16 }
 0x11e   : > { %20015 = vst [vmem:[#allocation28_spill] sm:$0xff] %v16031_v28  ;;  %v810_v20 = vpack.c.bf16 %v16031_v28, %v16028_v18  ;;  %v16050_v35 = vsel %vm1003_vm4, %v1118_v14, %v1122_v5  ;;  %v1129_v13 = vrot.slane %v1127_v27, 1  ;;  %v1134_v51 = vrot.slane %v1132_v0, 1 }
 0x11f   : > { %20017 = vst [vmem:[#allocation30_spill] sm:$0xff] %v16041_v8  ;;  %v16055_v36 = vsel %vm15745_vm3, 0, %v896_v16  ;;  %v809_v4 = vpack.c.bf16 %v16041_v8, %v16038_v30  ;;  %13077 = vmatmul.mubr.msk.bf16.gmra.mrb[48].mxu1 %vm1196_vm5, %v16050_v35  ;;  %v16063_v63 = vsel %vm15745_vm3, 0, %v903_v54  ;;  %v1144_v2 = vshll.u32 %v16035_v43, 16 }
 0x120   : > { %v912_v19 = vshrl.u32 %v810_v20, 16  ;;  %v1139_v5 = vshll.u32 %v16055_v36, 16  ;;  %v1156_v7 = vshll.u32 %v16045_v50, 16  ;;  %v915_v14 = vshll.u32 %v810_v20, 16 }
 0x121   : > { %v905_v16 = vshrl.u32 %v809_v4, 16  ;;  %v1130_v18 = vor.u32 %v1129_v13, %v1125_v57  ;;  %v13056_v30 = vpop.f32.mrb[28].mxu1  ;;  %v1137_v0 = vshrl.u32 %v16055_v36, 16  ;;  %v908_v55 = vshll.u32 %v809_v4, 16 }
 0x122   : > { %v914_v8 = vrot.slane %v912_v19, 7  ;;  %v16069_v28 = vadd.f32 %v13056_v30, %v15772_v34  ;;  %v772_v27 = vpop.f32.mrb[29].mxu1  ;;  %v1141_v54 = vrot.slane %v1139_v5, 1  ;;  %v1151_v38 = vshll.u32 %v16063_v63, 16 }
 0x123   : > { %v907_v56 = vrot.slane %v905_v16, 7  ;;  %v16073_v61 = vsel %vm1003_vm4, %v1130_v18, %v1134_v51  ;;  %v13057_v37 = vpop.f32.mrb[30].mxu1  ;;  %v1146_v19 = vrot.slane %v1144_v2, 1  ;;  %v16086_v18 = vadd.f32 %v15772_v34, %v772_v27 }
 0x124   : > { %v917_v20 = vor.u32 %v915_v14, %v914_v8  ;;  %13080 = vmatprep.mubr.msk.bf16.mxu1 %vm1196_vm5, %v16073_v61  ;;  %v16079_v57 = vadd.f32 %v13057_v37, %v15772_v34  ;;  %v775_v30 = vpop.f32.mrb[31].mxu1  ;;  %v1142_v13 = vor.u32 %v1141_v54, %v1137_v0  ;;  %v16093_v5 = vsel %vm15745_vm3, %v914_v8, 0 }
 0x125   : > { %v910_v40 = vor.u32 %v908_v55, %v907_v56  ;;  %v16083_v4 = vsel %vm15745_vm3, %v907_v56, 0  ;;  %20018 = vst [vmem:[#allocation31_spill] sm:$0xff] %v16086_v18  ;;  %v16089_v51 = vadd.f32 %v15772_v34, %v775_v30  ;;  %v1149_v2 = vshrl.u32 %v16063_v63, 16 }
 0x126   : > { %v16096_v37 = vsel %vm1003_vm4, %v1142_v13, %v1146_v19  ;;  %v16101_v55 = vsel %vm15745_vm3, 0, %v917_v20  ;;  %v1153_v8 = vrot.slane %v1151_v38, 1  ;;  %v1168_v14 = vshll.u32 %v16083_v4, 16 }
 0x127   : > { %20019 = vst [vmem:[#allocation32_spill] sm:$0xff] %v16089_v51  ;;  %v16105_v56 = vsel %vm15745_vm3, 0, %v910_v40  ;;  %v811_v34 = vpack.c.bf16 %v16089_v51, %v16086_v18  ;;  %13081 = vmatmul.mubr.msk.bf16.gmra.mrb[52].mxu1 %vm1196_vm5, %v16096_v37  ;;  %v1158_v54 = vrot.slane %v1156_v7, 1  ;;  %v1180_v20 = vshll.u32 %v16093_v5, 16 }
 0x128   : > { %v1163_v16 = vshll.u32 %v16105_v56, 16  ;;  %v1154_v0 = vor.u32 %v1153_v8, %v1149_v2  ;;  %v1161_v30 = vshrl.u32 %v16105_v56, 16  ;;  %v1175_v13 = vshll.u32 %v16101_v55, 16 }
 0x129   : > { %v919_v27 = vshrl.u32 %v811_v34, 16  ;;  %v922_v18 = vshll.u32 %v811_v34, 16  ;;  %v1170_v41 = vrot.slane %v1168_v14, 1  ;;  %v1173_v2 = vshrl.u32 %v16101_v55, 16 }
 0x12a   : > { %v1165_v40 = vrot.slane %v1163_v16, 1  ;;  %v16117_v51 = vsel %vm1003_vm4, %v1154_v0, %v1158_v54  ;;  %v1177_v7 = vrot.slane %v1175_v13, 1 }
 0x12b   : > { %v921_v19 = vrot.slane %v919_v27, 7  ;;  %13084 = vmatprep.mubr.msk.bf16.mxu1 %vm1196_vm5, %v16117_v51  ;;  %v1182_v27 = vrot.slane %v1180_v20, 1 }
 0x12c   : > { %v1166_v38 = vor.u32 %v1165_v40, %v1161_v30  ;;  %v1178_v34 = vor.u32 %v1177_v7, %v1173_v2  ;;  %v1640_v2 = vrot.slane %v15756_v25, 1  ;;  %v1646_v25 = vrot.slane %v15801_v58, 1 }
 0x12d   : > { %v924_v8 = vor.u32 %v922_v18, %v921_v19  ;;  %v16124_v31 = vsel %vm15745_vm3, %v921_v19, 0  ;;  %v1736_v19 = vsel %vm966_vm1, %v15861_v45, 0  ;;  %v1639_v45 = vrot.slane %v15751_v23, 1 }
 0x12e   : > { %v16127_v16 = vsel %vm1003_vm4, %v1166_v38, %v1170_v41  ;;  %v1192_v14 = vshll.u32 %v16124_v31, 16  ;;  %v16137_v18 = vsel %vm1003_vm4, %v1178_v34, %v1182_v27  ;;  %v790_v38 = vld [vmem:[%s19882_s3 + $0x3] sm:$0x1]  ;;  %v1645_v34 = vrot.slane %v15812_v62, 1 }
 0x12f   : > { %v16131_v0 = vsel %vm15745_vm3, 0, %v924_v8  ;;  %13085 = vmatmul.mubr.msk.bf16.gmra.mrb[56].mxu1 %vm1196_vm5, %v16127_v16  ;;  %v16187_v7 = vsel %vm1638_vm6, %v1639_v45, %v1640_v2  ;;  %v1642_v8 = vrot.slane %v15819_v1, 1  ;;  %v1643_v27 = vrot.slane %v15805_v60, 1 }
 0x130   : > { %v1187_v54 = vshll.u32 %v16131_v0, 16  ;;  %13088 = vmatprep.mubr.msk.bf16.mxu1 %vm1196_vm5, %v16137_v18  ;;  %v1185_v41 = vshrl.u32 %v16131_v0, 16  ;;  %v1194_v40 = vrot.slane %v1192_v14, 1  ;;  %v1935_v14 = vsel %vm966_vm1, %v790_v38, 0 }
 0x131   : > { %v1648_v58 = vrot.slane %v15865_v46, 1  ;;  %v1651_v60 = vrot.slane %v15847_v39, 1  ;;  %v1654_v45 = vrot.slane %v15911_v29, 1  ;;  %v1657_v2 = vrot.slane %v15920_v47, 1 }
 0x132   : > { %v1189_v20 = vrot.slane %v1187_v54, 1  ;;  %v16199_v54 = vsel %vm1638_vm6, %v1642_v8, %v1643_v27  ;;  %v1660_v27 = vrot.slane %v15959_v52, 1 }
 0x134   : > { %v1190_v30 = vor.u32 %v1189_v20, %v1185_v41  ;;  %v791_v41 = vld [vmem:[%s19882_s3 + $0x4] sm:$0x1]  ;;  %v16207_v20 = vsel %vm1638_vm6, %v1645_v34, %v1646_v25 }
 0x136   : > { %v16144_v13 = vsel %vm1003_vm4, %v1190_v30, %v1194_v40  ;;  %v1649_v30 = vrot.slane %v15837_v33, 1  ;;  %v1652_v40 = vrot.slane %v15851_v42, 1  ;;  %v1655_v33 = vrot.slane %v15892_v17, 1 }
 0x137   : > { %13089 = vmatmul.mubr.msk.bf16.gmra.mrb[60].mxu1 %vm1196_vm5, %v16144_v13  ;;  %v1658_v42 = vrot.slane %v15902_v21, 1  ;;  %v1661_v17 = vrot.slane %v15939_v24, 1  ;;  %v1664_v21 = vrot.slane %v15949_v32, 1  ;;  %v1667_v24 = vrot.slane %v15987_v3, 1 }
 0x138   : > { %13094 = vmatprep.mubr.msk.bf16.mxu1 %vm1196_vm5, %v15751_v23  ;;  %v16231_v8 = vsel %vm1638_vm6, %v1654_v45, %v1655_v33  ;;  %v1670_v32 = vrot.slane %v15997_v6, 1  ;;  %v1675_v33 = vrot.slane %v16063_v63, 1  ;;  %v1673_v3 = vrot.slane %v16035_v43, 1 }
 0x139   : > { %v16236_v34 = vsel %vm1638_vm6, %v1657_v2, %v1658_v42  ;;  %v16245_v25 = vsel %vm1638_vm6, %v1660_v27, %v1661_v17  ;;  %v1672_v2 = vrot.slane %v16055_v36, 1  ;;  %v1676_v6 = vrot.slane %v16045_v50, 1 }
 0x13a   : > { %v1681_v17 = vrot.slane %v16101_v55, 1  ;;  %v1679_v43 = vrot.slane %v16083_v4, 1  ;;  %v1682_v50 = vrot.slane %v16093_v5, 1  ;;  %v2145_v5 = vsel %vm966_vm1, %v791_v41, 0 }
 0x13b   : > { %v16273_v42 = vsel %vm1638_vm6, %v1672_v2, %v1673_v3  ;;  %v16278_v27 = vsel %vm1638_vm6, %v1675_v33, %v1676_v6 }
 0x13f   : > { %13095 = vmatmul.mubr.msk.bf16.vlgmr.msra.gmra.mrb[32].mxu1 %vm1196_vm5, %v15819_v1 }
 0x140   : > { %13127 = vmatpush3.bf16.msra.mxu1 %v1736_v19  ;;  %13098 = vmatprep.mubr.msk.bf16.mxu1 %vm1196_vm5, %v15812_v62  ;;  %v16217_v19 = vsel %vm1638_vm6, %v1648_v58, %v1649_v30  ;;  %v1669_v30 = vrot.slane %v16016_v15, 1 }
 0x141   : > { %15343 = vmatprep.subr.msk.bf16.mxu1 %vm966_vm1, %v790_v38  ;;  %v16222_v38 = vsel %vm1638_vm6, %v1651_v60, %v1652_v40  ;;  %v1666_v60 = vrot.slane %v16007_v11, 1 }
 0x142   : > { %v16264_v45 = vsel %vm1638_vm6, %v1669_v30, %v1670_v32  ;;  %v1684_v30 = vrot.slane %v16131_v0, 1  ;;  %v792_v32 = vld [vmem:[%s19882_s3 + $0x5] sm:$0x1] }
 0x143   : > { %v16259_v40 = vsel %vm1638_vm6, %v1666_v60, %v1667_v24  ;;  %v16292_v60 = vsel %vm1638_vm6, %v1681_v17, %v1682_v50  ;;  %v1685_v24 = vrot.slane %v16124_v31, 1  ;;  %v812_v31 = vpack.c.bf16 %v16079_v57, %v16069_v28 }
 0x144   : > { %v2349_v6 = vsel %vm966_vm1, %v792_v32, 0 }
 0x145   : > { %v16299_v4 = vsel %vm1638_vm6, %v1684_v30, %v1685_v24  ;;  %v929_v2 = vshll.u32 %v812_v31, 16 }
 0x147   : > { %13099 = vmatmul.mubr.msk.bf16.gmra.mrb[36].mxu1 %vm1196_vm5, %v15865_v46 }
 0x148   : > { %13102 = vmatprep.mubr.msk.bf16.mxu1 %vm1196_vm5, %v15847_v39 }
 0x14f   : > { %13103 = vmatmul.mubr.msk.bf16.gmra.mrb[40].mxu1 %vm1196_vm5, %v15911_v29 }
 0x150   : > { %13106 = vmatprep.mubr.msk.bf16.mxu1 %vm1196_vm5, %v15920_v47 }
 0x157   : > { %13107 = vmatmul.mubr.msk.bf16.gmra.mrb[44].mxu1 %vm1196_vm5, %v15959_v52 }
 0x158   : > { %13110 = vmatprep.mubr.msk.bf16.mxu1 %vm1196_vm5, %v15968_v59 }
 0x15f   : > { %13111 = vmatmul.mubr.msk.bf16.gmra.mrb[48].mxu1 %vm1196_vm5, %v16007_v11 }
 0x160   : > { %13114 = vmatprep.mubr.msk.bf16.mxu1 %vm1196_vm5, %v16016_v15 }
 0x167   : > { %13115 = vmatmul.mubr.msk.bf16.gmra.mrb[52].mxu1 %vm1196_vm5, %v16055_v36 }
 0x168   : > { %13118 = vmatprep.mubr.msk.bf16.mxu1 %vm1196_vm5, %v16063_v63 }
 0x16f   : > { %13119 = vmatmul.mubr.msk.bf16.gmra.mrb[56].mxu1 %vm1196_vm5, %v16105_v56 }
 0x170   : > { %13122 = vmatprep.mubr.msk.bf16.mxu1 %vm1196_vm5, %v16101_v55 }
 0x177   : > { %13123 = vmatmul.mubr.msk.bf16.gmra.mrb[60].mxu1 %vm1196_vm5, %v16131_v0 }
 0x178   : > { %13128 = vmatprep.mubr.msk.bf16.mxu1 %vm1196_vm5, %v16187_v7 }
 0x17f   : > { %13129 = vmatmul.mubr.msk.bf16.vlgmr.msra.gmra.mrb[32].mxu1 %vm1196_vm5, %v16199_v54 }
 0x180   : > { %13161 = vmatpush3.bf16.msra.mxu1 %v1935_v14  ;;  %13132 = vmatprep.mubr.msk.bf16.mxu1 %vm1196_vm5, %v16207_v20  ;;  %v1663_v14 = vrot.slane %v15968_v59, 1 }
 0x181   : > { %15344 = vmatprep.subr.msk.bf16.mxu1 %vm966_vm1, %v791_v41 }
 0x182   : > { %v16250_v58 = vsel %vm1638_vm6, %v1663_v14, %v1664_v21  ;;  %v1678_v14 = vrot.slane %v16105_v56, 1 }
 0x184   : > { %v16287_v21 = vsel %vm1638_vm6, %v1678_v14, %v1679_v43  ;;  %v793_v14 = vld [vmem:[%s19882_s3 + $0x6] sm:$0x1] }
 0x187   : > { %13133 = vmatmul.mubr.msk.bf16.gmra.mrb[36].mxu1 %vm1196_vm5, %v16217_v19 }
 0x188   : > { %13136 = vmatprep.mubr.msk.bf16.mxu1 %vm1196_vm5, %v16222_v38 }
 0x18f   : > { %13137 = vmatmul.mubr.msk.bf16.gmra.mrb[40].mxu1 %vm1196_vm5, %v16231_v8 }
 0x190   : > { %13140 = vmatprep.mubr.msk.bf16.mxu1 %vm1196_vm5, %v16236_v34 }
 0x197   : > { %13141 = vmatmul.mubr.msk.bf16.gmra.mrb[44].mxu1 %vm1196_vm5, %v16245_v25 }
 0x198   : > { %13144 = vmatprep.mubr.msk.bf16.mxu1 %vm1196_vm5, %v16250_v58 }
 0x19f   : > { %13145 = vmatmul.mubr.msk.bf16.gmra.mrb[48].mxu1 %vm1196_vm5, %v16259_v40 }
 0x1a0   : > { %13148 = vmatprep.mubr.msk.bf16.mxu1 %vm1196_vm5, %v16264_v45 }
 0x1a7   : > { %13149 = vmatmul.mubr.msk.bf16.gmra.mrb[52].mxu1 %vm1196_vm5, %v16273_v42 }
 0x1a8   : > { %13152 = vmatprep.mubr.msk.bf16.mxu1 %vm1196_vm5, %v16278_v27 }
 0x1af   : > { %13153 = vmatmul.mubr.msk.bf16.gmra.mrb[56].mxu1 %vm1196_vm5, %v16287_v21 }
 0x1b0   : > { %13156 = vmatprep.mubr.msk.bf16.mxu1 %vm1196_vm5, %v16292_v60 }
 0x1b7   : > { %13157 = vmatmul.mubr.msk.bf16.gmra.mrb[60].mxu1 %vm1196_vm5, %v16299_v4 }
 0x1b8   : > { %13162 = vmatprep.mubr.msk.bf16.mxu1 %vm1196_vm5, %v15819_v1  ;;  %v926_v1 = vshrl.u32 %v812_v31, 16  ;;  %v2545_v31 = vsel %vm966_vm1, %v793_v14, 0 }
 0x1ba   : > { %v928_v41 = vrot.slane %v926_v1, 7  ;;  %v794_v1 = vld [vmem:[%s19882_s3 + $0x7] sm:$0x1] }
 0x1bc   : > { %v931_v33 = vor.u32 %v929_v2, %v928_v41  ;;  %v1002_v17 = vsel %vm15745_vm3, %v928_v41, 0 }
 0x1bd   : > { %v2137_v50 = vshll.u32 %v1002_v17, 16  ;;  %v2343_v41 = vrot.slane %v1002_v17, 1 }
 0x1be   : > { %v16342_v3 = vsel %vm15745_vm3, 0, %v931_v33  ;;  %v2741_v33 = vsel %vm966_vm1, %v794_v1, 0 }
 0x1bf   : > { %13163 = vmatmul.mubr.msk.bf16.vlgmr.msra.gmra.mrb[32].mxu1 %vm1196_vm5, %v15812_v62  ;;  %v2130_v30 = vshrl.u32 %v16342_v3, 16 }
 0x1c0   : > { %13195 = vmatpush3.bf16.msra.mxu1 %v2145_v5  ;;  %13166 = vmatprep.mubr.msk.bf16.mxu1 %vm1196_vm5, %v15865_v46  ;;  %v2139_v5 = vrot.slane %v2137_v50, 1 }
 0x1c1   : > { %15345 = vmatprep.subr.msk.bf16.mxu1 %vm966_vm1, %v792_v32 }
 0x1c7   : > { %13167 = vmatmul.mubr.msk.bf16.gmra.mrb[36].mxu1 %vm1196_vm5, %v15847_v39 }
 0x1c8   : > { %13170 = vmatprep.mubr.msk.bf16.mxu1 %vm1196_vm5, %v15911_v29 }
 0x1cf   : > { %13171 = vmatmul.mubr.msk.bf16.gmra.mrb[40].mxu1 %vm1196_vm5, %v15920_v47 }
 0x1d0   : > { %13174 = vmatprep.mubr.msk.bf16.mxu1 %vm1196_vm5, %v15959_v52 }
 0x1d7   : > { %13175 = vmatmul.mubr.msk.bf16.gmra.mrb[44].mxu1 %vm1196_vm5, %v15968_v59 }
 0x1d8   : > { %13178 = vmatprep.mubr.msk.bf16.mxu1 %vm1196_vm5, %v16007_v11 }
 0x1df   : > { %13179 = vmatmul.mubr.msk.bf16.gmra.mrb[48].mxu1 %vm1196_vm5, %v16016_v15 }
 0x1e0   : > { %13182 = vmatprep.mubr.msk.bf16.mxu1 %vm1196_vm5, %v16055_v36 }
 0x1e7   : > { %13183 = vmatmul.mubr.msk.bf16.gmra.mrb[52].mxu1 %vm1196_vm5, %v16063_v63 }
 0x1e8   : > { %13186 = vmatprep.mubr.msk.bf16.mxu1 %vm1196_vm5, %v16105_v56 }
 0x1ef   : > { %13187 = vmatmul.mubr.msk.bf16.gmra.mrb[56].mxu1 %vm1196_vm5, %v16101_v55 }
 0x1f0   : > { %13190 = vmatprep.mubr.msk.bf16.mxu1 %vm1196_vm5, %v16131_v0 }
 0x1f7   : > { %13191 = vmatmul.mubr.msk.bf16.gmra.mrb[60].mxu1 %vm1196_vm5, %v16342_v3 }
 0x1f8   : > { %13196 = vmatprep.mubr.msk.bf16.mxu1 %vm1196_vm5, %v15856_v44  ;;  %v2132_v44 = vshll.u32 %v16342_v3, 16 }
 0x1fa   : > { %v2134_v43 = vrot.slane %v2132_v44, 1 }
 0x1fc   : > { %v2135_v24 = vor.u32 %v2134_v43, %v2130_v30 }
 0x1fe   : > { %v2140_v32 = vsel %vm1003_vm4, %v2135_v24, %v2139_v5 }
 0x1ff   : > { %13197 = vmatmul.mubr.msk.bf16.vlgmr.msra.gmra.mrb[32].mxu1 %vm1196_vm5, %v15873_v49 }
 0x200   : > { %13229 = vmatpush3.bf16.msra.mxu1 %v2349_v6  ;;  %13200 = vmatprep.mubr.msk.bf16.mxu1 %vm1196_vm5, %v15907_v26  ;;  %v795_v6 = vld [vmem:[%s19882_s3 + $0x8] sm:$0x1] }
 0x201   : > { %15346 = vmatprep.subr.msk.bf16.mxu1 %vm966_vm1, %v793_v14 }
 0x207   : > { %13201 = vmatmul.mubr.msk.bf16.gmra.mrb[36].mxu1 %vm1196_vm5, %v15925_v53 }
 0x208   : > { %13204 = vmatprep.mubr.msk.bf16.mxu1 %vm1196_vm5, %v15954_v48 }
 0x20f   : > { %13205 = vmatmul.mubr.msk.bf16.gmra.mrb[40].mxu1 %vm1196_vm5, %v15974_v9 }
 0x210   : > { %13208 = vmatprep.mubr.msk.bf16.mxu1 %vm1196_vm5, %v16002_v10 }
 0x217   : > { %13209 = vmatmul.mubr.msk.bf16.gmra.mrb[44].mxu1 %vm1196_vm5, %v16022_v12 }
 0x218   : > { %13212 = vmatprep.mubr.msk.bf16.mxu1 %vm1196_vm5, %v16050_v35 }
 0x21f   : > { %13213 = vmatmul.mubr.msk.bf16.gmra.mrb[48].mxu1 %vm1196_vm5, %v16073_v61 }
 0x220   : > { %13216 = vmatprep.mubr.msk.bf16.mxu1 %vm1196_vm5, %v16096_v37 }
 0x227   : > { %13217 = vmatmul.mubr.msk.bf16.gmra.mrb[52].mxu1 %vm1196_vm5, %v16117_v51 }
 0x228   : > { %13220 = vmatprep.mubr.msk.bf16.mxu1 %vm1196_vm5, %v16127_v16 }
 0x22f   : > { %13221 = vmatmul.mubr.msk.bf16.gmra.mrb[56].mxu1 %vm1196_vm5, %v16137_v18 }
 0x230   : > { %13224 = vmatprep.mubr.msk.bf16.mxu1 %vm1196_vm5, %v16144_v13 }
 0x237   : > { %13225 = vmatmul.mubr.msk.bf16.gmra.mrb[60].mxu1 %vm1196_vm5, %v2140_v32 }
 0x238   : > { %13230 = vmatprep.mubr.msk.bf16.mxu1 %vm1196_vm5, %v16199_v54  ;;  %v2342_v54 = vrot.slane %v16342_v3, 1 }
 0x23a   : > { %v2344_v2 = vsel %vm1638_vm6, %v2342_v54, %v2343_v41 }
 0x23f   : > { %13231 = vmatmul.mubr.msk.bf16.vlgmr.msra.gmra.mrb[32].mxu1 %vm1196_vm5, %v16207_v20 }
 0x240   : > { %13263 = vmatpush3.bf16.msra.mxu1 %v2545_v31  ;;  %13234 = vmatprep.mubr.msk.bf16.mxu1 %vm1196_vm5, %v16217_v19 }
 0x241   : > { %15347 = vmatprep.subr.msk.bf16.mxu1 %vm966_vm1, %v794_v1 }
 0x247   : > { %13235 = vmatmul.mubr.msk.bf16.gmra.mrb[36].mxu1 %vm1196_vm5, %v16222_v38 }
 0x248   : > { %13238 = vmatprep.mubr.msk.bf16.mxu1 %vm1196_vm5, %v16231_v8 }
 0x24f   : > { %13239 = vmatmul.mubr.msk.bf16.gmra.mrb[40].mxu1 %vm1196_vm5, %v16236_v34 }
 0x250   : > { %13242 = vmatprep.mubr.msk.bf16.mxu1 %vm1196_vm5, %v16245_v25 }
 0x257   : > { %13243 = vmatmul.mubr.msk.bf16.gmra.mrb[44].mxu1 %vm1196_vm5, %v16250_v58 }
 0x258   : > { %13246 = vmatprep.mubr.msk.bf16.mxu1 %vm1196_vm5, %v16259_v40 }
 0x25f   : > { %13247 = vmatmul.mubr.msk.bf16.gmra.mrb[48].mxu1 %vm1196_vm5, %v16264_v45 }
 0x260   : > { %13250 = vmatprep.mubr.msk.bf16.mxu1 %vm1196_vm5, %v16273_v42 }
 0x267   : > { %13251 = vmatmul.mubr.msk.bf16.gmra.mrb[52].mxu1 %vm1196_vm5, %v16278_v27 }
 0x268   : > { %13254 = vmatprep.mubr.msk.bf16.mxu1 %vm1196_vm5, %v16287_v21 }
 0x26f   : > { %13255 = vmatmul.mubr.msk.bf16.gmra.mrb[56].mxu1 %vm1196_vm5, %v16292_v60 }
 0x270   : > { %13258 = vmatprep.mubr.msk.bf16.mxu1 %vm1196_vm5, %v16299_v4 }
 0x277   : > { %13259 = vmatmul.mubr.msk.bf16.gmra.mrb[60].mxu1 %vm1196_vm5, %v2344_v2 }
 0x278   : > { %13264 = vmatprep.mubr.msk.bf16.mxu1 %vm1196_vm5, %v15812_v62  ;;  %v2937_v62 = vsel %vm966_vm1, %v795_v6, 0 }
 0x27f   : > { %13265 = vmatmul.mubr.msk.bf16.vlgmr.msra.gmra.mrb[32].mxu1 %vm1196_vm5, %v15865_v46 }
 0x280   : > { %13297 = vmatpush3.bf16.msra.mxu1 %v2741_v33  ;;  %13268 = vmatprep.mubr.msk.bf16.mxu1 %vm1196_vm5, %v15847_v39  ;;  %v20020_v39 = vld [vmem:[#allocation2_spill] sm:$0xff] }
 0x281   : > { %15348 = vmatprep.subr.msk.bf16.mxu1 %vm966_vm1, %v795_v6  ;;  %13366 = vmatprep.mubr.msk.bf16.mxu0 %vm3744_vm8, %v20020_v39 }
 0x287   : > { %13269 = vmatmul.mubr.msk.bf16.gmra.mrb[36].mxu1 %vm1196_vm5, %v15911_v29 }
 0x288   : > { %13272 = vmatprep.mubr.msk.bf16.mxu1 %vm1196_vm5, %v15920_v47 }
 0x28f   : > { %13273 = vmatmul.mubr.msk.bf16.gmra.mrb[40].mxu1 %vm1196_vm5, %v15959_v52 }
 0x290   : > { %13276 = vmatprep.mubr.msk.bf16.mxu1 %vm1196_vm5, %v15968_v59 }
 0x297   : > { %13277 = vmatmul.mubr.msk.bf16.gmra.mrb[44].mxu1 %vm1196_vm5, %v16007_v11 }
 0x298   : > { %13280 = vmatprep.mubr.msk.bf16.mxu1 %vm1196_vm5, %v16016_v15 }
 0x29f   : > { %13281 = vmatmul.mubr.msk.bf16.gmra.mrb[48].mxu1 %vm1196_vm5, %v16055_v36 }
 0x2a0   : > { %13284 = vmatprep.mubr.msk.bf16.mxu1 %vm1196_vm5, %v16063_v63 }
 0x2a7   : > { %13285 = vmatmul.mubr.msk.bf16.gmra.mrb[52].mxu1 %vm1196_vm5, %v16105_v56 }
 0x2a8   : > { %13288 = vmatprep.mubr.msk.bf16.mxu1 %vm1196_vm5, %v16101_v55 }
 0x2af   : > { %13289 = vmatmul.mubr.msk.bf16.gmra.mrb[56].mxu1 %vm1196_vm5, %v16131_v0 }
 0x2b0   : > { %13292 = vmatprep.mubr.msk.bf16.mxu1 %vm1196_vm5, %v16342_v3 }
 0x2b7   : > { %13293 = vmatmul.mubr.msk.bf16.gmra.mrb[60].mxu1 %vm1196_vm5, %v15751_v23 }
 0x2b8   : > { %13298 = vmatprep.mubr.msk.bf16.mxu1 %vm1196_vm5, %v15873_v49 }
 0x2bf   : > { %13299 = vmatmul.mubr.msk.bf16.vlgmr.msra.gmra.mrb[32].mxu1 %vm1196_vm5, %v15907_v26 }
 0x2c0   : > { %13331 = vmatpush3.bf16.msra.mxu1 %v2937_v62  ;;  %13302 = vmatprep.mubr.msk.bf16.mxu1 %vm1196_vm5, %v15925_v53 }
 0x2c7   : > { %13303 = vmatmul.mubr.msk.bf16.gmra.mrb[36].mxu1 %vm1196_vm5, %v15954_v48 }
 0x2c8   : > { %13306 = vmatprep.mubr.msk.bf16.mxu1 %vm1196_vm5, %v15974_v9 }
 0x2cf   : > { %13307 = vmatmul.mubr.msk.bf16.gmra.mrb[40].mxu1 %vm1196_vm5, %v16002_v10 }
 0x2d0   : > { %13310 = vmatprep.mubr.msk.bf16.mxu1 %vm1196_vm5, %v16022_v12 }
 0x2d7   : > { %13311 = vmatmul.mubr.msk.bf16.gmra.mrb[44].mxu1 %vm1196_vm5, %v16050_v35 }
 0x2d8   : > { %13314 = vmatprep.mubr.msk.bf16.mxu1 %vm1196_vm5, %v16073_v61  ;;  %v16530_v61 = vld [vmem:[%s19883_s4] ss:$0 sm:$0xff] }
 0x2df   : > { %13315 = vmatmul.mubr.msk.bf16.gmra.mrb[48].mxu1 %vm1196_vm5, %v16096_v37 }
 0x2e0   : > { %13318 = vmatprep.mubr.msk.bf16.mxu1 %vm1196_vm5, %v16117_v51 }
 0x2e7   : > { %13319 = vmatmul.mubr.msk.bf16.gmra.mrb[52].mxu1 %vm1196_vm5, %v16127_v16 }
 0x2e8   : > { %13322 = vmatprep.mubr.msk.bf16.mxu1 %vm1196_vm5, %v16137_v18 }
 0x2ef   : > { %13323 = vmatmul.mubr.msk.bf16.gmra.mrb[56].mxu1 %vm1196_vm5, %v16144_v13 }
 0x2f0   : > { %13326 = vmatprep.mubr.msk.bf16.mxu1 %vm1196_vm5, %v2140_v32 }
 0x2f7   : > { %13327 = vmatmul.mubr.msk.bf16.gmra.mrb[60].mxu1 %vm1196_vm5, %v20020_v39 }
 0x2f8   : > { %13332 = vmatprep.mubr.msk.bf16.mxu1 %vm1196_vm5, %v16207_v20 }
 0x2ff   : > { %13333 = vmatmul.mubr.msk.bf16.vlgmr.msra.gmra.mrb[32].mxu1 %vm1196_vm5, %v16217_v19 }
 0x300   : > { %13336 = vmatprep.mubr.msk.bf16.mxu1 %vm1196_vm5, %v16222_v38 }
 0x307   : > { %13337 = vmatmul.mubr.msk.bf16.gmra.mrb[36].mxu1 %vm1196_vm5, %v16231_v8 }
 0x308   : > { %13340 = vmatprep.mubr.msk.bf16.mxu1 %vm1196_vm5, %v16236_v34 }
 0x30f   : > { %13341 = vmatmul.mubr.msk.bf16.gmra.mrb[40].mxu1 %vm1196_vm5, %v16245_v25 }
 0x310   : > { %13344 = vmatprep.mubr.msk.bf16.mxu1 %vm1196_vm5, %v16250_v58 }
 0x317   : > { %13345 = vmatmul.mubr.msk.bf16.gmra.mrb[44].mxu1 %vm1196_vm5, %v16259_v40 }
 0x318   : > { %13348 = vmatprep.mubr.msk.bf16.mxu1 %vm1196_vm5, %v16264_v45  ;;  %v3379_v45 = vld [vmem:[%s19884_s5 + $0x4] sm:$0xf] }
 0x319   : > { %15349 = vmatprep.subr.msk.bf16.mxu0 %vm3792_vm7, %v3379_v45 }
 0x31f   : > { %13349 = vmatmul.mubr.msk.bf16.gmra.mrb[48].mxu1 %vm1196_vm5, %v16273_v42 }
 0x320   : > { %13352 = vmatprep.mubr.msk.bf16.mxu1 %vm1196_vm5, %v16278_v27 }
 0x327   : > { %13353 = vmatmul.mubr.msk.bf16.gmra.mrb[52].mxu1 %vm1196_vm5, %v16287_v21 }
 0x328   : > { %13356 = vmatprep.mubr.msk.bf16.mxu1 %vm1196_vm5, %v16292_v60  ;;  %v3794_v60 = vsel %vm3792_vm7, %v3379_v45, 0 }
 0x329   : > { %13365 = vmatpush3.bf16.msra.mxu0 %v3794_v60 }
 0x32f   : > { %13357 = vmatmul.mubr.msk.bf16.gmra.mrb[56].mxu1 %vm1196_vm5, %v16299_v4  ;;  %v16562_v4 = vld [vmem:[%s19884_s5] sm:$0xf] }
 0x330   : > { %13360 = vmatprep.mubr.msk.bf16.mxu1 %vm1196_vm5, %v2344_v2  ;;  %15350 = vmatprep.subr.msk.bf16.mxu0 %vm3792_vm7, %v16562_v4 }
 0x337   : > { %13361 = vmatmul.mubr.msk.bf16.gmra.mrb[60].mxu1 %vm1196_vm5, %v16187_v7 }
 0x338   : > { %13672 = vmatprep.mubr.msk.bf16.mxu1 %vm1196_vm5, %v20020_v39 }
 0x3d2   : > { %v13334_v46 = vpop.f32.mrb[32].mxu1 }
 0x3d3   : > { %v2973_v49 = vpop.f32.mrb[33].mxu1  ;;  %v3140_v29 = vadd.f32 %v13334_v46, %v16530_v61 }
 0x3d4   : > { %v13335_v26 = vpop.f32.mrb[34].mxu1  ;;  %v3138_v48 = vadd.f32 %v16530_v61, %v2973_v49 }
 0x3d5   : > { %v3141_v47 = vadd.f32 %v13335_v26, %v16530_v61  ;;  %v2976_v53 = vpop.f32.mrb[35].mxu1 }
 0x3d6   : > { %v3139_v52 = vadd.f32 %v16530_v61, %v2976_v53 }
 0x3d7   : > { %v15396_v59 = vpack.i.bf16 %v3141_v47, %v3140_v29 }
 0x3d8   : > { %v15391_v9 = vpack.i.bf16 %v3139_v52, %v3138_v48 }
 0x3da   : > { %15392 = vrot.lane.b32.xlu0 %v15391_v9, %s15610_s28  ;;  %v13338_v10 = vpop.f32.mrb[36].mxu1 }
 0x3db   : > { %v2989_v11 = vpop.f32.mrb[37].mxu1  ;;  %v3144_v12 = vadd.f32 %v13338_v10, %v16530_v61 }
 0x3dc   : > { %v13339_v15 = vpop.f32.mrb[38].mxu1  ;;  %v3142_v63 = vadd.f32 %v16530_v61, %v2989_v11 }
 0x3dd   : > { %v3145_v35 = vadd.f32 %v13339_v15, %v16530_v61  ;;  %v2992_v36 = vpop.f32.mrb[39].mxu1 }
 0x3de   : > { %v3143_v51 = vadd.f32 %v16530_v61, %v2992_v36  ;;  %15397 = vrot.lane.b32.xlu0 %v15396_v59, %s15610_s28 }
 0x3df   : > { %v15406_v37 = vpack.i.bf16 %v3145_v35, %v3144_v12 }
 0x3e0   : > { %v15401_v55 = vpack.i.bf16 %v3143_v51, %v3142_v63 }
 0x3e2   : > { %15402 = vrot.lane.b32.xlu1 %v15401_v55, %s15610_s28  ;;  %v13342_v56 = vpop.f32.mrb[40].mxu1 }
 0x3e3   : > { %v3005_v16 = vpop.f32.mrb[41].mxu1  ;;  %v3148_v18 = vadd.f32 %v13342_v56, %v16530_v61 }
 0x3e4   : > { %v13343_v0 = vpop.f32.mrb[42].mxu1  ;;  %v3146_v19 = vadd.f32 %v16530_v61, %v3005_v16 }
 0x3e5   : > { %v3149_v13 = vadd.f32 %v13343_v0, %v16530_v61  ;;  %v3008_v20 = vpop.f32.mrb[43].mxu1 }
 0x3e6   : > { %v3147_v38 = vadd.f32 %v16530_v61, %v3008_v20  ;;  %15407 = vrot.lane.b32.xlu1 %v15406_v37, %s15610_s28 }
 0x3e7   : > { %v15416_v8 = vpack.i.bf16 %v3149_v13, %v3148_v18 }
 0x3e8   : > { %v15411_v34 = vpack.i.bf16 %v3147_v38, %v3146_v19 }
 0x3ea   : > { %15417 = vrot.lane.b32.xlu1 %v15416_v8, %s15610_s28  ;;  %15412 = vrot.lane.b32.xlu0 %v15411_v34, %s15610_s28  ;;  %v13346_v25 = vpop.f32.mrb[44].mxu1  ;;  %v20021_v34 = vld [vmem:[#allocation6_spill] sm:$0xff] }
 0x3eb   : > { %v3021_v58 = vpop.f32.mrb[45].mxu1  ;;  %v3152_v42 = vadd.f32 %v13346_v25, %v16530_v61 }
 0x3ec   : > { %v13347_v40 = vpop.f32.mrb[46].mxu1  ;;  %v3150_v3 = vadd.f32 %v16530_v61, %v3021_v58  ;;  %v20022_v58 = vld [vmem:[#allocation5_spill] sm:$0xff] }
 0x3ed   : > { %v3153_v27 = vadd.f32 %v13347_v40, %v16530_v61  ;;  %v3024_v21 = vpop.f32.mrb[47].mxu1 }
 0x3ee   : > { %v3151_v14 = vadd.f32 %v16530_v61, %v3024_v21 }
 0x3ef   : > { %v15426_v44 = vpack.i.bf16 %v3153_v27, %v3152_v42 }
 0x3f0   : > { %v15421_v17 = vpack.i.bf16 %v3151_v14, %v3150_v3  ;;  %v20023_v3 = vld [vmem:[#allocation4_spill] sm:$0xff] }
 0x3f1   : > { %15427 = vrot.lane.b32.xlu1 %v15426_v44, %s15610_s28  ;;  %v20024_v44 = vld [vmem:[#allocation3_spill] sm:$0xff] }
 0x3f2   : > { %15422 = vrot.lane.b32.xlu0 %v15421_v17, %s15610_s28  ;;  %v13350_v43 = vpop.f32.mrb[48].mxu1 }
 0x3f3   : > { %v3037_v50 = vpop.f32.mrb[49].mxu1  ;;  %v3156_v24 = vadd.f32 %v13350_v43, %v16530_v61 }
 0x3f4   : > { %v13351_v30 = vpop.f32.mrb[50].mxu1  ;;  %v3154_v31 = vadd.f32 %v16530_v61, %v3037_v50 }
 0x3f5   : > { %v3157_v5 = vadd.f32 %v13351_v30, %v16530_v61  ;;  %v3040_v32 = vpop.f32.mrb[51].mxu1 }
 0x3f6   : > { %v3155_v1 = vadd.f32 %v16530_v61, %v3040_v32 }
 0x3f7   : > { %v15436_v54 = vpack.i.bf16 %v3157_v5, %v3156_v24 }
 0x3f8   : > { %v15431_v41 = vpack.i.bf16 %v3155_v1, %v3154_v31 }
 0x3f9   : > { %15437 = vrot.lane.b32.xlu1 %v15436_v54, %s15610_s28 }
 0x3fa   : > { %15432 = vrot.lane.b32.xlu0 %v15431_v41, %s15610_s28  ;;  %v13354_v2 = vpop.f32.mrb[52].mxu1  ;;  %v20025_v41 = vld [vmem:[#allocation10_spill] sm:$0xff] }
 0x3fb   : > { %v3053_v33 = vpop.f32.mrb[53].mxu1  ;;  %v3160_v62 = vadd.f32 %v13354_v2, %v16530_v61 }
 0x3fc   : > { %v13355_v6 = vpop.f32.mrb[54].mxu1  ;;  %v3158_v26 = vadd.f32 %v16530_v61, %v3053_v33  ;;  %v20026_v33 = vld [vmem:[#allocation8_spill] sm:$0xff] }
 0x3fd   : > { %v3161_v46 = vadd.f32 %v13355_v6, %v16530_v61  ;;  %v3056_v49 = vpop.f32.mrb[55].mxu1 }
 0x3fe   : > { %v3159_v29 = vadd.f32 %v16530_v61, %v3056_v49 }
 0x3ff   : > { %v15446_v47 = vpack.i.bf16 %v3161_v46, %v3160_v62 }
 0x400   : > { %v15441_v53 = vpack.i.bf16 %v3159_v29, %v3158_v26 }
 0x401   : > { %15447 = vrot.lane.b32.xlu1 %v15446_v47, %s15610_s28 }
 0x402   : > { %15442 = vrot.lane.b32.xlu0 %v15441_v53, %s15610_s28  ;;  %v13358_v48 = vpop.f32.mrb[56].mxu1 }
 0x403   : > { %v3069_v52 = vpop.f32.mrb[57].mxu1  ;;  %v3164_v9 = vadd.f32 %v13358_v48, %v16530_v61 }
 0x404   : > { %v13359_v59 = vpop.f32.mrb[58].mxu1  ;;  %v3162_v15 = vadd.f32 %v16530_v61, %v3069_v52 }
 0x405   : > { %v3165_v10 = vadd.f32 %v13359_v59, %v16530_v61  ;;  %v3072_v11 = vpop.f32.mrb[59].mxu1 }
 0x406   : > { %v3163_v12 = vadd.f32 %v16530_v61, %v3072_v11  ;;  %v20027_v11 = vld [vmem:[#allocation9_spill] sm:$0xff] }
 0x407   : > { %v15456_v35 = vpack.i.bf16 %v3165_v10, %v3164_v9 }
 0x408   : > { %v15451_v36 = vpack.i.bf16 %v3163_v12, %v3162_v15  ;;  %v20028_v12 = vld [vmem:[#allocation7_spill] sm:$0xff] }
 0x409   : > { %15457 = vrot.lane.b32.xlu1 %v15456_v35, %s15610_s28 }
 0x40a   : > { %15452 = vrot.lane.b32.xlu0 %v15451_v36, %s15610_s28  ;;  %v13362_v63 = vpop.f32.mrb[60].mxu1 }
 0x40b   : > { %v3085_v51 = vpop.f32.mrb[61].mxu1  ;;  %v3168_v55 = vadd.f32 %v13362_v63, %v16530_v61 }
 0x40c   : > { %v13363_v37 = vpop.f32.mrb[62].mxu1  ;;  %v3166_v0 = vadd.f32 %v16530_v61, %v3085_v51 }
 0x40d   : > { %v3169_v56 = vadd.f32 %v13363_v37, %v16530_v61  ;;  %v3088_v16 = vpop.f32.mrb[63].mxu1 }
 0x40e   : > { %v3167_v18 = vadd.f32 %v16530_v61, %v3088_v16 }
 0x40f   : > { %v15466_v13 = vpack.i.bf16 %v3169_v56, %v3168_v55 }
 0x410   : > { %v15461_v20 = vpack.i.bf16 %v3167_v18, %v3166_v0 }
 0x411   : > { %15467 = vrot.lane.b32.xlu1 %v15466_v13, %s15610_s28 }
 0x412   : > { %15462 = vrot.lane.b32.xlu0 %v15461_v20, %s15610_s28 }
 0x44c   : > { %v15393_v19 = vpop.permute.xlu0 %15392 }
 0x44d   : > { %v15395_v38 = vunpack.i.h.bf16 %v15393_v19  ;;  %v15394_v8 = vunpack.i.l.bf16 %v15393_v19 }
 0x44f   : > { %v3299_v25 = vsel %vm1196_vm5, %v20021_v34, %v15395_v38  ;;  %v3298_v40 = vsel %vm1196_vm5, %v20022_v58, %v15394_v8  ;;  %v20029_v58 = vld [vmem:[#allocation12_spill] sm:$0xff] }
 0x450   : > { %v3331_v45 = vmax.f32 %v3299_v25, 0.0  ;;  %v3330_v42 = vmax.f32 %v3298_v40, 0.0  ;;  %v15398_v27 = vpop.permute.xlu0 %15397 }
 0x451   : > { %v15400_v21 = vunpack.i.h.bf16 %v15398_v27  ;;  %v15399_v61 = vunpack.i.l.bf16 %v15398_v27 }
 0x452   : > { %v3362_v60 = vpack.c.bf16 %v3331_v45, %v3330_v42  ;;  %v20030_v45 = vld [vmem:[#allocation11_spill] sm:$0xff] }
 0x453   : > { %v3301_v14 = vsel %vm1196_vm5, %v20023_v3, %v15400_v21  ;;  %v3300_v17 = vsel %vm1196_vm5, %v20024_v44, %v15399_v61 }
 0x454   : > { %v3389_v43 = vshrl.u32 %v3362_v60, 16  ;;  %v3333_v50 = vmax.f32 %v3301_v14, 0.0  ;;  %v3332_v30 = vmax.f32 %v3300_v17, 0.0  ;;  %v15403_v24 = vpop.permute.xlu1 %15402  ;;  %v3392_v1 = vshll.u32 %v3362_v60, 16  ;;  %v20031_v14 = vld [vmem:[#allocation14_spill] sm:$0xff]  ;;  %v20032_v17 = vld [vmem:[#allocation13_spill] sm:$0xff] }
 0x455   : > { %v15405_v5 = vunpack.i.h.bf16 %v15403_v24  ;;  %v15404_v32 = vunpack.i.l.bf16 %v15403_v24 }
 0x456   : > { %v3391_v31 = vrot.slane %v3389_v43, 7  ;;  %v3363_v54 = vpack.c.bf16 %v3333_v50, %v3332_v30 }
 0x457   : > { %v3303_v2 = vsel %vm1196_vm5, %v20025_v41, %v15405_v5  ;;  %v3302_v6 = vsel %vm1196_vm5, %v20026_v33, %v15404_v32 }
 0x458   : > { %v3394_v62 = vor.u32 %v3392_v1, %v3391_v31  ;;  %v3396_v46 = vshrl.u32 %v3363_v54, 16  ;;  %v3335_v49 = vmax.f32 %v3303_v2, 0.0  ;;  %v15408_v26 = vpop.permute.xlu1 %15407  ;;  %v3334_v29 = vmax.f32 %v3302_v6, 0.0 }
 0x459   : > { %v15410_v47 = vunpack.i.h.bf16 %v15408_v26  ;;  %v15409_v53 = vunpack.i.l.bf16 %v15408_v26  ;;  %v16608_v48 = vsel %vm15745_vm3, %v3391_v31, 0  ;;  %v3399_v9 = vshll.u32 %v3363_v54, 16 }
 0x45a   : > { %v16612_v52 = vsel %vm15745_vm3, 0, %v3394_v62  ;;  %v3398_v59 = vrot.slane %v3396_v46, 7  ;;  %v3364_v10 = vpack.c.bf16 %v3335_v49, %v3334_v29  ;;  %v3572_v36 = vshll.u32 %v16608_v48, 16 }
 0x45b   : > { %v3305_v15 = vsel %vm1196_vm5, %v20027_v11, %v15410_v47  ;;  %v3304_v35 = vsel %vm1196_vm5, %v20028_v12, %v15409_v53  ;;  %v3565_v56 = vshrl.u32 %v16612_v52, 16  ;;  %v3567_v16 = vshll.u32 %v16612_v52, 16  ;;  %v16647_v53 = vld [vmem:[%s19884_s5 + $0x8] sm:$0xf] }
 0x45c   : > { %v3337_v63 = vmax.f32 %v3305_v15, 0.0  ;;  %v3336_v51 = vmax.f32 %v3304_v35, 0.0  ;;  %v15418_v37 = vpop.permute.xlu1 %15417  ;;  %v15413_v55 = vpop.permute.xlu0 %15412  ;;  %v3401_v0 = vor.u32 %v3399_v9, %v3398_v59  ;;  %v3403_v18 = vshrl.u32 %v3364_v10, 16  ;;  %v20033_v15 = vld [vmem:[#allocation16_spill] sm:$0xff]  ;;  %v20034_v35 = vld [vmem:[#allocation15_spill] sm:$0xff] }
 0x45d   : > { %v15420_v13 = vunpack.i.h.bf16 %v15418_v37  ;;  %v15419_v20 = vunpack.i.l.bf16 %v15418_v37  ;;  %v3406_v19 = vshll.u32 %v3364_v10, 16  ;;  %v15415_v8 = vunpack.i.h.bf16 %v15413_v55 }
 0x45e   : > { %v3365_v38 = vpack.c.bf16 %v3337_v63, %v3336_v51  ;;  %v15414_v34 = vunpack.i.l.bf16 %v15413_v55  ;;  %v3405_v25 = vrot.slane %v3403_v18, 7  ;;  %v3569_v27 = vrot.slane %v3567_v16, 1  ;;  %v20035_v63 = vld [vmem:[#allocation18_spill] sm:$0xff]  ;;  %v20036_v18 = vld [vmem:[#allocation17_spill] sm:$0xff] }
 0x45f   : > { %v3309_v40 = vsel %vm1196_vm5, %v20029_v58, %v15420_v13  ;;  %v3308_v42 = vsel %vm1196_vm5, %v20030_v45, %v15419_v20  ;;  %v3307_v44 = vsel %vm1196_vm5, %v20031_v14, %v15415_v8  ;;  %v16633_v31 = vsel %vm15745_vm3, 0, %v3401_v0 }
 0x460   : > { %v3410_v21 = vshrl.u32 %v3365_v38, 16  ;;  %v3341_v61 = vmax.f32 %v3309_v40, 0.0  ;;  %v3340_v60 = vmax.f32 %v3308_v42, 0.0  ;;  %v3408_v3 = vor.u32 %v3406_v19, %v3405_v25 }
 0x461   : > { %v3306_v43 = vsel %vm1196_vm5, %v20032_v17, %v15414_v34  ;;  %v3570_v50 = vor.u32 %v3569_v27, %v3565_v56  ;;  %v3339_v5 = vmax.f32 %v3307_v44, 0.0  ;;  %v3574_v1 = vrot.slane %v3572_v36, 1 }
 0x462   : > { %v16629_v30 = vrot.slane %v3410_v21, 7  ;;  %v3367_v24 = vpack.c.bf16 %v3341_v61, %v3340_v60  ;;  %v3338_v32 = vmax.f32 %v3306_v43, 0.0  ;;  %v3990_v54 = vsel %vm3792_vm7, %v16562_v4, 0 }
 0x463   : > { %v15428_v41 = vpop.permute.xlu1 %15427  ;;  %v16639_v2 = vsel %vm15745_vm3, 0, %v3408_v3  ;;  %v3413_v33 = vshll.u32 %v3365_v38, 16  ;;  %v16642_v49 = vsel %vm1003_vm4, %v3570_v50, %v3574_v1  ;;  %v16656_v11 = vsel %vm15745_vm3, %v3398_v59, 0 }
 0x464   : > { %v3424_v6 = vshrl.u32 %v3367_v24, 16  ;;  %v3366_v62 = vpack.c.bf16 %v3339_v5, %v3338_v32  ;;  %v15423_v46 = vpop.permute.xlu0 %15422  ;;  %v15430_v26 = vunpack.i.h.bf16 %v15428_v41  ;;  %v15429_v29 = vunpack.i.l.bf16 %v15428_v41  ;;  %13367 = vmatmul.mubr.msk.bf16.vlgmr.msra.gmra.mrb[0].mxu0 %vm3744_vm8, %v16642_v49 }
 0x465   : > { %v15425_v47 = vunpack.i.h.bf16 %v15423_v46  ;;  %v3415_v4 = vor.u32 %v3413_v33, %v16629_v30  ;;  %13399 = vmatpush3.bf16.msra.mxu0 %v3990_v54  ;;  %v15424_v37 = vunpack.i.l.bf16 %v15423_v46  ;;  %v3427_v55 = vshll.u32 %v3367_v24, 16 }
 0x466   : > { %v16650_v9 = vrot.slane %v3424_v6, 7  ;;  %v3417_v10 = vshrl.u32 %v3366_v62, 16  ;;  %v3313_v12 = vsel %vm1196_vm5, %v20033_v15, %v15430_v26  ;;  %v3312_v36 = vsel %vm1196_vm5, %v20034_v35, %v15429_v29  ;;  %15351 = vmatprep.subr.msk.bf16.mxu0 %vm3792_vm7, %v16647_v53  ;;  %v20037_v6 = vld [vmem:[#allocation20_spill] sm:$0xff] }
 0x467   : > { %v3311_v51 = vsel %vm1196_vm5, %v20035_v63, %v15425_v47  ;;  %v3345_v16 = vmax.f32 %v3313_v12, 0.0  ;;  %v3344_v0 = vmax.f32 %v3312_v36, 0.0  ;;  %v3310_v13 = vsel %vm1196_vm5, %v20036_v18, %v15424_v37  ;;  %v20038_v47 = vld [vmem:[#allocation19_spill] sm:$0xff]  ;;  %v20040_v18 = vld [vmem:[#allocation21_spill] sm:$0xff] }
 0x468   : > { %v3419_v56 = vrot.slane %v3417_v10, 7  ;;  %v3343_v59 = vmax.f32 %v3311_v51, 0.0  ;;  %v3579_v20 = vshll.u32 %v16633_v31, 16  ;;  %v3584_v19 = vshll.u32 %v16656_v11, 16 }
 0x469   : > { %v3420_v38 = vshll.u32 %v3366_v62, 16  ;;  %v3369_v8 = vpack.c.bf16 %v3345_v16, %v3344_v0  ;;  %v3342_v34 = vmax.f32 %v3310_v13, 0.0  ;;  %v3577_v58 = vshrl.u32 %v16633_v31, 16  ;;  %v20039_v0 = vld [vmem:[#allocation22_spill] sm:$0xff] }
 0x46a   : > { %v16673_v40 = vsel %vm15745_vm3, 0, %v3415_v4  ;;  %v3429_v45 = vor.u32 %v3427_v55, %v16650_v9  ;;  %v3581_v42 = vrot.slane %v3579_v20, 1  ;;  %v16678_v27 = vsel %vm15745_vm3, %v3405_v25, 0 }
 0x46b   : > { %v15438_v21 = vpop.permute.xlu1 %15437  ;;  %v3422_v61 = vor.u32 %v3420_v38, %v3419_v56  ;;  %v3438_v60 = vshrl.u32 %v3369_v8, 16  ;;  %v3368_v3 = vpack.c.bf16 %v3343_v59, %v3342_v34  ;;  %v3586_v14 = vrot.slane %v3584_v19, 1 }
 0x46c   : > { %v3582_v44 = vor.u32 %v3581_v42, %v3577_v58  ;;  %v3591_v17 = vshll.u32 %v16639_v2, 16  ;;  %v3596_v43 = vshll.u32 %v16678_v27, 16  ;;  %v15440_v50 = vunpack.i.h.bf16 %v15438_v21  ;;  %v15433_v54 = vpop.permute.xlu0 %15432 }
 0x46d   : > { %v16682_v24 = vrot.slane %v3438_v60, 7  ;;  %v3431_v5 = vshrl.u32 %v3368_v3, 16  ;;  %v3589_v32 = vshrl.u32 %v16639_v2, 16  ;;  %v15439_v1 = vunpack.i.l.bf16 %v15438_v21 }
 0x46e   : > { %v3441_v25 = vshll.u32 %v3369_v8, 16  ;;  %v16686_v41 = vsel %vm1003_vm4, %v3582_v44, %v3586_v14  ;;  %v3593_v33 = vrot.slane %v3591_v17, 1  ;;  %v3317_v62 = vsel %vm1196_vm5, %v20037_v6, %v15440_v50 }
 0x46f   : > { %v16690_v46 = vrot.slane %v3431_v5, 7  ;;  %13370 = vmatprep.mubr.msk.bf16.mxu0 %vm3744_vm8, %v16686_v41  ;;  %v3598_v26 = vrot.slane %v3596_v43, 1  ;;  %v3349_v29 = vmax.f32 %v3317_v62, 0.0  ;;  %v3316_v4 = vsel %vm1196_vm5, %v20038_v47, %v15439_v1 }
 0x470   : > { %v3594_v10 = vor.u32 %v3593_v33, %v3589_v32  ;;  %v3348_v15 = vmax.f32 %v3316_v4, 0.0  ;;  %v15435_v12 = vunpack.i.h.bf16 %v15433_v54  ;;  %v15434_v35 = vunpack.i.l.bf16 %v15433_v54 }
 0x471   : > { %v16698_v36 = vsel %vm15745_vm3, 0, %v3422_v61  ;;  %v3443_v63 = vor.u32 %v3441_v25, %v16682_v24  ;;  %v3434_v51 = vshll.u32 %v3368_v3, 16  ;;  %v16704_v37 = vsel %vm15745_vm3, %v16629_v30, 0 }
 0x472   : > { %v16707_v55 = vsel %vm1003_vm4, %v3594_v10, %v3598_v26  ;;  %v3371_v16 = vpack.c.bf16 %v3349_v29, %v3348_v15  ;;  %v3315_v59 = vsel %vm1196_vm5, %v20039_v0, %v15435_v12  ;;  %v3314_v13 = vsel %vm1196_vm5, %v20040_v18, %v15434_v35 }
 0x473   : > { %13371 = vmatmul.mubr.msk.bf16.gmra.mrb[4].mxu0 %vm3744_vm8, %v16707_v55  ;;  %v3347_v20 = vmax.f32 %v3315_v59, 0.0  ;;  %v3346_v19 = vmax.f32 %v3314_v13, 0.0  ;;  %v3603_v38 = vshll.u32 %v16673_v40, 16  ;;  %v16718_v30 = vsel %vm15745_vm3, 0, %v3429_v45  ;;  %v15448_v5 = vpop.permute.xlu1 %15447  ;;  %v20042_v59 = vld [vmem:[#allocation23_spill] sm:$0xff] }
 0x474   : > { %v3436_v8 = vor.u32 %v3434_v51, %v16690_v46  ;;  %v3608_v34 = vshll.u32 %v16704_v37, 16  ;;  %v16724_v58 = vsel %vm15745_vm3, %v3419_v56, 0  ;;  %v3601_v21 = vshrl.u32 %v16673_v40, 16  ;;  %v15443_v33 = vpop.permute.xlu0 %15442 }
 0x475   : > { %v3370_v42 = vpack.c.bf16 %v3347_v20, %v3346_v19  ;;  %v3605_v61 = vrot.slane %v3603_v38, 1  ;;  %v3615_v60 = vshll.u32 %v16698_v36, 16  ;;  %v16730_v3 = vsel %vm15745_vm3, 0, %v3443_v63 }
 0x476   : > { %v3452_v45 = vshrl.u32 %v3371_v16, 16  ;;  %v3620_v14 = vshll.u32 %v16724_v58, 16  ;;  %v16736_v44 = vsel %vm15745_vm3, %v16650_v9, 0  ;;  %v3610_v17 = vrot.slane %v3608_v34, 1 }
 0x477   : > { %v3606_v56 = vor.u32 %v3605_v61, %v3601_v21  ;;  %v3613_v43 = vshrl.u32 %v16698_v36, 16  ;;  %v3617_v50 = vrot.slane %v3615_v60, 1  ;;  %v16741_v32 = vsel %vm15745_vm3, 0, %v3436_v8  ;;  %v20043_v8 = vld [vmem:[#allocation26_spill] sm:$0xff]  ;;  %v20044_v60 = vld [vmem:[#allocation25_spill] sm:$0xff] }
 0x478   : > { %v3455_v1 = vshll.u32 %v3371_v16, 16  ;;  %v3445_v54 = vshrl.u32 %v3370_v42, 16  ;;  %v3627_v25 = vshll.u32 %v16718_v30, 16  ;;  %v3622_v62 = vrot.slane %v3620_v14, 1  ;;  %v20041_v16 = vld [vmem:[#allocation24_spill] sm:$0xff] }
 0x479   : > { %v16745_v6 = vsel %vm1003_vm4, %v3606_v56, %v3610_v17  ;;  %v3618_v9 = vor.u32 %v3617_v50, %v3613_v43  ;;  %v3632_v26 = vshll.u32 %v16736_v44, 16  ;;  %v3625_v29 = vshrl.u32 %v16718_v30, 16 }
 0x47a   : > { %13374 = vmatprep.mubr.msk.bf16.mxu0 %vm3744_vm8, %v16745_v6  ;;  %v3629_v47 = vrot.slane %v3627_v25, 1  ;;  %v15450_v4 = vunpack.i.h.bf16 %v15448_v5  ;;  %v15449_v10 = vunpack.i.l.bf16 %v15448_v5  ;;  %v16751_v15 = vrot.slane %v3452_v45, 7 }
 0x47b   : > { %v16754_v12 = vsel %vm1003_vm4, %v3618_v9, %v3622_v62  ;;  %v3634_v35 = vrot.slane %v3632_v26, 1  ;;  %v15445_v63 = vunpack.i.h.bf16 %v15443_v33  ;;  %v15444_v13 = vunpack.i.l.bf16 %v15443_v33  ;;  %v15458_v5 = vpop.permute.xlu1 %15457 }
 0x47c   : > { %13375 = vmatmul.mubr.msk.bf16.gmra.mrb[8].mxu0 %vm3744_vm8, %v16754_v12  ;;  %v3630_v51 = vor.u32 %v3629_v47, %v3625_v29  ;;  %v3321_v0 = vsel %vm1196_vm5, %v20041_v16, %v15450_v4  ;;  %v3320_v18 = vsel %vm1196_vm5, %v20042_v59, %v15449_v10  ;;  %v3447_v20 = vrot.slane %v3445_v54, 7  ;;  %v20045_v59 = vld [vmem:[#allocation28_spill] sm:$0xff] }
 0x47d   : > { %v3353_v19 = vmax.f32 %v3321_v0, 0.0  ;;  %v3352_v38 = vmax.f32 %v3320_v18, 0.0  ;;  %v3319_v34 = vsel %vm1196_vm5, %v20043_v8, %v15445_v63  ;;  %v3318_v45 = vsel %vm1196_vm5, %v20044_v60, %v15444_v13  ;;  %v20046_v60 = vld [vmem:[#allocation27_spill] sm:$0xff] }
 0x47e   : > { %v16765_v21 = vsel %vm1003_vm4, %v3630_v51, %v3634_v35  ;;  %v3351_v61 = vmax.f32 %v3319_v34, 0.0  ;;  %v16772_v14 = vsel %vm15745_vm3, %v16690_v46, 0  ;;  %v3448_v56 = vshll.u32 %v3370_v42, 16 }
 0x47f   : > { %13378 = vmatprep.mubr.msk.bf16.mxu0 %vm3744_vm8, %v16765_v21  ;;  %v16776_v17 = vpack.c.bf16 %v3353_v19, %v3352_v38  ;;  %v3350_v43 = vmax.f32 %v3318_v45, 0.0  ;;  %v3639_v50 = vshll.u32 %v16741_v32, 16  ;;  %v3457_v54 = vor.u32 %v3455_v1, %v16751_v15 }
 0x480   : > { %v3644_v25 = vshll.u32 %v16772_v14, 16  ;;  %v16784_v33 = vsel %vm15745_vm3, %v16682_v24, 0  ;;  %v3651_v46 = vshll.u32 %v16730_v3, 16  ;;  %v3450_v42 = vor.u32 %v3448_v56, %v3447_v20  ;;  %v15453_v24 = vpop.permute.xlu0 %15452 }
 0x481   : > { %v3372_v9 = vpack.c.bf16 %v3351_v61, %v3350_v43  ;;  %v3637_v62 = vshrl.u32 %v16741_v32, 16  ;;  %v3641_v26 = vrot.slane %v3639_v50, 1  ;;  %v3649_v29 = vshrl.u32 %v16730_v3, 16 }
 0x482   : > { %v3653_v47 = vrot.slane %v3651_v46, 1  ;;  %v3656_v4 = vshll.u32 %v16784_v33, 16  ;;  %v15460_v1 = vunpack.i.h.bf16 %v15458_v5  ;;  %v3466_v10 = vshrl.u32 %v16776_v17, 16 }
 0x483   : > { %v3459_v35 = vshrl.u32 %v3372_v9, 16  ;;  %v3642_v63 = vor.u32 %v3641_v26, %v3637_v62  ;;  %v3646_v51 = vrot.slane %v3644_v25, 1  ;;  %v15459_v13 = vunpack.i.l.bf16 %v15458_v5  ;;  %v20047_v62 = vld [vmem:[#allocation30_spill] sm:$0xff] }
 0x484   : > { %v3654_v16 = vor.u32 %v3653_v47, %v3649_v29  ;;  %v3658_v0 = vrot.slane %v3656_v4, 1  ;;  %v3325_v18 = vsel %vm1196_vm5, %v20045_v59, %v15460_v1  ;;  %v16795_v19 = vsel %vm15745_vm3, 0, %v3450_v42  ;;  %v20048_v29 = vld [vmem:[#allocation29_spill] sm:$0xff] }
 0x485   : > { %v3461_v38 = vrot.slane %v3459_v35, 7  ;;  %v16798_v8 = vsel %vm1003_vm4, %v3642_v63, %v3646_v51  ;;  %v3357_v34 = vmax.f32 %v3325_v18, 0.0  ;;  %v3324_v45 = vsel %vm1196_vm5, %v20046_v60, %v15459_v13 }
 0x486   : > { %13379 = vmatmul.mubr.msk.bf16.gmra.mrb[12].mxu0 %vm3744_vm8, %v16798_v8  ;;  %v16803_v61 = vsel %vm1003_vm4, %v3654_v16, %v3658_v0  ;;  %v15455_v56 = vunpack.i.h.bf16 %v15453_v24  ;;  %v15454_v43 = vunpack.i.l.bf16 %v15453_v24  ;;  %v16809_v50 = vsel %vm15745_vm3, 0, %v3457_v54 }
 0x487   : > { %v3462_v5 = vshll.u32 %v3372_v9, 16  ;;  %13382 = vmatprep.mubr.msk.bf16.mxu0 %vm3744_vm8, %v16803_v61  ;;  %v3356_v25 = vmax.f32 %v3324_v45, 0.0  ;;  %v16815_v46 = vsel %vm15745_vm3, %v3447_v20, 0  ;;  %v3468_v42 = vrot.slane %v3466_v10, 7 }
 0x488   : > { %v3323_v26 = vsel %vm1196_vm5, %v20047_v62, %v15455_v56  ;;  %v3322_v47 = vsel %vm1196_vm5, %v20048_v29, %v15454_v43  ;;  %v3663_v4 = vshll.u32 %v16795_v19, 16  ;;  %v3661_v63 = vshrl.u32 %v16795_v19, 16 }
 0x489   : > { %v3464_v54 = vor.u32 %v3462_v5, %v3461_v38  ;;  %v3375_v1 = vpack.c.bf16 %v3357_v34, %v3356_v25  ;;  %v3355_v9 = vmax.f32 %v3323_v26, 0.0  ;;  %v3354_v35 = vmax.f32 %v3322_v47, 0.0  ;;  %v15463_v25 = vpop.permute.xlu0 %15462 }
 0x48a   : > { %v3665_v51 = vrot.slane %v3663_v4, 1  ;;  %v3668_v24 = vshll.u32 %v16815_v46, 16  ;;  %v16827_v20 = vsel %vm15745_vm3, %v16751_v15, 0  ;;  %v3469_v10 = vshll.u32 %v16776_v17, 16 }
 0x48b   : > { %v3480_v16 = vshrl.u32 %v3375_v1, 16  ;;  %v3374_v0 = vpack.c.bf16 %v3355_v9, %v3354_v35  ;;  %v3675_v59 = vshll.u32 %v16809_v50, 16  ;;  %v3673_v34 = vshrl.u32 %v16809_v50, 16 }
 0x48c   : > { %v3666_v18 = vor.u32 %v3665_v51, %v3661_v63  ;;  %v3670_v13 = vrot.slane %v3668_v24, 1  ;;  %v3680_v60 = vshll.u32 %v16827_v20, 16  ;;  %v3483_v56 = vshll.u32 %v3375_v1, 16 }
 0x48d   : > { %v3482_v45 = vrot.slane %v3480_v16, 7  ;;  %v3473_v43 = vshrl.u32 %v3374_v0, 16  ;;  %v3677_v5 = vrot.slane %v3675_v59, 1  ;;  %v3471_v62 = vor.u32 %v3469_v10, %v3468_v42  ;;  %v20049_v10 = vld [vmem:[#allocation32_spill] sm:$0xff] }
 0x48e   : > { %v16835_v15 = vsel %vm15745_vm3, 0, %v3464_v54  ;;  %v3476_v17 = vshll.u32 %v3374_v0, 16  ;;  %v16838_v26 = vsel %vm1003_vm4, %v3666_v18, %v3670_v13  ;;  %v3682_v9 = vrot.slane %v3680_v60, 1  ;;  %v20050_v0 = vld [vmem:[#allocation31_spill] sm:$0xff] }
 0x48f   : > { %v3485_v29 = vor.u32 %v3483_v56, %v3482_v45  ;;  %v3475_v47 = vrot.slane %v3473_v43, 7  ;;  %13383 = vmatmul.mubr.msk.bf16.gmra.mrb[16].mxu0 %vm3744_vm8, %v16838_v26  ;;  %v3678_v4 = vor.u32 %v3677_v5, %v3673_v34  ;;  %v15465_v1 = vunpack.i.h.bf16 %v15463_v25 }
 0x490   : > { %v15464_v35 = vunpack.i.l.bf16 %v15463_v25  ;;  %v16847_v54 = vsel %vm15745_vm3, %v3461_v38, 0  ;;  %v16851_v24 = vsel %vm15745_vm3, 0, %v3471_v62  ;;  %v3687_v18 = vshll.u32 %v16835_v15, 16 }
 0x491   : > { %v3478_v63 = vor.u32 %v3476_v17, %v3475_v47  ;;  %v16843_v51 = vsel %vm1003_vm4, %v3678_v4, %v3682_v9  ;;  %v3327_v16 = vsel %vm1196_vm5, %v20049_v10, %v15465_v1  ;;  %v16862_v13 = vsel %vm15745_vm3, 0, %v3485_v29 }
 0x492   : > { %13386 = vmatprep.mubr.msk.bf16.mxu0 %vm3744_vm8, %v16843_v51  ;;  %v3326_v59 = vsel %vm1196_vm5, %v20050_v0, %v15464_v35  ;;  %v3359_v34 = vmax.f32 %v3327_v16, 0.0  ;;  %v3685_v56 = vshrl.u32 %v16835_v15, 16  ;;  %v3689_v43 = vrot.slane %v3687_v18, 1 }
 0x493   : > { %v16866_v38 = vsel %vm15745_vm3, 0, %v3478_v63  ;;  %v3358_v60 = vmax.f32 %v3326_v59, 0.0  ;;  %v3692_v5 = vshll.u32 %v16847_v54, 16  ;;  %v16872_v25 = vsel %vm15745_vm3, %v3468_v42, 0 }
 0x494   : > { %v3699_v17 = vshll.u32 %v16851_v24, 16  ;;  %v3704_v29 = vshll.u32 %v16872_v25, 16  ;;  %v16878_v4 = vsel %vm15745_vm3, %v3475_v47, 0  ;;  %v3690_v9 = vor.u32 %v3689_v43, %v3685_v56 }
 0x495   : > { %v3376_v62 = vpack.c.bf16 %v3359_v34, %v3358_v60  ;;  %v3694_v1 = vrot.slane %v3692_v5, 1  ;;  %v3697_v35 = vshrl.u32 %v16851_v24, 16  ;;  %v3711_v63 = vshll.u32 %v16866_v38, 16 }
 0x496   : > { %v3701_v0 = vrot.slane %v3699_v17, 1  ;;  %v3709_v42 = vshrl.u32 %v16866_v38, 16  ;;  %v3716_v34 = vshll.u32 %v16878_v4, 16  ;;  %v16889_v47 = vsel %vm15745_vm3, %v3482_v45, 0 }
 0x497   : > { %v3487_v10 = vshrl.u32 %v3376_v62, 16  ;;  %v3490_v16 = vshll.u32 %v3376_v62, 16  ;;  %v16884_v59 = vsel %vm1003_vm4, %v3690_v9, %v3694_v1  ;;  %v3713_v18 = vrot.slane %v3711_v63, 1 }
 0x498   : > { %13387 = vmatmul.mubr.msk.bf16.gmra.mrb[20].mxu0 %vm3744_vm8, %v16884_v59  ;;  %v3702_v56 = vor.u32 %v3701_v0, %v3697_v35  ;;  %v3706_v43 = vrot.slane %v3704_v29, 1  ;;  %v3723_v5 = vshll.u32 %v16862_v13, 16  ;;  %v3721_v17 = vshrl.u32 %v16862_v13, 16 }
 0x499   : > { %v3489_v60 = vrot.slane %v3487_v10, 7  ;;  %v3714_v62 = vor.u32 %v3713_v18, %v3709_v42  ;;  %v3728_v39 = vshll.u32 %v16889_v47, 16  ;;  %v3718_v45 = vrot.slane %v3716_v34, 1 }
 0x49a   : > { %v16896_v1 = vsel %vm1003_vm4, %v3702_v56, %v3706_v43  ;;  %v3725_v63 = vrot.slane %v3723_v5, 1 }
 0x49b   : > { %v3492_v9 = vor.u32 %v3490_v16, %v3489_v60  ;;  %13390 = vmatprep.mubr.msk.bf16.mxu0 %vm3744_vm8, %v16896_v1  ;;  %v16907_v10 = vsel %vm15745_vm3, %v3489_v60, 0  ;;  %v16910_v16 = vsel %vm1003_vm4, %v3714_v62, %v3718_v45  ;;  %v3730_v42 = vrot.slane %v3728_v39, 1 }
 0x49c   : > { %v3726_v29 = vor.u32 %v3725_v63, %v3721_v17  ;;  %v3740_v34 = vshll.u32 %v16907_v10, 16  ;;  %v4276_v39 = vsel %vm3792_vm7, %v16647_v53, 0  ;;  %v3381_v17 = vld [vmem:[%s19884_s5 + $0xc] sm:$0xf]  ;;  %v4183_v53 = vrot.slane %v16612_v52, 1 }
 0x49d   : > { %v16903_v35 = vsel %vm15745_vm3, 0, %v3492_v9  ;;  %v4186_v9 = vrot.slane %v16633_v31, 1  ;;  %v4184_v63 = vrot.slane %v16608_v48, 1  ;;  %v4475_v45 = vsel %vm3792_vm7, %v3381_v17, 0 }
 0x49e   : > { %v3735_v0 = vshll.u32 %v16903_v35, 16  ;;  %v3733_v18 = vshrl.u32 %v16903_v35, 16  ;;  %v16918_v43 = vsel %vm1003_vm4, %v3726_v29, %v3730_v42  ;;  %v3742_v5 = vrot.slane %v3740_v34, 1  ;;  %v3382_v42 = vld [vmem:[%s19884_s5 + $0x10] sm:$0xf] }
 0x49f   : > { %v4187_v29 = vrot.slane %v16656_v11, 1  ;;  %v4189_v48 = vrot.slane %v16639_v2, 1  ;;  %v4192_v11 = vrot.slane %v16673_v40, 1  ;;  %v4193_v34 = vrot.slane %v16704_v37, 1 }
 0x4a0   : > { %v3737_v56 = vrot.slane %v3735_v0, 1  ;;  %13391 = vmatmul.mubr.msk.bf16.gmra.mrb[24].mxu0 %vm3744_vm8, %v16910_v16  ;;  %v16973_v0 = vsel %vm1638_vm6, %v4183_v53, %v4184_v63  ;;  %v4199_v37 = vrot.slane %v16736_v44, 1  ;;  %v4201_v63 = vrot.slane %v16741_v32, 1 }
 0x4a1   : > { %13394 = vmatprep.mubr.msk.bf16.mxu0 %vm3744_vm8, %v16918_v43  ;;  %v4205_v44 = vrot.slane %v16784_v33, 1  ;;  %v4211_v33 = vrot.slane %v16827_v20, 1  ;;  %v4217_v20 = vrot.slane %v16872_v25, 1  ;;  %v4223_v25 = vrot.slane %v16889_v47, 1 }
 0x4a2   : > { %v3738_v60 = vor.u32 %v3737_v56, %v3733_v18  ;;  %v16981_v18 = vsel %vm1638_vm6, %v4186_v9, %v4187_v29  ;;  %v4190_v56 = vrot.slane %v16678_v27, 1  ;;  %v4196_v27 = vrot.slane %v16724_v58, 1 }
 0x4a3   : > { %v4202_v58 = vrot.slane %v16772_v14, 1  ;;  %v4208_v14 = vrot.slane %v16815_v46, 1  ;;  %v4214_v46 = vrot.slane %v16847_v54, 1  ;;  %v4220_v54 = vrot.slane %v16878_v4, 1 }
 0x4a4   : > { %v16923_v62 = vsel %vm1003_vm4, %v3738_v60, %v3742_v5  ;;  %v16991_v60 = vsel %vm1638_vm6, %v4189_v48, %v4190_v56  ;;  %v16996_v5 = vsel %vm1638_vm6, %v4192_v11, %v4193_v34  ;;  %v4207_v11 = vrot.slane %v16795_v19, 1 }
 0x4a5   : > { %v17019_v29 = vsel %vm1638_vm6, %v4201_v63, %v4202_v58  ;;  %v4210_v56 = vrot.slane %v16809_v50, 1  ;;  %v4222_v58 = vrot.slane %v16862_v13, 1  ;;  %v4685_v47 = vsel %vm3792_vm7, %v3382_v42, 0 }
 0x4a6   : > { %v17033_v34 = vsel %vm1638_vm6, %v4207_v11, %v4208_v14  ;;  %v4226_v14 = vrot.slane %v16907_v10, 1 }
 0x4a7   : > { %v17066_v11 = vsel %vm1638_vm6, %v4222_v58, %v4223_v25 }
 0x4a8   : > { %13395 = vmatmul.mubr.msk.bf16.gmra.mrb[28].mxu0 %vm3744_vm8, %v16923_v62 }
 0x4a9   : > { %13400 = vmatprep.mubr.msk.bf16.mxu0 %vm3744_vm8, %v15751_v23 }
 0x4b0   : > { %13401 = vmatmul.mubr.msk.bf16.vlgmr.msra.gmra.mrb[0].mxu0 %vm3744_vm8, %v16612_v52 }
 0x4b1   : > { %13433 = vmatpush3.bf16.msra.mxu0 %v4276_v39  ;;  %13404 = vmatprep.mubr.msk.bf16.mxu0 %vm3744_vm8, %v16633_v31  ;;  %v4195_v39 = vrot.slane %v16698_v36, 1 }
 0x4b2   : > { %15352 = vmatprep.subr.msk.bf16.mxu0 %vm3792_vm7, %v3381_v17  ;;  %v4198_v17 = vrot.slane %v16718_v30, 1 }
 0x4b3   : > { %v17005_v53 = vsel %vm1638_vm6, %v4195_v39, %v4196_v27  ;;  %v17038_v39 = vsel %vm1638_vm6, %v4210_v56, %v4211_v33  ;;  %v4216_v27 = vrot.slane %v16851_v24, 1  ;;  %v4225_v56 = vrot.slane %v16903_v35, 1  ;;  %v3383_v33 = vld [vmem:[%s19884_s5 + $0x14] sm:$0xf] }
 0x4b4   : > { %v17010_v9 = vsel %vm1638_vm6, %v4198_v17, %v4199_v37  ;;  %v4213_v17 = vrot.slane %v16835_v15, 1 }
 0x4b5   : > { %v17052_v63 = vsel %vm1638_vm6, %v4216_v27, %v4217_v20  ;;  %v17073_v4 = vsel %vm1638_vm6, %v4225_v56, %v4226_v14  ;;  %v4889_v56 = vsel %vm3792_vm7, %v3383_v33, 0  ;;  %v3384_v14 = vld [vmem:[%s19884_s5 + $0x18] sm:$0xf] }
 0x4b6   : > { %v17047_v37 = vsel %vm1638_vm6, %v4213_v17, %v4214_v46 }
 0x4b8   : > { %13405 = vmatmul.mubr.msk.bf16.gmra.mrb[4].mxu0 %vm3744_vm8, %v16639_v2 }
 0x4b9   : > { %13408 = vmatprep.mubr.msk.bf16.mxu0 %vm3744_vm8, %v16673_v40 }
 0x4c0   : > { %13409 = vmatmul.mubr.msk.bf16.gmra.mrb[8].mxu0 %vm3744_vm8, %v16698_v36 }
 0x4c1   : > { %13412 = vmatprep.mubr.msk.bf16.mxu0 %vm3744_vm8, %v16718_v30 }
 0x4c8   : > { %13413 = vmatmul.mubr.msk.bf16.gmra.mrb[12].mxu0 %vm3744_vm8, %v16741_v32 }
 0x4c9   : > { %13416 = vmatprep.mubr.msk.bf16.mxu0 %vm3744_vm8, %v16730_v3 }
 0x4d0   : > { %13417 = vmatmul.mubr.msk.bf16.gmra.mrb[16].mxu0 %vm3744_vm8, %v16795_v19 }
 0x4d1   : > { %13420 = vmatprep.mubr.msk.bf16.mxu0 %vm3744_vm8, %v16809_v50 }
 0x4d8   : > { %13421 = vmatmul.mubr.msk.bf16.gmra.mrb[20].mxu0 %vm3744_vm8, %v16835_v15 }
 0x4d9   : > { %13424 = vmatprep.mubr.msk.bf16.mxu0 %vm3744_vm8, %v16851_v24 }
 0x4e0   : > { %13425 = vmatmul.mubr.msk.bf16.gmra.mrb[24].mxu0 %vm3744_vm8, %v16866_v38 }
 0x4e1   : > { %13428 = vmatprep.mubr.msk.bf16.mxu0 %vm3744_vm8, %v16862_v13 }
 0x4e8   : > { %13429 = vmatmul.mubr.msk.bf16.gmra.mrb[28].mxu0 %vm3744_vm8, %v16903_v35 }
 0x4e9   : > { %13434 = vmatprep.mubr.msk.bf16.mxu0 %vm3744_vm8, %v16187_v7 }
 0x4f0   : > { %13435 = vmatmul.mubr.msk.bf16.vlgmr.msra.gmra.mrb[0].mxu0 %vm3744_vm8, %v16973_v0 }
 0x4f1   : > { %13467 = vmatpush3.bf16.msra.mxu0 %v4475_v45  ;;  %13438 = vmatprep.mubr.msk.bf16.mxu0 %vm3744_vm8, %v16981_v18  ;;  %v4204_v45 = vrot.slane %v16730_v3, 1 }
 0x4f2   : > { %15353 = vmatprep.subr.msk.bf16.mxu0 %vm3792_vm7, %v3382_v42 }
 0x4f3   : > { %v17024_v48 = vsel %vm1638_vm6, %v4204_v45, %v4205_v44  ;;  %v4219_v45 = vrot.slane %v16866_v38, 1 }
 0x4f5   : > { %v17061_v44 = vsel %vm1638_vm6, %v4219_v45, %v4220_v54 }
 0x4f8   : > { %13439 = vmatmul.mubr.msk.bf16.gmra.mrb[4].mxu0 %vm3744_vm8, %v16991_v60 }
 0x4f9   : > { %13442 = vmatprep.mubr.msk.bf16.mxu0 %vm3744_vm8, %v16996_v5 }
 0x500   : > { %13443 = vmatmul.mubr.msk.bf16.gmra.mrb[8].mxu0 %vm3744_vm8, %v17005_v53 }
 0x501   : > { %13446 = vmatprep.mubr.msk.bf16.mxu0 %vm3744_vm8, %v17010_v9 }
 0x508   : > { %13447 = vmatmul.mubr.msk.bf16.gmra.mrb[12].mxu0 %vm3744_vm8, %v17019_v29 }
 0x509   : > { %13450 = vmatprep.mubr.msk.bf16.mxu0 %vm3744_vm8, %v17024_v48 }
 0x510   : > { %13451 = vmatmul.mubr.msk.bf16.gmra.mrb[16].mxu0 %vm3744_vm8, %v17033_v34 }
 0x511   : > { %13454 = vmatprep.mubr.msk.bf16.mxu0 %vm3744_vm8, %v17038_v39 }
 0x518   : > { %13455 = vmatmul.mubr.msk.bf16.gmra.mrb[20].mxu0 %vm3744_vm8, %v17047_v37 }
 0x519   : > { %13458 = vmatprep.mubr.msk.bf16.mxu0 %vm3744_vm8, %v17052_v63 }
 0x520   : > { %13459 = vmatmul.mubr.msk.bf16.gmra.mrb[24].mxu0 %vm3744_vm8, %v17061_v44 }
 0x521   : > { %13462 = vmatprep.mubr.msk.bf16.mxu0 %vm3744_vm8, %v17066_v11 }
 0x528   : > { %13463 = vmatmul.mubr.msk.bf16.gmra.mrb[28].mxu0 %vm3744_vm8, %v17073_v4 }
 0x529   : > { %13468 = vmatprep.mubr.msk.bf16.mxu0 %vm3744_vm8, %v16612_v52  ;;  %v15468_v52 = vpop.permute.xlu1 %15467 }
 0x52a   : > { %v15470_v10 = vunpack.i.h.bf16 %v15468_v52  ;;  %v15469_v42 = vunpack.i.l.bf16 %v15468_v52 }
 0x52c   : > { %v3329_v17 = vsel %vm1196_vm5, %v16079_v57, %v15470_v10  ;;  %v3328_v27 = vsel %vm1196_vm5, %v16069_v28, %v15469_v42 }
 0x52d   : > { %v3361_v46 = vmax.f32 %v3329_v17, 0.0  ;;  %v3360_v20 = vmax.f32 %v3328_v27, 0.0 }
 0x52f   : > { %v3377_v45 = vpack.c.bf16 %v3361_v46, %v3360_v20  ;;  %v5085_v46 = vsel %vm3792_vm7, %v3384_v14, 0  ;;  %v3385_v20 = vld [vmem:[%s19884_s5 + $0x1c] sm:$0xf] }
 0x530   : > { %13469 = vmatmul.mubr.msk.bf16.vlgmr.msra.gmra.mrb[0].mxu0 %vm3744_vm8, %v16633_v31 }
 0x531   : > { %13501 = vmatpush3.bf16.msra.mxu0 %v4685_v47  ;;  %13472 = vmatprep.mubr.msk.bf16.mxu0 %vm3744_vm8, %v16639_v2  ;;  %v3494_v58 = vshrl.u32 %v3377_v45, 16  ;;  %v3497_v28 = vshll.u32 %v3377_v45, 16 }
 0x532   : > { %15354 = vmatprep.subr.msk.bf16.mxu0 %vm3792_vm7, %v3383_v33 }
 0x533   : > { %v3496_v57 = vrot.slane %v3494_v58, 7 }
 0x535   : > { %v3499_v54 = vor.u32 %v3497_v28, %v3496_v57  ;;  %v3563_v47 = vsel %vm15745_vm3, %v3496_v57, 0  ;;  %v5281_v57 = vsel %vm3792_vm7, %v3385_v20, 0  ;;  %v3386_v28 = vld [vmem:[%s19884_s5 + $0x20] sm:$0xf] }
 0x536   : > { %v4677_v10 = vshll.u32 %v3563_v47, 16  ;;  %v4883_v45 = vrot.slane %v3563_v47, 1 }
 0x537   : > { %v17118_v25 = vsel %vm15745_vm3, 0, %v3499_v54 }
 0x538   : > { %13473 = vmatmul.mubr.msk.bf16.gmra.mrb[4].mxu0 %vm3744_vm8, %v16673_v40  ;;  %v4670_v52 = vshrl.u32 %v17118_v25, 16  ;;  %v4679_v17 = vrot.slane %v4677_v10, 1 }
 0x539   : > { %13476 = vmatprep.mubr.msk.bf16.mxu0 %vm3744_vm8, %v16698_v36 }
 0x540   : > { %13477 = vmatmul.mubr.msk.bf16.gmra.mrb[8].mxu0 %vm3744_vm8, %v16718_v30 }
 0x541   : > { %13480 = vmatprep.mubr.msk.bf16.mxu0 %vm3744_vm8, %v16741_v32 }
 0x548   : > { %13481 = vmatmul.mubr.msk.bf16.gmra.mrb[12].mxu0 %vm3744_vm8, %v16730_v3 }
 0x549   : > { %13484 = vmatprep.mubr.msk.bf16.mxu0 %vm3744_vm8, %v16795_v19 }
 0x550   : > { %13485 = vmatmul.mubr.msk.bf16.gmra.mrb[16].mxu0 %vm3744_vm8, %v16809_v50 }
 0x551   : > { %13488 = vmatprep.mubr.msk.bf16.mxu0 %vm3744_vm8, %v16835_v15 }
 0x558   : > { %13489 = vmatmul.mubr.msk.bf16.gmra.mrb[20].mxu0 %vm3744_vm8, %v16851_v24 }
 0x559   : > { %13492 = vmatprep.mubr.msk.bf16.mxu0 %vm3744_vm8, %v16866_v38 }
 0x560   : > { %13493 = vmatmul.mubr.msk.bf16.gmra.mrb[24].mxu0 %vm3744_vm8, %v16862_v13 }
 0x561   : > { %13496 = vmatprep.mubr.msk.bf16.mxu0 %vm3744_vm8, %v16903_v35 }
 0x568   : > { %13497 = vmatmul.mubr.msk.bf16.gmra.mrb[28].mxu0 %vm3744_vm8, %v17118_v25 }
 0x569   : > { %13502 = vmatprep.mubr.msk.bf16.mxu0 %vm3744_vm8, %v16642_v49  ;;  %v4672_v49 = vshll.u32 %v17118_v25, 16 }
 0x56b   : > { %v4674_v33 = vrot.slane %v4672_v49, 1 }
 0x56d   : > { %v4675_v42 = vor.u32 %v4674_v33, %v4670_v52 }
 0x56f   : > { %v17162_v27 = vsel %vm1003_vm4, %v4675_v42, %v4679_v17 }
 0x570   : > { %13503 = vmatmul.mubr.msk.bf16.vlgmr.msra.gmra.mrb[0].mxu0 %vm3744_vm8, %v16686_v41 }
 0x571   : > { %13535 = vmatpush3.bf16.msra.mxu0 %v4889_v56  ;;  %13506 = vmatprep.mubr.msk.bf16.mxu0 %vm3744_vm8, %v16707_v55 }
 0x572   : > { %15355 = vmatprep.subr.msk.bf16.mxu0 %vm3792_vm7, %v3384_v14 }
 0x578   : > { %13507 = vmatmul.mubr.msk.bf16.gmra.mrb[4].mxu0 %vm3744_vm8, %v16745_v6 }
 0x579   : > { %13510 = vmatprep.mubr.msk.bf16.mxu0 %vm3744_vm8, %v16754_v12 }
 0x580   : > { %13511 = vmatmul.mubr.msk.bf16.gmra.mrb[8].mxu0 %vm3744_vm8, %v16765_v21 }
 0x581   : > { %13514 = vmatprep.mubr.msk.bf16.mxu0 %vm3744_vm8, %v16798_v8 }
 0x588   : > { %13515 = vmatmul.mubr.msk.bf16.gmra.mrb[12].mxu0 %vm3744_vm8, %v16803_v61 }
 0x589   : > { %13518 = vmatprep.mubr.msk.bf16.mxu0 %vm3744_vm8, %v16838_v26 }
 0x590   : > { %13519 = vmatmul.mubr.msk.bf16.gmra.mrb[16].mxu0 %vm3744_vm8, %v16843_v51 }
 0x591   : > { %13522 = vmatprep.mubr.msk.bf16.mxu0 %vm3744_vm8, %v16884_v59 }
 0x598   : > { %13523 = vmatmul.mubr.msk.bf16.gmra.mrb[20].mxu0 %vm3744_vm8, %v16896_v1 }
 0x599   : > { %13526 = vmatprep.mubr.msk.bf16.mxu0 %vm3744_vm8, %v16910_v16 }
 0x5a0   : > { %13527 = vmatmul.mubr.msk.bf16.gmra.mrb[24].mxu0 %vm3744_vm8, %v16918_v43 }
 0x5a1   : > { %13530 = vmatprep.mubr.msk.bf16.mxu0 %vm3744_vm8, %v16923_v62 }
 0x5a8   : > { %13531 = vmatmul.mubr.msk.bf16.gmra.mrb[28].mxu0 %vm3744_vm8, %v17162_v27 }
 0x5a9   : > { %13536 = vmatprep.mubr.msk.bf16.mxu0 %vm3744_vm8, %v16973_v0  ;;  %v4882_v0 = vrot.slane %v17118_v25, 1 }
 0x5ab   : > { %v4884_v58 = vsel %vm1638_vm6, %v4882_v0, %v4883_v45 }
 0x5b0   : > { %13537 = vmatmul.mubr.msk.bf16.vlgmr.msra.gmra.mrb[0].mxu0 %vm3744_vm8, %v16981_v18 }
 0x5b1   : > { %13569 = vmatpush3.bf16.msra.mxu0 %v5085_v46  ;;  %13540 = vmatprep.mubr.msk.bf16.mxu0 %vm3744_vm8, %v16991_v60 }
 0x5b2   : > { %15356 = vmatprep.subr.msk.bf16.mxu0 %vm3792_vm7, %v3385_v20 }
 0x5b8   : > { %13541 = vmatmul.mubr.msk.bf16.gmra.mrb[4].mxu0 %vm3744_vm8, %v16996_v5 }
 0x5b9   : > { %13544 = vmatprep.mubr.msk.bf16.mxu0 %vm3744_vm8, %v17005_v53 }
 0x5c0   : > { %13545 = vmatmul.mubr.msk.bf16.gmra.mrb[8].mxu0 %vm3744_vm8, %v17010_v9 }
 0x5c1   : > { %13548 = vmatprep.mubr.msk.bf16.mxu0 %vm3744_vm8, %v17019_v29 }
 0x5c8   : > { %13549 = vmatmul.mubr.msk.bf16.gmra.mrb[12].mxu0 %vm3744_vm8, %v17024_v48 }
 0x5c9   : > { %13552 = vmatprep.mubr.msk.bf16.mxu0 %vm3744_vm8, %v17033_v34 }
 0x5d0   : > { %13553 = vmatmul.mubr.msk.bf16.gmra.mrb[16].mxu0 %vm3744_vm8, %v17038_v39 }
 0x5d1   : > { %13556 = vmatprep.mubr.msk.bf16.mxu0 %vm3744_vm8, %v17047_v37 }
 0x5d8   : > { %13557 = vmatmul.mubr.msk.bf16.gmra.mrb[20].mxu0 %vm3744_vm8, %v17052_v63 }
 0x5d9   : > { %13560 = vmatprep.mubr.msk.bf16.mxu0 %vm3744_vm8, %v17061_v44 }
 0x5e0   : > { %13561 = vmatmul.mubr.msk.bf16.gmra.mrb[24].mxu0 %vm3744_vm8, %v17066_v11 }
 0x5e1   : > { %13564 = vmatprep.mubr.msk.bf16.mxu0 %vm3744_vm8, %v17073_v4 }
 0x5e8   : > { %13565 = vmatmul.mubr.msk.bf16.gmra.mrb[28].mxu0 %vm3744_vm8, %v4884_v58 }
 0x5e9   : > { %13570 = vmatprep.mubr.msk.bf16.mxu0 %vm3744_vm8, %v16633_v31  ;;  %v5711_v31 = vld [vmem:[%s19886_s7 + $0x1] sm:$0x1] }
 0x5ea   : > { %15358 = vmatprep.subr.msk.bf16.mxu1 %vm966_vm1, %v5711_v31 }
 0x5f0   : > { %13571 = vmatmul.mubr.msk.bf16.vlgmr.msra.gmra.mrb[0].mxu0 %vm3744_vm8, %v16639_v2  ;;  %v6138_v2 = vsel %vm966_vm1, %v5711_v31, 0 }
 0x5f1   : > { %13603 = vmatpush3.bf16.msra.mxu0 %v5281_v57  ;;  %13574 = vmatprep.mubr.msk.bf16.mxu0 %vm3744_vm8, %v16673_v40  ;;  %v5477_v40 = vsel %vm3792_vm7, %v3386_v28, 0 }
 0x5f2   : > { %15357 = vmatprep.subr.msk.bf16.mxu0 %vm3792_vm7, %v3386_v28  ;;  %13671 = vmatpush3.bf16.msra.mxu1 %v6138_v2 }
 0x5f8   : > { %13575 = vmatmul.mubr.msk.bf16.gmra.mrb[4].mxu0 %vm3744_vm8, %v16698_v36  ;;  %v5710_v36 = vld [vmem:[%s19886_s7] sm:$0x1] }
 0x5f9   : > { %13578 = vmatprep.mubr.msk.bf16.mxu0 %vm3744_vm8, %v16718_v30  ;;  %15359 = vmatprep.subr.msk.bf16.mxu1 %vm966_vm1, %v5710_v36 }
 0x600   : > { %13579 = vmatmul.mubr.msk.bf16.gmra.mrb[8].mxu0 %vm3744_vm8, %v16741_v32 }
 0x601   : > { %13582 = vmatprep.mubr.msk.bf16.mxu0 %vm3744_vm8, %v16730_v3 }
 0x608   : > { %13583 = vmatmul.mubr.msk.bf16.gmra.mrb[12].mxu0 %vm3744_vm8, %v16795_v19 }
 0x609   : > { %13586 = vmatprep.mubr.msk.bf16.mxu0 %vm3744_vm8, %v16809_v50 }
 0x610   : > { %13587 = vmatmul.mubr.msk.bf16.gmra.mrb[16].mxu0 %vm3744_vm8, %v16835_v15 }
 0x611   : > { %13590 = vmatprep.mubr.msk.bf16.mxu0 %vm3744_vm8, %v16851_v24 }
 0x618   : > { %13591 = vmatmul.mubr.msk.bf16.gmra.mrb[20].mxu0 %vm3744_vm8, %v16866_v38 }
 0x619   : > { %13594 = vmatprep.mubr.msk.bf16.mxu0 %vm3744_vm8, %v16862_v13 }
 0x620   : > { %13595 = vmatmul.mubr.msk.bf16.gmra.mrb[24].mxu0 %vm3744_vm8, %v16903_v35 }
 0x621   : > { %13598 = vmatprep.mubr.msk.bf16.mxu0 %vm3744_vm8, %v17118_v25  ;;  %v6332_v25 = vsel %vm966_vm1, %v5710_v36, 0 }
 0x628   : > { %13599 = vmatmul.mubr.msk.bf16.gmra.mrb[28].mxu0 %vm3744_vm8, %v15751_v23 }
 0x629   : > { %13604 = vmatprep.mubr.msk.bf16.mxu0 %vm3744_vm8, %v16686_v41  ;;  %v20051_v41 = vld [vmem:[#allocation2_spill] sm:$0xff] }
 0x630   : > { %13605 = vmatmul.mubr.msk.bf16.vlgmr.msra.gmra.mrb[0].mxu0 %vm3744_vm8, %v16707_v55  ;;  %v17317_v55 = vld [vmem:[%s19885_s6] ss:$0 sm:$0xff] }
 0x631   : > { %13637 = vmatpush3.bf16.msra.mxu0 %v5477_v40  ;;  %13608 = vmatprep.mubr.msk.bf16.mxu0 %vm3744_vm8, %v16745_v6 }
 0x638   : > { %13609 = vmatmul.mubr.msk.bf16.gmra.mrb[4].mxu0 %vm3744_vm8, %v16754_v12 }
 0x639   : > { %13612 = vmatprep.mubr.msk.bf16.mxu0 %vm3744_vm8, %v16765_v21 }
 0x640   : > { %13613 = vmatmul.mubr.msk.bf16.gmra.mrb[8].mxu0 %vm3744_vm8, %v16798_v8 }
 0x641   : > { %13616 = vmatprep.mubr.msk.bf16.mxu0 %vm3744_vm8, %v16803_v61 }
 0x648   : > { %13617 = vmatmul.mubr.msk.bf16.gmra.mrb[12].mxu0 %vm3744_vm8, %v16838_v26 }
 0x649   : > { %13620 = vmatprep.mubr.msk.bf16.mxu0 %vm3744_vm8, %v16843_v51 }
 0x650   : > { %13621 = vmatmul.mubr.msk.bf16.gmra.mrb[16].mxu0 %vm3744_vm8, %v16884_v59 }
 0x651   : > { %13624 = vmatprep.mubr.msk.bf16.mxu0 %vm3744_vm8, %v16896_v1 }
 0x658   : > { %13625 = vmatmul.mubr.msk.bf16.gmra.mrb[20].mxu0 %vm3744_vm8, %v16910_v16 }
 0x659   : > { %13628 = vmatprep.mubr.msk.bf16.mxu0 %vm3744_vm8, %v16918_v43 }
 0x660   : > { %13629 = vmatmul.mubr.msk.bf16.gmra.mrb[24].mxu0 %vm3744_vm8, %v16923_v62 }
 0x661   : > { %13632 = vmatprep.mubr.msk.bf16.mxu0 %vm3744_vm8, %v17162_v27 }
 0x668   : > { %13633 = vmatmul.mubr.msk.bf16.gmra.mrb[28].mxu0 %vm3744_vm8, %v20051_v41 }
 0x669   : > { %13638 = vmatprep.mubr.msk.bf16.mxu0 %vm3744_vm8, %v16981_v18 }
 0x670   : > { %13639 = vmatmul.mubr.msk.bf16.vlgmr.msra.gmra.mrb[0].mxu0 %vm3744_vm8, %v16991_v60 }
 0x671   : > { %13642 = vmatprep.mubr.msk.bf16.mxu0 %vm3744_vm8, %v16996_v5 }
 0x678   : > { %13643 = vmatmul.mubr.msk.bf16.gmra.mrb[4].mxu0 %vm3744_vm8, %v17005_v53 }
 0x679   : > { %13646 = vmatprep.mubr.msk.bf16.mxu0 %vm3744_vm8, %v17010_v9 }
 0x680   : > { %13647 = vmatmul.mubr.msk.bf16.gmra.mrb[8].mxu0 %vm3744_vm8, %v17019_v29 }
 0x681   : > { %13650 = vmatprep.mubr.msk.bf16.mxu0 %vm3744_vm8, %v17024_v48 }
 0x688   : > { %13651 = vmatmul.mubr.msk.bf16.gmra.mrb[12].mxu0 %vm3744_vm8, %v17033_v34 }
 0x689   : > { %13654 = vmatprep.mubr.msk.bf16.mxu0 %vm3744_vm8, %v17038_v39 }
 0x690   : > { %13655 = vmatmul.mubr.msk.bf16.gmra.mrb[16].mxu0 %vm3744_vm8, %v17047_v37 }
 0x691   : > { %13658 = vmatprep.mubr.msk.bf16.mxu0 %vm3744_vm8, %v17052_v63 }
 0x698   : > { %13659 = vmatmul.mubr.msk.bf16.gmra.mrb[20].mxu0 %vm3744_vm8, %v17061_v44 }
 0x699   : > { %13662 = vmatprep.mubr.msk.bf16.mxu0 %vm3744_vm8, %v17066_v11 }
 0x6a0   : > { %13663 = vmatmul.mubr.msk.bf16.gmra.mrb[24].mxu0 %vm3744_vm8, %v17073_v4 }
 0x6a1   : > { %13666 = vmatprep.mubr.msk.bf16.mxu0 %vm3744_vm8, %v4884_v58 }
 0x6a8   : > { %13667 = vmatmul.mubr.msk.bf16.gmra.mrb[28].mxu0 %vm3744_vm8, %v16187_v7 }
 0x743   : > { %v13640_v30 = vpop.f32.mrb[0].mxu0 }
 0x744   : > { %v5513_v3 = vpop.f32.mrb[1].mxu0  ;;  %v17320_v6 = vadd.f32 %v13640_v30, %v17317_v55 }
 0x745   : > { %v13641_v32 = vpop.f32.mrb[2].mxu0  ;;  %v17326_v19 = vadd.f32 %v17317_v55, %v5513_v3 }
 0x746   : > { %20052 = vst [vmem:[#allocation6_spill] sm:$0xff] %v17320_v6  ;;  %v17323_v12 = vadd.f32 %v13641_v32, %v17317_v55  ;;  %v5516_v21 = vpop.f32.mrb[3].mxu0 }
 0x747   : > { %20054 = vst [vmem:[#allocation4_spill] sm:$0xff] %v17326_v19  ;;  %v17329_v8 = vadd.f32 %v17317_v55, %v5516_v21 }
 0x748   : > { %20053 = vst [vmem:[#allocation5_spill] sm:$0xff] %v17323_v12  ;;  %v5721_v61 = vpack.c.bf16 %v17323_v12, %v17320_v6 }
 0x749   : > { %20055 = vst [vmem:[#allocation3_spill] sm:$0xff] %v17329_v8  ;;  %v5720_v50 = vpack.c.bf16 %v17329_v8, %v17326_v19 }
 0x74a   : > { %v5744_v15 = vshrl.u32 %v5721_v61, 16  ;;  %v5747_v13 = vshll.u32 %v5721_v61, 16 }
 0x74b   : > { %v5737_v26 = vshrl.u32 %v5720_v50, 16  ;;  %v13644_v51 = vpop.f32.mrb[4].mxu0  ;;  %v5740_v1 = vshll.u32 %v5720_v50, 16 }
 0x74c   : > { %v5746_v24 = vrot.slane %v5744_v15, 7  ;;  %v5529_v38 = vpop.f32.mrb[5].mxu0  ;;  %v17336_v43 = vadd.f32 %v13644_v51, %v17317_v55 }
 0x74d   : > { %v5739_v59 = vrot.slane %v5737_v26, 7  ;;  %v13645_v35 = vpop.f32.mrb[6].mxu0  ;;  %v17339_v62 = vadd.f32 %v17317_v55, %v5529_v38  ;;  %v17406_v26 = vld [vmem:[%s19886_s7 + $0x2] sm:$0x1] }
 0x74e   : > { %v5749_v16 = vor.u32 %v5747_v13, %v5746_v24  ;;  %20056 = vst [vmem:[#allocation10_spill] sm:$0xff] %v17336_v43  ;;  %v17342_v18 = vadd.f32 %v13645_v35, %v17317_v55  ;;  %v5532_v60 = vpop.f32.mrb[7].mxu0  ;;  %v17346_v5 = vsel %vm15745_vm3, %v5746_v24, 0 }
 0x74f   : > { %20057 = vst [vmem:[#allocation8_spill] sm:$0xff] %v17339_v62  ;;  %v5742_v53 = vor.u32 %v5740_v1, %v5739_v59  ;;  %v17350_v9 = vsel %vm15745_vm3, %v5739_v59, 0  ;;  %v17353_v29 = vadd.f32 %v17317_v55, %v5532_v60  ;;  %v5932_v11 = vshll.u32 %v17346_v5, 16 }
 0x750   : > { %20058 = vst [vmem:[#allocation9_spill] sm:$0xff] %v17342_v18  ;;  %v17357_v48 = vsel %vm15745_vm3, 0, %v5749_v16  ;;  %v5920_v34 = vshll.u32 %v17350_v9, 16  ;;  %v5723_v39 = vpack.c.bf16 %v17342_v18, %v17336_v43 }
 0x751   : > { %20059 = vst [vmem:[#allocation7_spill] sm:$0xff] %v17353_v29  ;;  %v17364_v37 = vsel %vm15745_vm3, 0, %v5742_v53  ;;  %v5722_v63 = vpack.c.bf16 %v17353_v29, %v17339_v62  ;;  %v5927_v44 = vshll.u32 %v17357_v48, 16  ;;  %v5925_v47 = vshrl.u32 %v17357_v48, 16 }
 0x752   : > { %v5915_v4 = vshll.u32 %v17364_v37, 16  ;;  %v5758_v54 = vshrl.u32 %v5723_v39, 16  ;;  %v5913_v56 = vshrl.u32 %v17364_v37, 16  ;;  %v5922_v52 = vrot.slane %v5920_v34, 1 }
 0x753   : > { %v5751_v14 = vshrl.u32 %v5722_v63, 16  ;;  %v13648_v49 = vpop.f32.mrb[8].mxu0  ;;  %v5929_v33 = vrot.slane %v5927_v44, 1  ;;  %v5761_v42 = vshll.u32 %v5723_v39, 16  ;;  %v5754_v20 = vshll.u32 %v5722_v63, 16 }
 0x754   : > { %v5760_v10 = vrot.slane %v5758_v54, 7  ;;  %v5545_v17 = vpop.f32.mrb[9].mxu0  ;;  %v5917_v27 = vrot.slane %v5915_v4, 1  ;;  %v17375_v0 = vadd.f32 %v13648_v49, %v17317_v55  ;;  %v5934_v40 = vrot.slane %v5932_v11, 1 }
 0x755   : > { %v5753_v46 = vrot.slane %v5751_v14, 7  ;;  %v13649_v45 = vpop.f32.mrb[10].mxu0  ;;  %v5930_v58 = vor.u32 %v5929_v33, %v5925_v47  ;;  %v17385_v3 = vadd.f32 %v17317_v55, %v5545_v17 }
 0x756   : > { %20060 = vst [vmem:[#allocation12_spill] sm:$0xff] %v17375_v0  ;;  %v5763_v57 = vor.u32 %v5761_v42, %v5760_v10  ;;  %v17378_v28 = vadd.f32 %v13649_v45, %v17317_v55  ;;  %v5548_v31 = vpop.f32.mrb[11].mxu0  ;;  %v5918_v2 = vor.u32 %v5917_v27, %v5913_v56  ;;  %v17396_v61 = vsel %vm15745_vm3, %v5760_v10, 0 }
 0x757   : > { %v5756_v36 = vor.u32 %v5754_v20, %v5753_v46  ;;  %v17382_v30 = vsel %vm15745_vm3, %v5753_v46, 0  ;;  %20062 = vst [vmem:[#allocation14_spill] sm:$0xff] %v17385_v3  ;;  %v17388_v32 = vadd.f32 %v17317_v55, %v5548_v31  ;;  %v17418_v38 = vsel %vm1003_vm4, %v5930_v58, %v5934_v40 }
 0x758   : > { %20061 = vst [vmem:[#allocation11_spill] sm:$0xff] %v17378_v28  ;;  %v17392_v21 = vsel %vm15745_vm3, 0, %v5763_v57  ;;  %v5725_v50 = vpack.c.bf16 %v17378_v28, %v17375_v0  ;;  %v17401_v15 = vsel %vm1003_vm4, %v5918_v2, %v5922_v52  ;;  %v5944_v24 = vshll.u32 %v17382_v30, 16 }
 0x759   : > { %20063 = vst [vmem:[#allocation13_spill] sm:$0xff] %v17388_v32  ;;  %v17410_v51 = vsel %vm15745_vm3, 0, %v5756_v36  ;;  %v5724_v13 = vpack.c.bf16 %v17388_v32, %v17385_v3  ;;  %13673 = vmatmul.mubr.msk.bf16.vlgmr.msra.gmra.mrb[64].mxu1 %vm1196_vm5, %v17401_v15  ;;  %v5956_v35 = vshll.u32 %v17396_v61, 16  ;;  %v5949_v53 = vshrl.u32 %v17392_v21, 16 }
 0x75a   : > { %v5772_v59 = vshrl.u32 %v5725_v50, 16  ;;  %13705 = vmatpush3.bf16.msra.mxu1 %v6332_v25  ;;  %13676 = vmatprep.mubr.msk.bf16.mxu1 %vm1196_vm5, %v17418_v38  ;;  %v5939_v1 = vshll.u32 %v17410_v51, 16  ;;  %v5951_v34 = vshll.u32 %v17392_v21, 16  ;;  %v5775_v63 = vshll.u32 %v5725_v50, 16 }
 0x75b   : > { %v5765_v16 = vshrl.u32 %v5724_v13, 16  ;;  %v13652_v60 = vpop.f32.mrb[12].mxu0  ;;  %15360 = vmatprep.subr.msk.bf16.mxu1 %vm966_vm1, %v17406_v26  ;;  %v5937_v11 = vshrl.u32 %v17410_v51, 16  ;;  %v5768_v25 = vshll.u32 %v5724_v13, 16  ;;  %v5946_v14 = vrot.slane %v5944_v24, 1 }
 0x75c   : > { %v5774_v39 = vrot.slane %v5772_v59, 7  ;;  %v5561_v44 = vpop.f32.mrb[13].mxu0  ;;  %v5941_v4 = vrot.slane %v5939_v1, 1  ;;  %v5953_v49 = vrot.slane %v5951_v34, 1  ;;  %v17430_v33 = vadd.f32 %v13652_v60, %v17317_v55 }
 0x75d   : > { %v5767_v54 = vrot.slane %v5765_v16, 7  ;;  %v13653_v56 = vpop.f32.mrb[14].mxu0  ;;  %v17440_v46 = vadd.f32 %v17317_v55, %v5561_v44  ;;  %v5958_v31 = vrot.slane %v5956_v35, 1 }
 0x75e   : > { %v5777_v47 = vor.u32 %v5775_v63, %v5774_v39  ;;  %20064 = vst [vmem:[#allocation16_spill] sm:$0xff] %v17430_v33  ;;  %v17433_v52 = vadd.f32 %v13653_v56, %v17317_v55  ;;  %v5564_v10 = vpop.f32.mrb[15].mxu0  ;;  %v5942_v42 = vor.u32 %v5941_v4, %v5937_v11  ;;  %v17447_v45 = vsel %vm15745_vm3, %v5774_v39, 0 }
 0x75f   : > { %v5770_v17 = vor.u32 %v5768_v25, %v5767_v54  ;;  %v17437_v27 = vsel %vm15745_vm3, %v5767_v54, 0  ;;  %20066 = vst [vmem:[#allocation18_spill] sm:$0xff] %v17440_v46  ;;  %v17443_v20 = vadd.f32 %v17317_v55, %v5564_v10  ;;  %v5954_v50 = vor.u32 %v5953_v49, %v5949_v53 }
 0x760   : > { %20065 = vst [vmem:[#allocation15_spill] sm:$0xff] %v17433_v52  ;;  %v5727_v58 = vpack.c.bf16 %v17433_v52, %v17430_v33  ;;  %v17452_v57 = vsel %vm1003_vm4, %v5942_v42, %v5946_v14  ;;  %v5968_v40 = vshll.u32 %v17437_v27, 16  ;;  %v17465_v24 = vsel %vm15745_vm3, 0, %v5777_v47 }
 0x761   : > { %20067 = vst [vmem:[#allocation17_spill] sm:$0xff] %v17443_v20  ;;  %v17456_v2 = vsel %vm15745_vm3, 0, %v5770_v17  ;;  %v5726_v36 = vpack.c.bf16 %v17443_v20, %v17440_v46  ;;  %13677 = vmatmul.mubr.msk.bf16.gmra.mrb[68].mxu1 %vm1196_vm5, %v17452_v57  ;;  %v5980_v1 = vshll.u32 %v17447_v45, 16  ;;  %v17470_v16 = vsel %vm1003_vm4, %v5954_v50, %v5958_v31 }
 0x762   : > { %v5786_v13 = vshrl.u32 %v5727_v58, 16  ;;  %v5963_v59 = vshll.u32 %v17456_v2, 16  ;;  %v5789_v39 = vshll.u32 %v5727_v58, 16  ;;  %13680 = vmatprep.mubr.msk.bf16.mxu1 %vm1196_vm5, %v17470_v16  ;;  %v5961_v63 = vshrl.u32 %v17456_v2, 16 }
 0x763   : > { %v5779_v35 = vshrl.u32 %v5726_v36, 16  ;;  %v13656_v60 = vpop.f32.mrb[16].mxu0  ;;  %v5782_v4 = vshll.u32 %v5726_v36, 16  ;;  %v5970_v25 = vrot.slane %v5968_v40, 1  ;;  %v5975_v56 = vshll.u32 %v17465_v24, 16 }
 0x764   : > { %v5788_v34 = vrot.slane %v5786_v13, 7  ;;  %v5577_v53 = vpop.f32.mrb[17].mxu0  ;;  %v5965_v44 = vrot.slane %v5963_v59, 1  ;;  %v17477_v49 = vadd.f32 %v13656_v60, %v17317_v55  ;;  %v5973_v59 = vshrl.u32 %v17465_v24, 16 }
 0x765   : > { %v5781_v11 = vrot.slane %v5779_v35, 7  ;;  %v13657_v54 = vpop.f32.mrb[18].mxu0  ;;  %v17487_v31 = vadd.f32 %v17317_v55, %v5577_v53 }
 0x766   : > { %v5791_v14 = vor.u32 %v5789_v39, %v5788_v34  ;;  %20068 = vst [vmem:[#allocation20_spill] sm:$0xff] %v17477_v49  ;;  %v17480_v47 = vadd.f32 %v13657_v54, %v17317_v55  ;;  %v5580_v10 = vpop.f32.mrb[19].mxu0  ;;  %v5966_v42 = vor.u32 %v5965_v44, %v5961_v63  ;;  %v17494_v36 = vsel %vm15745_vm3, %v5788_v34, 0 }
 0x767   : > { %v5784_v17 = vor.u32 %v5782_v4, %v5781_v11  ;;  %v17484_v58 = vsel %vm15745_vm3, %v5781_v11, 0  ;;  %20070 = vst [vmem:[#allocation22_spill] sm:$0xff] %v17487_v31  ;;  %v17490_v40 = vadd.f32 %v17317_v55, %v5580_v10  ;;  %v5977_v34 = vrot.slane %v5975_v56, 1 }
 0x768   : > { %20069 = vst [vmem:[#allocation19_spill] sm:$0xff] %v17480_v47  ;;  %v5729_v50 = vpack.c.bf16 %v17480_v47, %v17477_v49  ;;  %v17499_v13 = vsel %vm1003_vm4, %v5966_v42, %v5970_v25  ;;  %v5992_v60 = vshll.u32 %v17484_v58, 16  ;;  %v17513_v53 = vsel %vm15745_vm3, 0, %v5791_v14 }
 0x769   : > { %20071 = vst [vmem:[#allocation21_spill] sm:$0xff] %v17490_v40  ;;  %v17504_v35 = vsel %vm15745_vm3, 0, %v5784_v17  ;;  %v5728_v39 = vpack.c.bf16 %v17490_v40, %v17487_v31  ;;  %13681 = vmatmul.mubr.msk.bf16.gmra.mrb[72].mxu1 %vm1196_vm5, %v17499_v13  ;;  %v5982_v44 = vrot.slane %v5980_v1, 1  ;;  %v6004_v4 = vshll.u32 %v17494_v36, 16 }
 0x76a   : > { %v5800_v63 = vshrl.u32 %v5729_v50, 16  ;;  %v5987_v11 = vshll.u32 %v17504_v35, 16  ;;  %v5803_v54 = vshll.u32 %v5729_v50, 16  ;;  %v5978_v10 = vor.u32 %v5977_v34, %v5973_v59 }
 0x76b   : > { %v5793_v25 = vshrl.u32 %v5728_v39, 16  ;;  %v13660_v42 = vpop.f32.mrb[20].mxu0  ;;  %v5796_v31 = vshll.u32 %v5728_v39, 16  ;;  %v5985_v49 = vshrl.u32 %v17504_v35, 16  ;;  %v5994_v1 = vrot.slane %v5992_v60, 1 }
 0x76c   : > { %v5802_v17 = vrot.slane %v5800_v63, 7  ;;  %v5593_v40 = vpop.f32.mrb[21].mxu0  ;;  %v5989_v56 = vrot.slane %v5987_v11, 1  ;;  %v17519_v14 = vsel %vm1003_vm4, %v5978_v10, %v5982_v44  ;;  %v5999_v20 = vshll.u32 %v17513_v53, 16 }
 0x76d   : > { %v5795_v47 = vrot.slane %v5793_v25, 7  ;;  %v13661_v46 = vpop.f32.mrb[22].mxu0  ;;  %13684 = vmatprep.mubr.msk.bf16.mxu1 %vm1196_vm5, %v17519_v14  ;;  %v17525_v50 = vadd.f32 %v13660_v42, %v17317_v55  ;;  %v17535_v60 = vadd.f32 %v17317_v55, %v5593_v40 }
 0x76e   : > { %v5805_v33 = vor.u32 %v5803_v54, %v5802_v17  ;;  %v17528_v59 = vadd.f32 %v13661_v46, %v17317_v55  ;;  %v5596_v39 = vpop.f32.mrb[23].mxu0  ;;  %v5990_v34 = vor.u32 %v5989_v56, %v5985_v49  ;;  %v17542_v54 = vsel %vm15745_vm3, %v5802_v17, 0 }
 0x76f   : > { %20072 = vst [vmem:[#allocation24_spill] sm:$0xff] %v17525_v50  ;;  %v5798_v63 = vor.u32 %v5796_v31, %v5795_v47  ;;  %v17532_v44 = vsel %vm15745_vm3, %v5795_v47, 0  ;;  %20074 = vst [vmem:[#allocation26_spill] sm:$0xff] %v17535_v60  ;;  %v17538_v11 = vadd.f32 %v17317_v55, %v5596_v39  ;;  %v5997_v31 = vshrl.u32 %v17513_v53, 16 }
 0x770   : > { %20073 = vst [vmem:[#allocation23_spill] sm:$0xff] %v17528_v59  ;;  %v5731_v46 = vpack.c.bf16 %v17528_v59, %v17525_v50  ;;  %v17547_v49 = vsel %vm1003_vm4, %v5990_v34, %v5994_v1  ;;  %v6016_v40 = vshll.u32 %v17532_v44, 16  ;;  %v6001_v10 = vrot.slane %v5999_v20, 1 }
 0x771   : > { %20075 = vst [vmem:[#allocation25_spill] sm:$0xff] %v17538_v11  ;;  %v17552_v47 = vsel %vm15745_vm3, 0, %v5798_v63  ;;  %v5730_v25 = vpack.c.bf16 %v17538_v11, %v17535_v60  ;;  %13685 = vmatmul.mubr.msk.bf16.gmra.mrb[76].mxu1 %vm1196_vm5, %v17547_v49  ;;  %v17561_v42 = vsel %vm15745_vm3, 0, %v5805_v33  ;;  %v6006_v56 = vrot.slane %v6004_v4, 1 }
 0x772   : > { %v5814_v17 = vshrl.u32 %v5731_v46, 16  ;;  %v6011_v1 = vshll.u32 %v17552_v47, 16  ;;  %v6028_v39 = vshll.u32 %v17542_v54, 16  ;;  %v5817_v34 = vshll.u32 %v5731_v46, 16 }
 0x773   : > { %v5807_v63 = vshrl.u32 %v5730_v25, 16  ;;  %v6002_v50 = vor.u32 %v6001_v10, %v5997_v31  ;;  %v13664_v59 = vpop.f32.mrb[24].mxu0  ;;  %v5810_v60 = vshll.u32 %v5730_v25, 16  ;;  %v6009_v3 = vshrl.u32 %v17552_v47, 16 }
 0x774   : > { %v5816_v52 = vrot.slane %v5814_v17, 7  ;;  %v5609_v11 = vpop.f32.mrb[25].mxu0  ;;  %v6013_v20 = vrot.slane %v6011_v1, 1  ;;  %v6018_v4 = vrot.slane %v6016_v40, 1  ;;  %v6023_v28 = vshll.u32 %v17561_v42, 16 }
 0x775   : > { %v5809_v32 = vrot.slane %v5807_v63, 7  ;;  %v17567_v33 = vsel %vm1003_vm4, %v6002_v50, %v6006_v56  ;;  %v13665_v0 = vpop.f32.mrb[26].mxu0  ;;  %v17573_v46 = vadd.f32 %v13664_v59, %v17317_v55  ;;  %v17583_v40 = vadd.f32 %v17317_v55, %v5609_v11 }
 0x776   : > { %v5819_v62 = vor.u32 %v5817_v34, %v5816_v52  ;;  %13688 = vmatprep.mubr.msk.bf16.mxu1 %vm1196_vm5, %v17567_v33  ;;  %v17576_v31 = vadd.f32 %v13665_v0, %v17317_v55  ;;  %v5612_v25 = vpop.f32.mrb[27].mxu0  ;;  %v6014_v10 = vor.u32 %v6013_v20, %v6009_v3  ;;  %v17590_v59 = vsel %vm15745_vm3, %v5816_v52, 0 }
 0x777   : > { %20076 = vst [vmem:[#allocation28_spill] sm:$0xff] %v17573_v46  ;;  %v5812_v17 = vor.u32 %v5810_v60, %v5809_v32  ;;  %v17580_v50 = vsel %vm15745_vm3, %v5809_v32, 0  ;;  %20078 = vst [vmem:[#allocation30_spill] sm:$0xff] %v17583_v40  ;;  %v17586_v56 = vadd.f32 %v17317_v55, %v5612_v25  ;;  %v6021_v60 = vshrl.u32 %v17561_v42, 16 }
 0x778   : > { %20077 = vst [vmem:[#allocation27_spill] sm:$0xff] %v17576_v31  ;;  %v5733_v0 = vpack.c.bf16 %v17576_v31, %v17573_v46  ;;  %v17595_v3 = vsel %vm1003_vm4, %v6014_v10, %v6018_v4  ;;  %v6025_v52 = vrot.slane %v6023_v28, 1  ;;  %v6030_v1 = vrot.slane %v6028_v39, 1 }
 0x779   : > { %20079 = vst [vmem:[#allocation29_spill] sm:$0xff] %v17586_v56  ;;  %v17600_v32 = vsel %vm15745_vm3, 0, %v5812_v17  ;;  %v5732_v11 = vpack.c.bf16 %v17586_v56, %v17583_v40  ;;  %13689 = vmatmul.mubr.msk.bf16.gmra.mrb[80].mxu1 %vm1196_vm5, %v17595_v3  ;;  %v17608_v34 = vsel %vm15745_vm3, 0, %v5819_v62  ;;  %v6040_v63 = vshll.u32 %v17580_v50, 16 }
 0x77a   : > { %v5828_v20 = vshrl.u32 %v5733_v0, 16  ;;  %v6035_v4 = vshll.u32 %v17600_v32, 16  ;;  %v6052_v25 = vshll.u32 %v17590_v59, 16  ;;  %v5831_v10 = vshll.u32 %v5733_v0, 16 }
 0x77b   : > { %v5821_v17 = vshrl.u32 %v5732_v11, 16  ;;  %v6026_v46 = vor.u32 %v6025_v52, %v6021_v60  ;;  %v13668_v40 = vpop.f32.mrb[28].mxu0  ;;  %v6033_v39 = vshrl.u32 %v17600_v32, 16  ;;  %v5824_v43 = vshll.u32 %v5732_v11, 16 }
 0x77c   : > { %v5830_v56 = vrot.slane %v5828_v20, 7  ;;  %v17614_v31 = vadd.f32 %v13668_v40, %v17317_v55  ;;  %v5625_v28 = vpop.f32.mrb[29].mxu0  ;;  %v6037_v62 = vrot.slane %v6035_v4, 1  ;;  %v6047_v8 = vshll.u32 %v17608_v34, 16 }
 0x77d   : > { %v5823_v29 = vrot.slane %v5821_v17, 7  ;;  %v17618_v18 = vsel %vm1003_vm4, %v6026_v46, %v6030_v1  ;;  %v13669_v19 = vpop.f32.mrb[30].mxu0  ;;  %v6042_v20 = vrot.slane %v6040_v63, 1  ;;  %v17631_v46 = vadd.f32 %v17317_v55, %v5625_v28 }
 0x77e   : > { %v5833_v0 = vor.u32 %v5831_v10, %v5830_v56  ;;  %13692 = vmatprep.mubr.msk.bf16.mxu1 %vm1196_vm5, %v17618_v18  ;;  %v17624_v60 = vadd.f32 %v13669_v19, %v17317_v55  ;;  %v5628_v40 = vpop.f32.mrb[31].mxu0  ;;  %v6038_v52 = vor.u32 %v6037_v62, %v6033_v39  ;;  %v17638_v4 = vsel %vm15745_vm3, %v5830_v56, 0 }
 0x77f   : > { %v5826_v6 = vor.u32 %v5824_v43, %v5823_v29  ;;  %v17628_v11 = vsel %vm15745_vm3, %v5823_v29, 0  ;;  %20080 = vst [vmem:[#allocation32_spill] sm:$0xff] %v17631_v46  ;;  %v17634_v1 = vadd.f32 %v17317_v55, %v5628_v40  ;;  %v6045_v63 = vshrl.u32 %v17608_v34, 16 }
 0x780   : > { %v17641_v19 = vsel %vm1003_vm4, %v6038_v52, %v6042_v20  ;;  %v17646_v43 = vsel %vm15745_vm3, 0, %v5833_v0  ;;  %v6049_v56 = vrot.slane %v6047_v8, 1  ;;  %v6064_v10 = vshll.u32 %v17628_v11, 16 }
 0x781   : > { %20081 = vst [vmem:[#allocation31_spill] sm:$0xff] %v17634_v1  ;;  %v17650_v29 = vsel %vm15745_vm3, 0, %v5826_v6  ;;  %v5734_v55 = vpack.c.bf16 %v17634_v1, %v17631_v46  ;;  %13693 = vmatmul.mubr.msk.bf16.gmra.mrb[84].mxu1 %vm1196_vm5, %v17641_v19  ;;  %v6054_v62 = vrot.slane %v6052_v25, 1  ;;  %v6076_v0 = vshll.u32 %v17638_v4, 16 }
 0x782   : > { %v6059_v17 = vshll.u32 %v17650_v29, 16  ;;  %v6050_v39 = vor.u32 %v6049_v56, %v6045_v63  ;;  %v6057_v40 = vshrl.u32 %v17650_v29, 16  ;;  %v6071_v52 = vshll.u32 %v17646_v43, 16 }
 0x783   : > { %v5835_v28 = vshrl.u32 %v5734_v55, 16  ;;  %v5838_v46 = vshll.u32 %v5734_v55, 16  ;;  %v6066_v12 = vrot.slane %v6064_v10, 1  ;;  %v6069_v63 = vshrl.u32 %v17646_v43, 16 }
 0x784   : > { %v6061_v6 = vrot.slane %v6059_v17, 1  ;;  %v17662_v1 = vsel %vm1003_vm4, %v6050_v39, %v6054_v62  ;;  %v6073_v25 = vrot.slane %v6071_v52, 1 }
 0x785   : > { %v5837_v20 = vrot.slane %v5835_v28, 7  ;;  %13696 = vmatprep.mubr.msk.bf16.mxu1 %vm1196_vm5, %v17662_v1  ;;  %v6078_v28 = vrot.slane %v6076_v0, 1 }
 0x786   : > { %v6062_v8 = vor.u32 %v6061_v6, %v6057_v40  ;;  %v6074_v55 = vor.u32 %v6073_v25, %v6069_v63  ;;  %v6528_v63 = vrot.slane %v17357_v48, 1  ;;  %v6526_v25 = vrot.slane %v17350_v9, 1 }
 0x787   : > { %v5840_v56 = vor.u32 %v5838_v46, %v5837_v20  ;;  %v17669_v41 = vsel %vm15745_vm3, %v5837_v20, 0  ;;  %v6616_v20 = vsel %vm966_vm1, %v17406_v26, 0  ;;  %v6525_v26 = vrot.slane %v17364_v37, 1 }
 0x788   : > { %v17672_v17 = vsel %vm1003_vm4, %v6062_v8, %v6066_v12  ;;  %v6088_v10 = vshll.u32 %v17669_v41, 16  ;;  %v17682_v46 = vsel %vm1003_vm4, %v6074_v55, %v6078_v28  ;;  %v5713_v8 = vld [vmem:[%s19886_s7 + $0x3] sm:$0x1]  ;;  %v6529_v55 = vrot.slane %v17346_v5, 1 }
 0x789   : > { %v17676_v39 = vsel %vm15745_vm3, 0, %v5840_v56  ;;  %13697 = vmatmul.mubr.msk.bf16.gmra.mrb[88].mxu1 %vm1196_vm5, %v17672_v17  ;;  %v6815_v56 = vsel %vm966_vm1, %v5713_v8, 0  ;;  %v17739_v28 = vsel %vm1638_vm6, %v6525_v26, %v6526_v25  ;;  %v6531_v5 = vrot.slane %v17410_v51, 1 }
 0x78a   : > { %v6083_v62 = vshll.u32 %v17676_v39, 16  ;;  %13700 = vmatprep.mubr.msk.bf16.mxu1 %vm1196_vm5, %v17682_v46  ;;  %v6081_v12 = vshrl.u32 %v17676_v39, 16  ;;  %v6090_v6 = vrot.slane %v6088_v10, 1  ;;  %v5714_v10 = vld [vmem:[%s19886_s7 + $0x4] sm:$0x1]  ;;  %v6534_v9 = vrot.slane %v17392_v21, 1 }
 0x78b   : > { %v6543_v25 = vrot.slane %v17504_v35, 1 }
 0x78c   : > { %v6085_v0 = vrot.slane %v6083_v62, 1  ;;  %v17747_v62 = vsel %vm1638_vm6, %v6528_v63, %v6529_v55 }
 0x78e   : > { %v6086_v40 = vor.u32 %v6085_v0, %v6081_v12  ;;  %v6532_v12 = vrot.slane %v17382_v30, 1  ;;  %v6535_v0 = vrot.slane %v17396_v61, 1  ;;  %v6538_v30 = vrot.slane %v17437_v27, 1 }
 0x78f   : > { %v6541_v61 = vrot.slane %v17447_v45, 1  ;;  %v6544_v27 = vrot.slane %v17484_v58, 1  ;;  %v6547_v45 = vrot.slane %v17494_v36, 1  ;;  %v6550_v58 = vrot.slane %v17532_v44, 1 }
 0x790   : > { %v17689_v52 = vsel %vm1003_vm4, %v6086_v40, %v6090_v6  ;;  %v17757_v40 = vsel %vm1638_vm6, %v6531_v5, %v6532_v12  ;;  %v17762_v6 = vsel %vm1638_vm6, %v6534_v9, %v6535_v0  ;;  %v6549_v9 = vrot.slane %v17552_v47, 1 }
 0x791   : > { %13701 = vmatmul.mubr.msk.bf16.gmra.mrb[92].mxu1 %vm1196_vm5, %v17689_v52  ;;  %v17785_v55 = vsel %vm1638_vm6, %v6543_v25, %v6544_v27  ;;  %v6552_v12 = vrot.slane %v17561_v42, 1  ;;  %v6553_v36 = vrot.slane %v17542_v54, 1  ;;  %v6556_v44 = vrot.slane %v17580_v50, 1 }
 0x792   : > { %13706 = vmatprep.mubr.msk.bf16.mxu1 %vm1196_vm5, %v15751_v23  ;;  %v17799_v0 = vsel %vm1638_vm6, %v6549_v9, %v6550_v58  ;;  %v6559_v54 = vrot.slane %v17590_v59, 1  ;;  %v6564_v27 = vrot.slane %v17646_v43, 1  ;;  %v6562_v50 = vrot.slane %v17628_v11, 1 }
 0x793   : > { %v6565_v59 = vrot.slane %v17638_v4, 1  ;;  %v6568_v58 = vrot.slane %v17669_v41, 1  ;;  %v7025_v4 = vsel %vm966_vm1, %v5714_v10, 0  ;;  %v5735_v41 = vpack.c.bf16 %v17624_v60, %v17614_v31 }
 0x795   : > { %v17832_v9 = vsel %vm1638_vm6, %v6564_v27, %v6565_v59 }
 0x799   : > { %13707 = vmatmul.mubr.msk.bf16.vlgmr.msra.gmra.mrb[64].mxu1 %vm1196_vm5, %v17364_v37 }
 0x79a   : > { %13739 = vmatpush3.bf16.msra.mxu1 %v6616_v20  ;;  %13710 = vmatprep.mubr.msk.bf16.mxu1 %vm1196_vm5, %v17357_v48  ;;  %v6537_v20 = vrot.slane %v17456_v2, 1 }
 0x79b   : > { %15361 = vmatprep.subr.msk.bf16.mxu1 %vm966_vm1, %v5713_v8  ;;  %v6540_v8 = vrot.slane %v17465_v24, 1 }
 0x79c   : > { %v17771_v26 = vsel %vm1638_vm6, %v6537_v20, %v6538_v30  ;;  %v17804_v20 = vsel %vm1638_vm6, %v6552_v12, %v6553_v36  ;;  %v6558_v30 = vrot.slane %v17608_v34, 1  ;;  %v6567_v12 = vrot.slane %v17676_v39, 1  ;;  %v5715_v36 = vld [vmem:[%s19886_s7 + $0x5] sm:$0x1] }
 0x79d   : > { %v17776_v63 = vsel %vm1638_vm6, %v6540_v8, %v6541_v61  ;;  %v6555_v8 = vrot.slane %v17600_v32, 1 }
 0x79e   : > { %v17818_v25 = vsel %vm1638_vm6, %v6558_v30, %v6559_v54  ;;  %v17839_v11 = vsel %vm1638_vm6, %v6567_v12, %v6568_v58  ;;  %v7229_v54 = vsel %vm966_vm1, %v5715_v36, 0 }
 0x79f   : > { %v17813_v61 = vsel %vm1638_vm6, %v6555_v8, %v6556_v44  ;;  %v5845_v8 = vshll.u32 %v5735_v41, 16 }
 0x7a1   : > { %13711 = vmatmul.mubr.msk.bf16.gmra.mrb[68].mxu1 %vm1196_vm5, %v17410_v51 }
 0x7a2   : > { %13714 = vmatprep.mubr.msk.bf16.mxu1 %vm1196_vm5, %v17392_v21 }
 0x7a9   : > { %13715 = vmatmul.mubr.msk.bf16.gmra.mrb[72].mxu1 %vm1196_vm5, %v17456_v2 }
 0x7aa   : > { %13718 = vmatprep.mubr.msk.bf16.mxu1 %vm1196_vm5, %v17465_v24 }
 0x7b1   : > { %13719 = vmatmul.mubr.msk.bf16.gmra.mrb[76].mxu1 %vm1196_vm5, %v17504_v35 }
 0x7b2   : > { %13722 = vmatprep.mubr.msk.bf16.mxu1 %vm1196_vm5, %v17513_v53 }
 0x7b9   : > { %13723 = vmatmul.mubr.msk.bf16.gmra.mrb[80].mxu1 %vm1196_vm5, %v17552_v47 }
 0x7ba   : > { %13726 = vmatprep.mubr.msk.bf16.mxu1 %vm1196_vm5, %v17561_v42 }
 0x7c1   : > { %13727 = vmatmul.mubr.msk.bf16.gmra.mrb[84].mxu1 %vm1196_vm5, %v17600_v32 }
 0x7c2   : > { %13730 = vmatprep.mubr.msk.bf16.mxu1 %vm1196_vm5, %v17608_v34 }
 0x7c9   : > { %13731 = vmatmul.mubr.msk.bf16.gmra.mrb[88].mxu1 %vm1196_vm5, %v17650_v29 }
 0x7ca   : > { %13734 = vmatprep.mubr.msk.bf16.mxu1 %vm1196_vm5, %v17646_v43 }
 0x7d1   : > { %13735 = vmatmul.mubr.msk.bf16.gmra.mrb[92].mxu1 %vm1196_vm5, %v17676_v39 }
 0x7d2   : > { %13740 = vmatprep.mubr.msk.bf16.mxu1 %vm1196_vm5, %v16187_v7 }
 0x7d9   : > { %13741 = vmatmul.mubr.msk.bf16.vlgmr.msra.gmra.mrb[64].mxu1 %vm1196_vm5, %v17739_v28 }
 0x7da   : > { %13773 = vmatpush3.bf16.msra.mxu1 %v6815_v56  ;;  %13744 = vmatprep.mubr.msk.bf16.mxu1 %vm1196_vm5, %v17747_v62  ;;  %v6546_v56 = vrot.slane %v17513_v53, 1 }
 0x7db   : > { %15362 = vmatprep.subr.msk.bf16.mxu1 %vm966_vm1, %v5714_v10 }
 0x7dc   : > { %v17790_v5 = vsel %vm1638_vm6, %v6546_v56, %v6547_v45  ;;  %v6561_v56 = vrot.slane %v17650_v29, 1 }
 0x7de   : > { %v17827_v45 = vsel %vm1638_vm6, %v6561_v56, %v6562_v50  ;;  %v5716_v56 = vld [vmem:[%s19886_s7 + $0x6] sm:$0x1] }
 0x7e1   : > { %13745 = vmatmul.mubr.msk.bf16.gmra.mrb[68].mxu1 %vm1196_vm5, %v17757_v40 }
 0x7e2   : > { %13748 = vmatprep.mubr.msk.bf16.mxu1 %vm1196_vm5, %v17762_v6 }
 0x7e9   : > { %13749 = vmatmul.mubr.msk.bf16.gmra.mrb[72].mxu1 %vm1196_vm5, %v17771_v26 }
 0x7ea   : > { %13752 = vmatprep.mubr.msk.bf16.mxu1 %vm1196_vm5, %v17776_v63 }
 0x7f1   : > { %13753 = vmatmul.mubr.msk.bf16.gmra.mrb[76].mxu1 %vm1196_vm5, %v17785_v55 }
 0x7f2   : > { %13756 = vmatprep.mubr.msk.bf16.mxu1 %vm1196_vm5, %v17790_v5 }
 0x7f9   : > { %13757 = vmatmul.mubr.msk.bf16.gmra.mrb[80].mxu1 %vm1196_vm5, %v17799_v0 }
 0x7fa   : > { %13760 = vmatprep.mubr.msk.bf16.mxu1 %vm1196_vm5, %v17804_v20 }
 0x801   : > { %13761 = vmatmul.mubr.msk.bf16.gmra.mrb[84].mxu1 %vm1196_vm5, %v17813_v61 }
 0x802   : > { %13764 = vmatprep.mubr.msk.bf16.mxu1 %vm1196_vm5, %v17818_v25 }
 0x809   : > { %13765 = vmatmul.mubr.msk.bf16.gmra.mrb[88].mxu1 %vm1196_vm5, %v17827_v45 }
 0x80a   : > { %13768 = vmatprep.mubr.msk.bf16.mxu1 %vm1196_vm5, %v17832_v9 }
 0x811   : > { %13769 = vmatmul.mubr.msk.bf16.gmra.mrb[92].mxu1 %vm1196_vm5, %v17839_v11 }
 0x812   : > { %13774 = vmatprep.mubr.msk.bf16.mxu1 %vm1196_vm5, %v17364_v37  ;;  %v5842_v37 = vshrl.u32 %v5735_v41, 16  ;;  %v7425_v41 = vsel %vm966_vm1, %v5716_v56, 0 }
 0x814   : > { %v5844_v10 = vrot.slane %v5842_v37, 7  ;;  %v5717_v37 = vld [vmem:[%s19886_s7 + $0x7] sm:$0x1] }
 0x816   : > { %v5847_v30 = vor.u32 %v5845_v8, %v5844_v10  ;;  %v5911_v27 = vsel %vm15745_vm3, %v5844_v10, 0 }
 0x817   : > { %v7017_v59 = vshll.u32 %v5911_v27, 16  ;;  %v7223_v10 = vrot.slane %v5911_v27, 1 }
 0x818   : > { %v17882_v44 = vsel %vm15745_vm3, 0, %v5847_v30  ;;  %v7621_v30 = vsel %vm966_vm1, %v5717_v37, 0 }
 0x819   : > { %13775 = vmatmul.mubr.msk.bf16.vlgmr.msra.gmra.mrb[64].mxu1 %vm1196_vm5, %v17357_v48  ;;  %v7010_v12 = vshrl.u32 %v17882_v44, 16 }
 0x81a   : > { %13807 = vmatpush3.bf16.msra.mxu1 %v7025_v4  ;;  %13778 = vmatprep.mubr.msk.bf16.mxu1 %vm1196_vm5, %v17410_v51  ;;  %v7019_v4 = vrot.slane %v7017_v59, 1 }
 0x81b   : > { %15363 = vmatprep.subr.msk.bf16.mxu1 %vm966_vm1, %v5715_v36 }
 0x821   : > { %13779 = vmatmul.mubr.msk.bf16.gmra.mrb[68].mxu1 %vm1196_vm5, %v17392_v21 }
 0x822   : > { %13782 = vmatprep.mubr.msk.bf16.mxu1 %vm1196_vm5, %v17456_v2 }
 0x829   : > { %13783 = vmatmul.mubr.msk.bf16.gmra.mrb[72].mxu1 %vm1196_vm5, %v17465_v24 }
 0x82a   : > { %13786 = vmatprep.mubr.msk.bf16.mxu1 %vm1196_vm5, %v17504_v35 }
 0x831   : > { %13787 = vmatmul.mubr.msk.bf16.gmra.mrb[76].mxu1 %vm1196_vm5, %v17513_v53 }
 0x832   : > { %13790 = vmatprep.mubr.msk.bf16.mxu1 %vm1196_vm5, %v17552_v47 }
 0x839   : > { %13791 = vmatmul.mubr.msk.bf16.gmra.mrb[80].mxu1 %vm1196_vm5, %v17561_v42 }
 0x83a   : > { %13794 = vmatprep.mubr.msk.bf16.mxu1 %vm1196_vm5, %v17600_v32 }
 0x841   : > { %13795 = vmatmul.mubr.msk.bf16.gmra.mrb[84].mxu1 %vm1196_vm5, %v17608_v34 }
 0x842   : > { %13798 = vmatprep.mubr.msk.bf16.mxu1 %vm1196_vm5, %v17650_v29 }
 0x849   : > { %13799 = vmatmul.mubr.msk.bf16.gmra.mrb[88].mxu1 %vm1196_vm5, %v17646_v43 }
 0x84a   : > { %13802 = vmatprep.mubr.msk.bf16.mxu1 %vm1196_vm5, %v17676_v39 }
 0x851   : > { %13803 = vmatmul.mubr.msk.bf16.gmra.mrb[92].mxu1 %vm1196_vm5, %v17882_v44 }
 0x852   : > { %13808 = vmatprep.mubr.msk.bf16.mxu1 %vm1196_vm5, %v17401_v15  ;;  %v7012_v15 = vshll.u32 %v17882_v44, 16 }
 0x854   : > { %v7014_v50 = vrot.slane %v7012_v15, 1 }
 0x856   : > { %v7015_v58 = vor.u32 %v7014_v50, %v7010_v12 }
 0x858   : > { %v7020_v36 = vsel %vm1003_vm4, %v7015_v58, %v7019_v4 }
 0x859   : > { %13809 = vmatmul.mubr.msk.bf16.vlgmr.msra.gmra.mrb[64].mxu1 %vm1196_vm5, %v17418_v38 }
 0x85a   : > { %13841 = vmatpush3.bf16.msra.mxu1 %v7229_v54  ;;  %13812 = vmatprep.mubr.msk.bf16.mxu1 %vm1196_vm5, %v17452_v57  ;;  %v5718_v54 = vld [vmem:[%s19886_s7 + $0x8] sm:$0x1] }
 0x85b   : > { %15364 = vmatprep.subr.msk.bf16.mxu1 %vm966_vm1, %v5716_v56 }
 0x861   : > { %13813 = vmatmul.mubr.msk.bf16.gmra.mrb[68].mxu1 %vm1196_vm5, %v17470_v16 }
 0x862   : > { %13816 = vmatprep.mubr.msk.bf16.mxu1 %vm1196_vm5, %v17499_v13 }
 0x869   : > { %13817 = vmatmul.mubr.msk.bf16.gmra.mrb[72].mxu1 %vm1196_vm5, %v17519_v14 }
 0x86a   : > { %13820 = vmatprep.mubr.msk.bf16.mxu1 %vm1196_vm5, %v17547_v49 }
 0x871   : > { %13821 = vmatmul.mubr.msk.bf16.gmra.mrb[76].mxu1 %vm1196_vm5, %v17567_v33 }
 0x872   : > { %13824 = vmatprep.mubr.msk.bf16.mxu1 %vm1196_vm5, %v17595_v3 }
 0x879   : > { %13825 = vmatmul.mubr.msk.bf16.gmra.mrb[80].mxu1 %vm1196_vm5, %v17618_v18 }
 0x87a   : > { %13828 = vmatprep.mubr.msk.bf16.mxu1 %vm1196_vm5, %v17641_v19 }
 0x881   : > { %13829 = vmatmul.mubr.msk.bf16.gmra.mrb[84].mxu1 %vm1196_vm5, %v17662_v1 }
 0x882   : > { %13832 = vmatprep.mubr.msk.bf16.mxu1 %vm1196_vm5, %v17672_v17 }
 0x889   : > { %13833 = vmatmul.mubr.msk.bf16.gmra.mrb[88].mxu1 %vm1196_vm5, %v17682_v46 }
 0x88a   : > { %13836 = vmatprep.mubr.msk.bf16.mxu1 %vm1196_vm5, %v17689_v52 }
 0x891   : > { %13837 = vmatmul.mubr.msk.bf16.gmra.mrb[92].mxu1 %vm1196_vm5, %v7020_v36 }
 0x892   : > { %13842 = vmatprep.mubr.msk.bf16.mxu1 %vm1196_vm5, %v17739_v28  ;;  %v7222_v28 = vrot.slane %v17882_v44, 1 }
 0x894   : > { %v7224_v8 = vsel %vm1638_vm6, %v7222_v28, %v7223_v10 }
 0x899   : > { %13843 = vmatmul.mubr.msk.bf16.vlgmr.msra.gmra.mrb[64].mxu1 %vm1196_vm5, %v17747_v62 }
 0x89a   : > { %13875 = vmatpush3.bf16.msra.mxu1 %v7425_v41  ;;  %13846 = vmatprep.mubr.msk.bf16.mxu1 %vm1196_vm5, %v17757_v40 }
 0x89b   : > { %15365 = vmatprep.subr.msk.bf16.mxu1 %vm966_vm1, %v5717_v37 }
 0x8a1   : > { %13847 = vmatmul.mubr.msk.bf16.gmra.mrb[68].mxu1 %vm1196_vm5, %v17762_v6 }
 0x8a2   : > { %13850 = vmatprep.mubr.msk.bf16.mxu1 %vm1196_vm5, %v17771_v26 }
 0x8a9   : > { %13851 = vmatmul.mubr.msk.bf16.gmra.mrb[72].mxu1 %vm1196_vm5, %v17776_v63 }
 0x8aa   : > { %13854 = vmatprep.mubr.msk.bf16.mxu1 %vm1196_vm5, %v17785_v55 }
 0x8b1   : > { %13855 = vmatmul.mubr.msk.bf16.gmra.mrb[76].mxu1 %vm1196_vm5, %v17790_v5 }
 0x8b2   : > { %13858 = vmatprep.mubr.msk.bf16.mxu1 %vm1196_vm5, %v17799_v0 }
 0x8b9   : > { %13859 = vmatmul.mubr.msk.bf16.gmra.mrb[80].mxu1 %vm1196_vm5, %v17804_v20 }
 0x8ba   : > { %13862 = vmatprep.mubr.msk.bf16.mxu1 %vm1196_vm5, %v17813_v61 }
 0x8c1   : > { %13863 = vmatmul.mubr.msk.bf16.gmra.mrb[84].mxu1 %vm1196_vm5, %v17818_v25 }
 0x8c2   : > { %13866 = vmatprep.mubr.msk.bf16.mxu1 %vm1196_vm5, %v17827_v45 }
 0x8c9   : > { %13867 = vmatmul.mubr.msk.bf16.gmra.mrb[88].mxu1 %vm1196_vm5, %v17832_v9 }
 0x8ca   : > { %13870 = vmatprep.mubr.msk.bf16.mxu1 %vm1196_vm5, %v17839_v11 }
 0x8d1   : > { %13871 = vmatmul.mubr.msk.bf16.gmra.mrb[92].mxu1 %vm1196_vm5, %v7224_v8 }
 0x8d2   : > { %13876 = vmatprep.mubr.msk.bf16.mxu1 %vm1196_vm5, %v17357_v48  ;;  %v7817_v48 = vsel %vm966_vm1, %v5718_v54, 0 }
 0x8d9   : > { %13877 = vmatmul.mubr.msk.bf16.vlgmr.msra.gmra.mrb[64].mxu1 %vm1196_vm5, %v17410_v51 }
 0x8da   : > { %13909 = vmatpush3.bf16.msra.mxu1 %v7621_v30  ;;  %13880 = vmatprep.mubr.msk.bf16.mxu1 %vm1196_vm5, %v17392_v21  ;;  %v20082_v21 = vld [vmem:[#allocation2_spill] sm:$0xff] }
 0x8db   : > { %15366 = vmatprep.subr.msk.bf16.mxu1 %vm966_vm1, %v5718_v54  ;;  %vm11646_vm1 = vcmask 785408  }
 0x8e1   : > { %13881 = vmatmul.mubr.msk.bf16.gmra.mrb[68].mxu1 %vm1196_vm5, %v17456_v2 }
 0x8e2   : > { %13884 = vmatprep.mubr.msk.bf16.mxu1 %vm1196_vm5, %v17465_v24 }
 0x8e9   : > { %13885 = vmatmul.mubr.msk.bf16.gmra.mrb[72].mxu1 %vm1196_vm5, %v17504_v35 }
 0x8ea   : > { %13888 = vmatprep.mubr.msk.bf16.mxu1 %vm1196_vm5, %v17513_v53 }
 0x8f1   : > { %13889 = vmatmul.mubr.msk.bf16.gmra.mrb[76].mxu1 %vm1196_vm5, %v17552_v47 }
 0x8f2   : > { %13892 = vmatprep.mubr.msk.bf16.mxu1 %vm1196_vm5, %v17561_v42 }
 0x8f9   : > { %13893 = vmatmul.mubr.msk.bf16.gmra.mrb[80].mxu1 %vm1196_vm5, %v17600_v32 }
 0x8fa   : > { %13896 = vmatprep.mubr.msk.bf16.mxu1 %vm1196_vm5, %v17608_v34 }
 0x901   : > { %13897 = vmatmul.mubr.msk.bf16.gmra.mrb[84].mxu1 %vm1196_vm5, %v17650_v29 }
 0x902   : > { %13900 = vmatprep.mubr.msk.bf16.mxu1 %vm1196_vm5, %v17646_v43 }
 0x909   : > { %13901 = vmatmul.mubr.msk.bf16.gmra.mrb[88].mxu1 %vm1196_vm5, %v17676_v39 }
 0x90a   : > { %13904 = vmatprep.mubr.msk.bf16.mxu1 %vm1196_vm5, %v17882_v44 }
 0x911   : > { %13905 = vmatmul.mubr.msk.bf16.gmra.mrb[92].mxu1 %vm1196_vm5, %v15751_v23 }
 0x912   : > { %13910 = vmatprep.mubr.msk.bf16.mxu1 %vm1196_vm5, %v17418_v38  ;;  %v18073_v38 = vld [vmem:[%s19887_s8] ss:$0 sm:$0xff] }
 0x919   : > { %13911 = vmatmul.mubr.msk.bf16.vlgmr.msra.gmra.mrb[64].mxu1 %vm1196_vm5, %v17452_v57 }
 0x91a   : > { %13943 = vmatpush3.bf16.msra.mxu1 %v7817_v48  ;;  %13914 = vmatprep.mubr.msk.bf16.mxu1 %vm1196_vm5, %v17470_v16 }
 0x921   : > { %13915 = vmatmul.mubr.msk.bf16.gmra.mrb[68].mxu1 %vm1196_vm5, %v17499_v13 }
 0x922   : > { %13918 = vmatprep.mubr.msk.bf16.mxu1 %vm1196_vm5, %v17519_v14 }
 0x929   : > { %13919 = vmatmul.mubr.msk.bf16.gmra.mrb[72].mxu1 %vm1196_vm5, %v17547_v49 }
 0x92a   : > { %13922 = vmatprep.mubr.msk.bf16.mxu1 %vm1196_vm5, %v17567_v33 }
 0x931   : > { %13923 = vmatmul.mubr.msk.bf16.gmra.mrb[76].mxu1 %vm1196_vm5, %v17595_v3 }
 0x932   : > { %13926 = vmatprep.mubr.msk.bf16.mxu1 %vm1196_vm5, %v17618_v18  ;;  %v8258_v18 = vld [vmem:[%s19888_s9] sm:$0xf] }
 0x933   : > { %15367 = vmatprep.subr.msk.bf16.mxu0 %vm3792_vm7, %v8258_v18  ;;  %v8315_v51 = vsel %vm3792_vm7, %v8258_v18, 0 }
 0x934   : > { %13977 = vmatpush3.bf16.msra.mxu0 %v8315_v51 }
 0x939   : > { %13927 = vmatmul.mubr.msk.bf16.gmra.mrb[80].mxu1 %vm1196_vm5, %v17641_v19 }
 0x93a   : > { %13930 = vmatprep.mubr.msk.bf16.mxu1 %vm1196_vm5, %v17662_v1 }
 0x941   : > { %13931 = vmatmul.mubr.msk.bf16.gmra.mrb[84].mxu1 %vm1196_vm5, %v17672_v17 }
 0x942   : > { %13934 = vmatprep.mubr.msk.bf16.mxu1 %vm1196_vm5, %v17682_v46 }
 0x949   : > { %13935 = vmatmul.mubr.msk.bf16.gmra.mrb[88].mxu1 %vm1196_vm5, %v17689_v52 }
 0x94a   : > { %13938 = vmatprep.mubr.msk.bf16.mxu1 %vm1196_vm5, %v7020_v36 }
 0x951   : > { %13939 = vmatmul.mubr.msk.bf16.gmra.mrb[92].mxu1 %vm1196_vm5, %v20082_v21 }
 0x952   : > { %13944 = vmatprep.mubr.msk.bf16.mxu1 %vm1196_vm5, %v17747_v62 }
 0x959   : > { %13945 = vmatmul.mubr.msk.bf16.vlgmr.msra.gmra.mrb[64].mxu1 %vm1196_vm5, %v17757_v40 }
 0x95a   : > { %13948 = vmatprep.mubr.msk.bf16.mxu1 %vm1196_vm5, %v17762_v6 }
 0x961   : > { %13949 = vmatmul.mubr.msk.bf16.gmra.mrb[68].mxu1 %vm1196_vm5, %v17771_v26 }
 0x962   : > { %13952 = vmatprep.mubr.msk.bf16.mxu1 %vm1196_vm5, %v17776_v63 }
 0x969   : > { %13953 = vmatmul.mubr.msk.bf16.gmra.mrb[72].mxu1 %vm1196_vm5, %v17785_v55 }
 0x96a   : > { %13956 = vmatprep.mubr.msk.bf16.mxu1 %vm1196_vm5, %v17790_v5 }
 0x971   : > { %13957 = vmatmul.mubr.msk.bf16.gmra.mrb[76].mxu1 %vm1196_vm5, %v17799_v0 }
 0x972   : > { %13960 = vmatprep.mubr.msk.bf16.mxu1 %vm1196_vm5, %v17804_v20 }
 0x979   : > { %13961 = vmatmul.mubr.msk.bf16.gmra.mrb[80].mxu1 %vm1196_vm5, %v17813_v61 }
 0x97a   : > { %13964 = vmatprep.mubr.msk.bf16.mxu1 %vm1196_vm5, %v17818_v25 }
 0x981   : > { %13965 = vmatmul.mubr.msk.bf16.gmra.mrb[84].mxu1 %vm1196_vm5, %v17827_v45 }
 0x982   : > { %13968 = vmatprep.mubr.msk.bf16.mxu1 %vm1196_vm5, %v17832_v9 }
 0x989   : > { %13969 = vmatmul.mubr.msk.bf16.gmra.mrb[88].mxu1 %vm1196_vm5, %v17839_v11 }
 0x98a   : > { %13972 = vmatprep.mubr.msk.bf16.mxu1 %vm1196_vm5, %v7224_v8 }
 0x991   : > { %13973 = vmatmul.mubr.msk.bf16.gmra.mrb[92].mxu1 %vm1196_vm5, %v16187_v7 }
 0xa2c   : > { %v13946_v57 = vpop.f32.mrb[64].mxu1 }
 0xa2d   : > { %v7853_v2 = vpop.f32.mrb[65].mxu1  ;;  %v8020_v16 = vadd.f32 %v13946_v57, %v18073_v38 }
 0xa2e   : > { %v13947_v24 = vpop.f32.mrb[66].mxu1  ;;  %v8018_v53 = vadd.f32 %v18073_v38, %v7853_v2 }
 0xa2f   : > { %v8021_v13 = vadd.f32 %v13947_v24, %v18073_v38  ;;  %v7856_v35 = vpop.f32.mrb[67].mxu1 }
 0xa30   : > { %v8019_v14 = vadd.f32 %v18073_v38, %v7856_v35 }
 0xa31   : > { %v15476_v49 = vpack.i.bf16 %v8021_v13, %v8020_v16 }
 0xa32   : > { %v15471_v47 = vpack.i.bf16 %v8019_v14, %v8018_v53 }
 0xa33   : > { %15477 = vrot.lane.b32.xlu1 %v15476_v49, %s15610_s28 }
 0xa34   : > { %15472 = vrot.lane.b32.xlu0 %v15471_v47, %s15610_s28  ;;  %v13950_v42 = vpop.f32.mrb[68].mxu1 }
 0xa35   : > { %v7869_v33 = vpop.f32.mrb[69].mxu1  ;;  %v8024_v32 = vadd.f32 %v13950_v42, %v18073_v38 }
 0xa36   : > { %v13951_v3 = vpop.f32.mrb[70].mxu1  ;;  %v8022_v19 = vadd.f32 %v18073_v38, %v7869_v33 }
 0xa37   : > { %v8025_v34 = vadd.f32 %v13951_v3, %v18073_v38  ;;  %v7872_v1 = vpop.f32.mrb[71].mxu1 }
 0xa38   : > { %v8023_v43 = vadd.f32 %v18073_v38, %v7872_v1 }
 0xa39   : > { %v15486_v29 = vpack.i.bf16 %v8025_v34, %v8024_v32 }
 0xa3a   : > { %v15481_v17 = vpack.i.bf16 %v8023_v43, %v8022_v19 }
 0xa3b   : > { %15487 = vrot.lane.b32.xlu1 %v15486_v29, %s15610_s28 }
 0xa3c   : > { %15482 = vrot.lane.b32.xlu0 %v15481_v17, %s15610_s28  ;;  %v13954_v39 = vpop.f32.mrb[72].mxu1  ;;  %v8479_v17 = vld [vmem:[%s19890_s11 + $0x4] sm:$0xf] }
 0xa3d   : > { %v7885_v46 = vpop.f32.mrb[73].mxu1  ;;  %v8028_v62 = vadd.f32 %v13954_v39, %v18073_v38  ;;  %15368 = vmatprep.subr.msk.bf16.mxu0 %vm3792_vm7, %v8479_v17 }
 0xa3e   : > { %v13955_v52 = vpop.f32.mrb[74].mxu1  ;;  %v8026_v26 = vadd.f32 %v18073_v38, %v7885_v46 }
 0xa3f   : > { %v8029_v40 = vadd.f32 %v13955_v52, %v18073_v38  ;;  %v7888_v6 = vpop.f32.mrb[75].mxu1 }
 0xa40   : > { %v8027_v63 = vadd.f32 %v18073_v38, %v7888_v6 }
 0xa41   : > { %v15496_v55 = vpack.i.bf16 %v8029_v40, %v8028_v62 }
 0xa42   : > { %v15491_v5 = vpack.i.bf16 %v8027_v63, %v8026_v26 }
 0xa43   : > { %15497 = vrot.lane.b32.xlu1 %v15496_v55, %s15610_s28 }
 0xa44   : > { %15492 = vrot.lane.b32.xlu0 %v15491_v5, %s15610_s28  ;;  %v13958_v0 = vpop.f32.mrb[76].mxu1 }
 0xa45   : > { %v7901_v20 = vpop.f32.mrb[77].mxu1  ;;  %v8032_v25 = vadd.f32 %v13958_v0, %v18073_v38  ;;  %v20083_v0 = vld [vmem:[#allocation5_spill] sm:$0xff] }
 0xa46   : > { %v13959_v61 = vpop.f32.mrb[78].mxu1  ;;  %v8030_v11 = vadd.f32 %v18073_v38, %v7901_v20 }
 0xa47   : > { %v8033_v45 = vadd.f32 %v13959_v61, %v18073_v38  ;;  %v7904_v9 = vpop.f32.mrb[79].mxu1  ;;  %v20084_v61 = vld [vmem:[#allocation6_spill] sm:$0xff] }
 0xa48   : > { %v8031_v44 = vadd.f32 %v18073_v38, %v7904_v9  ;;  %v20085_v9 = vld [vmem:[#allocation3_spill] sm:$0xff] }
 0xa49   : > { %v15506_v56 = vpack.i.bf16 %v8033_v45, %v8032_v25 }
 0xa4a   : > { %v15501_v15 = vpack.i.bf16 %v8031_v44, %v8030_v11  ;;  %v20086_v44 = vld [vmem:[#allocation4_spill] sm:$0xff] }
 0xa4b   : > { %15507 = vrot.lane.b32.xlu1 %v15506_v56, %s15610_s28 }
 0xa4c   : > { %15502 = vrot.lane.b32.xlu0 %v15501_v15, %s15610_s28  ;;  %v13962_v27 = vpop.f32.mrb[80].mxu1 }
 0xa4d   : > { %v7917_v50 = vpop.f32.mrb[81].mxu1  ;;  %v8036_v12 = vadd.f32 %v13962_v27, %v18073_v38 }
 0xa4e   : > { %v13963_v59 = vpop.f32.mrb[82].mxu1  ;;  %v8034_v36 = vadd.f32 %v18073_v38, %v7917_v50 }
 0xa4f   : > { %v8037_v58 = vadd.f32 %v13963_v59, %v18073_v38  ;;  %v7920_v4 = vpop.f32.mrb[83].mxu1 }
 0xa50   : > { %v8035_v41 = vadd.f32 %v18073_v38, %v7920_v4 }
 0xa51   : > { %v15516_v37 = vpack.i.bf16 %v8037_v58, %v8036_v12  ;;  %v8906_v58 = vsel %vm3792_vm7, %v8479_v17, 0  ;;  %v20093_v17 = vld [vmem:[#allocation13_spill] sm:$0xff] }
 0xa52   : > { %v15511_v28 = vpack.i.bf16 %v8035_v41, %v8034_v36 }
 0xa53   : > { %15517 = vrot.lane.b32.xlu1 %v15516_v37, %s15610_s28 }
 0xa54   : > { %15512 = vrot.lane.b32.xlu0 %v15511_v28, %s15610_s28  ;;  %v13966_v10 = vpop.f32.mrb[84].mxu1 }
 0xa55   : > { %v7933_v8 = vpop.f32.mrb[85].mxu1  ;;  %v8040_v54 = vadd.f32 %v13966_v10, %v18073_v38  ;;  %v20087_v10 = vld [vmem:[#allocation9_spill] sm:$0xff] }
 0xa56   : > { %v13967_v30 = vpop.f32.mrb[86].mxu1  ;;  %v8038_v51 = vadd.f32 %v18073_v38, %v7933_v8 }
 0xa57   : > { %v8041_v48 = vadd.f32 %v13967_v30, %v18073_v38  ;;  %v7936_v18 = vpop.f32.mrb[87].mxu1  ;;  %v20088_v30 = vld [vmem:[#allocation10_spill] sm:$0xff] }
 0xa58   : > { %v8039_v57 = vadd.f32 %v18073_v38, %v7936_v18 }
 0xa59   : > { %v15526_v2 = vpack.i.bf16 %v8041_v48, %v8040_v54 }
 0xa5a   : > { %v15521_v24 = vpack.i.bf16 %v8039_v57, %v8038_v51  ;;  %v20089_v51 = vld [vmem:[#allocation7_spill] sm:$0xff] }
 0xa5b   : > { %15527 = vrot.lane.b32.xlu1 %v15526_v2, %s15610_s28  ;;  %v20090_v2 = vld [vmem:[#allocation8_spill] sm:$0xff] }
 0xa5c   : > { %15522 = vrot.lane.b32.xlu0 %v15521_v24, %s15610_s28  ;;  %v13970_v16 = vpop.f32.mrb[88].mxu1 }
 0xa5d   : > { %v7949_v13 = vpop.f32.mrb[89].mxu1  ;;  %v8044_v53 = vadd.f32 %v13970_v16, %v18073_v38 }
 0xa5e   : > { %v13971_v35 = vpop.f32.mrb[90].mxu1  ;;  %v8042_v47 = vadd.f32 %v18073_v38, %v7949_v13 }
 0xa5f   : > { %v8045_v14 = vadd.f32 %v13971_v35, %v18073_v38  ;;  %v7952_v49 = vpop.f32.mrb[91].mxu1 }
 0xa60   : > { %v8043_v42 = vadd.f32 %v18073_v38, %v7952_v49 }
 0xa61   : > { %v15536_v33 = vpack.i.bf16 %v8045_v14, %v8044_v53 }
 0xa62   : > { %v15531_v3 = vpack.i.bf16 %v8043_v42, %v8042_v47 }
 0xa63   : > { %15537 = vrot.lane.b32.xlu1 %v15536_v33, %s15610_s28 }
 0xa64   : > { %15532 = vrot.lane.b32.xlu0 %v15531_v3, %s15610_s28  ;;  %v13974_v32 = vpop.f32.mrb[92].mxu1 }
 0xa65   : > { %v7965_v34 = vpop.f32.mrb[93].mxu1  ;;  %v8048_v19 = vadd.f32 %v13974_v32, %v18073_v38  ;;  %v20091_v32 = vld [vmem:[#allocation11_spill] sm:$0xff] }
 0xa66   : > { %v13975_v1 = vpop.f32.mrb[94].mxu1  ;;  %v8046_v39 = vadd.f32 %v18073_v38, %v7965_v34 }
 0xa67   : > { %v8049_v43 = vadd.f32 %v13975_v1, %v18073_v38  ;;  %v7968_v29 = vpop.f32.mrb[95].mxu1  ;;  %v20092_v1 = vld [vmem:[#allocation12_spill] sm:$0xff] }
 0xa68   : > { %v8047_v46 = vadd.f32 %v18073_v38, %v7968_v29 }
 0xa69   : > { %v15546_v52 = vpack.i.bf16 %v8049_v43, %v8048_v19 }
 0xa6a   : > { %v15541_v62 = vpack.i.bf16 %v8047_v46, %v8046_v39  ;;  %v20094_v46 = vld [vmem:[#allocation14_spill] sm:$0xff] }
 0xa6b   : > { %15547 = vrot.lane.b32.xlu1 %v15546_v52, %s15610_s28 }
 0xa6c   : > { %15542 = vrot.lane.b32.xlu0 %v15541_v62, %s15610_s28 }
 0xaa5   : > { %v15478_v40 = vpop.permute.xlu1 %15477 }
 0xaa6   : > { %v15480_v6 = vunpack.i.h.bf16 %v15478_v40  ;;  %v15479_v26 = vunpack.i.l.bf16 %v15478_v40  ;;  %v15473_v63 = vpop.permute.xlu0 %15472 }
 0xaa7   : > { %v15475_v55 = vunpack.i.h.bf16 %v15473_v63  ;;  %v15474_v5 = vunpack.i.l.bf16 %v15473_v63 }
 0xaa8   : > { %v8181_v20 = vsel %vm1196_vm5, %v20083_v0, %v15480_v6  ;;  %v8180_v38 = vsel %vm1196_vm5, %v20084_v61, %v15479_v26 }
 0xaa9   : > { %v8213_v25 = vmax.f32 %v8181_v20, 0.0  ;;  %v8212_v45 = vmax.f32 %v8180_v38, 0.0  ;;  %v8179_v11 = vsel %vm1196_vm5, %v20085_v9, %v15475_v55  ;;  %v8178_v56 = vsel %vm1196_vm5, %v20086_v44, %v15474_v5  ;;  %v20095_v38 = vld [vmem:[#allocation15_spill] sm:$0xff] }
 0xaaa   : > { %v8211_v15 = vmax.f32 %v8179_v11, 0.0  ;;  %v8210_v27 = vmax.f32 %v8178_v56, 0.0  ;;  %v20097_v56 = vld [vmem:[#allocation17_spill] sm:$0xff] }
 0xaab   : > { %v8243_v59 = vpack.c.bf16 %v8213_v25, %v8212_v45  ;;  %v20096_v45 = vld [vmem:[#allocation16_spill] sm:$0xff] }
 0xaac   : > { %v8242_v50 = vpack.c.bf16 %v8211_v15, %v8210_v27  ;;  %v20098_v27 = vld [vmem:[#allocation18_spill] sm:$0xff] }
 0xaad   : > { %v15488_v12 = vpop.permute.xlu1 %15487 }
 0xaae   : > { %v15490_v4 = vunpack.i.h.bf16 %v15488_v12  ;;  %v15489_v36 = vunpack.i.l.bf16 %v15488_v12  ;;  %13978 = vmatprep.mubr.msk.bf16.mxu0 %vm3744_vm8, %v8242_v50  ;;  %v15483_v41 = vpop.permute.xlu0 %15482 }
 0xaaf   : > { %v15485_v37 = vunpack.i.h.bf16 %v15483_v41  ;;  %v15484_v28 = vunpack.i.l.bf16 %v15483_v41  ;;  %13979 = vmatmul.mubr.msk.bf16.vlgmr.msra.gmra.mrb[32].mxu0 %vm3744_vm8, %v8243_v59 }
 0xab0   : > { %v8185_v8 = vsel %vm1196_vm5, %v20087_v10, %v15490_v4  ;;  %v8184_v54 = vsel %vm1196_vm5, %v20088_v30, %v15489_v36  ;;  %14011 = vmatpush3.bf16.msra.mxu0 %v8906_v58  ;;  %v20099_v30 = vld [vmem:[#allocation19_spill] sm:$0xff] }
 0xab1   : > { %v8217_v48 = vmax.f32 %v8185_v8, 0.0  ;;  %v8216_v18 = vmax.f32 %v8184_v54, 0.0  ;;  %v8183_v57 = vsel %vm1196_vm5, %v20089_v51, %v15485_v37  ;;  %v8182_v24 = vsel %vm1196_vm5, %v20090_v2, %v15484_v28  ;;  %v20101_v2 = vld [vmem:[#allocation21_spill] sm:$0xff] }
 0xab2   : > { %v8215_v16 = vmax.f32 %v8183_v57, 0.0  ;;  %v8214_v13 = vmax.f32 %v8182_v24, 0.0 }
 0xab3   : > { %v8245_v14 = vpack.c.bf16 %v8217_v48, %v8216_v18  ;;  %v20100_v48 = vld [vmem:[#allocation20_spill] sm:$0xff] }
 0xab4   : > { %v8244_v35 = vpack.c.bf16 %v8215_v16, %v8214_v13  ;;  %v20102_v16 = vld [vmem:[#allocation22_spill] sm:$0xff] }
 0xab5   : > { %v15498_v53 = vpop.permute.xlu1 %15497 }
 0xab6   : > { %v15500_v49 = vunpack.i.h.bf16 %v15498_v53  ;;  %v15499_v47 = vunpack.i.l.bf16 %v15498_v53  ;;  %13982 = vmatprep.mubr.msk.bf16.mxu0 %vm3744_vm8, %v8244_v35  ;;  %v15493_v42 = vpop.permute.xlu0 %15492 }
 0xab7   : > { %v15495_v33 = vunpack.i.h.bf16 %v15493_v42  ;;  %v15494_v3 = vunpack.i.l.bf16 %v15493_v42  ;;  %13983 = vmatmul.mubr.msk.bf16.gmra.mrb[36].mxu0 %vm3744_vm8, %v8245_v14 }
 0xab8   : > { %v8189_v34 = vsel %vm1196_vm5, %v20091_v32, %v15500_v49  ;;  %v8188_v19 = vsel %vm1196_vm5, %v20092_v1, %v15499_v47  ;;  %v20103_v1 = vld [vmem:[#allocation23_spill] sm:$0xff] }
 0xab9   : > { %v8221_v43 = vmax.f32 %v8189_v34, 0.0  ;;  %v8220_v29 = vmax.f32 %v8188_v19, 0.0  ;;  %v8187_v39 = vsel %vm1196_vm5, %v20093_v17, %v15495_v33  ;;  %v8186_v52 = vsel %vm1196_vm5, %v20094_v46, %v15494_v3  ;;  %v20105_v46 = vld [vmem:[#allocation25_spill] sm:$0xff] }
 0xaba   : > { %v8219_v62 = vmax.f32 %v8187_v39, 0.0  ;;  %v8218_v40 = vmax.f32 %v8186_v52, 0.0 }
 0xabb   : > { %v8247_v63 = vpack.c.bf16 %v8221_v43, %v8220_v29  ;;  %v20104_v43 = vld [vmem:[#allocation24_spill] sm:$0xff] }
 0xabc   : > { %v8246_v6 = vpack.c.bf16 %v8219_v62, %v8218_v40  ;;  %v20106_v62 = vld [vmem:[#allocation26_spill] sm:$0xff] }
 0xabd   : > { %v15508_v26 = vpop.permute.xlu1 %15507 }
 0xabe   : > { %v15510_v55 = vunpack.i.h.bf16 %v15508_v26  ;;  %v15509_v5 = vunpack.i.l.bf16 %v15508_v26  ;;  %13986 = vmatprep.mubr.msk.bf16.mxu0 %vm3744_vm8, %v8246_v6  ;;  %v15503_v0 = vpop.permute.xlu0 %15502 }
 0xabf   : > { %v15505_v20 = vunpack.i.h.bf16 %v15503_v0  ;;  %v15504_v61 = vunpack.i.l.bf16 %v15503_v0  ;;  %13987 = vmatmul.mubr.msk.bf16.gmra.mrb[40].mxu0 %vm3744_vm8, %v8247_v63 }
 0xac0   : > { %v8193_v25 = vsel %vm1196_vm5, %v20095_v38, %v15510_v55  ;;  %v8192_v9 = vsel %vm1196_vm5, %v20096_v45, %v15509_v5  ;;  %v20107_v45 = vld [vmem:[#allocation27_spill] sm:$0xff] }
 0xac1   : > { %v8225_v11 = vmax.f32 %v8193_v25, 0.0  ;;  %v8224_v44 = vmax.f32 %v8192_v9, 0.0  ;;  %v8191_v15 = vsel %vm1196_vm5, %v20097_v56, %v15505_v20  ;;  %v8190_v50 = vsel %vm1196_vm5, %v20098_v27, %v15504_v61  ;;  %v20109_v27 = vld [vmem:[#allocation29_spill] sm:$0xff] }
 0xac2   : > { %v8223_v59 = vmax.f32 %v8191_v15, 0.0  ;;  %v8222_v12 = vmax.f32 %v8190_v50, 0.0 }
 0xac3   : > { %v8249_v36 = vpack.c.bf16 %v8225_v11, %v8224_v44  ;;  %v20108_v11 = vld [vmem:[#allocation28_spill] sm:$0xff] }
 0xac4   : > { %v8248_v58 = vpack.c.bf16 %v8223_v59, %v8222_v12  ;;  %v20110_v59 = vld [vmem:[#allocation30_spill] sm:$0xff] }
 0xac5   : > { %v15518_v4 = vpop.permute.xlu1 %15517 }
 0xac6   : > { %v15520_v41 = vunpack.i.h.bf16 %v15518_v4  ;;  %v15519_v37 = vunpack.i.l.bf16 %v15518_v4  ;;  %13990 = vmatprep.mubr.msk.bf16.mxu0 %vm3744_vm8, %v8248_v58  ;;  %v15513_v28 = vpop.permute.xlu0 %15512 }
 0xac7   : > { %v15515_v10 = vunpack.i.h.bf16 %v15513_v28  ;;  %v15514_v8 = vunpack.i.l.bf16 %v15513_v28  ;;  %13991 = vmatmul.mubr.msk.bf16.gmra.mrb[44].mxu0 %vm3744_vm8, %v8249_v36 }
 0xac8   : > { %v8197_v54 = vsel %vm1196_vm5, %v20099_v30, %v15520_v41  ;;  %v8196_v18 = vsel %vm1196_vm5, %v20100_v48, %v15519_v37 }
 0xac9   : > { %v8229_v51 = vmax.f32 %v8197_v54, 0.0  ;;  %v8228_v57 = vmax.f32 %v8196_v18, 0.0  ;;  %v8195_v24 = vsel %vm1196_vm5, %v20101_v2, %v15515_v10  ;;  %v8194_v13 = vsel %vm1196_vm5, %v20102_v16, %v15514_v8  ;;  %v20111_v2 = vld [vmem:[#allocation31_spill] sm:$0xff]  ;;  %v20112_v16 = vld [vmem:[#allocation32_spill] sm:$0xff] }
 0xaca   : > { %v8227_v35 = vmax.f32 %v8195_v24, 0.0  ;;  %v8226_v53 = vmax.f32 %v8194_v13, 0.0 }
 0xacb   : > { %v8251_v47 = vpack.c.bf16 %v8229_v51, %v8228_v57 }
 0xacc   : > { %v8250_v14 = vpack.c.bf16 %v8227_v35, %v8226_v53 }
 0xacd   : > { %v15528_v49 = vpop.permute.xlu1 %15527 }
 0xace   : > { %v15530_v42 = vunpack.i.h.bf16 %v15528_v49  ;;  %v15529_v33 = vunpack.i.l.bf16 %v15528_v49  ;;  %13994 = vmatprep.mubr.msk.bf16.mxu0 %vm3744_vm8, %v8250_v14  ;;  %v15523_v3 = vpop.permute.xlu0 %15522 }
 0xacf   : > { %v15525_v32 = vunpack.i.h.bf16 %v15523_v3  ;;  %v15524_v34 = vunpack.i.l.bf16 %v15523_v3  ;;  %13995 = vmatmul.mubr.msk.bf16.gmra.mrb[48].mxu0 %vm3744_vm8, %v8251_v47  ;;  %v18217_v47 = vld [vmem:[%s19889_s10] ss:$0 sm:$0xff] }
 0xad0   : > { %v8201_v19 = vsel %vm1196_vm5, %v20103_v1, %v15530_v42  ;;  %v8200_v29 = vsel %vm1196_vm5, %v20104_v43, %v15529_v33 }
 0xad1   : > { %v8233_v17 = vmax.f32 %v8201_v19, 0.0  ;;  %v8232_v39 = vmax.f32 %v8200_v29, 0.0  ;;  %v8199_v52 = vsel %vm1196_vm5, %v20105_v46, %v15525_v32  ;;  %v8198_v40 = vsel %vm1196_vm5, %v20106_v62, %v15524_v34 }
 0xad2   : > { %v8231_v6 = vmax.f32 %v8199_v52, 0.0  ;;  %v8230_v26 = vmax.f32 %v8198_v40, 0.0 }
 0xad3   : > { %v8253_v5 = vpack.c.bf16 %v8233_v17, %v8232_v39 }
 0xad4   : > { %v8252_v63 = vpack.c.bf16 %v8231_v6, %v8230_v26 }
 0xad5   : > { %v15538_v55 = vpop.permute.xlu1 %15537 }
 0xad6   : > { %v15540_v0 = vunpack.i.h.bf16 %v15538_v55  ;;  %v15539_v20 = vunpack.i.l.bf16 %v15538_v55  ;;  %13998 = vmatprep.mubr.msk.bf16.mxu0 %vm3744_vm8, %v8252_v63  ;;  %v15533_v61 = vpop.permute.xlu0 %15532 }
 0xad7   : > { %v15535_v38 = vunpack.i.h.bf16 %v15533_v61  ;;  %v15534_v25 = vunpack.i.l.bf16 %v15533_v61  ;;  %13999 = vmatmul.mubr.msk.bf16.gmra.mrb[52].mxu0 %vm3744_vm8, %v8253_v5 }
 0xad8   : > { %v8205_v9 = vsel %vm1196_vm5, %v20107_v45, %v15540_v0  ;;  %v8204_v44 = vsel %vm1196_vm5, %v20108_v11, %v15539_v20 }
 0xad9   : > { %v8237_v56 = vmax.f32 %v8205_v9, 0.0  ;;  %v8236_v15 = vmax.f32 %v8204_v44, 0.0  ;;  %v8203_v50 = vsel %vm1196_vm5, %v20109_v27, %v15535_v38  ;;  %v8202_v12 = vsel %vm1196_vm5, %v20110_v59, %v15534_v25 }
 0xada   : > { %v8235_v58 = vmax.f32 %v8203_v50, 0.0  ;;  %v8234_v4 = vmax.f32 %v8202_v12, 0.0 }
 0xadb   : > { %v8255_v37 = vpack.c.bf16 %v8237_v56, %v8236_v15 }
 0xadc   : > { %v8254_v36 = vpack.c.bf16 %v8235_v58, %v8234_v4 }
 0xadd   : > { %v15548_v41 = vpop.permute.xlu1 %15547 }
 0xade   : > { %v15550_v28 = vunpack.i.h.bf16 %v15548_v41  ;;  %v15549_v10 = vunpack.i.l.bf16 %v15548_v41  ;;  %14002 = vmatprep.mubr.msk.bf16.mxu0 %vm3744_vm8, %v8254_v36  ;;  %v15543_v8 = vpop.permute.xlu0 %15542 }
 0xadf   : > { %v15545_v30 = vunpack.i.h.bf16 %v15543_v8  ;;  %v15544_v54 = vunpack.i.l.bf16 %v15543_v8  ;;  %14003 = vmatmul.mubr.msk.bf16.gmra.mrb[56].mxu0 %vm3744_vm8, %v8255_v37 }
 0xae0   : > { %v8209_v48 = vsel %vm1196_vm5, %v17624_v60, %v15550_v28  ;;  %v8208_v18 = vsel %vm1196_vm5, %v17614_v31, %v15549_v10  ;;  %v8478_v31 = vld [vmem:[%s19890_s11] sm:$0xf] }
 0xae1   : > { %v8241_v51 = vmax.f32 %v8209_v48, 0.0  ;;  %v8240_v57 = vmax.f32 %v8208_v18, 0.0  ;;  %v8207_v24 = vsel %vm1196_vm5, %v20111_v2, %v15545_v30  ;;  %v8206_v13 = vsel %vm1196_vm5, %v20112_v16, %v15544_v54  ;;  %15369 = vmatprep.subr.msk.bf16.mxu0 %vm3792_vm7, %v8478_v31 }
 0xae2   : > { %v8239_v35 = vmax.f32 %v8207_v24, 0.0  ;;  %v8238_v53 = vmax.f32 %v8206_v13, 0.0  ;;  %v9100_v4 = vsel %vm3792_vm7, %v8478_v31, 0 }
 0xae3   : > { %v8257_v49 = vpack.c.bf16 %v8241_v51, %v8240_v57 }
 0xae4   : > { %v8256_v14 = vpack.c.bf16 %v8239_v35, %v8238_v53 }
 0xae6   : > { %14006 = vmatprep.mubr.msk.bf16.mxu0 %vm3744_vm8, %v8256_v14 }
 0xae7   : > { %14007 = vmatmul.mubr.msk.bf16.gmra.mrb[60].mxu0 %vm3744_vm8, %v8257_v49 }
 0xae8   : > { %14012 = vmatprep.mubr.msk.bf16.mxu0 %vm3744_vm8, %v20082_v21 }
 0xb82   : > { %v13980_v60 = vpop.f32.mrb[32].mxu0 }
 0xb83   : > { %v8351_v42 = vpop.f32.mrb[33].mxu0  ;;  %v18220_v3 = vadd.f32 %v13980_v60, %v18217_v47 }
 0xb84   : > { %v13981_v33 = vpop.f32.mrb[34].mxu0  ;;  %v18226_v1 = vadd.f32 %v18217_v47, %v8351_v42 }
 0xb85   : > { %20113 = vst [vmem:[#allocation5_spill] sm:$0xff] %v18220_v3  ;;  %v18223_v32 = vadd.f32 %v13981_v33, %v18217_v47  ;;  %v8354_v34 = vpop.f32.mrb[35].mxu0 }
 0xb86   : > { %20115 = vst [vmem:[#allocation3_spill] sm:$0xff] %v18226_v1  ;;  %v18229_v19 = vadd.f32 %v18217_v47, %v8354_v34 }
 0xb87   : > { %20114 = vst [vmem:[#allocation6_spill] sm:$0xff] %v18223_v32  ;;  %v8489_v43 = vpack.c.bf16 %v18223_v32, %v18220_v3 }
 0xb88   : > { %20116 = vst [vmem:[#allocation4_spill] sm:$0xff] %v18229_v19  ;;  %v8488_v29 = vpack.c.bf16 %v18229_v19, %v18226_v1 }
 0xb89   : > { %v8512_v17 = vshrl.u32 %v8489_v43, 16  ;;  %v8515_v62 = vshll.u32 %v8489_v43, 16 }
 0xb8a   : > { %v8505_v39 = vshrl.u32 %v8488_v29, 16  ;;  %v13984_v46 = vpop.f32.mrb[36].mxu0  ;;  %v8508_v26 = vshll.u32 %v8488_v29, 16 }
 0xb8b   : > { %v8514_v52 = vrot.slane %v8512_v17, 7  ;;  %v8367_v40 = vpop.f32.mrb[37].mxu0  ;;  %v18236_v5 = vadd.f32 %v13984_v46, %v18217_v47 }
 0xb8c   : > { %v8507_v6 = vrot.slane %v8505_v39, 7  ;;  %v13985_v63 = vpop.f32.mrb[38].mxu0  ;;  %v18239_v0 = vadd.f32 %v18217_v47, %v8367_v40  ;;  %v18306_v39 = vld [vmem:[%s19890_s11 + $0x8] sm:$0xf] }
 0xb8d   : > { %v8517_v55 = vor.u32 %v8515_v62, %v8514_v52  ;;  %20117 = vst [vmem:[#allocation9_spill] sm:$0xff] %v18236_v5  ;;  %v18242_v20 = vadd.f32 %v13985_v63, %v18217_v47  ;;  %v8370_v61 = vpop.f32.mrb[39].mxu0  ;;  %v18246_v38 = vsel %vm15745_vm3, %v8514_v52, 0 }
 0xb8e   : > { %20118 = vst [vmem:[#allocation10_spill] sm:$0xff] %v18239_v0  ;;  %v8510_v25 = vor.u32 %v8508_v26, %v8507_v6  ;;  %v18250_v45 = vsel %vm15745_vm3, %v8507_v6, 0  ;;  %v18253_v9 = vadd.f32 %v18217_v47, %v8370_v61  ;;  %v8700_v59 = vshll.u32 %v18246_v38, 16 }
 0xb8f   : > { %20119 = vst [vmem:[#allocation7_spill] sm:$0xff] %v18242_v20  ;;  %v18257_v11 = vsel %vm15745_vm3, 0, %v8517_v55  ;;  %v8688_v44 = vshll.u32 %v18250_v45, 16  ;;  %v8491_v56 = vpack.c.bf16 %v18242_v20, %v18236_v5 }
 0xb90   : > { %20120 = vst [vmem:[#allocation8_spill] sm:$0xff] %v18253_v9  ;;  %v18264_v15 = vsel %vm15745_vm3, 0, %v8510_v25  ;;  %v8490_v27 = vpack.c.bf16 %v18253_v9, %v18239_v0  ;;  %v8695_v50 = vshll.u32 %v18257_v11, 16  ;;  %v8693_v28 = vshrl.u32 %v18257_v11, 16 }
 0xb91   : > { %v8683_v12 = vshll.u32 %v18264_v15, 16  ;;  %v8526_v58 = vshrl.u32 %v8491_v56, 16  ;;  %v8681_v36 = vshrl.u32 %v18264_v15, 16  ;;  %v8690_v8 = vrot.slane %v8688_v44, 1 }
 0xb92   : > { %v8519_v41 = vshrl.u32 %v8490_v27, 16  ;;  %v13988_v37 = vpop.f32.mrb[40].mxu0  ;;  %v8697_v10 = vrot.slane %v8695_v50, 1  ;;  %v8529_v54 = vshll.u32 %v8491_v56, 16  ;;  %v8522_v57 = vshll.u32 %v8490_v27, 16 }
 0xb93   : > { %v8528_v30 = vrot.slane %v8526_v58, 7  ;;  %v8383_v48 = vpop.f32.mrb[41].mxu0  ;;  %v8685_v18 = vrot.slane %v8683_v12, 1  ;;  %v18275_v2 = vadd.f32 %v13988_v37, %v18217_v47  ;;  %v8702_v49 = vrot.slane %v8700_v59, 1 }
 0xb94   : > { %v8521_v51 = vrot.slane %v8519_v41, 7  ;;  %v13989_v24 = vpop.f32.mrb[42].mxu0  ;;  %v8698_v16 = vor.u32 %v8697_v10, %v8693_v28  ;;  %v18285_v42 = vadd.f32 %v18217_v47, %v8383_v48 }
 0xb95   : > { %20121 = vst [vmem:[#allocation11_spill] sm:$0xff] %v18275_v2  ;;  %v8531_v13 = vor.u32 %v8529_v54, %v8528_v30  ;;  %v18278_v35 = vadd.f32 %v13989_v24, %v18217_v47  ;;  %v8386_v53 = vpop.f32.mrb[43].mxu0  ;;  %v8686_v14 = vor.u32 %v8685_v18, %v8681_v36  ;;  %v18296_v43 = vsel %vm15745_vm3, %v8528_v30, 0 }
 0xb96   : > { %v8524_v31 = vor.u32 %v8522_v57, %v8521_v51  ;;  %v18282_v60 = vsel %vm15745_vm3, %v8521_v51, 0  ;;  %20123 = vst [vmem:[#allocation13_spill] sm:$0xff] %v18285_v42  ;;  %v18288_v33 = vadd.f32 %v18217_v47, %v8386_v53  ;;  %v18318_v40 = vsel %vm1003_vm4, %v8698_v16, %v8702_v49 }
 0xb97   : > { %20122 = vst [vmem:[#allocation12_spill] sm:$0xff] %v18278_v35  ;;  %v18292_v34 = vsel %vm15745_vm3, 0, %v8531_v13  ;;  %v8493_v29 = vpack.c.bf16 %v18278_v35, %v18275_v2  ;;  %v18301_v17 = vsel %vm1003_vm4, %v8686_v14, %v8690_v8  ;;  %v8712_v52 = vshll.u32 %v18282_v60, 16 }
 0xb98   : > { %20124 = vst [vmem:[#allocation14_spill] sm:$0xff] %v18288_v33  ;;  %v18310_v46 = vsel %vm15745_vm3, 0, %v8524_v31  ;;  %v8492_v62 = vpack.c.bf16 %v18288_v33, %v18285_v42  ;;  %14013 = vmatmul.mubr.msk.bf16.vlgmr.msra.gmra.mrb[64].mxu0 %vm3744_vm8, %v18301_v17  ;;  %v8724_v63 = vshll.u32 %v18296_v43, 16  ;;  %v8717_v25 = vshrl.u32 %v18292_v34, 16 }
 0xb99   : > { %v8540_v6 = vshrl.u32 %v8493_v29, 16  ;;  %14045 = vmatpush3.bf16.msra.mxu0 %v9100_v4  ;;  %14016 = vmatprep.mubr.msk.bf16.mxu0 %vm3744_vm8, %v18318_v40  ;;  %v8707_v26 = vshll.u32 %v18310_v46, 16  ;;  %v8719_v44 = vshll.u32 %v18292_v34, 16  ;;  %v8543_v27 = vshll.u32 %v8493_v29, 16 }
 0xb9a   : > { %v8533_v55 = vshrl.u32 %v8492_v62, 16  ;;  %v13992_v61 = vpop.f32.mrb[44].mxu0  ;;  %15370 = vmatprep.subr.msk.bf16.mxu0 %vm3792_vm7, %v18306_v39  ;;  %v8705_v59 = vshrl.u32 %v18310_v46, 16  ;;  %v8536_v4 = vshll.u32 %v8492_v62, 16  ;;  %v8714_v41 = vrot.slane %v8712_v52, 1 }
 0xb9b   : > { %v8542_v56 = vrot.slane %v8540_v6, 7  ;;  %v8399_v50 = vpop.f32.mrb[45].mxu0  ;;  %v8709_v12 = vrot.slane %v8707_v26, 1  ;;  %v8721_v37 = vrot.slane %v8719_v44, 1  ;;  %v18330_v10 = vadd.f32 %v13992_v61, %v18217_v47 }
 0xb9c   : > { %v8535_v58 = vrot.slane %v8533_v55, 7  ;;  %v13993_v36 = vpop.f32.mrb[46].mxu0  ;;  %v18340_v51 = vadd.f32 %v18217_v47, %v8399_v50  ;;  %v8726_v53 = vrot.slane %v8724_v63, 1 }
 0xb9d   : > { %v8545_v28 = vor.u32 %v8543_v27, %v8542_v56  ;;  %20125 = vst [vmem:[#allocation15_spill] sm:$0xff] %v18330_v10  ;;  %v18333_v8 = vadd.f32 %v13993_v36, %v18217_v47  ;;  %v8402_v30 = vpop.f32.mrb[47].mxu0  ;;  %v8710_v54 = vor.u32 %v8709_v12, %v8705_v59  ;;  %v18347_v24 = vsel %vm15745_vm3, %v8542_v56, 0 }
 0xb9e   : > { %v8538_v48 = vor.u32 %v8536_v4, %v8535_v58  ;;  %v18337_v18 = vsel %vm15745_vm3, %v8535_v58, 0  ;;  %20127 = vst [vmem:[#allocation17_spill] sm:$0xff] %v18340_v51  ;;  %v18343_v57 = vadd.f32 %v18217_v47, %v8402_v30  ;;  %v8722_v29 = vor.u32 %v8721_v37, %v8717_v25 }
 0xb9f   : > { %20126 = vst [vmem:[#allocation16_spill] sm:$0xff] %v18333_v8  ;;  %v8495_v16 = vpack.c.bf16 %v18333_v8, %v18330_v10  ;;  %v18352_v13 = vsel %vm1003_vm4, %v8710_v54, %v8714_v41  ;;  %v8736_v49 = vshll.u32 %v18337_v18, 16  ;;  %v18365_v52 = vsel %vm15745_vm3, 0, %v8545_v28 }
 0xba0   : > { %20128 = vst [vmem:[#allocation18_spill] sm:$0xff] %v18343_v57  ;;  %v18356_v14 = vsel %vm15745_vm3, 0, %v8538_v48  ;;  %v8494_v31 = vpack.c.bf16 %v18343_v57, %v18340_v51  ;;  %14017 = vmatmul.mubr.msk.bf16.gmra.mrb[68].mxu0 %vm3744_vm8, %v18352_v13  ;;  %v8748_v26 = vshll.u32 %v18347_v24, 16  ;;  %v18370_v55 = vsel %vm1003_vm4, %v8722_v29, %v8726_v53 }
 0xba1   : > { %v8554_v62 = vshrl.u32 %v8495_v16, 16  ;;  %v8731_v6 = vshll.u32 %v18356_v14, 16  ;;  %v8557_v56 = vshll.u32 %v8495_v16, 16  ;;  %14020 = vmatprep.mubr.msk.bf16.mxu0 %vm3744_vm8, %v18370_v55  ;;  %v8729_v27 = vshrl.u32 %v18356_v14, 16 }
 0xba2   : > { %v8547_v63 = vshrl.u32 %v8494_v31, 16  ;;  %v13996_v61 = vpop.f32.mrb[48].mxu0  ;;  %v8550_v12 = vshll.u32 %v8494_v31, 16  ;;  %v8738_v4 = vrot.slane %v8736_v49, 1  ;;  %v8743_v36 = vshll.u32 %v18365_v52, 16 }
 0xba3   : > { %v8556_v44 = vrot.slane %v8554_v62, 7  ;;  %v8415_v25 = vpop.f32.mrb[49].mxu0  ;;  %v8733_v50 = vrot.slane %v8731_v6, 1  ;;  %v18377_v37 = vadd.f32 %v13996_v61, %v18217_v47  ;;  %v8741_v6 = vshrl.u32 %v18365_v52, 16 }
 0xba4   : > { %v8549_v59 = vrot.slane %v8547_v63, 7  ;;  %v13997_v58 = vpop.f32.mrb[50].mxu0  ;;  %v18387_v53 = vadd.f32 %v18217_v47, %v8415_v25 }
 0xba5   : > { %v8559_v41 = vor.u32 %v8557_v56, %v8556_v44  ;;  %20129 = vst [vmem:[#allocation19_spill] sm:$0xff] %v18377_v37  ;;  %v18380_v28 = vadd.f32 %v13997_v58, %v18217_v47  ;;  %v8418_v30 = vpop.f32.mrb[51].mxu0  ;;  %v8734_v54 = vor.u32 %v8733_v50, %v8729_v27  ;;  %v18394_v31 = vsel %vm15745_vm3, %v8556_v44, 0 }
 0xba6   : > { %v8552_v48 = vor.u32 %v8550_v12, %v8549_v59  ;;  %v18384_v16 = vsel %vm15745_vm3, %v8549_v59, 0  ;;  %20131 = vst [vmem:[#allocation21_spill] sm:$0xff] %v18387_v53  ;;  %v18390_v49 = vadd.f32 %v18217_v47, %v8418_v30  ;;  %v8745_v44 = vrot.slane %v8743_v36, 1 }
 0xba7   : > { %20130 = vst [vmem:[#allocation20_spill] sm:$0xff] %v18380_v28  ;;  %v8497_v29 = vpack.c.bf16 %v18380_v28, %v18377_v37  ;;  %v18399_v62 = vsel %vm1003_vm4, %v8734_v54, %v8738_v4  ;;  %v8760_v61 = vshll.u32 %v18384_v16, 16  ;;  %v18413_v25 = vsel %vm15745_vm3, 0, %v8559_v41 }
 0xba8   : > { %20132 = vst [vmem:[#allocation22_spill] sm:$0xff] %v18390_v49  ;;  %v18404_v63 = vsel %vm15745_vm3, 0, %v8552_v48  ;;  %v8496_v56 = vpack.c.bf16 %v18390_v49, %v18387_v53  ;;  %14021 = vmatmul.mubr.msk.bf16.gmra.mrb[72].mxu0 %vm3744_vm8, %v18399_v62  ;;  %v8750_v50 = vrot.slane %v8748_v26, 1  ;;  %v8772_v12 = vshll.u32 %v18394_v31, 16 }
 0xba9   : > { %v8568_v27 = vshrl.u32 %v8497_v29, 16  ;;  %v8755_v59 = vshll.u32 %v18404_v63, 16  ;;  %v8571_v58 = vshll.u32 %v8497_v29, 16  ;;  %v8746_v30 = vor.u32 %v8745_v44, %v8741_v6 }
 0xbaa   : > { %v8561_v4 = vshrl.u32 %v8496_v56, 16  ;;  %v14000_v54 = vpop.f32.mrb[52].mxu0  ;;  %v8564_v49 = vshll.u32 %v8496_v56, 16  ;;  %v8753_v28 = vshrl.u32 %v18404_v63, 16  ;;  %v8762_v26 = vrot.slane %v8760_v61, 1 }
 0xbab   : > { %v8570_v48 = vrot.slane %v8568_v27, 7  ;;  %v8431_v53 = vpop.f32.mrb[53].mxu0  ;;  %v8757_v36 = vrot.slane %v8755_v59, 1  ;;  %v18419_v41 = vsel %vm1003_vm4, %v8746_v30, %v8750_v50  ;;  %v8767_v51 = vshll.u32 %v18413_v25, 16 }
 0xbac   : > { %v8563_v37 = vrot.slane %v8561_v4, 7  ;;  %v14001_v57 = vpop.f32.mrb[54].mxu0  ;;  %14024 = vmatprep.mubr.msk.bf16.mxu0 %vm3744_vm8, %v18419_v41  ;;  %v18425_v29 = vadd.f32 %v14000_v54, %v18217_v47  ;;  %v18435_v61 = vadd.f32 %v18217_v47, %v8431_v53 }
 0xbad   : > { %v8573_v8 = vor.u32 %v8571_v58, %v8570_v48  ;;  %v18428_v6 = vadd.f32 %v14001_v57, %v18217_v47  ;;  %v8434_v56 = vpop.f32.mrb[55].mxu0  ;;  %v8758_v44 = vor.u32 %v8757_v36, %v8753_v28  ;;  %v18442_v58 = vsel %vm15745_vm3, %v8570_v48, 0 }
 0xbae   : > { %20133 = vst [vmem:[#allocation23_spill] sm:$0xff] %v18425_v29  ;;  %v8566_v27 = vor.u32 %v8564_v49, %v8563_v37  ;;  %v18432_v50 = vsel %vm15745_vm3, %v8563_v37, 0  ;;  %20135 = vst [vmem:[#allocation25_spill] sm:$0xff] %v18435_v61  ;;  %v18438_v59 = vadd.f32 %v18217_v47, %v8434_v56  ;;  %v8765_v49 = vshrl.u32 %v18413_v25, 16 }
 0xbaf   : > { %20134 = vst [vmem:[#allocation24_spill] sm:$0xff] %v18428_v6  ;;  %v8499_v57 = vpack.c.bf16 %v18428_v6, %v18425_v29  ;;  %v18447_v28 = vsel %vm1003_vm4, %v8758_v44, %v8762_v26  ;;  %v8784_v53 = vshll.u32 %v18432_v50, 16  ;;  %v8769_v30 = vrot.slane %v8767_v51, 1 }
 0xbb0   : > { %20136 = vst [vmem:[#allocation26_spill] sm:$0xff] %v18438_v59  ;;  %v18452_v37 = vsel %vm15745_vm3, 0, %v8566_v27  ;;  %v8498_v4 = vpack.c.bf16 %v18438_v59, %v18435_v61  ;;  %14025 = vmatmul.mubr.msk.bf16.gmra.mrb[76].mxu0 %vm3744_vm8, %v18447_v28  ;;  %v18461_v54 = vsel %vm15745_vm3, 0, %v8573_v8  ;;  %v8774_v36 = vrot.slane %v8772_v12, 1 }
 0xbb1   : > { %v8582_v48 = vshrl.u32 %v8499_v57, 16  ;;  %v8779_v26 = vshll.u32 %v18452_v37, 16  ;;  %v8796_v56 = vshll.u32 %v18442_v58, 16  ;;  %v8585_v44 = vshll.u32 %v8499_v57, 16 }
 0xbb2   : > { %v8575_v27 = vshrl.u32 %v8498_v4, 16  ;;  %v8770_v6 = vor.u32 %v8769_v30, %v8765_v49  ;;  %v14004_v29 = vpop.f32.mrb[56].mxu0  ;;  %v8578_v59 = vshll.u32 %v8498_v4, 16  ;;  %v8777_v33 = vshrl.u32 %v18452_v37, 16 }
 0xbb3   : > { %v8584_v10 = vrot.slane %v8582_v48, 7  ;;  %v8447_v61 = vpop.f32.mrb[57].mxu0  ;;  %v8781_v51 = vrot.slane %v8779_v26, 1  ;;  %v8786_v12 = vrot.slane %v8784_v53, 1  ;;  %v8791_v2 = vshll.u32 %v18461_v54, 16 }
 0xbb4   : > { %v8577_v42 = vrot.slane %v8575_v27, 7  ;;  %v18467_v8 = vsel %vm1003_vm4, %v8770_v6, %v8774_v36  ;;  %v14005_v35 = vpop.f32.mrb[58].mxu0  ;;  %v18473_v57 = vadd.f32 %v14004_v29, %v18217_v47  ;;  %v18483_v53 = vadd.f32 %v18217_v47, %v8447_v61 }
 0xbb5   : > { %v8587_v9 = vor.u32 %v8585_v44, %v8584_v10  ;;  %14028 = vmatprep.mubr.msk.bf16.mxu0 %vm3744_vm8, %v18467_v8  ;;  %v18476_v49 = vadd.f32 %v14005_v35, %v18217_v47  ;;  %v8450_v4 = vpop.f32.mrb[59].mxu0  ;;  %v8782_v30 = vor.u32 %v8781_v51, %v8777_v33  ;;  %v18490_v29 = vsel %vm15745_vm3, %v8584_v10, 0 }
 0xbb6   : > { %20137 = vst [vmem:[#allocation27_spill] sm:$0xff] %v18473_v57  ;;  %v8580_v48 = vor.u32 %v8578_v59, %v8577_v42  ;;  %v18480_v6 = vsel %vm15745_vm3, %v8577_v42, 0  ;;  %20139 = vst [vmem:[#allocation29_spill] sm:$0xff] %v18483_v53  ;;  %v18486_v36 = vadd.f32 %v18217_v47, %v8450_v4  ;;  %v8789_v59 = vshrl.u32 %v18461_v54, 16 }
 0xbb7   : > { %20138 = vst [vmem:[#allocation28_spill] sm:$0xff] %v18476_v49  ;;  %v8501_v35 = vpack.c.bf16 %v18476_v49, %v18473_v57  ;;  %v18495_v33 = vsel %vm1003_vm4, %v8782_v30, %v8786_v12  ;;  %v8793_v10 = vrot.slane %v8791_v2, 1  ;;  %v8798_v26 = vrot.slane %v8796_v56, 1 }
 0xbb8   : > { %20140 = vst [vmem:[#allocation30_spill] sm:$0xff] %v18486_v36  ;;  %v18500_v42 = vsel %vm15745_vm3, 0, %v8580_v48  ;;  %v8500_v61 = vpack.c.bf16 %v18486_v36, %v18483_v53  ;;  %14029 = vmatmul.mubr.msk.bf16.gmra.mrb[80].mxu0 %vm3744_vm8, %v18495_v33  ;;  %v18508_v44 = vsel %vm15745_vm3, 0, %v8587_v9  ;;  %v8808_v27 = vshll.u32 %v18480_v6, 16 }
 0xbb9   : > { %v8596_v51 = vshrl.u32 %v8501_v35, 16  ;;  %v8803_v12 = vshll.u32 %v18500_v42, 16  ;;  %v8820_v4 = vshll.u32 %v18490_v29, 16  ;;  %v8599_v30 = vshll.u32 %v8501_v35, 16 }
 0xbba   : > { %v8589_v48 = vshrl.u32 %v8500_v61, 16  ;;  %v8794_v49 = vor.u32 %v8793_v10, %v8789_v59  ;;  %v14008_v36 = vpop.f32.mrb[60].mxu0  ;;  %v8801_v56 = vshrl.u32 %v18500_v42, 16  ;;  %v8592_v20 = vshll.u32 %v8500_v61, 16 }
 0xbbb   : > { %v8598_v53 = vrot.slane %v8596_v51, 7  ;;  %v18514_v57 = vadd.f32 %v14008_v36, %v18217_v47  ;;  %v8463_v2 = vpop.f32.mrb[61].mxu0  ;;  %v8805_v9 = vrot.slane %v8803_v12, 1  ;;  %v8815_v1 = vshll.u32 %v18508_v44, 16 }
 0xbbc   : > { %v8591_v0 = vrot.slane %v8589_v48, 7  ;;  %v18518_v5 = vsel %vm1003_vm4, %v8794_v49, %v8798_v26  ;;  %v14009_v19 = vpop.f32.mrb[62].mxu0  ;;  %v8810_v51 = vrot.slane %v8808_v27, 1  ;;  %v18531_v49 = vadd.f32 %v18217_v47, %v8463_v2 }
 0xbbd   : > { %v8601_v35 = vor.u32 %v8599_v30, %v8598_v53  ;;  %14032 = vmatprep.mubr.msk.bf16.mxu0 %vm3744_vm8, %v18518_v5  ;;  %v18524_v59 = vadd.f32 %v14009_v19, %v18217_v47  ;;  %v8466_v36 = vpop.f32.mrb[63].mxu0  ;;  %v8806_v10 = vor.u32 %v8805_v9, %v8801_v56  ;;  %v18538_v12 = vsel %vm15745_vm3, %v8598_v53, 0 }
 0xbbe   : > { %v8594_v32 = vor.u32 %v8592_v20, %v8591_v0  ;;  %v18528_v61 = vsel %vm15745_vm3, %v8591_v0, 0  ;;  %20141 = vst [vmem:[#allocation31_spill] sm:$0xff] %v18531_v49  ;;  %v18534_v26 = vadd.f32 %v18217_v47, %v8466_v36  ;;  %v8813_v27 = vshrl.u32 %v18508_v44, 16 }
 0xbbf   : > { %v18541_v19 = vsel %vm1003_vm4, %v8806_v10, %v8810_v51  ;;  %v18546_v20 = vsel %vm15745_vm3, 0, %v8601_v35  ;;  %v8817_v53 = vrot.slane %v8815_v1, 1  ;;  %v8832_v30 = vshll.u32 %v18528_v61, 16 }
 0xbc0   : > { %20142 = vst [vmem:[#allocation32_spill] sm:$0xff] %v18534_v26  ;;  %v18550_v0 = vsel %vm15745_vm3, 0, %v8594_v32  ;;  %v8502_v47 = vpack.c.bf16 %v18534_v26, %v18531_v49  ;;  %14033 = vmatmul.mubr.msk.bf16.gmra.mrb[84].mxu0 %vm3744_vm8, %v18541_v19  ;;  %v8822_v9 = vrot.slane %v8820_v4, 1  ;;  %v8844_v35 = vshll.u32 %v18538_v12, 16 }
 0xbc1   : > { %v8827_v48 = vshll.u32 %v18550_v0, 16  ;;  %v8818_v56 = vor.u32 %v8817_v53, %v8813_v27  ;;  %v8825_v36 = vshrl.u32 %v18550_v0, 16  ;;  %v8839_v10 = vshll.u32 %v18546_v20, 16 }
 0xbc2   : > { %v8603_v2 = vshrl.u32 %v8502_v47, 16  ;;  %v8606_v26 = vshll.u32 %v8502_v47, 16  ;;  %v8834_v3 = vrot.slane %v8832_v30, 1  ;;  %v8837_v27 = vshrl.u32 %v18546_v20, 16 }
 0xbc3   : > { %v8829_v32 = vrot.slane %v8827_v48, 1  ;;  %v18562_v49 = vsel %vm1003_vm4, %v8818_v56, %v8822_v9  ;;  %v8841_v4 = vrot.slane %v8839_v10, 1 }
 0xbc4   : > { %v8605_v51 = vrot.slane %v8603_v2, 7  ;;  %14036 = vmatprep.mubr.msk.bf16.mxu0 %vm3744_vm8, %v18562_v49  ;;  %v8846_v2 = vrot.slane %v8844_v35, 1 }
 0xbc5   : > { %v8830_v1 = vor.u32 %v8829_v32, %v8825_v36  ;;  %v8842_v47 = vor.u32 %v8841_v4, %v8837_v27  ;;  %v9296_v27 = vrot.slane %v18257_v11, 1  ;;  %v9294_v4 = vrot.slane %v18250_v45, 1 }
 0xbc6   : > { %v8608_v53 = vor.u32 %v8606_v26, %v8605_v51  ;;  %v18569_v21 = vsel %vm15745_vm3, %v8605_v51, 0  ;;  %v9384_v51 = vsel %vm3792_vm7, %v18306_v39, 0  ;;  %v9293_v39 = vrot.slane %v18264_v15, 1 }
 0xbc7   : > { %v18572_v48 = vsel %vm1003_vm4, %v8830_v1, %v8834_v3  ;;  %v8856_v30 = vshll.u32 %v18569_v21, 16  ;;  %v18582_v26 = vsel %vm1003_vm4, %v8842_v47, %v8846_v2  ;;  %v8481_v1 = vld [vmem:[%s19890_s11 + $0xc] sm:$0xf]  ;;  %v9297_v47 = vrot.slane %v18246_v38, 1 }
 0xbc8   : > { %v18576_v56 = vsel %vm15745_vm3, 0, %v8608_v53  ;;  %14037 = vmatmul.mubr.msk.bf16.gmra.mrb[88].mxu0 %vm3744_vm8, %v18572_v48  ;;  %v9583_v53 = vsel %vm3792_vm7, %v8481_v1, 0  ;;  %v18639_v2 = vsel %vm1638_vm6, %v9293_v39, %v9294_v4  ;;  %v9299_v38 = vrot.slane %v18310_v46, 1 }
 0xbc9   : > { %v8851_v9 = vshll.u32 %v18576_v56, 16  ;;  %14040 = vmatprep.mubr.msk.bf16.mxu0 %vm3744_vm8, %v18582_v26  ;;  %v8849_v3 = vshrl.u32 %v18576_v56, 16  ;;  %v8858_v32 = vrot.slane %v8856_v30, 1  ;;  %v8482_v30 = vld [vmem:[%s19890_s11 + $0x10] sm:$0xf]  ;;  %v9302_v45 = vrot.slane %v18292_v34, 1 }
 0xbca   : > { %v9311_v4 = vrot.slane %v18404_v63, 1 }
 0xbcb   : > { %v8853_v35 = vrot.slane %v8851_v9, 1  ;;  %v18647_v9 = vsel %vm1638_vm6, %v9296_v27, %v9297_v47 }
 0xbcd   : > { %v8854_v36 = vor.u32 %v8853_v35, %v8849_v3  ;;  %v9300_v3 = vrot.slane %v18282_v60, 1  ;;  %v9303_v35 = vrot.slane %v18296_v43, 1  ;;  %v9306_v60 = vrot.slane %v18337_v18, 1 }
 0xbce   : > { %v9309_v43 = vrot.slane %v18347_v24, 1  ;;  %v9312_v18 = vrot.slane %v18384_v16, 1  ;;  %v9315_v24 = vrot.slane %v18394_v31, 1  ;;  %v9318_v16 = vrot.slane %v18432_v50, 1 }
 0xbcf   : > { %v18589_v10 = vsel %vm1003_vm4, %v8854_v36, %v8858_v32  ;;  %v18657_v36 = vsel %vm1638_vm6, %v9299_v38, %v9300_v3  ;;  %v18662_v32 = vsel %vm1638_vm6, %v9302_v45, %v9303_v35  ;;  %v9317_v45 = vrot.slane %v18452_v37, 1 }
 0xbd0   : > { %14041 = vmatmul.mubr.msk.bf16.gmra.mrb[92].mxu0 %vm3744_vm8, %v18589_v10  ;;  %v18685_v47 = vsel %vm1638_vm6, %v9311_v4, %v9312_v18  ;;  %v9320_v3 = vrot.slane %v18461_v54, 1  ;;  %v9321_v31 = vrot.slane %v18442_v58, 1  ;;  %v9324_v50 = vrot.slane %v18480_v6, 1 }
 0xbd1   : > { %14046 = vmatprep.mubr.msk.bf16.mxu0 %vm3744_vm8, %v15751_v23  ;;  %v18699_v35 = vsel %vm1638_vm6, %v9317_v45, %v9318_v16  ;;  %v9327_v58 = vrot.slane %v18490_v29, 1  ;;  %v9332_v18 = vrot.slane %v18546_v20, 1  ;;  %v9330_v6 = vrot.slane %v18528_v61, 1 }
 0xbd2   : > { %v9333_v29 = vrot.slane %v18538_v12, 1  ;;  %v9336_v16 = vrot.slane %v18569_v21, 1  ;;  %v9793_v12 = vsel %vm3792_vm7, %v8482_v30, 0  ;;  %v8503_v21 = vpack.c.bf16 %v18524_v59, %v18514_v57 }
 0xbd4   : > { %v18732_v45 = vsel %vm1638_vm6, %v9332_v18, %v9333_v29 }
 0xbd8   : > { %14047 = vmatmul.mubr.msk.bf16.vlgmr.msra.gmra.mrb[64].mxu0 %vm3744_vm8, %v18264_v15 }
 0xbd9   : > { %14079 = vmatpush3.bf16.msra.mxu0 %v9384_v51  ;;  %14050 = vmatprep.mubr.msk.bf16.mxu0 %vm3744_vm8, %v18257_v11  ;;  %v9305_v51 = vrot.slane %v18356_v14, 1 }
 0xbda   : > { %15371 = vmatprep.subr.msk.bf16.mxu0 %vm3792_vm7, %v8481_v1  ;;  %v9308_v1 = vrot.slane %v18365_v52, 1 }
 0xbdb   : > { %v18671_v39 = vsel %vm1638_vm6, %v9305_v51, %v9306_v60  ;;  %v18704_v51 = vsel %vm1638_vm6, %v9320_v3, %v9321_v31  ;;  %v9326_v60 = vrot.slane %v18508_v44, 1  ;;  %v9335_v3 = vrot.slane %v18576_v56, 1  ;;  %v8483_v31 = vld [vmem:[%s19890_s11 + $0x14] sm:$0xf] }
 0xbdc   : > { %v18676_v27 = vsel %vm1638_vm6, %v9308_v1, %v9309_v43  ;;  %v9323_v1 = vrot.slane %v18500_v42, 1 }
 0xbdd   : > { %v18718_v4 = vsel %vm1638_vm6, %v9326_v60, %v9327_v58  ;;  %v18739_v61 = vsel %vm1638_vm6, %v9335_v3, %v9336_v16  ;;  %v9997_v58 = vsel %vm3792_vm7, %v8483_v31, 0 }
 0xbde   : > { %v18713_v43 = vsel %vm1638_vm6, %v9323_v1, %v9324_v50  ;;  %v8613_v1 = vshll.u32 %v8503_v21, 16 }
 0xbe0   : > { %14051 = vmatmul.mubr.msk.bf16.gmra.mrb[68].mxu0 %vm3744_vm8, %v18310_v46 }
 0xbe1   : > { %14054 = vmatprep.mubr.msk.bf16.mxu0 %vm3744_vm8, %v18292_v34 }
 0xbe8   : > { %14055 = vmatmul.mubr.msk.bf16.gmra.mrb[72].mxu0 %vm3744_vm8, %v18356_v14 }
 0xbe9   : > { %14058 = vmatprep.mubr.msk.bf16.mxu0 %vm3744_vm8, %v18365_v52 }
 0xbf0   : > { %14059 = vmatmul.mubr.msk.bf16.gmra.mrb[76].mxu0 %vm3744_vm8, %v18404_v63 }
 0xbf1   : > { %14062 = vmatprep.mubr.msk.bf16.mxu0 %vm3744_vm8, %v18413_v25 }
 0xbf8   : > { %14063 = vmatmul.mubr.msk.bf16.gmra.mrb[80].mxu0 %vm3744_vm8, %v18452_v37 }
 0xbf9   : > { %14066 = vmatprep.mubr.msk.bf16.mxu0 %vm3744_vm8, %v18461_v54 }
 0xc00   : > { %14067 = vmatmul.mubr.msk.bf16.gmra.mrb[84].mxu0 %vm3744_vm8, %v18500_v42 }
 0xc01   : > { %14070 = vmatprep.mubr.msk.bf16.mxu0 %vm3744_vm8, %v18508_v44 }
 0xc08   : > { %14071 = vmatmul.mubr.msk.bf16.gmra.mrb[88].mxu0 %vm3744_vm8, %v18550_v0 }
 0xc09   : > { %14074 = vmatprep.mubr.msk.bf16.mxu0 %vm3744_vm8, %v18546_v20 }
 0xc10   : > { %14075 = vmatmul.mubr.msk.bf16.gmra.mrb[92].mxu0 %vm3744_vm8, %v18576_v56 }
 0xc11   : > { %14080 = vmatprep.mubr.msk.bf16.mxu0 %vm3744_vm8, %v16187_v7 }
 0xc18   : > { %14081 = vmatmul.mubr.msk.bf16.vlgmr.msra.gmra.mrb[64].mxu0 %vm3744_vm8, %v18639_v2 }
 0xc19   : > { %14113 = vmatpush3.bf16.msra.mxu0 %v9583_v53  ;;  %14084 = vmatprep.mubr.msk.bf16.mxu0 %vm3744_vm8, %v18647_v9  ;;  %v9314_v53 = vrot.slane %v18413_v25, 1 }
 0xc1a   : > { %15372 = vmatprep.subr.msk.bf16.mxu0 %vm3792_vm7, %v8482_v30 }
 0xc1b   : > { %v18690_v38 = vsel %vm1638_vm6, %v9314_v53, %v9315_v24  ;;  %v9329_v53 = vrot.slane %v18550_v0, 1 }
 0xc1d   : > { %v18727_v24 = vsel %vm1638_vm6, %v9329_v53, %v9330_v6  ;;  %v8484_v53 = vld [vmem:[%s19890_s11 + $0x18] sm:$0xf] }
 0xc1e   : > { %v10193_v22 = vsel %vm3792_vm7, %v8484_v53, 0 }
 0xc20   : > { %14085 = vmatmul.mubr.msk.bf16.gmra.mrb[68].mxu0 %vm3744_vm8, %v18657_v36 }
 0xc21   : > { %14088 = vmatprep.mubr.msk.bf16.mxu0 %vm3744_vm8, %v18662_v32 }
 0xc28   : > { %14089 = vmatmul.mubr.msk.bf16.gmra.mrb[72].mxu0 %vm3744_vm8, %v18671_v39 }
 0xc29   : > { %14092 = vmatprep.mubr.msk.bf16.mxu0 %vm3744_vm8, %v18676_v27 }
 0xc30   : > { %14093 = vmatmul.mubr.msk.bf16.gmra.mrb[76].mxu0 %vm3744_vm8, %v18685_v47 }
 0xc31   : > { %14096 = vmatprep.mubr.msk.bf16.mxu0 %vm3744_vm8, %v18690_v38 }
 0xc38   : > { %14097 = vmatmul.mubr.msk.bf16.gmra.mrb[80].mxu0 %vm3744_vm8, %v18699_v35 }
 0xc39   : > { %14100 = vmatprep.mubr.msk.bf16.mxu0 %vm3744_vm8, %v18704_v51 }
 0xc40   : > { %14101 = vmatmul.mubr.msk.bf16.gmra.mrb[84].mxu0 %vm3744_vm8, %v18713_v43 }
 0xc41   : > { %14104 = vmatprep.mubr.msk.bf16.mxu0 %vm3744_vm8, %v18718_v4 }
 0xc48   : > { %14105 = vmatmul.mubr.msk.bf16.gmra.mrb[88].mxu0 %vm3744_vm8, %v18727_v24 }
 0xc49   : > { %14108 = vmatprep.mubr.msk.bf16.mxu0 %vm3744_vm8, %v18732_v45 }
 0xc50   : > { %14109 = vmatmul.mubr.msk.bf16.gmra.mrb[92].mxu0 %vm3744_vm8, %v18739_v61 }
 0xc51   : > { %14114 = vmatprep.mubr.msk.bf16.mxu0 %vm3744_vm8, %v18264_v15  ;;  %v8610_v15 = vshrl.u32 %v8503_v21, 16  ;;  %v8485_v21 = vld [vmem:[%s19890_s11 + $0x1c] sm:$0xf] }
 0xc53   : > { %v8612_v30 = vrot.slane %v8610_v15, 7 }
 0xc55   : > { %v8615_v60 = vor.u32 %v8613_v1, %v8612_v30  ;;  %v8679_v18 = vsel %vm15745_vm3, %v8612_v30, 0  ;;  %v10389_v1 = vsel %vm3792_vm7, %v8485_v21, 0 }
 0xc56   : > { %v9785_v29 = vshll.u32 %v8679_v18, 16  ;;  %v9991_v15 = vrot.slane %v8679_v18, 1 }
 0xc57   : > { %v18782_v50 = vsel %vm15745_vm3, 0, %v8615_v60  ;;  %v8486_v60 = vld [vmem:[%s19890_s11 + $0x20] sm:$0xf] }
 0xc58   : > { %14115 = vmatmul.mubr.msk.bf16.vlgmr.msra.gmra.mrb[64].mxu0 %vm3744_vm8, %v18257_v11  ;;  %v9778_v3 = vshrl.u32 %v18782_v50, 16 }
 0xc59   : > { %14147 = vmatpush3.bf16.msra.mxu0 %v9793_v12  ;;  %14118 = vmatprep.mubr.msk.bf16.mxu0 %vm3744_vm8, %v18310_v46  ;;  %v9787_v12 = vrot.slane %v9785_v29, 1 }
 0xc5a   : > { %15373 = vmatprep.subr.msk.bf16.mxu0 %vm3792_vm7, %v8483_v31 }
 0xc60   : > { %14119 = vmatmul.mubr.msk.bf16.gmra.mrb[68].mxu0 %vm3744_vm8, %v18292_v34 }
 0xc61   : > { %14122 = vmatprep.mubr.msk.bf16.mxu0 %vm3744_vm8, %v18356_v14 }
 0xc68   : > { %14123 = vmatmul.mubr.msk.bf16.gmra.mrb[72].mxu0 %vm3744_vm8, %v18365_v52 }
 0xc69   : > { %14126 = vmatprep.mubr.msk.bf16.mxu0 %vm3744_vm8, %v18404_v63 }
 0xc70   : > { %14127 = vmatmul.mubr.msk.bf16.gmra.mrb[76].mxu0 %vm3744_vm8, %v18413_v25 }
 0xc71   : > { %14130 = vmatprep.mubr.msk.bf16.mxu0 %vm3744_vm8, %v18452_v37 }
 0xc78   : > { %14131 = vmatmul.mubr.msk.bf16.gmra.mrb[80].mxu0 %vm3744_vm8, %v18461_v54 }
 0xc79   : > { %14134 = vmatprep.mubr.msk.bf16.mxu0 %vm3744_vm8, %v18500_v42 }
 0xc80   : > { %14135 = vmatmul.mubr.msk.bf16.gmra.mrb[84].mxu0 %vm3744_vm8, %v18508_v44 }
 0xc81   : > { %14138 = vmatprep.mubr.msk.bf16.mxu0 %vm3744_vm8, %v18550_v0 }
 0xc88   : > { %14139 = vmatmul.mubr.msk.bf16.gmra.mrb[88].mxu0 %vm3744_vm8, %v18546_v20 }
 0xc89   : > { %14142 = vmatprep.mubr.msk.bf16.mxu0 %vm3744_vm8, %v18576_v56 }
 0xc90   : > { %14143 = vmatmul.mubr.msk.bf16.gmra.mrb[92].mxu0 %vm3744_vm8, %v18782_v50 }
 0xc91   : > { %14148 = vmatprep.mubr.msk.bf16.mxu0 %vm3744_vm8, %v18301_v17  ;;  %v9780_v17 = vshll.u32 %v18782_v50, 16 }
 0xc93   : > { %v9782_v6 = vrot.slane %v9780_v17, 1 }
 0xc95   : > { %v9783_v16 = vor.u32 %v9782_v6, %v9778_v3 }
 0xc97   : > { %v9788_v31 = vsel %vm1003_vm4, %v9783_v16, %v9787_v12 }
 0xc98   : > { %14149 = vmatmul.mubr.msk.bf16.vlgmr.msra.gmra.mrb[64].mxu0 %vm3744_vm8, %v18318_v40 }
 0xc99   : > { %14181 = vmatpush3.bf16.msra.mxu0 %v9997_v58  ;;  %14152 = vmatprep.mubr.msk.bf16.mxu0 %vm3744_vm8, %v18352_v13 }
 0xc9a   : > { %15374 = vmatprep.subr.msk.bf16.mxu0 %vm3792_vm7, %v8484_v53 }
 0xca0   : > { %14153 = vmatmul.mubr.msk.bf16.gmra.mrb[68].mxu0 %vm3744_vm8, %v18370_v55 }
 0xca1   : > { %14156 = vmatprep.mubr.msk.bf16.mxu0 %vm3744_vm8, %v18399_v62 }
 0xca8   : > { %14157 = vmatmul.mubr.msk.bf16.gmra.mrb[72].mxu0 %vm3744_vm8, %v18419_v41 }
 0xca9   : > { %14160 = vmatprep.mubr.msk.bf16.mxu0 %vm3744_vm8, %v18447_v28 }
 0xcb0   : > { %14161 = vmatmul.mubr.msk.bf16.gmra.mrb[76].mxu0 %vm3744_vm8, %v18467_v8 }
 0xcb1   : > { %14164 = vmatprep.mubr.msk.bf16.mxu0 %vm3744_vm8, %v18495_v33 }
 0xcb8   : > { %14165 = vmatmul.mubr.msk.bf16.gmra.mrb[80].mxu0 %vm3744_vm8, %v18518_v5 }
 0xcb9   : > { %14168 = vmatprep.mubr.msk.bf16.mxu0 %vm3744_vm8, %v18541_v19 }
 0xcc0   : > { %14169 = vmatmul.mubr.msk.bf16.gmra.mrb[84].mxu0 %vm3744_vm8, %v18562_v49 }
 0xcc1   : > { %14172 = vmatprep.mubr.msk.bf16.mxu0 %vm3744_vm8, %v18572_v48 }
 0xcc8   : > { %14173 = vmatmul.mubr.msk.bf16.gmra.mrb[88].mxu0 %vm3744_vm8, %v18582_v26 }
 0xcc9   : > { %14176 = vmatprep.mubr.msk.bf16.mxu0 %vm3744_vm8, %v18589_v10 }
 0xcd0   : > { %14177 = vmatmul.mubr.msk.bf16.gmra.mrb[92].mxu0 %vm3744_vm8, %v9788_v31 }
 0xcd1   : > { %14182 = vmatprep.mubr.msk.bf16.mxu0 %vm3744_vm8, %v18639_v2  ;;  %v9990_v2 = vrot.slane %v18782_v50, 1 }
 0xcd3   : > { %v9992_v30 = vsel %vm1638_vm6, %v9990_v2, %v9991_v15 }
 0xcd8   : > { %14183 = vmatmul.mubr.msk.bf16.vlgmr.msra.gmra.mrb[64].mxu0 %vm3744_vm8, %v18647_v9 }
 0xcd9   : > { %14215 = vmatpush3.bf16.msra.mxu0 %v10193_v22  ;;  %14186 = vmatprep.mubr.msk.bf16.mxu0 %vm3744_vm8, %v18657_v36 }
 0xcda   : > { %15375 = vmatprep.subr.msk.bf16.mxu0 %vm3792_vm7, %v8485_v21 }
 0xce0   : > { %14187 = vmatmul.mubr.msk.bf16.gmra.mrb[68].mxu0 %vm3744_vm8, %v18662_v32 }
 0xce1   : > { %14190 = vmatprep.mubr.msk.bf16.mxu0 %vm3744_vm8, %v18671_v39 }
 0xce8   : > { %14191 = vmatmul.mubr.msk.bf16.gmra.mrb[72].mxu0 %vm3744_vm8, %v18676_v27 }
 0xce9   : > { %14194 = vmatprep.mubr.msk.bf16.mxu0 %vm3744_vm8, %v18685_v47 }
 0xcf0   : > { %14195 = vmatmul.mubr.msk.bf16.gmra.mrb[76].mxu0 %vm3744_vm8, %v18690_v38 }
 0xcf1   : > { %14198 = vmatprep.mubr.msk.bf16.mxu0 %vm3744_vm8, %v18699_v35 }
 0xcf8   : > { %14199 = vmatmul.mubr.msk.bf16.gmra.mrb[80].mxu0 %vm3744_vm8, %v18704_v51 }
 0xcf9   : > { %14202 = vmatprep.mubr.msk.bf16.mxu0 %vm3744_vm8, %v18713_v43 }
 0xd00   : > { %14203 = vmatmul.mubr.msk.bf16.gmra.mrb[84].mxu0 %vm3744_vm8, %v18718_v4 }
 0xd01   : > { %14206 = vmatprep.mubr.msk.bf16.mxu0 %vm3744_vm8, %v18727_v24 }
 0xd08   : > { %14207 = vmatmul.mubr.msk.bf16.gmra.mrb[88].mxu0 %vm3744_vm8, %v18732_v45 }
 0xd09   : > { %14210 = vmatprep.mubr.msk.bf16.mxu0 %vm3744_vm8, %v18739_v61 }
 0xd10   : > { %14211 = vmatmul.mubr.msk.bf16.gmra.mrb[92].mxu0 %vm3744_vm8, %v9992_v30 }
 0xd11   : > { %14216 = vmatprep.mubr.msk.bf16.mxu0 %vm3744_vm8, %v18257_v11  ;;  %v10585_v11 = vsel %vm3792_vm7, %v8486_v60, 0 }
 0xd18   : > { %14217 = vmatmul.mubr.msk.bf16.vlgmr.msra.gmra.mrb[64].mxu0 %vm3744_vm8, %v18310_v46 }
 0xd19   : > { %14249 = vmatpush3.bf16.msra.mxu0 %v10389_v1  ;;  %14220 = vmatprep.mubr.msk.bf16.mxu0 %vm3744_vm8, %v18292_v34 }
 0xd1a   : > { %15376 = vmatprep.subr.msk.bf16.mxu0 %vm3792_vm7, %v8486_v60 }
 0xd20   : > { %14221 = vmatmul.mubr.msk.bf16.gmra.mrb[68].mxu0 %vm3744_vm8, %v18356_v14 }
 0xd21   : > { %14224 = vmatprep.mubr.msk.bf16.mxu0 %vm3744_vm8, %v18365_v52 }
 0xd28   : > { %14225 = vmatmul.mubr.msk.bf16.gmra.mrb[72].mxu0 %vm3744_vm8, %v18404_v63 }
 0xd29   : > { %14228 = vmatprep.mubr.msk.bf16.mxu0 %vm3744_vm8, %v18413_v25 }
 0xd30   : > { %14229 = vmatmul.mubr.msk.bf16.gmra.mrb[76].mxu0 %vm3744_vm8, %v18452_v37 }
 0xd31   : > { %14232 = vmatprep.mubr.msk.bf16.mxu0 %vm3744_vm8, %v18461_v54 }
 0xd38   : > { %14233 = vmatmul.mubr.msk.bf16.gmra.mrb[80].mxu0 %vm3744_vm8, %v18500_v42 }
 0xd39   : > { %14236 = vmatprep.mubr.msk.bf16.mxu0 %vm3744_vm8, %v18508_v44 }
 0xd40   : > { %14237 = vmatmul.mubr.msk.bf16.gmra.mrb[84].mxu0 %vm3744_vm8, %v18550_v0 }
 0xd41   : > { %14240 = vmatprep.mubr.msk.bf16.mxu0 %vm3744_vm8, %v18546_v20 }
 0xd48   : > { %14241 = vmatmul.mubr.msk.bf16.gmra.mrb[88].mxu0 %vm3744_vm8, %v18576_v56 }
 0xd49   : > { %14244 = vmatprep.mubr.msk.bf16.mxu0 %vm3744_vm8, %v18782_v50 }
 0xd50   : > { %14245 = vmatmul.mubr.msk.bf16.gmra.mrb[92].mxu0 %vm3744_vm8, %v15751_v23  ;;  %v20143_v23 = vld [vmem:[#allocation2_spill] sm:$0xff] }
 0xd51   : > { %14250 = vmatprep.mubr.msk.bf16.mxu0 %vm3744_vm8, %v18318_v40 }
 0xd58   : > { %14251 = vmatmul.mubr.msk.bf16.vlgmr.msra.gmra.mrb[64].mxu0 %vm3744_vm8, %v18352_v13 }
 0xd59   : > { %14283 = vmatpush3.bf16.msra.mxu0 %v10585_v11  ;;  %14254 = vmatprep.mubr.msk.bf16.mxu0 %vm3744_vm8, %v18370_v55 }
 0xd60   : > { %14255 = vmatmul.mubr.msk.bf16.gmra.mrb[68].mxu0 %vm3744_vm8, %v18399_v62 }
 0xd61   : > { %14258 = vmatprep.mubr.msk.bf16.mxu0 %vm3744_vm8, %v18419_v41 }
 0xd68   : > { %14259 = vmatmul.mubr.msk.bf16.gmra.mrb[72].mxu0 %vm3744_vm8, %v18447_v28 }
 0xd69   : > { %14262 = vmatprep.mubr.msk.bf16.mxu0 %vm3744_vm8, %v18467_v8 }
 0xd70   : > { %14263 = vmatmul.mubr.msk.bf16.gmra.mrb[76].mxu0 %vm3744_vm8, %v18495_v33 }
 0xd71   : > { %14266 = vmatprep.mubr.msk.bf16.mxu0 %vm3744_vm8, %v18518_v5  ;;  %v18968_v5 = vld [vmem:[%s19891_s12] ss:$0 sm:$0xff] }
 0xd78   : > { %14267 = vmatmul.mubr.msk.bf16.gmra.mrb[80].mxu0 %vm3744_vm8, %v18541_v19 }
 0xd79   : > { %14270 = vmatprep.mubr.msk.bf16.mxu0 %vm3744_vm8, %v18562_v49 }
 0xd80   : > { %14271 = vmatmul.mubr.msk.bf16.gmra.mrb[84].mxu0 %vm3744_vm8, %v18572_v48 }
 0xd81   : > { %14274 = vmatprep.mubr.msk.bf16.mxu0 %vm3744_vm8, %v18582_v26 }
 0xd88   : > { %14275 = vmatmul.mubr.msk.bf16.gmra.mrb[88].mxu0 %vm3744_vm8, %v18589_v10 }
 0xd89   : > { %14278 = vmatprep.mubr.msk.bf16.mxu0 %vm3744_vm8, %v9788_v31 }
 0xd90   : > { %14279 = vmatmul.mubr.msk.bf16.gmra.mrb[92].mxu0 %vm3744_vm8, %v20143_v23 }
 0xd91   : > { %14284 = vmatprep.mubr.msk.bf16.mxu0 %vm3744_vm8, %v18647_v9 }
 0xd98   : > { %14285 = vmatmul.mubr.msk.bf16.vlgmr.msra.gmra.mrb[64].mxu0 %vm3744_vm8, %v18657_v36 }
 0xd99   : > { %14288 = vmatprep.mubr.msk.bf16.mxu0 %vm3744_vm8, %v18662_v32 }
 0xda0   : > { %14289 = vmatmul.mubr.msk.bf16.gmra.mrb[68].mxu0 %vm3744_vm8, %v18671_v39 }
 0xda1   : > { %14292 = vmatprep.mubr.msk.bf16.mxu0 %vm3744_vm8, %v18676_v27 }
 0xda8   : > { %14293 = vmatmul.mubr.msk.bf16.gmra.mrb[72].mxu0 %vm3744_vm8, %v18685_v47 }
 0xda9   : > { %14296 = vmatprep.mubr.msk.bf16.mxu0 %vm3744_vm8, %v18690_v38 }
 0xdb0   : > { %14297 = vmatmul.mubr.msk.bf16.gmra.mrb[76].mxu0 %vm3744_vm8, %v18699_v35 }
 0xdb1   : > { %14300 = vmatprep.mubr.msk.bf16.mxu0 %vm3744_vm8, %v18704_v51 }
 0xdb8   : > { %14301 = vmatmul.mubr.msk.bf16.gmra.mrb[80].mxu0 %vm3744_vm8, %v18713_v43 }
 0xdb9   : > { %14304 = vmatprep.mubr.msk.bf16.mxu0 %vm3744_vm8, %v18718_v4 }
 0xdc0   : > { %14305 = vmatmul.mubr.msk.bf16.gmra.mrb[84].mxu0 %vm3744_vm8, %v18727_v24 }
 0xdc1   : > { %14308 = vmatprep.mubr.msk.bf16.mxu0 %vm3744_vm8, %v18732_v45 }
 0xdc8   : > { %14309 = vmatmul.mubr.msk.bf16.gmra.mrb[88].mxu0 %vm3744_vm8, %v18739_v61 }
 0xdc9   : > { %14312 = vmatprep.mubr.msk.bf16.mxu0 %vm3744_vm8, %v9992_v30 }
 0xdd0   : > { %14313 = vmatmul.mubr.msk.bf16.gmra.mrb[92].mxu0 %vm3744_vm8, %v16187_v7 }
 0xe6b   : > { %v14286_v34 = vpop.f32.mrb[64].mxu0 }
 0xe6c   : > { %v10788_v46 = vadd.f32 %v14286_v34, %v18968_v5  ;;  %v10621_v40 = vpop.f32.mrb[65].mxu0 }
 0xe6d   : > { %v14287_v13 = vpop.f32.mrb[66].mxu0  ;;  %v10786_v55 = vadd.f32 %v18968_v5, %v10621_v40 }
 0xe6e   : > { %v10789_v14 = vadd.f32 %v14287_v13, %v18968_v5  ;;  %10854 = vrot.lane.b32.xlu0 %v10788_v46, %s15611_s23  ;;  %v10624_v52 = vpop.f32.mrb[67].mxu0  ;;  %v19035_v13 = vld [vmem:[%s15705_s17] sm:$0xff]  }
 0xe6f   : > { %v10787_v7 = vadd.f32 %v18968_v5, %v10624_v52  ;;  %v10979_v52 = vunpack.c.h.bf16 %v19035_v13 }
 0xe70   : > { %10856 = vrot.lane.b32.xlu1 %v10789_v14, %s15611_s23  ;;  %v10978_v14 = vunpack.c.l.bf16 %v19035_v13 }
 0xe72   : > { %10850 = vrot.lane.b32.xlu0 %v10786_v55, %s15611_s23  ;;  %v15586_v55 = vld [vmem:[%s15705_s17 + $0x8] sm:$0xff]  }
 0xe73   : > { %v14290_v62 = vpop.f32.mrb[68].mxu0 }
 0xe74   : > { %v10792_v63 = vadd.f32 %v14290_v62, %v18968_v5  ;;  %10852 = vrot.lane.b32.xlu1 %v10787_v7, %s15611_s23  ;;  %v10637_v25 = vpop.f32.mrb[69].mxu0  ;;  %v10980_v7 = vunpack.c.l.bf16 %v15586_v55  ;;  %v10981_v62 = vunpack.c.h.bf16 %v15586_v55 }
 0xe75   : > { %v14291_v41 = vpop.f32.mrb[70].mxu0  ;;  %v10790_v54 = vadd.f32 %v18968_v5, %v10637_v25 }
 0xe76   : > { %v10793_v28 = vadd.f32 %v14291_v41, %v18968_v5  ;;  %10862 = vrot.lane.b32.xlu0 %v10792_v63, %s15611_s23  ;;  %v10640_v37 = vpop.f32.mrb[71].mxu0  ;;  %v19041_v63 = vld [vmem:[%s15705_s17 + $0x18] sm:$0xff]   ;;  %v19046_v41 = vld [vmem:[%s15705_s17 + $0x10] sm:$0xff]  }
 0xe77   : > { %v10791_v8 = vadd.f32 %v18968_v5, %v10640_v37  ;;  %v10985_v25 = vunpack.c.h.bf16 %v19041_v63  ;;  %v10983_v37 = vunpack.c.h.bf16 %v19046_v41 }
 0xe78   : > { %10864 = vrot.lane.b32.xlu1 %v10793_v28, %s15611_s23  ;;  %v10982_v28 = vunpack.c.l.bf16 %v19046_v41 }
 0xe7a   : > { %10858 = vrot.lane.b32.xlu0 %v10790_v54, %s15611_s23  ;;  %v19051_v54 = vld [vmem:[%s15705_s17 + $0x28] sm:$0xff]  }
 0xe7b   : > { %v14294_v33 = vpop.f32.mrb[72].mxu0 }
 0xe7c   : > { %v10796_v42 = vadd.f32 %v14294_v33, %v18968_v5  ;;  %10860 = vrot.lane.b32.xlu1 %v10791_v8, %s15611_s23  ;;  %v10653_v44 = vpop.f32.mrb[73].mxu0  ;;  %v10988_v8 = vunpack.c.l.bf16 %v19051_v54  ;;  %v10989_v33 = vunpack.c.h.bf16 %v19051_v54 }
 0xe7d   : > { %v14295_v49 = vpop.f32.mrb[74].mxu0  ;;  %v10794_v0 = vadd.f32 %v18968_v5, %v10653_v44 }
 0xe7e   : > { %v10797_v19 = vadd.f32 %v14295_v49, %v18968_v5  ;;  %10870 = vrot.lane.b32.xlu0 %v10796_v42, %s15611_s23  ;;  %v10656_v20 = vpop.f32.mrb[75].mxu0  ;;  %v19056_v42 = vld [vmem:[%s15705_s17 + $0x20] sm:$0xff]  }
 0xe7f   : > { %v10795_v48 = vadd.f32 %v18968_v5, %v10656_v20  ;;  %v10986_v44 = vunpack.c.l.bf16 %v19056_v42  ;;  %v10987_v49 = vunpack.c.h.bf16 %v19056_v42 }
 0xe80   : > { %10872 = vrot.lane.b32.xlu1 %v10797_v19, %s15611_s23  ;;  %v19061_v19 = vld [vmem:[%s15705_s17 + $0x38] sm:$0xff]  }
 0xe81   : > { %v10992_v20 = vunpack.c.l.bf16 %v19061_v19 }
 0xe82   : > { %10866 = vrot.lane.b32.xlu0 %v10794_v0, %s15611_s23  ;;  %v10993_v0 = vunpack.c.h.bf16 %v19061_v19 }
 0xe83   : > { %v14298_v56 = vpop.f32.mrb[76].mxu0 }
 0xe84   : > { %v10800_v26 = vadd.f32 %v14298_v56, %v18968_v5  ;;  %10868 = vrot.lane.b32.xlu1 %v10795_v48, %s15611_s23  ;;  %v10669_v10 = vpop.f32.mrb[77].mxu0  ;;  %v19066_v56 = vld [vmem:[%s15705_s17 + $0x30] sm:$0xff]  }
 0xe85   : > { %v14299_v9 = vpop.f32.mrb[78].mxu0  ;;  %v10798_v39 = vadd.f32 %v18968_v5, %v10669_v10  ;;  %v10991_v10 = vunpack.c.h.bf16 %v19066_v56 }
 0xe86   : > { %v10801_v36 = vadd.f32 %v14299_v9, %v18968_v5  ;;  %10878 = vrot.lane.b32.xlu0 %v10800_v26, %s15611_s23  ;;  %v10672_v32 = vpop.f32.mrb[79].mxu0  ;;  %v10990_v26 = vunpack.c.l.bf16 %v19066_v56  ;;  %v19071_v9 = vld [vmem:[%s15705_s17 + $0x48] sm:$0xff]  }
 0xe87   : > { %v10799_v27 = vadd.f32 %v18968_v5, %v10672_v32  ;;  %v10997_v32 = vunpack.c.h.bf16 %v19071_v9 }
 0xe88   : > { %10880 = vrot.lane.b32.xlu1 %v10801_v36, %s15611_s23  ;;  %v10996_v36 = vunpack.c.l.bf16 %v19071_v9 }
 0xe8a   : > { %10874 = vrot.lane.b32.xlu0 %v10798_v39, %s15611_s23  ;;  %v20144_v39 = vld [vmem:[#allocation5_spill] sm:$0xff] }
 0xe8b   : > { %v14302_v47 = vpop.f32.mrb[80].mxu0 }
 0xe8c   : > { %v10804_v38 = vadd.f32 %v14302_v47, %v18968_v5  ;;  %10876 = vrot.lane.b32.xlu1 %v10799_v27, %s15611_s23  ;;  %v10685_v35 = vpop.f32.mrb[81].mxu0  ;;  %v19078_v47 = vld [vmem:[%s15705_s17 + $0x40] sm:$0xff]  }
 0xe8d   : > { %v14303_v51 = vpop.f32.mrb[82].mxu0  ;;  %v10802_v24 = vadd.f32 %v18968_v5, %v10685_v35  ;;  %v10995_v35 = vunpack.c.h.bf16 %v19078_v47 }
 0xe8e   : > { %v10805_v43 = vadd.f32 %v14303_v51, %v18968_v5  ;;  %10886 = vrot.lane.b32.xlu0 %v10804_v38, %s15611_s23  ;;  %v10688_v4 = vpop.f32.mrb[83].mxu0  ;;  %v10994_v38 = vunpack.c.l.bf16 %v19078_v47  ;;  %v19083_v51 = vld [vmem:[%s15705_s17 + $0x58] sm:$0xff]  }
 0xe8f   : > { %v10803_v45 = vadd.f32 %v18968_v5, %v10688_v4 }
 0xe90   : > { %10888 = vrot.lane.b32.xlu1 %v10805_v43, %s15611_s23  ;;  %v11000_v43 = vunpack.c.l.bf16 %v19083_v51 }
 0xe92   : > { %10882 = vrot.lane.b32.xlu0 %v10802_v24, %s15611_s23 }
 0xe93   : > { %v14306_v61 = vpop.f32.mrb[84].mxu0 }
 0xe94   : > { %v10808_v50 = vadd.f32 %v14306_v61, %v18968_v5  ;;  %10884 = vrot.lane.b32.xlu1 %v10803_v45, %s15611_s23  ;;  %v10701_v58 = vpop.f32.mrb[85].mxu0  ;;  %v11001_v45 = vunpack.c.h.bf16 %v19083_v51  ;;  %v19088_v61 = vld [vmem:[%s15705_s17 + $0x50] sm:$0xff]  }
 0xe95   : > { %v14307_v53 = vpop.f32.mrb[86].mxu0  ;;  %v10806_v6 = vadd.f32 %v18968_v5, %v10701_v58 }
 0xe96   : > { %v10809_v17 = vadd.f32 %v14307_v53, %v18968_v5  ;;  %10894 = vrot.lane.b32.xlu0 %v10808_v50, %s15611_s23  ;;  %v10704_v18 = vpop.f32.mrb[87].mxu0  ;;  %v20145_v53 = vld [vmem:[#allocation6_spill] sm:$0xff] }
 0xe97   : > { %v10807_v29 = vadd.f32 %v18968_v5, %v10704_v18  ;;  %v19095_v18 = vld [vmem:[%s15705_s17 + $0x68] sm:$0xff]  }
 0xe98   : > { %10896 = vrot.lane.b32.xlu1 %v10809_v17, %s15611_s23 }
 0xe9a   : > { %10890 = vrot.lane.b32.xlu0 %v10806_v6, %s15611_s23 }
 0xe9b   : > { %v14310_v3 = vpop.f32.mrb[88].mxu0 }
 0xe9c   : > { %v10812_v16 = vadd.f32 %v14310_v3, %v18968_v5  ;;  %10892 = vrot.lane.b32.xlu1 %v10807_v29, %s15611_s23  ;;  %v10717_v12 = vpop.f32.mrb[89].mxu0  ;;  %v19100_v3 = vld [vmem:[%s15705_s17 + $0x60] sm:$0xff]  }
 0xe9d   : > { %v14311_v31 = vpop.f32.mrb[90].mxu0  ;;  %v10810_v2 = vadd.f32 %v18968_v5, %v10717_v12 }
 0xe9e   : > { %v10813_v22 = vadd.f32 %v14311_v31, %v18968_v5  ;;  %10902 = vrot.lane.b32.xlu0 %v10812_v16, %s15611_s23  ;;  %v10720_v21 = vpop.f32.mrb[91].mxu0 }
 0xe9f   : > { %v10811_v15 = vadd.f32 %v18968_v5, %v10720_v21  ;;  %v20150_v21 = vld [vmem:[#allocation10_spill] sm:$0xff] }
 0xea0   : > { %10904 = vrot.lane.b32.xlu1 %v10813_v22, %s15611_s23 }
 0xea2   : > { %10898 = vrot.lane.b32.xlu0 %v10810_v2, %s15611_s23  ;;  %v19107_v2 = vld [vmem:[%s15705_s17 + $0x70] sm:$0xff]  }
 0xea3   : > { %v14314_v30 = vpop.f32.mrb[92].mxu0 }
 0xea4   : > { %10900 = vrot.lane.b32.xlu1 %v10811_v15, %s15611_s23  ;;  %v10733_v1 = vpop.f32.mrb[93].mxu0  ;;  %v10816_v46 = vadd.f32 %v14314_v30, %v18968_v5  ;;  %v20146_v30 = vld [vmem:[#allocation3_spill] sm:$0xff] }
 0xea5   : > { %v10814_v60 = vadd.f32 %v18968_v5, %v10733_v1  ;;  %v14315_v11 = vpop.f32.mrb[94].mxu0 }
 0xea6   : > { %v10736_v23 = vpop.f32.mrb[95].mxu0  ;;  %v10817_v40 = vadd.f32 %v14315_v11, %v18968_v5  ;;  %v19114_v11 = vld [vmem:[%s15705_s17 + $0x78] sm:$0xff]   ;;  %s15612_s17 = smov 64  }
 0xea7   : > { %v10815_v34 = vadd.f32 %v18968_v5, %v10736_v23  ;;  %10906 = vrot.lane.b32.xlu0 %v10814_v60, %s15611_s23  ;;  %v10984_v5 = vunpack.c.l.bf16 %v19041_v63  ;;  %v20149_v60 = vld [vmem:[#allocation7_spill] sm:$0xff] }
 0xea9   : > { %10908 = vrot.lane.b32.xlu1 %v10815_v34, %s15611_s23 }
 0xeab   : > { %10910 = vrot.lane.b32.xlu0 %v10816_v46, %s15611_s23 }
 0xead   : > { %10912 = vrot.lane.b32.xlu1 %v10817_v40, %s15611_s23 }
 0xee0   : > { %v10855_v48 = vpop.permute.xlu0 %10854 }
 0xee1   : > { %v10948_v27 = vsel %vm3744_vm8, %v20144_v39, %v10855_v48  ;;  %v20147_v48 = vld [vmem:[#allocation4_spill] sm:$0xff] }
 0xee2   : > { %v11012_v4 = vadd.f32 %v10980_v7, %v10948_v27  ;;  %v10857_v24 = vpop.permute.xlu1 %10856 }
 0xee3   : > { %v10949_v17 = vsel %vm3744_vm8, %v20145_v53, %v10857_v24 }
 0xee4   : > { %v19103_v12 = vmax.f32 %v11012_v4, 0.0  ;;  %v11013_v31 = vadd.f32 %v10981_v62, %v10949_v17  ;;  %v10851_v22 = vpop.permute.xlu0 %10850 }
 0xee5   : > { %v10946_v1 = vsel %vm3744_vm8, %v20146_v30, %v10851_v22  ;;  %v20148_v30 = vld [vmem:[#allocation9_spill] sm:$0xff] }
 0xee6   : > { %v19118_v46 = vmax.f32 %v11013_v31, 0.0  ;;  %v11010_v40 = vadd.f32 %v10978_v14, %v10946_v1  ;;  %v10853_v55 = vpop.permute.xlu1 %10852  ;;  %v11294_v7 = vrot.slane %v19103_v12, 5  ;;  %v11260_v62 = vrot.slane %v19103_v12, 4 }
 0xee7   : > { %v10947_v39 = vsel %vm3744_vm8, %v20147_v48, %v10853_v55  ;;  %v11162_v27 = vrot.slane %v19103_v12, 1  ;;  %v11196_v4 = vrot.slane %v19103_v12, 2  ;;  %v11328_v24 = vrot.slane %v19103_v12, 6 }
 0xee8   : > { %v19127_v53 = vmax.f32 %v11010_v40, 0.0  ;;  %v11011_v17 = vadd.f32 %v10979_v52, %v10947_v39  ;;  %v10863_v14 = vpop.permute.xlu0 %10862  ;;  %v11574_v31 = vrot.slane %v19118_v46, 5 }
 0xee9   : > { %v10952_v1 = vsel %vm3744_vm8, %v20148_v30, %v10863_v14 }
 0xeea   : > { %v19138_v40 = vmax.f32 %v11011_v17, 0.0  ;;  %v11016_v13 = vadd.f32 %v10984_v5, %v10952_v1  ;;  %v10865_v52 = vpop.permute.xlu1 %10864  ;;  %v11293_v39 = vrot.slane %v19127_v53, 6  ;;  %v11127_v23 = vrot.slane %v19127_v53, 1 }
 0xeeb   : > { %v10953_v15 = vsel %vm3744_vm8, %v20149_v60, %v10865_v52  ;;  %v11259_v14 = vrot.slane %v19127_v53, 5  ;;  %v11161_v30 = vrot.slane %v19127_v53, 2  ;;  %v11195_v48 = vrot.slane %v19127_v53, 3 }
 0xeec   : > { %v19149_v34 = vmax.f32 %v11016_v13, 0.0  ;;  %v11017_v17 = vadd.f32 %v10985_v25, %v10953_v15  ;;  %v10859_v5 = vpop.permute.xlu0 %10858  ;;  %v11295_v1 = vsel %vm11091_vm9, %v11294_v7, %v11293_v39  ;;  %v11128_v55 = vsel %vm11091_vm9, %v19103_v12, %v11127_v23  ;;  %v20151_v23 = vld [vmem:[#allocation8_spill] sm:$0xff] }
 0xeed   : > { %v10950_v60 = vsel %vm3744_vm8, %v20150_v21, %v10859_v5  ;;  %v11261_v52 = vsel %vm11091_vm9, %v11260_v62, %v11259_v14  ;;  %v11163_v16 = vsel %vm11091_vm9, %v11162_v27, %v11161_v30  ;;  %v11573_v13 = vrot.slane %v19138_v40, 6 }
 0xeee   : > { %v19161_v22 = vmax.f32 %v11017_v17, 0.0  ;;  %v11014_v63 = vadd.f32 %v10982_v28, %v10950_v60  ;;  %v10861_v25 = vpop.permute.xlu1 %10860  ;;  %v11298_v15 = vrot.slane %v19149_v34, 3  ;;  %v11131_v7 = vrot.slane %v19149_v34, 6  ;;  %v20152_v60 = vld [vmem:[#allocation11_spill] sm:$0xff] }
 0xeef   : > { %v10951_v39 = vsel %vm3744_vm8, %v20151_v23, %v10861_v25  ;;  %v11264_v21 = vrot.slane %v19149_v34, 2  ;;  %v11165_v62 = vrot.slane %v19149_v34, 7  ;;  %v11575_v27 = vsel %vm11091_vm9, %v11574_v31, %v11573_v13 }
 0xef0   : > { %v19172_v14 = vmax.f32 %v11014_v63, 0.0  ;;  %v11015_v30 = vadd.f32 %v10983_v37, %v10951_v39  ;;  %v10871_v28 = vpop.permute.xlu0 %10870  ;;  %v11578_v17 = vrot.slane %v19161_v22, 3  ;;  %v11197_v5 = vsel %vm11091_vm9, %v11196_v4, %v11195_v48  ;;  %v20153_v4 = vld [vmem:[#allocation12_spill] sm:$0xff] }
 0xef1   : > { %v10956_v29 = vsel %vm3744_vm8, %v20152_v60, %v10871_v28  ;;  %v11327_v25 = vrot.slane %v19127_v53, 7  ;;  %v20168_v51 = vrot.slane %v19138_v40, 1 }
 0xef2   : > { %v19183_v31 = vmax.f32 %v11015_v30, 0.0  ;;  %v11020_v41 = vadd.f32 %v10988_v8, %v10956_v29  ;;  %v10873_v37 = vpop.permute.xlu1 %10872  ;;  %v11296_v13 = vrot.slane %v19172_v14, 4  ;;  %v11129_v63 = vrot.slane %v19172_v14, 7 }
 0xef3   : > { %v10957_v48 = vsel %vm3744_vm8, %v20153_v4, %v10873_v37  ;;  %v11262_v39 = vrot.slane %v19172_v14, 3  ;;  %v11164_v28 = vsel %vm11094_vm10, %v19172_v14, %v11163_v16  ;;  %v11198_v30 = vrot.slane %v19172_v14, 1  ;;  %v20154_v37 = vld [vmem:[#allocation13_spill] sm:$0xff] }
 0xef4   : > { %v19195_v60 = vmax.f32 %v11020_v41, 0.0  ;;  %v11021_v8 = vadd.f32 %v10989_v33, %v10957_v48  ;;  %v10867_v29 = vpop.permute.xlu0 %10866  ;;  %v11297_v58 = vsel %vm11094_vm10, %v11296_v13, %v11295_v1  ;;  %v11130_v50 = vsel %vm11094_vm10, %v11129_v63, %v11128_v55  ;;  %v20155_v55 = vld [vmem:[#allocation14_spill] sm:$0xff] }
 0xef5   : > { %v10954_v4 = vsel %vm3744_vm8, %v20154_v37, %v10867_v29  ;;  %v11299_v6 = vsel %vm11097_vm11, %v11298_v15, %v11297_v58  ;;  %v11132_v16 = vsel %vm11097_vm11, %v11131_v7, %v11130_v50  ;;  %v11263_v23 = vsel %vm11094_vm10, %v11262_v39, %v11261_v52 }
 0xef6   : > { %v19206_v41 = vmax.f32 %v11021_v8, 0.0  ;;  %v11018_v54 = vadd.f32 %v10986_v44, %v10954_v4  ;;  %v10869_v33 = vpop.permute.xlu1 %10868  ;;  %v11302_v48 = vrot.slane %v19195_v60, 1  ;;  %v11135_v1 = vrot.slane %v19195_v60, 4  ;;  %v20156_v8 = vld [vmem:[#allocation15_spill] sm:$0xff] }
 0xef7   : > { %v10955_v13 = vsel %vm3744_vm8, %v20155_v55, %v10869_v33  ;;  %v11265_v58 = vsel %vm11097_vm11, %v11264_v21, %v11263_v23  ;;  %v11166_v50 = vsel %vm11097_vm11, %v11165_v62, %v11164_v28  ;;  %v11169_v52 = vrot.slane %v19195_v60, 5 }
 0xef8   : > { %v19217_v15 = vmax.f32 %v11018_v54, 0.0  ;;  %v11019_v44 = vadd.f32 %v10987_v49, %v10955_v13  ;;  %v10879_v7 = vpop.permute.xlu0 %10878  ;;  %v11576_v63 = vrot.slane %v19183_v31, 4  ;;  %v11582_v39 = vrot.slane %v19206_v41, 1  ;;  %v20157_v54 = vld [vmem:[#allocation16_spill] sm:$0xff] }
 0xef9   : > { %v10960_v29 = vsel %vm3744_vm8, %v20156_v8, %v10879_v7  ;;  %v19226_v21 = vsel %vm11094_vm10, %v11198_v30, %v11197_v5  ;;  %v11203_v62 = vrot.slane %v19195_v60, 6  ;;  %v19232_v23 = vsel %vm11091_vm9, %v11328_v24, %v11327_v25  ;;  %v20158_v7 = vld [vmem:[#allocation17_spill] sm:$0xff] }
 0xefa   : > { %v19234_v42 = vmax.f32 %v11019_v44, 0.0  ;;  %v11024_v49 = vadd.f32 %v10992_v20, %v10960_v29  ;;  %v10881_v28 = vpop.permute.xlu1 %10880  ;;  %v11300_v37 = vrot.slane %v19217_v15, 2  ;;  %v11133_v4 = vrot.slane %v19217_v15, 5 }
 0xefb   : > { %v10961_v5 = vsel %vm3744_vm8, %v20157_v54, %v10881_v28  ;;  %v11266_v30 = vrot.slane %v19217_v15, 1  ;;  %v11167_v33 = vrot.slane %v19217_v15, 6  ;;  %v11577_v24 = vsel %vm11094_vm10, %v11576_v63, %v11575_v27 }
 0xefc   : > { %v19245_v25 = vmax.f32 %v11024_v49, 0.0  ;;  %v11025_v55 = vadd.f32 %v10993_v0, %v10961_v5  ;;  %v10875_v20 = vpop.permute.xlu0 %10874  ;;  %v11301_v13 = vsel %vm11100_vm12, %v11300_v37, %v11299_v6  ;;  %v11134_v44 = vsel %vm11100_vm12, %v11133_v4, %v11132_v16  ;;  %v20159_v16 = vld [vmem:[#allocation18_spill] sm:$0xff] }
 0xefd   : > { %v10958_v8 = vsel %vm3744_vm8, %v20158_v7, %v10875_v20  ;;  %v11303_v29 = vsel %vm11103_vm13, %v11302_v48, %v11301_v13  ;;  %v11136_v28 = vsel %vm11103_vm13, %v11135_v1, %v11134_v44  ;;  %v11267_v54 = vsel %vm11100_vm12, %v11266_v30, %v11265_v58 }
 0xefe   : > { %v19256_v27 = vmax.f32 %v11025_v55, 0.0  ;;  %v11022_v19 = vadd.f32 %v10990_v26, %v10958_v8  ;;  %v10877_v0 = vpop.permute.xlu1 %10876  ;;  %v11305_v63 = vrot.slane %v19245_v25, 7  ;;  %v11139_v6 = vrot.slane %v19245_v25, 2  ;;  %v20160_v55 = vld [vmem:[#allocation19_spill] sm:$0xff]  ;;  %v20161_v8 = vld [vmem:[#allocation20_spill] sm:$0xff] }
 0xeff   : > { %v10959_v49 = vsel %vm3744_vm8, %v20159_v16, %v10877_v0  ;;  %v11268_v48 = vsel %vm11103_vm13, %v19195_v60, %v11267_v54  ;;  %v11271_v1 = vrot.slane %v19245_v25, 6  ;;  %v11168_v58 = vsel %vm11100_vm12, %v11167_v33, %v11166_v50 }
 0xf00   : > { %v19268_v37 = vmax.f32 %v11022_v19, 0.0  ;;  %v11023_v26 = vadd.f32 %v10991_v10, %v10959_v49  ;;  %v10887_v4 = vpop.permute.xlu0 %10886  ;;  %v11170_v5 = vsel %vm11103_vm13, %v11169_v52, %v11168_v58  ;;  %v11173_v30 = vrot.slane %v19245_v25, 3  ;;  %v20162_v58 = vld [vmem:[#allocation21_spill] sm:$0xff] }
 0xf01   : > { %v10964_v20 = vsel %vm3744_vm8, %v20160_v55, %v10887_v4  ;;  %v11579_v13 = vsel %vm11097_vm11, %v11578_v17, %v11577_v24  ;;  %v11580_v44 = vrot.slane %v19234_v42, 2  ;;  %v11585_v50 = vrot.slane %v19256_v27, 7 }
 0xf02   : > { %v19281_v33 = vmax.f32 %v11023_v26, 0.0  ;;  %v11028_v56 = vadd.f32 %v10996_v36, %v10964_v20  ;;  %v10889_v10 = vpop.permute.xlu1 %10888  ;;  %v11304_v52 = vsel %vm11106_vm14, %v19268_v37, %v11303_v29  ;;  %v11137_v7 = vrot.slane %v19268_v37, 3 }
 0xf03   : > { %v10965_v54 = vsel %vm3744_vm8, %v20161_v8, %v10889_v10  ;;  %v11306_v17 = vsel %vm11109_vm15, %v11305_v63, %v11304_v52  ;;  %v11269_v24 = vrot.slane %v19268_v37, 7  ;;  %v11171_v19 = vrot.slane %v19268_v37, 4  ;;  %v20164_v52 = vld [vmem:[#allocation23_spill] sm:$0xff] }
 0xf04   : > { %v19293_v0 = vmax.f32 %v11028_v56, 0.0  ;;  %v11029_v36 = vadd.f32 %v10997_v32, %v10965_v54  ;;  %v10883_v16 = vpop.permute.xlu0 %10882  ;;  %11321 = vrot.lane.b32.xlu0 %v11306_v17, %s15612_s17  ;;  %v11138_v29 = vsel %vm11106_vm14, %v11137_v7, %v11136_v28  ;;  %v11581_v49 = vsel %vm11100_vm12, %v11580_v44, %v11579_v13  ;;  %v20163_v13 = vld [vmem:[#allocation22_spill] sm:$0xff] }
 0xf05   : > { %v10962_v63 = vsel %vm3744_vm8, %v20162_v58, %v10883_v16  ;;  %v11140_v26 = vsel %vm11109_vm15, %v11139_v6, %v11138_v29  ;;  %v11270_v4 = vsel %vm11106_vm14, %v11269_v24, %v11268_v48  ;;  %v11172_v55 = vsel %vm11106_vm14, %v11171_v19, %v11170_v5 }
 0xf06   : > { %v19305_v20 = vmax.f32 %v11029_v36, 0.0  ;;  %v11026_v9 = vadd.f32 %v10994_v38, %v10962_v63  ;;  %v10885_v32 = vpop.permute.xlu1 %10884  ;;  %v11272_v56 = vsel %vm11109_vm15, %v11271_v1, %v11270_v4  ;;  %v11174_v28 = vsel %vm11109_vm15, %v11173_v30, %v11172_v55  ;;  %v20165_v36 = vld [vmem:[#allocation24_spill] sm:$0xff]  ;;  %v20166_v4 = vld [vmem:[#allocation25_spill] sm:$0xff] }
 0xf07   : > { %v10963_v44 = vsel %vm3744_vm8, %v20163_v13, %v10885_v32  ;;  %v11583_v6 = vsel %vm11103_vm13, %v11582_v39, %v11581_v49  ;;  %v11200_v48 = vsel %vm11097_vm11, %v19149_v34, %v19226_v21  ;;  %v11201_v5 = vrot.slane %v19217_v15, 7 }
 0xf08   : > { %v19320_v10 = vmax.f32 %v11026_v9, 0.0  ;;  %v11027_v38 = vadd.f32 %v10995_v35, %v10963_v44  ;;  %v10895_v1 = vpop.permute.xlu0 %10894  ;;  %11155 = vrot.lane.b32.xlu0 %v11140_v26, %s15613_s24  ;;  %v11584_v30 = vsel %vm11106_vm14, %v19281_v33, %v11583_v6  ;;  %v11205_v39 = vrot.slane %v19268_v37, 5 }
 0xf09   : > { %v10968_v7 = vsel %vm3744_vm8, %v20164_v52, %v10895_v1  ;;  %v11586_v21 = vsel %vm11109_vm15, %v11585_v50, %v11584_v30  ;;  %v11202_v8 = vsel %vm11100_vm12, %v11201_v5, %v11200_v48  ;;  %v11207_v54 = vrot.slane %v19245_v25, 4 }
 0xf0a   : > { %v19333_v47 = vmax.f32 %v11027_v38, 0.0  ;;  %v11032_v35 = vadd.f32 %v11000_v43, %v10968_v7  ;;  %v10897_v17 = vpop.permute.xlu1 %10896  ;;  %v11204_v24 = vsel %vm11103_vm13, %v11203_v62, %v11202_v8  ;;  %v11330_v19 = vrot.slane %v19172_v14, 5  ;;  %v20170_v38 = vld [vmem:[#allocation26_spill] sm:$0xff] }
 0xf0b   : > { %v10969_v16 = vsel %vm3744_vm8, %v20165_v36, %v10897_v17  ;;  %v11206_v50 = vsel %vm11106_vm14, %v11205_v39, %v11204_v24  ;;  %v11334_v29 = vrot.slane %v19217_v15, 3  ;;  %v11336_v49 = vrot.slane %v19195_v60, 2 }
 0xf0c   : > { %v19346_v58 = vmax.f32 %v11032_v35, 0.0  ;;  %v11033_v43 = vadd.f32 %v11001_v45, %v10969_v16  ;;  %v10891_v63 = vpop.permute.xlu0 %10890  ;;  %11287 = vrot.lane.b32.xlu0 %v11272_v56, %s15613_s24  ;;  %v11208_v62 = vsel %vm11109_vm15, %v11207_v54, %v11206_v50  ;;  %v11331_v26 = vsel %vm11094_vm10, %v11330_v19, %v19232_v23  ;;  %v20172_v19 = vld [vmem:[#allocation27_spill] sm:$0xff] }
 0xf0d   : > { %v10966_v55 = vsel %vm3744_vm8, %v20166_v4, %v10891_v63  ;;  %v20167_v9 = vrot.slane %v19149_v34, 4  ;;  %v11338_v13 = vrot.slane %v19268_v37, 1  ;;  %v11408_v45 = vsel %vm11091_vm9, %v19118_v46, %v20168_v51  ;;  %v20174_v4 = vld [vmem:[#allocation28_spill] sm:$0xff] }
 0xf0e   : > { %v19364_v56 = vmax.f32 %v11033_v43, 0.0  ;;  %v20169_v44 = vunpack.c.l.bf16 %v19088_v61  ;;  %v10893_v23 = vpop.permute.xlu1 %10892  ;;  %v11409_v5 = vrot.slane %v19183_v31, 7  ;;  %v11411_v39 = vrot.slane %v19161_v22, 6 }
 0xf0f   : > { %v11333_v32 = vsel %vm11097_vm11, %v20167_v9, %v11331_v26  ;;  %v10967_v1 = vsel %vm3744_vm8, %v20170_v38, %v10893_v23  ;;  %v11413_v52 = vrot.slane %v19234_v42, 5  ;;  %v20171_v8 = vunpack.c.h.bf16 %v19088_v61 }
 0xf10   : > { %v11030_v6 = vadd.f32 %v20169_v44, %v10966_v55  ;;  %v11335_v48 = vsel %vm11100_vm12, %v11334_v29, %v11333_v32  ;;  %v10903_v35 = vpop.permute.xlu0 %10902  ;;  %11189 = vrot.lane.b32.xlu0 %v11174_v28, %s15612_s17  ;;  %v11410_v24 = vsel %vm11094_vm10, %v11409_v5, %v11408_v45  ;;  %v11415_v29 = vrot.slane %v19206_v41, 4  ;;  %v20176_v5 = vld [vmem:[#allocation29_spill] sm:$0xff] }
 0xf11   : > { %v11337_v30 = vsel %vm11103_vm13, %v11336_v49, %v11335_v48  ;;  %v11031_v54 = vadd.f32 %v20171_v8, %v10967_v1  ;;  %v10972_v36 = vsel %vm3744_vm8, %v20172_v19, %v10903_v35  ;;  %v11412_v50 = vsel %vm11097_vm11, %v11411_v39, %v11410_v24  ;;  %v20179_v24 = vld [vmem:[#allocation30_spill] sm:$0xff] }
 0xf12   : > { %v19375_v7 = vmax.f32 %v11030_v6, 0.0  ;;  %v11339_v17 = vsel %vm11106_vm14, %v11338_v13, %v11337_v30  ;;  %v20173_v61 = vunpack.c.l.bf16 %v19095_v18  ;;  %v10905_v28 = vpop.permute.xlu1 %10904  ;;  %v11414_v63 = vsel %vm11100_vm12, %v11413_v52, %v11412_v50 }
 0xf13   : > { %v11340_v16 = vsel %vm11109_vm15, %v19245_v25, %v11339_v17  ;;  %v19388_v49 = vmax.f32 %v11031_v54, 0.0  ;;  %v11417_v26 = vrot.slane %v19281_v33, 3  ;;  %v10973_v55 = vsel %vm3744_vm8, %v20174_v4, %v10905_v28 }
 0xf14   : > { %v11036_v43 = vadd.f32 %v20173_v61, %v10972_v36  ;;  %v11416_v9 = vsel %vm11103_vm13, %v11415_v29, %v11414_v63  ;;  %v11419_v32 = vrot.slane %v19256_v27, 2  ;;  %v11539_v13 = vrot.slane %v19138_v40, 5  ;;  %v10899_v6 = vpop.permute.xlu0 %10898  ;;  %11601 = vrot.lane.b32.xlu0 %v11586_v21, %s15612_s17 }
 0xf15   : > { %v20175_v45 = vunpack.c.h.bf16 %v19095_v18  ;;  %v11418_v23 = vsel %vm11106_vm14, %v11417_v26, %v11416_v9  ;;  %v11542_v48 = vrot.slane %v19183_v31, 3  ;;  %v10970_v38 = vsel %vm3744_vm8, %v20176_v5, %v10899_v6 }
 0xf16   : > { %v19399_v51 = vmax.f32 %v11036_v43, 0.0  ;;  %v11420_v1 = vsel %vm11109_vm15, %v11419_v32, %v11418_v23  ;;  %v20177_v30 = vrot.slane %v19118_v46, 4  ;;  %v11544_v52 = vrot.slane %v19161_v22, 2  ;;  %v10901_v54 = vpop.permute.xlu1 %10900 }
 0xf17   : > { %v11037_v44 = vadd.f32 %v20175_v45, %v10973_v55  ;;  %v20178_v8 = vunpack.c.l.bf16 %v19100_v3  ;;  %v11546_v17 = vrot.slane %v19234_v42, 1  ;;  %v10971_v19 = vsel %vm3744_vm8, %v20179_v24, %v10901_v54 }
 0xf18   : > { %v11541_v39 = vsel %vm11091_vm9, %v20177_v30, %v11539_v13  ;;  %v11549_v50 = vrot.slane %v19281_v33, 7  ;;  %v11551_v29 = vrot.slane %v19256_v27, 6  ;;  %v20180_v43 = vunpack.c.h.bf16 %v19100_v3  ;;  %11223 = vrot.lane.b32.xlu0 %v11208_v62, %s15614_s27  ;;  %v20181_v3 = vld [vmem:[#allocation31_spill] sm:$0xff] }
 0xf19   : > { %v19413_v18 = vmax.f32 %v11037_v44, 0.0  ;;  %v11034_v21 = vadd.f32 %v20178_v8, %v10970_v38  ;;  %v11543_v35 = vsel %vm11094_vm10, %v11542_v48, %v11541_v39  ;;  %v11307_v26 = vrot.slane %v19320_v10, 6  ;;  %v10907_v4 = vpop.permute.xlu0 %10906 }
 0xf1a   : > { %v11545_v36 = vsel %vm11097_vm11, %v11544_v52, %v11543_v35  ;;  %v11035_v28 = vadd.f32 %v20180_v43, %v10971_v19  ;;  %v11308_v9 = vrot.slane %v19293_v0, 5  ;;  %v11310_v32 = vrot.slane %v19375_v7, 4  ;;  %v20183_v52 = vld [vmem:[#allocation32_spill] sm:$0xff] }
 0xf1b   : > { %v19424_v61 = vmax.f32 %v11034_v21, 0.0  ;;  %v11547_v63 = vsel %vm11100_vm12, %v11546_v17, %v11545_v36  ;;  %v11312_v13 = vrot.slane %v19346_v58, 3  ;;  %v10974_v44 = vsel %vm3744_vm8, %v20181_v3, %v10907_v4  ;;  %v10909_v5 = vpop.permute.xlu1 %10908 }
 0xf1c   : > { %v11548_v55 = vsel %vm11103_vm13, %v19206_v41, %v11547_v63  ;;  %v19436_v45 = vmax.f32 %v11035_v28, 0.0  ;;  %v20182_v23 = vunpack.c.l.bf16 %v19107_v2  ;;  %v11309_v30 = vsel %vm11091_vm9, %v11308_v9, %v11307_v26  ;;  %11355 = vrot.lane.b32.xlu0 %v11340_v16, %s15614_s27 }
 0xf1d   : > { %v11550_v62 = vsel %vm11106_vm14, %v11549_v50, %v11548_v55  ;;  %v11314_v6 = vrot.slane %v19424_v61, 2  ;;  %v11316_v39 = vrot.slane %v19399_v51, 1  ;;  %v10975_v8 = vsel %vm3744_vm8, %v20183_v52, %v10909_v5  ;;  %v10911_v36 = vpop.permute.xlu0 %10910 }
 0xf1e   : > { %v11038_v48 = vadd.f32 %v20182_v23, %v10974_v44  ;;  %v11552_v38 = vsel %vm11109_vm15, %v11551_v29, %v11550_v62  ;;  %v11311_v21 = vsel %vm11094_vm10, %v11310_v32, %v11309_v30  ;;  %v11441_v54 = vrot.slane %v19138_v40, 2 }
 0xf1f   : > { %v11445_v35 = vrot.slane %v19161_v22, 7  ;;  %v20184_v24 = vunpack.c.h.bf16 %v19107_v2  ;;  %v11313_v50 = vsel %vm11097_vm11, %v11312_v13, %v11311_v21  ;;  %v11447_v29 = vrot.slane %v19234_v42, 6  ;;  %v10913_v9 = vpop.permute.xlu1 %10912 }
 0xf20   : > { %v19453_v17 = vmax.f32 %v11038_v48, 0.0  ;;  %v10976_v43 = vsel %vm3744_vm8, %v18514_v57, %v10911_v36  ;;  %v11315_v16 = vsel %vm11100_vm12, %v11314_v6, %v11313_v50  ;;  %v20185_v28 = vrot.slane %v19118_v46, 1  ;;  %11435 = vrot.lane.b32.xlu0 %v11420_v1, %s15613_s24 }
 0xf21   : > { %v11039_v19 = vadd.f32 %v20184_v24, %v10975_v8  ;;  %v11449_v26 = vrot.slane %v19206_v41, 5  ;;  %v20186_v2 = vunpack.c.l.bf16 %v19114_v11  ;;  %v11317_v32 = vsel %vm11103_vm13, %v11316_v39, %v11315_v16 }
 0xf22   : > { %v11443_v63 = vsel %vm11091_vm9, %v20185_v28, %v11441_v54  ;;  %v10977_v57 = vsel %vm3744_vm8, %v18524_v59, %v10913_v9  ;;  %v11318_v3 = vsel %vm11106_vm14, %v19453_v17, %v11317_v32  ;;  %v11451_v62 = vrot.slane %v19281_v33, 4 }
 0xf23   : > { %v19466_v4 = vmax.f32 %v11039_v19, 0.0  ;;  %v11040_v55 = vadd.f32 %v20186_v2, %v10976_v43  ;;  %v11444_v13 = vsel %vm11094_vm10, %v19183_v31, %v11443_v63  ;;  %v20187_v23 = vunpack.c.h.bf16 %v19114_v11 }
 0xf24   : > { %v11446_v44 = vsel %vm11097_vm11, %v11445_v35, %v11444_v13  ;;  %v11453_v30 = vrot.slane %v19256_v27, 3  ;;  %v11141_v1 = vrot.slane %v19320_v10, 1  ;;  %v11143_v39 = vrot.slane %v19375_v7, 7  ;;  %11567 = vrot.lane.b32.xlu0 %v11552_v38, %s15613_s24 }
 0xf25   : > { %v19480_v6 = vmax.f32 %v11040_v55, 0.0  ;;  %v11041_v48 = vadd.f32 %v20187_v23, %v10977_v57  ;;  %v11448_v5 = vsel %vm11100_vm12, %v11447_v29, %v11446_v44  ;;  %v11145_v52 = vrot.slane %v19346_v58, 6 }
 0xf26   : > { %v11450_v59 = vsel %vm11103_vm13, %v11449_v26, %v11448_v5  ;;  %v11147_v11 = vrot.slane %v19424_v61, 5  ;;  %v11142_v24 = vsel %vm11091_vm9, %v19293_v0, %v11141_v1  ;;  %v11149_v19 = vrot.slane %v19399_v51, 4 }
 0xf27   : > { %v19490_v8 = vmax.f32 %v11041_v48, 0.0  ;;  %v11319_v21 = vrot.slane %v19480_v6, 7  ;;  %v11452_v54 = vsel %vm11106_vm14, %v11451_v62, %v11450_v59  ;;  %v11151_v36 = vrot.slane %v19453_v17, 3 }
 0xf28   : > { %v11454_v35 = vsel %vm11109_vm15, %v11453_v30, %v11452_v54  ;;  %v11144_v29 = vsel %vm11094_vm10, %v11143_v39, %v11142_v24  ;;  %v11153_v43 = vrot.slane %v19480_v6, 2  ;;  %v11475_v16 = vrot.slane %v19138_v40, 3 }
 0xf29   : > { %v11320_v50 = vsel %vm11109_vm15, %v11319_v21, %v11318_v3  ;;  %v11146_v38 = vsel %vm11097_vm11, %v11145_v52, %v11144_v29  ;;  %v11478_v28 = vrot.slane %v19183_v31, 1  ;;  %v11481_v63 = vrot.slane %v19234_v42, 7  ;;  %11469 = vrot.lane.b32.xlu0 %v11454_v35, %s15612_s17 }
 0xf2a   : > { %11323 = vrot.lane.b32.xlu1 %v11320_v50, %s15612_s17  ;;  %v11483_v26 = vrot.slane %v19206_v41, 6  ;;  %v11148_v2 = vsel %vm11100_vm12, %v11147_v11, %v11146_v38  ;;  %v20188_v55 = vrot.slane %v19118_v46, 2  ;;  %v11485_v32 = vrot.slane %v19281_v33, 5 }
 0xf2b   : > { %v11487_v13 = vrot.slane %v19256_v27, 4  ;;  %v11150_v57 = vsel %vm11103_vm13, %v11149_v19, %v11148_v2  ;;  %v11273_v44 = vrot.slane %v19320_v10, 5  ;;  %v11274_v62 = vrot.slane %v19293_v0, 4 }
 0xf2c   : > { %v11477_v9 = vsel %vm11091_vm9, %v20188_v55, %v11475_v16  ;;  %v11152_v23 = vsel %vm11106_vm14, %v11151_v36, %v11150_v57  ;;  %v11276_v5 = vrot.slane %v19375_v7, 3  ;;  %v11278_v30 = vrot.slane %v19346_v58, 2 }
 0xf2d   : > { %v11479_v3 = vsel %vm11094_vm10, %v11478_v28, %v11477_v9  ;;  %v11154_v59 = vsel %vm11109_vm15, %v11153_v43, %v11152_v23  ;;  %v11275_v39 = vsel %vm11091_vm9, %v11274_v62, %v11273_v44  ;;  %v11280_v52 = vrot.slane %v19424_v61, 1 }
 0xf2e   : > { %v11480_v48 = vsel %vm11097_vm11, %v19161_v22, %v11479_v3  ;;  %11157 = vrot.lane.b32.xlu1 %v11154_v59, %s15613_s24  ;;  %v11277_v54 = vsel %vm11094_vm10, %v11276_v5, %v11275_v39  ;;  %v11283_v11 = vrot.slane %v19453_v17, 7  ;;  %v11285_v35 = vrot.slane %v19480_v6, 6 }
 0xf2f   : > { %v11482_v1 = vsel %vm11100_vm12, %v11481_v63, %v11480_v48  ;;  %v11279_v19 = vsel %vm11097_vm11, %v11278_v30, %v11277_v54  ;;  %v11607_v36 = vrot.slane %v19138_v40, 7  ;;  %v11610_v50 = vrot.slane %v19183_v31, 5 }
 0xf30   : > { %v11484_v21 = vsel %vm11103_vm13, %v11483_v26, %v11482_v1  ;;  %v11281_v43 = vsel %vm11100_vm12, %v11280_v52, %v11279_v19  ;;  %v11612_v16 = vrot.slane %v19161_v22, 4  ;;  %v11614_v38 = vrot.slane %v19234_v42, 3 }
 0xf31   : > { %v11486_v24 = vsel %vm11106_vm14, %v11485_v32, %v11484_v21  ;;  %v11282_v28 = vsel %vm11103_vm13, %v19399_v51, %v11281_v43  ;;  %v20189_v63 = vrot.slane %v19118_v46, 6  ;;  %v11616_v2 = vrot.slane %v19206_v41, 2 }
 0xf32   : > { %v11488_v29 = vsel %vm11109_vm15, %v11487_v13, %v11486_v24  ;;  %v11618_v55 = vrot.slane %v19281_v33, 1  ;;  %v11284_v9 = vsel %vm11106_vm14, %v11283_v11, %v11282_v28  ;;  %v11175_v13 = vrot.slane %v19320_v10, 2 }
 0xf33   : > { %11503 = vrot.lane.b32.xlu0 %v11488_v29, %s15614_s27  ;;  %v11609_v26 = vsel %vm11091_vm9, %v20189_v63, %v11607_v36  ;;  %v11176_v57 = vrot.slane %v19293_v0, 1  ;;  %v11286_v3 = vsel %vm11109_vm15, %v11285_v35, %v11284_v9  ;;  %v11179_v62 = vrot.slane %v19346_v58, 7 }
 0xf34   : > { %v11611_v32 = vsel %vm11094_vm10, %v11610_v50, %v11609_v26  ;;  %v11181_v23 = vrot.slane %v19424_v61, 6  ;;  %11289 = vrot.lane.b32.xlu1 %v11286_v3, %s15613_s24  ;;  %v11183_v30 = vrot.slane %v19399_v51, 5  ;;  %v11185_v59 = vrot.slane %v19453_v17, 4 }
 0xf35   : > { %v11613_v44 = vsel %vm11097_vm11, %v11612_v16, %v11611_v32  ;;  %v11177_v5 = vsel %vm11091_vm9, %v11176_v57, %v11175_v13  ;;  %v11187_v52 = vrot.slane %v19480_v6, 3  ;;  %v11587_v21 = vrot.slane %v19333_v47, 6 }
 0xf36   : > { %v11615_v48 = vsel %vm11100_vm12, %v11614_v38, %v11613_v44  ;;  %v11178_v39 = vsel %vm11094_vm10, %v19375_v7, %v11177_v5  ;;  %v11588_v35 = vrot.slane %v19305_v20, 5  ;;  %v11590_v24 = vrot.slane %v19388_v49, 4 }
 0xf37   : > { %v11617_v1 = vsel %vm11103_vm13, %v11616_v2, %v11615_v48  ;;  %v11180_v11 = vsel %vm11097_vm11, %v11179_v62, %v11178_v39  ;;  %v11592_v50 = vrot.slane %v19364_v56, 3  ;;  %v11594_v29 = vrot.slane %v19436_v45, 2 }
 0xf38   : > { %v11619_v54 = vsel %vm11106_vm14, %v11618_v55, %v11617_v1  ;;  %v11182_v36 = vsel %vm11100_vm12, %v11181_v23, %v11180_v11  ;;  %v11589_v16 = vsel %vm11091_vm9, %v11588_v35, %v11587_v21  ;;  %v11596_v38 = vrot.slane %v19413_v18, 1 }
 0xf39   : > { %v11620_v19 = vsel %vm11109_vm15, %v19256_v27, %v11619_v54  ;;  %v11184_v43 = vsel %vm11103_vm13, %v11183_v30, %v11182_v36  ;;  %v11599_v28 = vrot.slane %v19490_v8, 7  ;;  %v11591_v26 = vsel %vm11094_vm10, %v11590_v24, %v11589_v16 }
 0xf3a   : > { %11635 = vrot.lane.b32.xlu0 %v11620_v19, %s15614_s27  ;;  %v11186_v63 = vsel %vm11106_vm14, %v11185_v59, %v11184_v43  ;;  %v11209_v2 = vrot.slane %v19320_v10, 3  ;;  %v11210_v55 = vrot.slane %v19293_v0, 2  ;;  %v11593_v32 = vsel %vm11097_vm11, %v11592_v50, %v11591_v26 }
 0xf3b   : > { %v11188_v9 = vsel %vm11109_vm15, %v11187_v52, %v11186_v63  ;;  %v11212_v13 = vrot.slane %v19375_v7, 1  ;;  %v11215_v57 = vrot.slane %v19424_v61, 7  ;;  %v11595_v3 = vsel %vm11100_vm12, %v11594_v29, %v11593_v32 }
 0xf3c   : > { %11191 = vrot.lane.b32.xlu1 %v11188_v9, %s15612_s17  ;;  %v11211_v44 = vsel %vm11091_vm9, %v11210_v55, %v11209_v2  ;;  %v11217_v62 = vrot.slane %v19399_v51, 6  ;;  %v11597_v23 = vsel %vm11103_vm13, %v11596_v38, %v11595_v3  ;;  %v11219_v5 = vrot.slane %v19453_v17, 5 }
 0xf3d   : > { %v11213_v48 = vsel %vm11094_vm10, %v11212_v13, %v11211_v44  ;;  %v11341_v30 = vrot.slane %v19320_v10, 7  ;;  %v11598_v59 = vsel %vm11106_vm14, %v19466_v4, %v11597_v23  ;;  %v11342_v39 = vrot.slane %v19293_v0, 6 }
 0xf3e   : > { %v11214_v1 = vsel %vm11097_vm11, %v19346_v58, %v11213_v48  ;;  %v11344_v52 = vrot.slane %v19375_v7, 5  ;;  %v11600_v21 = vsel %vm11109_vm15, %v11599_v28, %v11598_v59  ;;  %v11221_v11 = vrot.slane %v19480_v6, 4 }
 0xf3f   : > { %v11216_v54 = vsel %vm11100_vm12, %v11215_v57, %v11214_v1  ;;  %v11348_v35 = vrot.slane %v19424_v61, 3  ;;  %v11343_v19 = vsel %vm11091_vm9, %v11342_v39, %v11341_v30  ;;  %v11346_v36 = vrot.slane %v19346_v58, 4 }
 0xf40   : > { %11603 = vrot.lane.b32.xlu1 %v11600_v21, %s15612_s17  ;;  %v11218_v24 = vsel %vm11103_vm13, %v11217_v62, %v11216_v54  ;;  %v11345_v50 = vsel %vm11094_vm10, %v11344_v52, %v11343_v19  ;;  %v11352_v29 = vrot.slane %v19453_v17, 1  ;;  %v11421_v43 = vrot.slane %v19333_v47, 1 }
 0xf41   : > { %v11423_v16 = vrot.slane %v19388_v49, 7  ;;  %v11220_v38 = vsel %vm11106_vm14, %v11219_v5, %v11218_v24  ;;  %v11347_v28 = vsel %vm11097_vm11, %v11346_v36, %v11345_v50  ;;  %v11350_v63 = vrot.slane %v19399_v51, 2 }
 0xf42   : > { %v11427_v26 = vrot.slane %v19436_v45, 5  ;;  %v11222_v2 = vsel %vm11109_vm15, %v11221_v11, %v11220_v38  ;;  %v11349_v55 = vsel %vm11100_vm12, %v11348_v35, %v11347_v28  ;;  %v11422_v9 = vsel %vm11091_vm9, %v19305_v20, %v11421_v43 }
 0xf43   : > { %v11425_v32 = vrot.slane %v19364_v56, 6  ;;  %v11351_v13 = vsel %vm11103_vm13, %v11350_v63, %v11349_v55  ;;  %v11424_v57 = vsel %vm11094_vm10, %v11423_v16, %v11422_v9  ;;  %v11553_v3 = vrot.slane %v19333_v47, 5 }
 0xf44   : > { %11225 = vrot.lane.b32.xlu1 %v11222_v2, %s15614_s27  ;;  %v11353_v44 = vsel %vm11106_vm14, %v11352_v29, %v11351_v13  ;;  %v11554_v23 = vrot.slane %v19305_v20, 4  ;;  %v11556_v48 = vrot.slane %v19388_v49, 3  ;;  %v11429_v30 = vrot.slane %v19413_v18, 4 }
 0xf45   : > { %v11426_v62 = vsel %vm11097_vm11, %v11425_v32, %v11424_v57  ;;  %v11431_v59 = vrot.slane %v19466_v4, 3  ;;  %v11560_v1 = vrot.slane %v19436_v45, 1  ;;  %v11354_v39 = vsel %vm11109_vm15, %v19480_v6, %v11353_v44 }
 0xf46   : > { %v11428_v5 = vsel %vm11100_vm12, %v11427_v26, %v11426_v62  ;;  %v11433_v52 = vrot.slane %v19490_v8, 2  ;;  %v11555_v21 = vsel %vm11091_vm9, %v11554_v23, %v11553_v3  ;;  %v11558_v54 = vrot.slane %v19364_v56, 2 }
 0xf47   : > { %v11557_v11 = vsel %vm11094_vm10, %v11556_v48, %v11555_v21  ;;  %v11455_v35 = vrot.slane %v19333_v47, 2  ;;  %v11456_v24 = vrot.slane %v19305_v20, 1  ;;  %v11430_v19 = vsel %vm11103_vm13, %v11429_v30, %v11428_v5 }
 0xf48   : > { %11357 = vrot.lane.b32.xlu1 %v11354_v39, %s15614_s27  ;;  %v11559_v36 = vsel %vm11097_vm11, %v11558_v54, %v11557_v11  ;;  %v11563_v50 = vrot.slane %v19466_v4, 7  ;;  %v11461_v29 = vrot.slane %v19436_v45, 6  ;;  %v11432_v43 = vsel %vm11106_vm14, %v11431_v59, %v11430_v19 }
 0xf49   : > { %v11561_v16 = vsel %vm11100_vm12, %v11560_v1, %v11559_v36  ;;  %v11457_v38 = vsel %vm11091_vm9, %v11456_v24, %v11455_v35  ;;  %v11459_v28 = vrot.slane %v19364_v56, 7  ;;  %v11434_v63 = vsel %vm11109_vm15, %v11433_v52, %v11432_v43 }
 0xf4a   : > { %v11565_v26 = vrot.slane %v19490_v8, 6  ;;  %v11458_v2 = vsel %vm11094_vm10, %v19388_v49, %v11457_v38  ;;  %v11489_v55 = vrot.slane %v19333_v47, 3  ;;  %v11490_v32 = vrot.slane %v19305_v20, 2 }
 0xf4b   : > { %v11460_v9 = vsel %vm11097_vm11, %v11459_v28, %v11458_v2  ;;  %v11492_v13 = vrot.slane %v19388_v49, 1  ;;  %v11562_v57 = vsel %vm11103_vm13, %v19413_v18, %v11561_v16  ;;  %v11463_v44 = vrot.slane %v19413_v18, 5 }
 0xf4c   : > { %11437 = vrot.lane.b32.xlu1 %v11434_v63, %s15613_s24  ;;  %v11462_v3 = vsel %vm11100_vm12, %v11461_v29, %v11460_v9  ;;  %v11465_v62 = vrot.slane %v19466_v4, 4  ;;  %v11564_v23 = vsel %vm11106_vm14, %v11563_v50, %v11562_v57  ;;  %v11467_v48 = vrot.slane %v19490_v8, 3 }
 0xf4d   : > { %v11491_v5 = vsel %vm11091_vm9, %v11490_v32, %v11489_v55  ;;  %v11495_v30 = vrot.slane %v19436_v45, 7  ;;  %v11566_v59 = vsel %vm11109_vm15, %v11565_v26, %v11564_v23  ;;  %v11621_v39 = vrot.slane %v19333_v47, 7 }
 0xf4e   : > { %v11493_v1 = vsel %vm11094_vm10, %v11492_v13, %v11491_v5  ;;  %v11622_v52 = vrot.slane %v19305_v20, 6  ;;  %v11464_v21 = vsel %vm11103_vm13, %v11463_v44, %v11462_v3  ;;  %v11624_v54 = vrot.slane %v19388_v49, 5 }
 0xf4f   : > { %v11494_v11 = vsel %vm11097_vm11, %v19364_v56, %v11493_v1  ;;  %v11626_v24 = vrot.slane %v19364_v56, 4  ;;  %v11628_v19 = vrot.slane %v19436_v45, 3  ;;  %v11466_v36 = vsel %vm11106_vm14, %v11465_v62, %v11464_v21 }
 0xf50   : > { %11569 = vrot.lane.b32.xlu1 %v11566_v59, %s15613_s24  ;;  %v11623_v35 = vsel %vm11091_vm9, %v11622_v52, %v11621_v39  ;;  %v11496_v50 = vsel %vm11100_vm12, %v11495_v30, %v11494_v11  ;;  %v11499_v29 = vrot.slane %v19466_v4, 5  ;;  %v11468_v16 = vsel %vm11109_vm15, %v11467_v48, %v11466_v36 }
 0xf51   : > { %v11625_v43 = vsel %vm11094_vm10, %v11624_v54, %v11623_v35  ;;  %v11497_v38 = vrot.slane %v19413_v18, 6  ;;  %v11501_v28 = vrot.slane %v19490_v8, 4  ;;  %v11632_v2 = vrot.slane %v19466_v4, 1 }
 0xf52   : > { %v11627_v63 = vsel %vm11097_vm11, %v11626_v24, %v11625_v43  ;;  %v11630_v9 = vrot.slane %v19413_v18, 2  ;;  %v11391_v62 = vrot.slane %v19305_v20, 7  ;;  %v11393_v23 = vrot.slane %v19388_v49, 6 }
 0xf53   : > { %v11629_v26 = vsel %vm11100_vm12, %v11628_v19, %v11627_v63  ;;  %v11498_v55 = vsel %vm11103_vm13, %v11497_v38, %v11496_v50  ;;  %v11397_v48 = vrot.slane %v19436_v45, 4  ;;  %v11395_v30 = vrot.slane %v19364_v56, 5 }
 0xf54   : > { %11471 = vrot.lane.b32.xlu1 %v11468_v16, %s15612_s17  ;;  %v11500_v32 = vsel %vm11106_vm14, %v11499_v29, %v11498_v55  ;;  %v11631_v57 = vsel %vm11103_vm13, %v11630_v9, %v11629_v26  ;;  %v11392_v5 = vsel %vm11091_vm9, %v11391_v62, %v19333_v47  ;;  %v11399_v1 = vrot.slane %v19413_v18, 3 }
 0xf55   : > { %v11502_v13 = vsel %vm11109_vm15, %v11501_v28, %v11500_v32  ;;  %v11633_v3 = vsel %vm11106_vm14, %v11632_v2, %v11631_v57  ;;  %v11394_v59 = vsel %vm11094_vm10, %v11393_v23, %v11392_v5  ;;  %v11401_v39 = vrot.slane %v19466_v4, 2 }
 0xf56   : > { %v11634_v44 = vsel %vm11109_vm15, %v19490_v8, %v11633_v3  ;;  %v11523_v52 = vrot.slane %v19333_v47, 4  ;;  %v11396_v21 = vsel %vm11097_vm11, %v11395_v30, %v11394_v59  ;;  %v11403_v54 = vrot.slane %v19490_v8, 1 }
 0xf57   : > { %v11524_v11 = vrot.slane %v19305_v20, 3  ;;  %v11526_v35 = vrot.slane %v19388_v49, 2  ;;  %v11398_v24 = vsel %vm11100_vm12, %v11397_v48, %v11396_v21  ;;  %v11528_v50 = vrot.slane %v19364_v56, 1 }
 0xf58   : > { %11505 = vrot.lane.b32.xlu1 %v11502_v13, %s15614_s27  ;;  %v11400_v19 = vsel %vm11103_vm13, %v11399_v1, %v11398_v24  ;;  %v11533_v43 = vrot.slane %v19466_v4, 6  ;;  %v11531_v49 = vrot.slane %v19413_v18, 7  ;;  %v11535_v38 = vrot.slane %v19490_v8, 5 }
 0xf59   : > { %v11525_v36 = vsel %vm11091_vm9, %v11524_v11, %v11523_v52  ;;  %v11402_v29 = vsel %vm11106_vm14, %v11401_v39, %v11400_v19  ;;  %v11093_v2 = vrot.slane %v19172_v14, 6  ;;  %v11090_v55 = vrot.slane %v19103_v12, 7 }
 0xf5a   : > { %v11527_v47 = vsel %vm11094_vm10, %v11526_v35, %v11525_v36  ;;  %v19728_v16 = vsel %vm11109_vm15, %v11403_v54, %v11402_v29  ;;  %v11229_v18 = vrot.slane %v19127_v53, 4  ;;  %v11232_v8 = vrot.slane %v19172_v14, 2 }
 0xf5b   : > { %v11529_v20 = vsel %vm11097_vm11, %v11528_v50, %v11527_v47  ;;  %v11230_v32 = vrot.slane %v19103_v12, 3  ;;  %v11099_v57 = vrot.slane %v19217_v15, 4  ;;  %v11096_v3 = vrot.slane %v19149_v34, 5 }
 0xf5c   : > { %11637 = vrot.lane.b32.xlu1 %v11634_v44, %s15614_s27  ;;  %v11530_v28 = vsel %vm11100_vm12, %v19436_v45, %v11529_v20  ;;  %v11092_v45 = vsel %vm11091_vm9, %v11090_v55, %v19127_v53  ;;  %v11234_v14 = vrot.slane %v19149_v34, 1  ;;  %v11105_v12 = vrot.slane %v19268_v37, 2 }
 0xf5d   : > { %v11532_v56 = vsel %vm11103_vm13, %v11531_v49, %v11530_v28  ;;  %v11095_v13 = vsel %vm11094_vm10, %v11093_v2, %v11092_v45  ;;  %v11231_v44 = vsel %vm11091_vm9, %v11230_v32, %v11229_v18  ;;  %v11102_v5 = vrot.slane %v19195_v60, 3 }
 0xf5e   : > { %v11534_v63 = vsel %vm11106_vm14, %v11533_v43, %v11532_v56  ;;  %v11233_v23 = vsel %vm11094_vm10, %v11232_v8, %v11231_v44  ;;  %v11098_v48 = vsel %vm11097_vm11, %v11096_v3, %v11095_v13  ;;  %v11239_v39 = vrot.slane %v19268_v37, 6 }
 0xf5f   : > { %v19738_v26 = vsel %vm11109_vm15, %v11535_v38, %v11534_v63  ;;  %v11101_v53 = vsel %vm11100_vm12, %v11099_v57, %v11098_v48  ;;  %v11235_v30 = vsel %vm11097_vm11, %v11234_v14, %v11233_v23  ;;  %v11237_v21 = vrot.slane %v19195_v60, 7 }
 0xf60   : > { %v11236_v1 = vsel %vm11100_vm12, %v19217_v15, %v11235_v30  ;;  %v11104_v52 = vsel %vm11103_vm13, %v11102_v5, %v11101_v53  ;;  %v11108_v54 = vrot.slane %v19245_v25, 1  ;;  %v11241_v15 = vrot.slane %v19245_v25, 5 }
 0xf61   : > { %v11107_v34 = vsel %vm11106_vm14, %v11105_v12, %v11104_v52  ;;  %v11238_v11 = vsel %vm11103_vm13, %v11237_v21, %v11236_v1  ;;  %v11379_v49 = vrot.slane %v19183_v31, 6  ;;  %v11377_v38 = vrot.slane %v19118_v46, 7 }
 0xf62   : > { %v11240_v24 = vsel %vm11106_vm14, %v11239_v39, %v11238_v11  ;;  %v11110_v19 = vsel %vm11109_vm15, %v11108_v54, %v11107_v34  ;;  %v11383_v2 = vrot.slane %v19234_v42, 4  ;;  %v11509_v55 = vrot.slane %v19138_v40, 4 }
 0xf63   : > { %v11242_v60 = vsel %vm11109_vm15, %v11241_v15, %v11240_v24  ;;  %v11378_v28 = vsel %vm11091_vm9, %v11377_v38, %v19138_v40  ;;  %v11510_v18 = vrot.slane %v19118_v46, 3  ;;  %v11387_v13 = vrot.slane %v19281_v33, 2 }
 0xf64   : > { %v11380_v63 = vsel %vm11094_vm10, %v11379_v49, %v11378_v28  ;;  %v11385_v3 = vrot.slane %v19206_v41, 3  ;;  %v11389_v14 = vrot.slane %v19256_v27, 1  ;;  %v11519_v12 = vrot.slane %v19281_v33, 6 }
 0xf65   : > { %v11511_v57 = vsel %vm11091_vm9, %v11510_v18, %v11509_v55  ;;  %v11517_v5 = vrot.slane %v19206_v41, 7  ;;  %v11521_v34 = vrot.slane %v19256_v27, 5  ;;  %v11113_v41 = vrot.slane %v19375_v7, 6 }
 0xf66   : > { %v11111_v11 = vrot.slane %v19293_v0, 7  ;;  %v11243_v24 = vrot.slane %v19320_v10, 4  ;;  %v11246_v15 = vrot.slane %v19375_v7, 2  ;;  %v11121_v38 = vrot.slane %v19453_v17, 2 }
 0xf67   : > { %v11123_v28 = vrot.slane %v19480_v6, 1 }
 0xf68   : > { %v11112_v27 = vsel %vm11091_vm9, %v11111_v11, %v19320_v10 }
 0xf76   : > { %v11322_v4 = vpop.permute.xlu0 %11321 }
 0xf7a   : > { %v11156_v9 = vpop.permute.xlu0 %11155 }
 0xf7b   : > { %v11641_v37 = vsel %vm577_vm0, %v11110_v19, %v11156_v9  ;;  %v11512_v9 = vrot.slane %v19183_v31, 2 }
 0xf7d   : > { %v11513_v44 = vsel %vm11094_vm10, %v11512_v9, %v11511_v57 }
 0xf7e   : > { %v11288_v62 = vpop.permute.xlu0 %11287 }
 0xf7f   : > { %v11649_v29 = vsel %vm577_vm0, %v11242_v60, %v11288_v62  ;;  %v11514_v62 = vrot.slane %v19161_v22, 1  ;;  %v11114_v60 = vsel %vm11094_vm10, %v11113_v41, %v11112_v27 }
 0xf80   : > { %v11651_v47 = vsel %vm11643_vm2, %v11649_v29, %v11322_v4  ;;  %v11381_v4 = vrot.slane %v19161_v22, 5 }
 0xf81   : > { %v11515_v48 = vsel %vm11097_vm11, %v11514_v62, %v11513_v44 }
 0xf82   : > { %v11190_v59 = vpop.permute.xlu0 %11189  ;;  %v11382_v8 = vsel %vm11097_vm11, %v11381_v4, %v11380_v63  ;;  %v11516_v53 = vsel %vm11100_vm12, %v19234_v42, %v11515_v48  ;;  %v11255_v4 = vrot.slane %v19480_v6, 5 }
 0xf83   : > { %v11644_v36 = vsel %vm11643_vm2, %v11641_v37, %v11190_v59  ;;  %v11384_v32 = vsel %vm11100_vm12, %v11383_v2, %v11382_v8  ;;  %v11518_v1 = vsel %vm11103_vm13, %v11517_v5, %v11516_v53  ;;  %v11244_v37 = vrot.slane %v19293_v0, 3 }
 0xf84   : > { %v11386_v31 = vsel %vm11103_vm13, %v11385_v3, %v11384_v32  ;;  %v11520_v39 = vsel %vm11106_vm14, %v11519_v12, %v11518_v1  ;;  %v11248_v0 = vrot.slane %v19346_v58, 1  ;;  %v11253_v2 = vrot.slane %v19453_v17, 6 }
 0xf85   : > { %v11388_v23 = vsel %vm11106_vm14, %v11387_v13, %v11386_v31  ;;  %v11522_v33 = vsel %vm11109_vm15, %v11521_v34, %v11520_v39 }
 0xf86   : > { %v19766_v35 = vpop.permute.xlu0 %11601  ;;  %v11390_v30 = vsel %vm11109_vm15, %v11389_v14, %v11388_v23 }
 0xf8a   : > { %v11224_v50 = vpop.permute.xlu0 %11223 }
 0xf8b   : > { %v11647_v25 = vsel %vm11646_vm1, %v11644_v36, %v11224_v50  ;;  %v11117_v36 = vrot.slane %v19424_v61, 4 }
 0xf8c   : > { %11667 = vst [vmem:[%s19776_s15] sm:$0xff] %v11647_v25  ;;  %v11115_v25 = vrot.slane %v19346_v58, 5  ;;  %v11251_v58 = vrot.slane %v19399_v51, 7 }
 0xf8e   : > { %v11356_v43 = vpop.permute.xlu0 %11355  ;;  %v11116_v10 = vsel %vm11097_vm11, %v11115_v25, %v11114_v60 }
 0xf8f   : > { %v11653_v20 = vsel %vm11646_vm1, %v11651_v47, %v11356_v43  ;;  %v11245_v47 = vsel %vm11091_vm9, %v11244_v37, %v11243_v24  ;;  %v11118_v49 = vsel %vm11100_vm12, %v11117_v36, %v11116_v10 }
 0xf90   : > { %11668 = vst [vmem:[%s19776_s15 + $0x8] sm:$0xff] %v11653_v20  ;;  %v11247_v7 = vsel %vm11094_vm10, %v11246_v15, %v11245_v47 }
 0xf92   : > { %v11436_v56 = vpop.permute.xlu0 %11435 }
 0xf93   : > { %v11655_v59 = vsel %vm577_vm0, %v11390_v30, %v11436_v56  ;;  %v11249_v56 = vsel %vm11097_vm11, %v11248_v0, %v11247_v7 }
 0xf94   : > { %v11250_v63 = vsel %vm11100_vm12, %v19424_v61, %v11249_v56 }
 0xf96   : > { %v11568_v45 = vpop.permute.xlu0 %11567 }
 0xf97   : > { %v11661_v54 = vsel %vm577_vm0, %v11522_v33, %v11568_v45  ;;  %v11252_v45 = vsel %vm11103_vm13, %v11251_v58, %v11250_v63 }
 0xf98   : > { %v11663_v50 = vsel %vm11643_vm2, %v11661_v54, %v19766_v35  ;;  %v11119_v35 = vrot.slane %v19399_v51, 3  ;;  %v11254_v61 = vsel %vm11106_vm14, %v11253_v2, %v11252_v45 }
 0xf99   : > { %v11256_v17 = vsel %vm11109_vm15, %v11255_v4, %v11254_v61 }
 0xf9a   : > { %v11120_v55 = vsel %vm11103_vm13, %v11119_v35, %v11118_v49 }
 0xf9b   : > { %v11470_v46 = vpop.permute.xlu0 %11469  ;;  %v11122_v18 = vsel %vm11106_vm14, %v11121_v38, %v11120_v55 }
 0xf9c   : > { %v19802_v40 = vpop.permute.xlu1 %11323  ;;  %v11657_v52 = vsel %vm11643_vm2, %v11655_v59, %v11470_v46  ;;  %v11124_v8 = vsel %vm11109_vm15, %v11123_v28, %v11122_v18 }
 0xfa0   : > { %v11158_v22 = vpop.permute.xlu1 %11157 }
 0xfa1   : > { %v11642_v32 = vsel %vm577_vm0, %v11124_v8, %v11158_v22 }
 0xfa5   : > { %v11504_v21 = vpop.permute.xlu0 %11503 }
 0xfa6   : > { %v11659_v42 = vsel %vm11646_vm1, %v11657_v52, %v11504_v21  ;;  %v11290_v19 = vpop.permute.xlu1 %11289 }
 0xfa7   : > { %11669 = vst [vmem:[%s19776_s15 + $0x10] sm:$0xff] %v11659_v42  ;;  %v11650_v51 = vsel %vm577_vm0, %v11256_v17, %v11290_v19 }
 0xfa8   : > { %v11652_v3 = vsel %vm11643_vm2, %v11650_v51, %v19802_v40 }
 0xfac   : > { %v11636_v29 = vpop.permute.xlu0 %11635 }
 0xfad   : > { %v11665_v43 = vsel %vm11646_vm1, %v11663_v50, %v11636_v29 }
 0xfae   : > { %11670 = vst [vmem:[%s19776_s15 + $0x18] sm:$0xff] %v11665_v43  ;;  %v11192_v20 = vpop.permute.xlu1 %11191 }
 0xfaf   : > { %v11645_v13 = vsel %vm11643_vm2, %v11642_v32, %v11192_v20 }
 0xfb2   : > { %v11604_v9 = vpop.permute.xlu1 %11603 }
 0xfb6   : > { %v11226_v57 = vpop.permute.xlu1 %11225 }
 0xfb7   : > { %v11648_v6 = vsel %vm11646_vm1, %v11645_v13, %v11226_v57 }
 0xfb8   : > { %11671 = vst [vmem:[%s19776_s15 + $0x20] sm:$0xff] %v11648_v6 }
 0xfba   : > { %v11358_v44 = vpop.permute.xlu1 %11357 }
 0xfbb   : > { %v11654_v62 = vsel %vm11646_vm1, %v11652_v3, %v11358_v44 }
 0xfbc   : > { %11672 = vst [vmem:[%s19776_s15 + $0x28] sm:$0xff] %v11654_v62 }
 0xfbe   : > { %v11438_v31 = vpop.permute.xlu1 %11437 }
 0xfbf   : > { %v11656_v53 = vsel %vm577_vm0, %v19728_v16, %v11438_v31 }
 0xfc2   : > { %v11570_v46 = vpop.permute.xlu1 %11569 }
 0xfc3   : > { %v11662_v23 = vsel %vm577_vm0, %v19738_v26, %v11570_v46 }
 0xfc4   : > { %v11664_v48 = vsel %vm11643_vm2, %v11662_v23, %v11604_v9 }
 0xfc6   : > { %v11472_v14 = vpop.permute.xlu1 %11471 }
 0xfc7   : > { %v11658_v12 = vsel %vm11643_vm2, %v11656_v53, %v11472_v14 }
 0xfca   : > { %v11506_v5 = vpop.permute.xlu1 %11505 }
 0xfcb   : > { %v11660_v40 = vsel %vm11646_vm1, %v11658_v12, %v11506_v5 }
 0xfcc   : > { %11673 = vst [vmem:[%s19776_s15 + $0x30] sm:$0xff] %v11660_v40 }
 0xfce   : > { %v11638_v30 = vpop.permute.xlu1 %11637 }
 0xfcf   : > { %v11666_v22 = vsel %vm11646_vm1, %v11664_v48, %v11638_v30 }
 0xfd0   : > { %11674 = vst [vmem:[%s19776_s15 + $0x38] sm:$0xff] %v11666_v22 }
 0xfd1 PF: > { %s23_s25 = sadd.s32 1, %s15607_s25  }
 0xfd2   : > { %p20_p4 = scmp.ge.s32.totalorder %s23_s25, 4  }
 0xfd4   :  { %22 = sbr.rel (!%p20_p4) target bundleno = 1 (0x1), region = 102 }

</bundles_post_ra>
